<compile_context>
chip_gen: v7x
topology: tpu7x:2x2x1
jax: 0.10.0
libtpu: 0.0.40
codegen_flags: <defaults>
</compile_context>

<pallas_src>
import functools
import math

import jax
import jax.numpy as jnp
from jax.experimental import pallas as pl
from jax.experimental.pallas import tpu as pltpu

D_MODEL = 1024      # fixed by the module (d_model=1024)
FF = 2048           # fixed by the module (dim_feedforward=2048)
LN_EPS = 1e-5       # PyTorch LayerNorm default
NEG_INF = -1e9      # large-negative stand-in for -inf key-padding mask


# ----------------------------- helpers ------------------------------------- #

def _layer_norm_f32(y, gamma, beta):
    """LayerNorm over last dim; y f32, gamma/beta (1, D) f32."""
    mu = jnp.mean(y, axis=-1, keepdims=True)
    yc = y - mu
    var = jnp.mean(yc * yc, axis=-1, keepdims=True)
    return yc * jax.lax.rsqrt(var + LN_EPS) * gamma + beta


def _const_spec(shape):
    """Grid-invariant operand: constant index_map, single-buffered."""
    zeros = (0,) * len(shape)
    return pl.BlockSpec(shape, lambda i: zeros, pipeline_mode=pl.Buffered(1))


def _cparams(vmem_bytes):
    """Explicit scoped-VMEM budget; cap below v7x's 64 MiB physical VMEM."""
    limit = int(min(max(vmem_bytes + (8 << 20), 32 << 20), 48 << 20))
    return pltpu.CompilerParams(dimension_semantics=("parallel",),
                                vmem_limit_bytes=limit)


def _pick_row_tile(M, pref=256):
    # pref=256 keeps the MXU M-dim full on v6e/v7x (256x256) and fits v5e VMEM.
    # NOTE: if M=B*S has no divisor >=128, padding M to a multiple of 256 would
    # keep the systolic rows full; not needed at these shapes.
    for t in (pref, 512, 128, 64, 32, 16, 8):
        if t <= M and M % t == 0:
            return t
    return M


# ----------------------------- kernels ------------------------------------- #

def _qkv_proj_kernel(x_ref, w_ref, b_ref, o_ref):
    """Row-tiled fused QKV projection: (tm, D) @ (D, 3D) + b -> bf16."""
    f = jnp.dot(x_ref[...], w_ref[...],
                preferred_element_type=jnp.float32) + b_ref[...]
    o_ref[...] = f.astype(o_ref.dtype)


def _attn_core_kernel(qkv_ref, kpm_ref, smask_ref, o_ref, *, num_heads):
    """Per-batch multi-head softmax attention (scale pre-folded into Q).

    Writes each head's (S, hd) context directly into the output block slice so
    only one head's (S,S) scores are live at a time.
    """
    S = o_ref.shape[1]
    D = o_ref.shape[2]
    hd = D // num_heads

    # Additive attention bias: src_mask (S,S) + key-padding row (1,S), f32.
    bias = smask_ref[...] + kpm_ref[0]

    # TODO(synk): flash-style KV tiling here for S >~ 512 (v7x VMEM bound).
    for h in range(num_heads):                                      # unrolled
        lo = h * hd
        qh = qkv_ref[0, :, lo:lo + hd]                              # (S,hd) bf16
        kh = qkv_ref[0, :, D + lo:D + lo + hd]
        vh = qkv_ref[0, :, 2 * D + lo:2 * D + lo + hd]

        s = jnp.einsum("qd,kd->qk", qh, kh,
                       preferred_element_type=jnp.float32) + bias
        s = s - jnp.max(s, axis=-1, keepdims=True)
        p = jnp.exp(s)
        p = p * pl.reciprocal(jnp.sum(p, axis=-1, keepdims=True), approx=True)

        ah = jnp.dot(p.astype(jnp.bfloat16), vh,
                     preferred_element_type=jnp.float32)            # (S, hd)
        o_ref[0, :, lo:lo + hd] = ah.astype(o_ref.dtype)


def _post_attn_ffn_kernel(ctx_ref, x_ref, wout_ref, bout_ref, g1_ref, b1_ref,
                          wff1_ref, bff1_ref, wff2_ref, bff2_ref,
                          g2_ref, b2_ref, o_ref):
    """Row-tiled fusion of: out-proj -> +x -> LN1 -> FFN -> +h -> LN2."""
    attn = jnp.dot(ctx_ref[...], wout_ref[...],
                   preferred_element_type=jnp.float32) + bout_ref[...]
    h = _layer_norm_f32(attn + x_ref[...].astype(jnp.float32),
                        g1_ref[...], b1_ref[...])                   # (tm, D) f32

    f = jnp.dot(h.astype(jnp.bfloat16), wff1_ref[...],
                preferred_element_type=jnp.float32) + bff1_ref[...]
    f = jnp.maximum(f, 0.0)
    f2 = jnp.dot(f.astype(jnp.bfloat16), wff2_ref[...],
                 preferred_element_type=jnp.float32) + bff2_ref[...]
    o_ref[...] = _layer_norm_f32(f2 + h, g2_ref[...], b2_ref[...]).astype(o_ref.dtype)


def _pool_kernel(x_ref, pad_ref, o_ref):
    """sum over ALL positions / number of non-pad positions (PyTorch exact)."""
    x = x_ref[0].astype(jnp.float32)                                # (S, D)
    pad = pad_ref[0]                                                # (1, S)
    lens = jnp.maximum(jnp.float32(x.shape[0]) - jnp.sum(pad), 1.0)
    o_ref[0] = jnp.sum(x, axis=0, keepdims=True) * (1.0 / lens)


# ----------------------------- wrappers ------------------------------------ #

def qkv_proj(x_flat, p):
    """x_flat:(M,D) bf16 -> (M,3D) bf16, row-tiled over M=B*S."""
    M, D = x_flat.shape
    tm = _pick_row_tile(M)
    est = (D * 3 * D * 2            # w_qkv bf16 (single-buffered)
           + 2 * tm * D * 2         # x tile (double-buffered)
           + 2 * tm * 3 * D * 2     # out tile (double-buffered)
           + 2 * tm * 3 * D * 4)    # f32 intermediates
    return pl.pallas_call(
        _qkv_proj_kernel,
        out_shape=jax.ShapeDtypeStruct((M, 3 * D), jnp.bfloat16),
        grid=(M // tm,),
        in_specs=[
            pl.BlockSpec((tm, D), lambda i: (i, 0)),          # x tile
            _const_spec((D, 3 * D)),                          # w_qkv (bf16)
            _const_spec((1, 3 * D)),                          # b_qkv (f32)
        ],
        out_specs=pl.BlockSpec((tm, 3 * D), lambda i: (i, 0)),
        compiler_params=_cparams(est),
    )(x_flat, p["w_qkv"], p["b_qkv"])


def attn_core(qkv_bsd, kpm_bias, src_mask, num_heads):
    """qkv:(B,S,3D) bf16; kpm_bias:(B,1,S) f32; src_mask:(S,S) f32 -> (B,S,D) bf16."""
    B, S, threeD = qkv_bsd.shape
    D = threeD // 3
    kernel = functools.partial(_attn_core_kernel, num_heads=num_heads)
    est = (S * S * 4                # src_mask (single-buffered)
           + 2 * S * threeD * 2     # qkv block (double-buffered)
           + 2 * S * D * 2          # out block (double-buffered)
           + 4 * S * S * 4          # f32 bias / scores / probs
           + 2 * S * D * 4)         # f32 per-head context + slack
    return pl.pallas_call(
        kernel,
        out_shape=jax.ShapeDtypeStruct((B, S, D), jnp.bfloat16),
        grid=(B,),
        in_specs=[
            pl.BlockSpec((1, S, threeD), lambda b: (b, 0, 0)),  # qkv
            pl.BlockSpec((1, 1, S), lambda b: (b, 0, 0)),       # key-pad bias
            _const_spec((S, S)),                                # src_mask
        ],
        out_specs=pl.BlockSpec((1, S, D), lambda b: (b, 0, 0)),
        compiler_params=_cparams(est),
    )(qkv_bsd, kpm_bias, src_mask)


def post_attn_ffn(ctx_flat, x_flat, p):
    """ctx,x:(M,D) bf16 -> layer output (M,D) bf16, row-tiled over M=B*S."""
    M, D = x_flat.shape
    tm = _pick_row_tile(M)
    est = ((D * D + D * FF + FF * D) * 2   # w_out, w_ff1, w_ff2 bf16 (single-buffered)
           + 2 * 3 * tm * D * 2            # ctx/x/out tiles (double-buffered)
           + 2 * tm * FF * 4               # f32 FFN intermediates
           + 4 * tm * D * 4)               # f32 attn / h / LN intermediates
    return pl.pallas_call(
        _post_attn_ffn_kernel,
        out_shape=jax.ShapeDtypeStruct((M, D), jnp.bfloat16),
        grid=(M // tm,),
        in_specs=[
            pl.BlockSpec((tm, D), lambda i: (i, 0)),          # ctx tile
            pl.BlockSpec((tm, D), lambda i: (i, 0)),          # x tile (residual)
            _const_spec((D, D)),                              # w_out (bf16)
            _const_spec((1, D)),                              # b_out
            _const_spec((1, D)),                              # ln1_g
            _const_spec((1, D)),                              # ln1_b
            _const_spec((D, FF)),                             # w_ff1 (bf16)
            _const_spec((1, FF)),                             # b_ff1
            _const_spec((FF, D)),                             # w_ff2 (bf16)
            _const_spec((1, D)),                              # b_ff2
            _const_spec((1, D)),                              # ln2_g
            _const_spec((1, D)),                              # ln2_b
        ],
        out_specs=pl.BlockSpec((tm, D), lambda i: (i, 0)),
        compiler_params=_cparams(est),
    )(ctx_flat, x_flat, p["w_out"], p["b_out"], p["ln1_g"], p["ln1_b"],
      p["w_ff1"], p["b_ff1"], p["w_ff2"], p["b_ff2"], p["ln2_g"], p["ln2_b"])


def masked_mean_pool(x_bsd, kpm_f):
    """x:(B,S,D) bf16; kpm_f:(B,S) f32 (1.0 = pad) -> (B,D) f32."""
    B, S, D = x_bsd.shape
    est = 2 * S * D * 2 + S * D * 4 + (1 << 20)
    out = pl.pallas_call(
        _pool_kernel,
        out_shape=jax.ShapeDtypeStruct((B, 1, D), jnp.float32),
        grid=(B,),
        in_specs=[
            pl.BlockSpec((1, S, D), lambda b: (b, 0, 0)),
            pl.BlockSpec((1, 1, S), lambda b: (b, 0, 0)),
        ],
        out_specs=pl.BlockSpec((1, 1, D), lambda b: (b, 0, 0)),
        compiler_params=_cparams(est),
    )(x_bsd, kpm_f.reshape(B, 1, S))
    return out.reshape(B, D)


# ----------------------------- model glue ---------------------------------- #

def encoder_layer(x_bsd, kpm_bias, smask, p, num_heads):
    B, S, D = x_bsd.shape
    x_flat = x_bsd.reshape(B * S, D)
    qkv = qkv_proj(x_flat, p)                                     # (B*S, 3D) bf16
    ctx = attn_core(qkv.reshape(B, S, 3 * D), kpm_bias, smask, num_heads)
    y = post_attn_ffn(ctx.reshape(B * S, D), x_flat, p)           # (B*S, D) bf16
    return y.reshape(B, S, D)


def esm_attn_forward(x, src_mask, src_key_padding_mask, params, num_heads):
    B, S, D = x.shape
    kpm_f = src_key_padding_mask.astype(jnp.float32)              # 1.0 = pad
    kpm_bias = (kpm_f * NEG_INF).reshape(B, 1, S)                 # additive row
    smask = src_mask.astype(jnp.float32)
    h = x.astype(jnp.bfloat16)                                    # bf16 activations
    for p in params:
        h = encoder_layer(h, kpm_bias, smask, p, num_heads)
    out = masked_mean_pool(h, kpm_f)
    # final nn.Dropout: identity in eval mode
    return out


def init_params(key, num_blocks):
    """Raw f32 params, weights stored pre-transposed to (in, out).
    When loading real PyTorch checkpoints ((out, in)), transpose before use."""
    params = []
    for i in range(num_blocks):
        k0, k1, k2, k3 = jax.random.split(jax.random.fold_in(key, i), 4)
        s = 0.02
        params.append({
            "w_qkv": s * jax.random.normal(k0, (D_MODEL, 3 * D_MODEL), jnp.float32),
            "b_qkv": jnp.zeros((3 * D_MODEL,), jnp.float32),
            "w_out": s * jax.random.normal(k1, (D_MODEL, D_MODEL), jnp.float32),
            "b_out": jnp.zeros((D_MODEL,), jnp.float32),
            "w_ff1": s * jax.random.normal(k2, (D_MODEL, FF), jnp.float32),
            "b_ff1": jnp.zeros((FF,), jnp.float32),
            "w_ff2": s * jax.random.normal(k3, (FF, D_MODEL), jnp.float32),
            "b_ff2": jnp.zeros((D_MODEL,), jnp.float32),
            "ln1_g": jnp.ones((D_MODEL,), jnp.float32),
            "ln1_b": jnp.zeros((D_MODEL,), jnp.float32),
            "ln2_g": jnp.ones((D_MODEL,), jnp.float32),
            "ln2_b": jnp.zeros((D_MODEL,), jnp.float32),
        })
    return params


def prepare_params(raw_params, num_heads):
    """One-time transform: fold 1/sqrt(head_dim) into the Q part of w_qkv/b_qkv,
    cast weights to bf16, reshape biases/LN params to (1, n) f32."""
    hd = D_MODEL // num_heads
    scale = 1.0 / math.sqrt(hd)
    prepared = []
    for p in raw_params:
        w_qkv = p["w_qkv"].at[:, :D_MODEL].multiply(scale)
        b_qkv = p["b_qkv"].at[:D_MODEL].multiply(scale)
        prepared.append({
            "w_qkv": w_qkv.astype(jnp.bfloat16),
            "b_qkv": b_qkv.reshape(1, 3 * D_MODEL),
            "w_out": p["w_out"].astype(jnp.bfloat16),
            "b_out": p["b_out"].reshape(1, D_MODEL),
            "w_ff1": p["w_ff1"].astype(jnp.bfloat16),
            "b_ff1": p["b_ff1"].reshape(1, FF),
            "w_ff2": p["w_ff2"].astype(jnp.bfloat16),
            "b_ff2": p["b_ff2"].reshape(1, D_MODEL),
            "ln1_g": p["ln1_g"].reshape(1, D_MODEL),
            "ln1_b": p["ln1_b"].reshape(1, D_MODEL),
            "ln2_g": p["ln2_g"].reshape(1, D_MODEL),
            "ln2_b": p["ln2_b"].reshape(1, D_MODEL),
        })
    return prepared


if __name__ == "__main__":
    key = jax.random.PRNGKey(0)
    B, S = 2, 16
    num_heads, num_blocks = 4, 2
    assert D_MODEL % num_heads == 0

    kx, kp = jax.random.split(key)
    x = jax.random.normal(kx, (B, S, D_MODEL), jnp.float32)
    src_mask = jnp.zeros((S, S), jnp.float32)                 # additive float mask
    src_key_padding_mask = (
        jnp.zeros((B, S), dtype=bool).at[0, 12:].set(True).at[1, 14:].set(True)
    )
    params = prepare_params(init_params(kp, num_blocks), num_heads)

    out = esm_attn_forward(x, src_mask, src_key_padding_mask, params, num_heads)
    out = jax.block_until_ready(out)
    assert out.shape == (B, D_MODEL)
    assert bool(jnp.all(jnp.isfinite(out)))
    print("KERNEL_OK")
</pallas_src>

<mosaic_0001>
module attributes {stable_mosaic.version = 11 : i64} {
  func.func @_qkv_proj_kernel(%arg0: i32, %arg1: memref<32x1024xbf16, #tpu.memory_space<vmem>>, %arg2: memref<1024x3072xbf16, #tpu.memory_space<vmem>>, %arg3: memref<1x3072xf32, #tpu.memory_space<vmem>>, %arg4: memref<32x3072xbf16, #tpu.memory_space<vmem>>) attributes {dimension_semantics = [#tpu.dimension_semantics<parallel>], iteration_bounds = array<i64: 1>, scalar_prefetch = 0 : i64, scratch_operands = 0 : i64, tpu.core_type = #tpu.core_type<tc>, window_params = [{transform_indices = @transform_0, window_bounds = array<i64: 32, 1024>}, {pipeline_mode = #tpu.pipeline_mode<synchronous>, transform_indices = @transform_1, window_bounds = array<i64: 1024, 3072>}, {pipeline_mode = #tpu.pipeline_mode<synchronous>, transform_indices = @transform_2, window_bounds = array<i64: 1, 3072>}, {transform_indices = @transform_3, window_bounds = array<i64: 32, 3072>}]} {
    %c0 = arith.constant 0 : index
    %c0_0 = arith.constant 0 : index
    %0 = vector.load %arg1[%c0, %c0_0] : memref<32x1024xbf16, #tpu.memory_space<vmem>>, vector<32x1024xbf16>
    %c0_1 = arith.constant 0 : index
    %c0_2 = arith.constant 0 : index
    %1 = vector.load %arg2[%c0_1, %c0_2] : memref<1024x3072xbf16, #tpu.memory_space<vmem>>, vector<1024x3072xbf16>
    %cst = arith.constant dense<0.000000e+00> : vector<32x3072xf32>
    %2 = tpu.matmul %0, %1, %cst {dimension_numbers = #tpu.dot_dimension_numbers<[1], [0], [0], [1], [0, 0, 1, 1], [], []>} : vector<32x1024xbf16>, vector<1024x3072xbf16>, vector<32x3072xf32> -> vector<32x3072xf32>
    %c0_3 = arith.constant 0 : index
    %c0_4 = arith.constant 0 : index
    %3 = vector.load %arg3[%c0_3, %c0_4] : memref<1x3072xf32, #tpu.memory_space<vmem>>, vector<1x3072xf32>
    %4 = vector.broadcast %3 : vector<1x3072xf32> to vector<32x3072xf32>
    %5 = arith.addf %2, %4 : vector<32x3072xf32>
    %6 = arith.truncf %5 : vector<32x3072xf32> to vector<32x3072xbf16>
    %c0_5 = arith.constant 0 : index
    %c0_6 = arith.constant 0 : index
    %7 = vector.load %arg4[%c0_5, %c0_6] : memref<32x3072xbf16, #tpu.memory_space<vmem>>, vector<32x3072xbf16>
    tpu.vector_store %arg4[%c0_5, %c0_6], %6 {strides = array<i32>} : memref<32x3072xbf16, #tpu.memory_space<vmem>>, vector<32x3072xbf16>,
    return
  }
  func.func @transform_0(%arg0: i32) -> (i32, i32) {
    %c0_i32 = arith.constant 0 : i32
    %c0_i32_0 = arith.constant 0 : i32
    return %arg0, %c0_i32 : i32, i32
  }
  func.func @transform_1(%arg0: i32) -> (i32, i32) {
    %c0_i32 = arith.constant 0 : i32
    %c0_i32_0 = arith.constant 0 : i32
    %c0_i32_1 = arith.constant 0 : i32
    return %c0_i32, %c0_i32_0 : i32, i32
  }
  func.func @transform_2(%arg0: i32) -> (i32, i32) {
    %c0_i32 = arith.constant 0 : i32
    %c0_i32_0 = arith.constant 0 : i32
    %c0_i32_1 = arith.constant 0 : i32
    return %c0_i32, %c0_i32_0 : i32, i32
  }
  func.func @transform_3(%arg0: i32) -> (i32, i32) {
    %c0_i32 = arith.constant 0 : i32
    %c0_i32_0 = arith.constant 0 : i32
    return %arg0, %c0_i32 : i32, i32
  }
}

</mosaic_0001>

<bundles_post_ra>
// kernel: tpu_custom_call.1
= control target key start
LH: loop header
LB: loop body
LE: loop exit
PB: predicated region body
PF: predicated region fallthrough
CT: control target
= control target key end

     0   :  { %8 = vsyncpa [#allocation3], 0  ;;  %s15044_s0 = inlined_call_operand.hbm [shape: bf16[32,1024], index: 0, kind: input, shape index: {}]   ;;  %s15045_s1 = inlined_call_operand.hbm [shape: bf16[1024,3072], index: 1, kind: input, shape index: {}]   ;;  %s15046_s2 = inlined_call_operand.hbm [shape: f32[1,3072], index: 2, kind: input, shape index: {}]   ;;  %s15047_s3 = inlined_call_operand.hbm [shape: bf16[32,3072], index: 3, kind: output, shape index: {}]  }
   0x1   :  { %9 = vsyncpa [#allocation6], 0 }
   0x2   :  { %10 = vsyncpa [#allocation4], 0  ;;  %s14526_s12 = smov [#allocation5]   ;;  %s14432_s16 = scalar_lea.hbm %s15045_s1, 196608 }
   0x3   :  { %s28_s13 = sshll.u32 %s14526_s12, 4  ;;  %p14433_p0 = scmp.ne.s32.totalorder %s15045_s1, %s14432_s16  ;;  %s29_s13 = int_to_ptr.vmem [resolvable:$true] %s28_s13 }
   0x4   :  { %p14436_p1 = scmp.lt.u32.totalorder %s14432_s16, %s15045_s1 }
   0x6   :  { %p14438_p2 = pnand %p14436_p1, %p14433_p0 }
   0x8   :  { %14441 = shalt.err (!%p14438_p2)
}
   0x9   :  { %s14442_s21 = scalar_lea.vmem %s29_s13, 196608  ;;  %p14447_p4 = scmp.lt.s32.totalorder %s29_s13, %s29_s13 }
   0xa   :  { %p14443_p3 = scmp.ne.s32.totalorder %s29_s13, %s14442_s21  ;;  %p14448_p5 = scmp.lt.s32.totalorder %s14442_s21, %s14442_s21 }
   0xc   :  { %p14449_p6 = por %p14448_p5, %p14447_p4 }
   0xe   :  { %p14450_p7 = pnand %p14449_p6, %p14443_p3 }
  0x10   :  { %14453 = shalt.err (!%p14450_p7)
}
  0x11   :  { %s14527_s22 = smov 1536   ;;  %s14528_s23 = smov 96  }
  0x12   :  { %34 = dma.hbm_to_vmem [thread:$0]  %s15045_s1, 196608, %s29_s13, [#allocation6], %s14527_s22, %s14527_s22, %s14528_s23  }
  0x13   :  { %s14529_s26 = smov [#allocation2]   ;;  %s14454_s30 = scalar_lea.hbm %s15044_s0, 2048 }
  0x14   :  { %s16_s27 = sshll.u32 %s14529_s26, 4  ;;  %p14455_p8 = scmp.ne.s32.totalorder %s15044_s0, %s14454_s30  ;;  %s17_s27 = int_to_ptr.vmem [resolvable:$true] %s16_s27 }
  0x15   :  { %p14458_p9 = scmp.lt.u32.totalorder %s14454_s30, %s15044_s0 }
  0x17   :  { %p14460_p10 = pnand %p14458_p9, %p14455_p8 }
  0x19   :  { %14463 = shalt.err (!%p14460_p10)
}
  0x1a   :  { %s14464_s8 = scalar_lea.vmem %s17_s27, 2048  ;;  %p14469_p12 = scmp.lt.s32.totalorder %s17_s27, %s17_s27 }
  0x1b   :  { %p14465_p11 = scmp.ne.s32.totalorder %s17_s27, %s14464_s8  ;;  %p14470_p13 = scmp.lt.s32.totalorder %s14464_s8, %s14464_s8 }
  0x1d   :  { %p14471_p0 = por %p14470_p13, %p14469_p12 }
  0x1f   :  { %p14472_p1 = pnand %p14471_p0, %p14465_p11 }
  0x21   :  { %14475 = shalt.err (!%p14472_p1)
}
  0x22   :  { %s14530_s1 = smov 512   ;;  %s14531_s9 = smov 32  }
  0x23   :  { %22 = dma.hbm_to_vmem [thread:$0]  %s15044_s0, 2048, %s17_s27, [#allocation3], %s14530_s1, %s14530_s1, %s14531_s9  }
  0x24   :  { %s14532_s12 = smov [#allocation7]   ;;  %s14476_s16 = scalar_lea.hbm %s15046_s2, 384 }
  0x25   :  { %s41_s13 = sshll.u32 %s14532_s12, 4  ;;  %p14477_p2 = scmp.ne.s32.totalorder %s15046_s2, %s14476_s16  ;;  %s42_s13 = int_to_ptr.vmem [resolvable:$true] %s41_s13 }
  0x26   :  { %p14480_p3 = scmp.lt.u32.totalorder %s14476_s16, %s15046_s2 }
  0x28   :  { %p14482_p4 = pnand %p14480_p3, %p14477_p2 }
  0x2a   :  { %14485 = shalt.err (!%p14482_p4)
}
  0x2b   :  { %s14486_s21 = scalar_lea.vmem %s42_s13, 384  ;;  %p14491_p6 = scmp.lt.s32.totalorder %s42_s13, %s42_s13 }
  0x2c   :  { %p14487_p5 = scmp.ne.s32.totalorder %s42_s13, %s14486_s21  ;;  %p14492_p7 = scmp.lt.s32.totalorder %s14486_s21, %s14486_s21 }
  0x2e   :  { %p14493_p8 = por %p14492_p7, %p14491_p6 }
  0x30   :  { %p14494_p9 = pnand %p14493_p8, %p14487_p5 }
  0x32   :  { %14497 = shalt.err (!%p14494_p9)
}
  0x33   :  { %44 = dma.hbm_to_vmem [thread:$0]  %s15046_s2, 384, %s42_s13, [#allocation6]  }
  0x34   :  { %14520 = dma.done.wait [#allocation3], 2048  }
  0x35   :  { %14521 = vsyncadd [#allocation3], 4294965248 }
  0x36   :  { %14522 = dma.done.wait [#allocation6], 196992  }
  0x37   :  { %14523 = vsyncadd [#allocation6], 4294770304  ;;  %v70_v0 = vld [vmem:[#allocation5] sm:$0xff]  ;;  %v71_v2 = vld [vmem:[#allocation5 + $0x8] sm:$0xff]  ;;  %s14533_s2 = smov [#allocation8]  }
  0x38   :  { %v82_v1 = vld [vmem:[#allocation5 + $0x60] sm:$0xff]  ;;  %v83_v4 = vld [vmem:[#allocation5 + $0x68] sm:$0xff]  ;;  %s12377_s25 = sshll.u32 %s14533_s2, 4  ;;  %s12378_s25 = int_to_ptr.vmem [resolvable:$true] %s12377_s25 }
  0x39   :  { %v12407_v3 = vcombine.high %v70_v0, %v82_v1  ;;  %v12406_v5 = vcombine.low %v70_v0, %v82_v1  ;;  %v94_v6 = vld [vmem:[#allocation5 + $0xc0] sm:$0xff]  ;;  %v12409_v8 = vcombine.high %v71_v2, %v83_v4  ;;  %v12408_v9 = vcombine.low %v71_v2, %v83_v4  ;;  %v95_v11 = vld [vmem:[#allocation5 + $0xc8] sm:$0xff]  ;;  %s14498_s26 = scalar_lea.vmem %s12378_s25, 6144  ;;  %p14503_p11 = scmp.lt.s32.totalorder %s12378_s25, %s12378_s25 }
  0x3a   :  { %v106_v7 = vld [vmem:[#allocation5 + $0x120] sm:$0xff]  ;;  %v107_v12 = vld [vmem:[#allocation5 + $0x128] sm:$0xff]  ;;  %p14499_p10 = scmp.ne.s32.totalorder %s12378_s25, %s14498_s26  ;;  %p14504_p12 = scmp.lt.s32.totalorder %s14498_s26, %s14498_s26 }
  0x3b   :  { %v12431_v10 = vcombine.high %v94_v6, %v106_v7  ;;  %v118_v13 = vld [vmem:[#allocation5 + $0x180] sm:$0xff]  ;;  %9492 = vmatprep.subr.bf16.mxu0 %v12407_v3  ;;  %v12433_v14 = vcombine.high %v95_v11, %v107_v12  ;;  %v119_v16 = vld [vmem:[#allocation5 + $0x188] sm:$0xff]  ;;  %9704 = vmatprep.subr.bf16.mxu1 %v12409_v8  ;;  %v12430_v18 = vcombine.low %v94_v6, %v106_v7 }
  0x3c   :  { %v130_v15 = vld [vmem:[#allocation5 + $0x1e0] sm:$0xff]  ;;  %v131_v17 = vld [vmem:[#allocation5 + $0x1e8] sm:$0xff]  ;;  %9493 = vmatpush1.bf16.msra.mxu0 %v12406_v5  ;;  %9705 = vmatpush1.bf16.msra.mxu1 %v12408_v9  ;;  %v12432_v19 = vcombine.low %v95_v11, %v107_v12  ;;  %p14505_p13 = por %p14504_p12, %p14503_p11 }
  0x3d   :  { %9494 = vmatprep.subr.bf16.mxu0 %v12431_v10  ;;  %v12455_v20 = vcombine.high %v118_v13, %v130_v15  ;;  %9706 = vmatprep.subr.bf16.mxu1 %v12433_v14  ;;  %v12457_v21 = vcombine.high %v119_v16, %v131_v17  ;;  %v142_v22 = vld [vmem:[#allocation5 + $0x240] sm:$0xff]  ;;  %v143_v24 = vld [vmem:[#allocation5 + $0x248] sm:$0xff]  ;;  %v12454_v26 = vcombine.low %v118_v13, %v130_v15 }
  0x3e   :  { %v154_v23 = vld [vmem:[#allocation5 + $0x2a0] sm:$0xff]  ;;  %v155_v25 = vld [vmem:[#allocation5 + $0x2a8] sm:$0xff]  ;;  %v12456_v27 = vcombine.low %v119_v16, %v131_v17  ;;  %p14506_p0 = pnand %p14505_p13, %p14499_p10 }
  0x3f   :  { %v12479_v28 = vcombine.high %v142_v22, %v154_v23  ;;  %v12481_v29 = vcombine.high %v143_v24, %v155_v25  ;;  %v166_v30 = vld [vmem:[#allocation5 + $0x300] sm:$0xff]  ;;  %v167_v32 = vld [vmem:[#allocation5 + $0x308] sm:$0xff]  ;;  %v12478_v34 = vcombine.low %v142_v22, %v154_v23  ;;  %v12480_v35 = vcombine.low %v143_v24, %v155_v25 }
  0x40   :  { %9495 = vmatpush1.bf16.msra.mxu0 %v12430_v18  ;;  %9707 = vmatpush1.bf16.msra.mxu1 %v12432_v19  ;;  %v178_v31 = vld [vmem:[#allocation5 + $0x360] sm:$0xff]  ;;  %v179_v33 = vld [vmem:[#allocation5 + $0x368] sm:$0xff] }
  0x41   :  { %9496 = vmatprep.subr.bf16.mxu0 %v12455_v20  ;;  %9708 = vmatprep.subr.bf16.mxu1 %v12457_v21  ;;  %v12503_v36 = vcombine.high %v166_v30, %v178_v31  ;;  %v12505_v37 = vcombine.high %v167_v32, %v179_v33  ;;  %v190_v38 = vld [vmem:[#allocation5 + $0x3c0] sm:$0xff]  ;;  %v191_v40 = vld [vmem:[#allocation5 + $0x3c8] sm:$0xff]  ;;  %v12502_v42 = vcombine.low %v166_v30, %v178_v31 }
  0x42   :  { %v202_v39 = vld [vmem:[#allocation5 + $0x420] sm:$0xff]  ;;  %v203_v41 = vld [vmem:[#allocation5 + $0x428] sm:$0xff]  ;;  %v12504_v43 = vcombine.low %v167_v32, %v179_v33 }
  0x43   :  { %v12527_v44 = vcombine.high %v190_v38, %v202_v39  ;;  %v12529_v45 = vcombine.high %v191_v40, %v203_v41  ;;  %v214_v46 = vld [vmem:[#allocation5 + $0x480] sm:$0xff]  ;;  %v215_v48 = vld [vmem:[#allocation5 + $0x488] sm:$0xff]  ;;  %v12526_v50 = vcombine.low %v190_v38, %v202_v39  ;;  %v12528_v51 = vcombine.low %v191_v40, %v203_v41 }
  0x44   :  { %9497 = vmatpush1.bf16.msra.mxu0 %v12454_v26  ;;  %9709 = vmatpush1.bf16.msra.mxu1 %v12456_v27  ;;  %v226_v47 = vld [vmem:[#allocation5 + $0x4e0] sm:$0xff]  ;;  %v227_v49 = vld [vmem:[#allocation5 + $0x4e8] sm:$0xff] }
  0x45   :  { %9498 = vmatprep.subr.bf16.mxu0 %v12479_v28  ;;  %9710 = vmatprep.subr.bf16.mxu1 %v12481_v29  ;;  %v12551_v52 = vcombine.high %v214_v46, %v226_v47  ;;  %v14593_v53 = vld [vmem:[#allocation2] sm:$0xff]  ;;  %v12553_v55 = vcombine.high %v215_v48, %v227_v49  ;;  %v239_v59 = vld [vmem:[#allocation5 + $0x548] sm:$0xff]  ;;  %v12550_v61 = vcombine.low %v214_v46, %v226_v47 }
  0x46   :  { %v14595_v54 = vld [vmem:[#allocation2 + $0x20] sm:$0xff]  ;;  %v251_v60 = vld [vmem:[#allocation5 + $0x5a8] sm:$0xff]  ;;  %v12552_v62 = vcombine.low %v215_v48, %v227_v49 }
  0x47   :  { %v238_v56 = vld [vmem:[#allocation5 + $0x540] sm:$0xff]  ;;  %v14599_v58 = vcombine.high %v14593_v53, %v14595_v54  ;;  %v12577_v0 = vcombine.high %v239_v59, %v251_v60  ;;  %v263_v3 = vld [vmem:[#allocation5 + $0x608] sm:$0xff]  ;;  %v12576_v6 = vcombine.low %v239_v59, %v251_v60 }
  0x48   :  { %9499 = vmatpush1.bf16.msra.mxu0 %v12478_v34  ;;  %9711 = vmatpush1.bf16.msra.mxu1 %v12480_v35  ;;  %v250_v57 = vld [vmem:[#allocation5 + $0x5a0] sm:$0xff]  ;;  %v275_v4 = vld [vmem:[#allocation5 + $0x668] sm:$0xff] }
  0x49   :  { %9500 = vmatprep.subr.bf16.mxu0 %v12503_v36  ;;  %9712 = vmatprep.subr.bf16.mxu1 %v12505_v37  ;;  %v12575_v63 = vcombine.high %v238_v56, %v250_v57  ;;  %v262_v1 = vld [vmem:[#allocation5 + $0x600] sm:$0xff]  ;;  %v12574_v5 = vcombine.low %v238_v56, %v250_v57  ;;  %v12601_v8 = vcombine.high %v263_v3, %v275_v4  ;;  %v287_v11 = vld [vmem:[#allocation5 + $0x6c8] sm:$0xff] }
  0x4a   :  { %9524 = vmatprep.mubr.bf16.mxu0 %v14599_v58  ;;  %v274_v2 = vld [vmem:[#allocation5 + $0x660] sm:$0xff]  ;;  %9736 = vmatprep.mubr.bf16.mxu1 %v14599_v58  ;;  %v299_v12 = vld [vmem:[#allocation5 + $0x728] sm:$0xff]  ;;  %v12600_v14 = vcombine.low %v263_v3, %v275_v4 }
  0x4b   :  { %v12599_v7 = vcombine.high %v262_v1, %v274_v2  ;;  %v286_v9 = vld [vmem:[#allocation5 + $0x6c0] sm:$0xff]  ;;  %v12598_v13 = vcombine.low %v262_v1, %v274_v2  ;;  %v12625_v16 = vcombine.high %v287_v11, %v299_v12  ;;  %v311_v19 = vld [vmem:[#allocation5 + $0x788] sm:$0xff]  ;;  %v12624_v22 = vcombine.low %v287_v11, %v299_v12 }
  0x4c   :  { %9501 = vmatpush1.bf16.msra.mxu0 %v12502_v42  ;;  %9713 = vmatpush1.bf16.msra.mxu1 %v12504_v43  ;;  %v298_v10 = vld [vmem:[#allocation5 + $0x720] sm:$0xff]  ;;  %v323_v20 = vld [vmem:[#allocation5 + $0x7e8] sm:$0xff] }
  0x4d   :  { %9502 = vmatprep.subr.bf16.mxu0 %v12527_v44  ;;  %9714 = vmatprep.subr.bf16.mxu1 %v12529_v45  ;;  %v12623_v15 = vcombine.high %v286_v9, %v298_v10  ;;  %v310_v17 = vld [vmem:[#allocation5 + $0x780] sm:$0xff]  ;;  %v12622_v21 = vcombine.low %v286_v9, %v298_v10  ;;  %v12649_v24 = vcombine.high %v311_v19, %v323_v20  ;;  %v335_v27 = vld [vmem:[#allocation5 + $0x848] sm:$0xff] }
  0x4e   :  { %v322_v18 = vld [vmem:[#allocation5 + $0x7e0] sm:$0xff]  ;;  %v347_v28 = vld [vmem:[#allocation5 + $0x8a8] sm:$0xff]  ;;  %v12648_v30 = vcombine.low %v311_v19, %v323_v20 }
  0x4f   :  { %v12647_v23 = vcombine.high %v310_v17, %v322_v18  ;;  %v334_v25 = vld [vmem:[#allocation5 + $0x840] sm:$0xff]  ;;  %v12646_v29 = vcombine.low %v310_v17, %v322_v18  ;;  %v12673_v32 = vcombine.high %v335_v27, %v347_v28  ;;  %v359_v35 = vld [vmem:[#allocation5 + $0x908] sm:$0xff]  ;;  %v12672_v38 = vcombine.low %v335_v27, %v347_v28 }
  0x50   :  { %9503 = vmatpush1.bf16.msra.mxu0 %v12526_v50  ;;  %9715 = vmatpush1.bf16.msra.mxu1 %v12528_v51  ;;  %v346_v26 = vld [vmem:[#allocation5 + $0x8a0] sm:$0xff]  ;;  %v371_v36 = vld [vmem:[#allocation5 + $0x968] sm:$0xff] }
  0x51   :  { %9504 = vmatprep.subr.bf16.mxu0 %v12551_v52  ;;  %9716 = vmatprep.subr.bf16.mxu1 %v12553_v55  ;;  %v12671_v31 = vcombine.high %v334_v25, %v346_v26  ;;  %v358_v33 = vld [vmem:[#allocation5 + $0x900] sm:$0xff]  ;;  %v12670_v37 = vcombine.low %v334_v25, %v346_v26  ;;  %v12697_v40 = vcombine.high %v359_v35, %v371_v36  ;;  %v383_v43 = vld [vmem:[#allocation5 + $0x9c8] sm:$0xff] }
  0x52   :  { %v370_v34 = vld [vmem:[#allocation5 + $0x960] sm:$0xff]  ;;  %v395_v44 = vld [vmem:[#allocation5 + $0xa28] sm:$0xff]  ;;  %v12696_v46 = vcombine.low %v359_v35, %v371_v36 }
  0x53   :  { %v12695_v39 = vcombine.high %v358_v33, %v370_v34  ;;  %v382_v41 = vld [vmem:[#allocation5 + $0x9c0] sm:$0xff]  ;;  %v12694_v45 = vcombine.low %v358_v33, %v370_v34  ;;  %v12721_v48 = vcombine.high %v383_v43, %v395_v44  ;;  %v407_v51 = vld [vmem:[#allocation5 + $0xa88] sm:$0xff]  ;;  %v12720_v56 = vcombine.low %v383_v43, %v395_v44 }
  0x54   :  { %9505 = vmatpush1.bf16.msra.mxu0 %v12550_v61  ;;  %9717 = vmatpush1.bf16.msra.mxu1 %v12552_v62  ;;  %v394_v42 = vld [vmem:[#allocation5 + $0xa20] sm:$0xff]  ;;  %v419_v52 = vld [vmem:[#allocation5 + $0xae8] sm:$0xff] }
  0x55   :  { %9506 = vmatprep.subr.bf16.mxu0 %v12575_v63  ;;  %9718 = vmatprep.subr.bf16.mxu1 %v12577_v0  ;;  %v12719_v47 = vcombine.high %v382_v41, %v394_v42  ;;  %v406_v49 = vld [vmem:[#allocation5 + $0xa80] sm:$0xff]  ;;  %v12718_v55 = vcombine.low %v382_v41, %v394_v42  ;;  %v12745_v59 = vcombine.high %v407_v51, %v419_v52  ;;  %v431_v62 = vld [vmem:[#allocation5 + $0xb48] sm:$0xff] }
  0x56   :  { %v418_v50 = vld [vmem:[#allocation5 + $0xae0] sm:$0xff]  ;;  %v443_v63 = vld [vmem:[#allocation5 + $0xba8] sm:$0xff]  ;;  %v12744_v1 = vcombine.low %v407_v51, %v419_v52 }
  0x57   :  { %v12743_v57 = vcombine.high %v406_v49, %v418_v50  ;;  %v430_v60 = vld [vmem:[#allocation5 + $0xb40] sm:$0xff]  ;;  %v12742_v0 = vcombine.low %v406_v49, %v418_v50  ;;  %v12769_v3 = vcombine.high %v431_v62, %v443_v63  ;;  %v12768_v9 = vcombine.low %v431_v62, %v443_v63  ;;  %v503_v26 = vld [vmem:[#allocation5 + $0xd88] sm:$0xff] }
  0x58   :  { %9507 = vmatpush1.bf16.msra.mxu0 %v12574_v5  ;;  %9719 = vmatpush1.bf16.msra.mxu1 %v12576_v6  ;;  %v442_v61 = vld [vmem:[#allocation5 + $0xba0] sm:$0xff]  ;;  %v455_v6 = vld [vmem:[#allocation5 + $0xc08] sm:$0xff] }
  0x59   :  { %9508 = vmatprep.subr.bf16.mxu0 %v12599_v7  ;;  %9720 = vmatprep.subr.bf16.mxu1 %v12601_v8  ;;  %v12767_v2 = vcombine.high %v430_v60, %v442_v61  ;;  %v454_v4 = vld [vmem:[#allocation5 + $0xc00] sm:$0xff]  ;;  %v467_v7 = vld [vmem:[#allocation5 + $0xc68] sm:$0xff]  ;;  %v12766_v8 = vcombine.low %v430_v60, %v442_v61 }
  0x5a   :  { %v466_v5 = vld [vmem:[#allocation5 + $0xc60] sm:$0xff]  ;;  %v12793_v11 = vcombine.high %v455_v6, %v467_v7  ;;  %v12792_v20 = vcombine.low %v455_v6, %v467_v7  ;;  %v539_v33 = vld [vmem:[#allocation5 + $0xea8] sm:$0xff] }
  0x5b   :  { %v12791_v10 = vcombine.high %v454_v4, %v466_v5  ;;  %v478_v12 = vld [vmem:[#allocation5 + $0xcc0] sm:$0xff]  ;;  %v12790_v19 = vcombine.low %v454_v4, %v466_v5  ;;  %v14615_v35 = vld [vmem:[#allocation2 + $0x8] sm:$0xff] }
  0x5c   :  { %9509 = vmatpush1.bf16.msra.mxu0 %v12598_v13  ;;  %9721 = vmatpush1.bf16.msra.mxu1 %v12600_v14  ;;  %v490_v13 = vld [vmem:[#allocation5 + $0xd20] sm:$0xff]  ;;  %v479_v14 = vld [vmem:[#allocation5 + $0xcc8] sm:$0xff] }
  0x5d   :  { %9510 = vmatprep.subr.bf16.mxu0 %v12623_v15  ;;  %9722 = vmatprep.subr.bf16.mxu1 %v12625_v16  ;;  %v14605_v15 = vcombine.low %v14593_v53, %v14595_v54  ;;  %v491_v16 = vld [vmem:[#allocation5 + $0xd28] sm:$0xff]  ;;  %v62_v17 = vld [vmem:[#allocation2 + $0x40] sm:$0xff]  ;;  %v12814_v54 = vcombine.low %v478_v12, %v490_v13 }
  0x5e   :  { %v66_v18 = vld [vmem:[#allocation2 + $0x60] sm:$0xff]  ;;  %v515_v53 = vld [vmem:[#allocation5 + $0xde8] sm:$0xff]  ;;  %v12816_v27 = vcombine.low %v479_v14, %v491_v16 }
  0x5f   :  { %v14607_v25 = vcombine.high %v62_v17, %v66_v18  ;;  %v14613_v34 = vcombine.low %v62_v17, %v66_v18  ;;  %v14617_v36 = vld [vmem:[#allocation2 + $0x28] sm:$0xff]  ;;  %v550_v41 = vld [vmem:[#allocation5 + $0xf00] sm:$0xff] }
  0x60   :  { %9511 = vmatpush1.bf16.msra.mxu0 %v12622_v21  ;;  %9723 = vmatpush1.bf16.msra.mxu1 %v12624_v22  ;;  %v12815_v21 = vcombine.high %v478_v12, %v490_v13  ;;  %v12817_v22 = vcombine.high %v479_v14, %v491_v16  ;;  %v562_v42 = vld [vmem:[#allocation5 + $0xf60] sm:$0xff]  ;;  %v14621_v43 = vcombine.high %v14615_v35, %v14617_v36  ;;  %v551_v44 = vld [vmem:[#allocation5 + $0xf08] sm:$0xff] }
  0x61   :  { %9512 = vmatprep.subr.bf16.mxu0 %v12647_v23  ;;  %9724 = vmatprep.subr.bf16.mxu1 %v12649_v24  ;;  %v502_v23 = vld [vmem:[#allocation5 + $0xd80] sm:$0xff]  ;;  %v575_v52 = vld [vmem:[#allocation5 + $0xfc8] sm:$0xff] }
  0x62   :  { %v514_v24 = vld [vmem:[#allocation5 + $0xde0] sm:$0xff]  ;;  %v599_v63 = vld [vmem:[#allocation5 + $0x1088] sm:$0xff] }
  0x63   :  { %v12839_v28 = vcombine.high %v502_v23, %v514_v24  ;;  %v574_v50 = vld [vmem:[#allocation5 + $0xfc0] sm:$0xff]  ;;  %v623_v7 = vld [vmem:[#allocation5 + $0x1148] sm:$0xff] }
  0x64   :  { %9513 = vmatpush1.bf16.msra.mxu0 %v12646_v29  ;;  %9725 = vmatpush1.bf16.msra.mxu1 %v12648_v30  ;;  %v12841_v29 = vcombine.high %v503_v26, %v515_v53  ;;  %v526_v30 = vld [vmem:[#allocation5 + $0xe40] sm:$0xff]  ;;  %v647_v16 = vld [vmem:[#allocation5 + $0x1208] sm:$0xff] }
  0x65   :  { %9514 = vmatprep.subr.bf16.mxu0 %v12671_v31  ;;  %9726 = vmatprep.subr.bf16.mxu1 %v12673_v32  ;;  %v538_v31 = vld [vmem:[#allocation5 + $0xea0] sm:$0xff]  ;;  %v527_v32 = vld [vmem:[#allocation5 + $0xe48] sm:$0xff] }
  0x66   :  { %v586_v51 = vld [vmem:[#allocation5 + $0x1020] sm:$0xff]  ;;  %v659_v17 = vld [vmem:[#allocation5 + $0x1268] sm:$0xff] }
  0x67   :  { %v598_v61 = vld [vmem:[#allocation5 + $0x1080] sm:$0xff] }
  0x68   :  { %9515 = vmatpush1.bf16.msra.mxu0 %v12670_v37  ;;  %9727 = vmatpush1.bf16.msra.mxu1 %v12672_v38  ;;  %v12838_v37 = vcombine.low %v502_v23, %v514_v24  ;;  %v12840_v38 = vcombine.low %v503_v26, %v515_v53  ;;  %v610_v62 = vld [vmem:[#allocation5 + $0x10e0] sm:$0xff]  ;;  %v671_v24 = vld [vmem:[#allocation5 + $0x12c8] sm:$0xff] }
  0x69   :  { %9516 = vmatprep.subr.bf16.mxu0 %v12695_v39  ;;  %9728 = vmatprep.subr.bf16.mxu1 %v12697_v40  ;;  %v12863_v39 = vcombine.high %v526_v30, %v538_v31  ;;  %v12865_v40 = vcombine.high %v527_v32, %v539_v33  ;;  %v622_v5 = vld [vmem:[#allocation5 + $0x1140] sm:$0xff]  ;;  %v683_v26 = vld [vmem:[#allocation5 + $0x1328] sm:$0xff] }
  0x6a   :  { %v634_v6 = vld [vmem:[#allocation5 + $0x11a0] sm:$0xff] }
  0x6b   :  { %v646_v13 = vld [vmem:[#allocation5 + $0x1200] sm:$0xff]  ;;  %v12958_v18 = vcombine.low %v622_v5, %v634_v6 }
  0x6c   :  { %9517 = vmatpush1.bf16.msra.mxu0 %v12694_v45  ;;  %9729 = vmatpush1.bf16.msra.mxu1 %v12696_v46  ;;  %v563_v45 = vld [vmem:[#allocation5 + $0xf68] sm:$0xff]  ;;  %v12862_v46 = vcombine.low %v526_v30, %v538_v31  ;;  %v658_v14 = vld [vmem:[#allocation5 + $0x1260] sm:$0xff] }
  0x6d   :  { %9518 = vmatprep.subr.bf16.mxu0 %v12719_v47  ;;  %9730 = vmatprep.subr.bf16.mxu1 %v12721_v48  ;;  %v12864_v47 = vcombine.low %v527_v32, %v539_v33  ;;  %v12887_v48 = vcombine.high %v550_v41, %v562_v42  ;;  %v12889_v49 = vcombine.high %v551_v44, %v563_v45  ;;  %v682_v23 = vld [vmem:[#allocation5 + $0x1320] sm:$0xff]  ;;  %v695_v31 = vld [vmem:[#allocation5 + $0x1388] sm:$0xff] }
  0x6e   :  { %v12982_v53 = vcombine.low %v646_v13, %v658_v14  ;;  %v706_v30 = vld [vmem:[#allocation5 + $0x13e0] sm:$0xff]  ;;  %v707_v32 = vld [vmem:[#allocation5 + $0x13e8] sm:$0xff] }
  0x70   :  { %9519 = vmatpush1.bf16.msra.mxu0 %v12718_v55  ;;  %9731 = vmatpush1.bf16.msra.mxu1 %v12720_v56  ;;  %v587_v55 = vld [vmem:[#allocation5 + $0x1028] sm:$0xff]  ;;  %v12886_v56 = vcombine.low %v550_v41, %v562_v42  ;;  %v730_v41 = vld [vmem:[#allocation5 + $0x14a0] sm:$0xff] }
  0x71   :  { %9520 = vmatprep.subr.bf16.mxu0 %v12743_v57  ;;  %9732 = vmatprep.subr.bf16.mxu1 %v12745_v59  ;;  %v12888_v57 = vcombine.low %v551_v44, %v563_v45  ;;  %v12911_v59 = vcombine.high %v574_v50, %v586_v51  ;;  %v12913_v60 = vcombine.high %v575_v52, %v587_v55  ;;  %v719_v42 = vld [vmem:[#allocation5 + $0x1448] sm:$0xff] }
  0x72   :  { %v731_v44 = vld [vmem:[#allocation5 + $0x14a8] sm:$0xff] }
  0x74   :  { %9521 = vmatpush1.bf16.msra.mxu0 %v12742_v0  ;;  %9733 = vmatpush1.bf16.msra.mxu1 %v12744_v1  ;;  %v611_v0 = vld [vmem:[#allocation5 + $0x10e8] sm:$0xff]  ;;  %v12910_v1 = vcombine.low %v574_v50, %v586_v51  ;;  %v754_v50 = vld [vmem:[#allocation5 + $0x1560] sm:$0xff] }
  0x75   :  { %9522 = vmatprep.subr.bf16.mxu0 %v12767_v2  ;;  %9734 = vmatprep.subr.bf16.mxu1 %v12769_v3  ;;  %v12912_v2 = vcombine.low %v575_v52, %v587_v55  ;;  %v12935_v3 = vcombine.high %v598_v61, %v610_v62  ;;  %v12937_v4 = vcombine.high %v599_v63, %v611_v0  ;;  %v743_v51 = vld [vmem:[#allocation5 + $0x1508] sm:$0xff] }
  0x76   :  { %v755_v52 = vld [vmem:[#allocation5 + $0x1568] sm:$0xff] }
  0x78   :  { %9523 = vmatpush1.bf16.msra.mxu0 %v12766_v8  ;;  %9735 = vmatpush1.bf16.msra.mxu1 %v12768_v9  ;;  %v635_v8 = vld [vmem:[#allocation5 + $0x11a8] sm:$0xff]  ;;  %v12934_v9 = vcombine.low %v598_v61, %v610_v62  ;;  %v778_v61 = vld [vmem:[#allocation5 + $0x1620] sm:$0xff] }
  0x79   :  { %9545 = vmatprep.subr.bf16.mxu0 %v12791_v10  ;;  %9757 = vmatprep.subr.bf16.mxu1 %v12793_v11  ;;  %v12936_v10 = vcombine.low %v599_v63, %v611_v0  ;;  %v12959_v11 = vcombine.high %v622_v5, %v634_v6  ;;  %v12961_v12 = vcombine.high %v623_v7, %v635_v8  ;;  %v767_v62 = vld [vmem:[#allocation5 + $0x15c8] sm:$0xff]  ;;  %v802_v5 = vld [vmem:[#allocation5 + $0x16e0] sm:$0xff] }
  0x7a   :  { %v779_v63 = vld [vmem:[#allocation5 + $0x1628] sm:$0xff] }
  0x7b   :  { %9525 = vmatmul.mubr.bf16.vlgmr.msra.gmra.mrb[0].mxu0 %v14605_v15  ;;  %9737 = vmatmul.mubr.bf16.vlgmr.msra.gmra.mrb[0].mxu1 %v14605_v15  ;;  %v791_v6 = vld [vmem:[#allocation5 + $0x1688] sm:$0xff] }
  0x7c   :  { %9546 = vmatpush1.bf16.msra.mxu0 %v12790_v19  ;;  %9758 = vmatpush1.bf16.msra.mxu1 %v12792_v20  ;;  %v12960_v19 = vcombine.low %v623_v7, %v635_v8  ;;  %v12983_v20 = vcombine.high %v646_v13, %v658_v14  ;;  %v803_v7 = vld [vmem:[#allocation5 + $0x16e8] sm:$0xff]  ;;  %v826_v13 = vld [vmem:[#allocation5 + $0x17a0] sm:$0xff] }
  0x7d   :  { %9547 = vmatprep.subr.bf16.mxu0 %v12815_v21  ;;  %9759 = vmatprep.subr.bf16.mxu1 %v12817_v22  ;;  %v12985_v21 = vcombine.high %v647_v16, %v659_v17  ;;  %v670_v22 = vld [vmem:[#allocation5 + $0x12c0] sm:$0xff]  ;;  %v815_v14 = vld [vmem:[#allocation5 + $0x1748] sm:$0xff] }
  0x7e   :  { %9534 = vmatprep.mubr.bf16.mxu0 %v14607_v25  ;;  %9746 = vmatprep.mubr.bf16.mxu1 %v14607_v25  ;;  %v13006_v33 = vcombine.low %v670_v22, %v682_v23 }
  0x80   :  { %9548 = vmatpush1.bf16.msra.mxu0 %v12814_v54  ;;  %9760 = vmatpush1.bf16.msra.mxu1 %v12816_v27  ;;  %v12984_v54 = vcombine.low %v647_v16, %v659_v17  ;;  %v13007_v27 = vcombine.high %v670_v22, %v682_v23  ;;  %v827_v16 = vld [vmem:[#allocation5 + $0x17a8] sm:$0xff]  ;;  %v850_v22 = vld [vmem:[#allocation5 + $0x1860] sm:$0xff] }
  0x81   :  { %9549 = vmatprep.subr.bf16.mxu0 %v12839_v28  ;;  %9761 = vmatprep.subr.bf16.mxu1 %v12841_v29  ;;  %v13009_v28 = vcombine.high %v671_v24, %v683_v26  ;;  %v694_v29 = vld [vmem:[#allocation5 + $0x1380] sm:$0xff]  ;;  %v839_v23 = vld [vmem:[#allocation5 + $0x1808] sm:$0xff] }
  0x82   :  { %v13030_v45 = vcombine.low %v694_v29, %v706_v30 }
  0x83   :  { %9535 = vmatmul.mubr.bf16.gmra.mrb[4].mxu0 %v14613_v34  ;;  %9747 = vmatmul.mubr.bf16.gmra.mrb[4].mxu1 %v14613_v34 }
  0x84   :  { %9550 = vmatpush1.bf16.msra.mxu0 %v12838_v37  ;;  %9762 = vmatpush1.bf16.msra.mxu1 %v12840_v38  ;;  %v13008_v37 = vcombine.low %v671_v24, %v683_v26  ;;  %v13031_v38 = vcombine.high %v694_v29, %v706_v30  ;;  %v851_v24 = vld [vmem:[#allocation5 + $0x1868] sm:$0xff]  ;;  %v874_v29 = vld [vmem:[#allocation5 + $0x1920] sm:$0xff] }
  0x85   :  { %9551 = vmatprep.subr.bf16.mxu0 %v12863_v39  ;;  %9763 = vmatprep.subr.bf16.mxu1 %v12865_v40  ;;  %v13033_v39 = vcombine.high %v695_v31, %v707_v32  ;;  %v718_v40 = vld [vmem:[#allocation5 + $0x1440] sm:$0xff]  ;;  %v863_v30 = vld [vmem:[#allocation5 + $0x18c8] sm:$0xff] }
  0x86   :  { %9577 = vmatprep.mubr.bf16.mxu0 %v14621_v43  ;;  %9789 = vmatprep.mubr.bf16.mxu1 %v14621_v43  ;;  %v13054_v55 = vcombine.low %v718_v40, %v730_v41 }
  0x88   :  { %9552 = vmatpush1.bf16.msra.mxu0 %v12862_v46  ;;  %9764 = vmatpush1.bf16.msra.mxu1 %v12864_v47  ;;  %v13032_v46 = vcombine.low %v695_v31, %v707_v32  ;;  %v13055_v47 = vcombine.high %v718_v40, %v730_v41  ;;  %v14629_v31 = vcombine.low %v14615_v35, %v14617_v36  ;;  %v875_v32 = vld [vmem:[#allocation5 + $0x1928] sm:$0xff] }
  0x89   :  { %9553 = vmatprep.subr.bf16.mxu0 %v12887_v48  ;;  %9765 = vmatprep.subr.bf16.mxu1 %v12889_v49  ;;  %v13057_v48 = vcombine.high %v719_v42, %v731_v44  ;;  %v742_v49 = vld [vmem:[#allocation5 + $0x1500] sm:$0xff]  ;;  %v13201_v41 = vcombine.high %v863_v30, %v875_v32  ;;  %v899_v35 = vld [vmem:[#allocation5 + $0x19e8] sm:$0xff] }
  0x8a   :  { %v13078_v0 = vcombine.low %v742_v49, %v754_v50 }
  0x8c   :  { %9554 = vmatpush1.bf16.msra.mxu0 %v12886_v56  ;;  %9766 = vmatpush1.bf16.msra.mxu1 %v12888_v57  ;;  %v13056_v56 = vcombine.low %v719_v42, %v731_v44  ;;  %v13079_v57 = vcombine.high %v742_v49, %v754_v50  ;;  %v886_v42 = vld [vmem:[#allocation5 + $0x1980] sm:$0xff] }
  0x8d   :  { %9555 = vmatprep.subr.bf16.mxu0 %v12911_v59  ;;  %9767 = vmatprep.subr.bf16.mxu1 %v12913_v60  ;;  %v13081_v59 = vcombine.high %v743_v51, %v755_v52  ;;  %v766_v60 = vld [vmem:[#allocation5 + $0x15c0] sm:$0xff] }
  0x8e   :  { %v13102_v8 = vcombine.low %v766_v60, %v778_v61  ;;  %v898_v44 = vld [vmem:[#allocation5 + $0x19e0] sm:$0xff] }
  0x8f   :  { %v910_v50 = vld [vmem:[#allocation5 + $0x1a40] sm:$0xff] }
  0x90   :  { %9556 = vmatpush1.bf16.msra.mxu0 %v12910_v1  ;;  %9768 = vmatpush1.bf16.msra.mxu1 %v12912_v2  ;;  %v13080_v1 = vcombine.low %v743_v51, %v755_v52  ;;  %v13103_v2 = vcombine.high %v766_v60, %v778_v61  ;;  %v922_v51 = vld [vmem:[#allocation5 + $0x1aa0] sm:$0xff]  ;;  %v911_v52 = vld [vmem:[#allocation5 + $0x1a48] sm:$0xff]  ;;  %v13222_v60 = vcombine.low %v886_v42, %v898_v44 }
  0x91   :  { %9557 = vmatprep.subr.bf16.mxu0 %v12935_v3  ;;  %9769 = vmatprep.subr.bf16.mxu1 %v12937_v4  ;;  %v13105_v3 = vcombine.high %v767_v62, %v779_v63  ;;  %v790_v4 = vld [vmem:[#allocation5 + $0x1680] sm:$0xff] }
  0x92   :  { %v13126_v17 = vcombine.low %v790_v4, %v802_v5 }
  0x94   :  { %9558 = vmatpush1.bf16.msra.mxu0 %v12934_v9  ;;  %9770 = vmatpush1.bf16.msra.mxu1 %v12936_v10  ;;  %v13104_v9 = vcombine.low %v767_v62, %v779_v63  ;;  %v13127_v10 = vcombine.high %v790_v4, %v802_v5  ;;  %v13247_v62 = vcombine.high %v910_v50, %v922_v51  ;;  %v947_v4 = vld [vmem:[#allocation5 + $0x1b68] sm:$0xff] }
  0x95   :  { %9559 = vmatprep.subr.bf16.mxu0 %v12959_v11  ;;  %9771 = vmatprep.subr.bf16.mxu1 %v12961_v12  ;;  %v13129_v11 = vcombine.high %v791_v6, %v803_v7  ;;  %v814_v12 = vld [vmem:[#allocation5 + $0x1740] sm:$0xff]  ;;  %v13246_v5 = vcombine.low %v910_v50, %v922_v51 }
  0x96   :  { %v13150_v26 = vcombine.low %v814_v12, %v826_v13 }
  0x98   :  { %9560 = vmatpush1.bf16.msra.mxu0 %v12958_v18  ;;  %9772 = vmatpush1.bf16.msra.mxu1 %v12960_v19  ;;  %v13128_v18 = vcombine.low %v791_v6, %v803_v7  ;;  %v13151_v19 = vcombine.high %v814_v12, %v826_v13  ;;  %v971_v12 = vld [vmem:[#allocation5 + $0x1c28] sm:$0xff] }
  0x99   :  { %9561 = vmatprep.subr.bf16.mxu0 %v12983_v20  ;;  %9773 = vmatprep.subr.bf16.mxu1 %v12985_v21  ;;  %v13153_v20 = vcombine.high %v815_v14, %v827_v16  ;;  %v838_v21 = vld [vmem:[#allocation5 + $0x1800] sm:$0xff] }
  0x9c   :  { %9562 = vmatpush1.bf16.msra.mxu0 %v12982_v53  ;;  %9774 = vmatpush1.bf16.msra.mxu1 %v12984_v54  ;;  %v13152_v53 = vcombine.low %v815_v14, %v827_v16  ;;  %v13175_v54 = vcombine.high %v838_v21, %v850_v22 }
  0x9d   :  { %9563 = vmatprep.subr.bf16.mxu0 %v13007_v27  ;;  %9775 = vmatprep.subr.bf16.mxu1 %v13009_v28  ;;  %v13177_v27 = vcombine.high %v839_v23, %v851_v24  ;;  %v862_v28 = vld [vmem:[#allocation5 + $0x18c0] sm:$0xff] }
  0x9e   :  { %v13199_v40 = vcombine.high %v862_v28, %v874_v29  ;;  %v13198_v36 = vcombine.low %v862_v28, %v874_v29  ;;  %v1019_v28 = vld [vmem:[#allocation5 + $0x1da8] sm:$0xff] }
  0xa0   :  { %9564 = vmatpush1.bf16.msra.mxu0 %v13006_v33  ;;  %9776 = vmatpush1.bf16.msra.mxu1 %v13008_v37  ;;  %v63_v33 = vld [vmem:[#allocation2 + $0x48] sm:$0xff] }
  0xa1   :  { %9565 = vmatprep.subr.bf16.mxu0 %v13031_v38  ;;  %9777 = vmatprep.subr.bf16.mxu1 %v13033_v39  ;;  %v67_v37 = vld [vmem:[#allocation2 + $0x68] sm:$0xff]  ;;  %v13174_v38 = vcombine.low %v838_v21, %v850_v22  ;;  %v13176_v39 = vcombine.low %v839_v23, %v851_v24 }
  0xa2   :  { %v995_v21 = vld [vmem:[#allocation5 + $0x1ce8] sm:$0xff] }
  0xa4   :  { %9566 = vmatpush1.bf16.msra.mxu0 %v13030_v45  ;;  %9778 = vmatpush1.bf16.msra.mxu1 %v13032_v46  ;;  %v14631_v45 = vcombine.high %v63_v33, %v67_v37  ;;  %v887_v46 = vld [vmem:[#allocation5 + $0x1988] sm:$0xff] }
  0xa5   :  { %9567 = vmatprep.subr.bf16.mxu0 %v13055_v47  ;;  %9779 = vmatprep.subr.bf16.mxu1 %v13057_v48  ;;  %v13200_v47 = vcombine.low %v863_v30, %v875_v32  ;;  %v13223_v48 = vcombine.high %v886_v42, %v898_v44  ;;  %v13225_v49 = vcombine.high %v887_v46, %v899_v35 }
  0xa6   :  { %v13224_v61 = vcombine.low %v887_v46, %v899_v35  ;;  %v1054_v35 = vld [vmem:[#allocation5 + $0x1ec0] sm:$0xff] }
  0xa8   :  { %9568 = vmatpush1.bf16.msra.mxu0 %v13054_v55  ;;  %9780 = vmatpush1.bf16.msra.mxu1 %v13056_v56  ;;  %v923_v55 = vld [vmem:[#allocation5 + $0x1aa8] sm:$0xff]  ;;  %v14637_v56 = vcombine.low %v63_v33, %v67_v37  ;;  %v1030_v37 = vld [vmem:[#allocation5 + $0x1e00] sm:$0xff] }
  0xa9   :  { %9569 = vmatprep.subr.bf16.mxu0 %v13079_v57  ;;  %9781 = vmatprep.subr.bf16.mxu1 %v13081_v59  ;;  %v14639_v57 = vld [vmem:[#allocation2 + $0x10] sm:$0xff]  ;;  %v13249_v63 = vcombine.high %v911_v52, %v923_v55  ;;  %v13248_v6 = vcombine.low %v911_v52, %v923_v55  ;;  %v1078_v55 = vld [vmem:[#allocation5 + $0x1f80] sm:$0xff] }
  0xaa   :  { %v14641_v59 = vld [vmem:[#allocation2 + $0x30] sm:$0xff] }
  0xac   :  { %9570 = vmatpush1.bf16.msra.mxu0 %v13078_v0  ;;  %9782 = vmatpush1.bf16.msra.mxu1 %v13080_v1  ;;  %v934_v0 = vld [vmem:[#allocation5 + $0x1b00] sm:$0xff] }
  0xad   :  { %9571 = vmatprep.subr.bf16.mxu0 %v13103_v2  ;;  %9783 = vmatprep.subr.bf16.mxu1 %v13105_v3  ;;  %v946_v1 = vld [vmem:[#allocation5 + $0x1b60] sm:$0xff]  ;;  %v14645_v2 = vcombine.high %v14639_v57, %v14641_v59  ;;  %v935_v3 = vld [vmem:[#allocation5 + $0x1b08] sm:$0xff] }
  0xae   :  { %v13271_v7 = vcombine.high %v934_v0, %v946_v1  ;;  %v13270_v13 = vcombine.low %v934_v0, %v946_v1  ;;  %v13272_v14 = vcombine.low %v935_v3, %v947_v4 }
  0xb0   :  { %9572 = vmatpush1.bf16.msra.mxu0 %v13102_v8  ;;  %9784 = vmatpush1.bf16.msra.mxu1 %v13104_v9  ;;  %v13273_v8 = vcombine.high %v935_v3, %v947_v4  ;;  %v958_v9 = vld [vmem:[#allocation5 + $0x1bc0] sm:$0xff] }
  0xb1   :  { %9573 = vmatprep.subr.bf16.mxu0 %v13127_v10  ;;  %9785 = vmatprep.subr.bf16.mxu1 %v13129_v11  ;;  %v970_v10 = vld [vmem:[#allocation5 + $0x1c20] sm:$0xff]  ;;  %v959_v11 = vld [vmem:[#allocation5 + $0x1bc8] sm:$0xff] }
  0xb2   :  { %v13295_v16 = vcombine.high %v958_v9, %v970_v10  ;;  %v13294_v22 = vcombine.low %v958_v9, %v970_v10  ;;  %v13296_v23 = vcombine.low %v959_v11, %v971_v12  ;;  %v1102_v4 = vld [vmem:[#allocation5 + $0x2040] sm:$0xff] }
  0xb4   :  { %9574 = vmatpush1.bf16.msra.mxu0 %v13126_v17  ;;  %9786 = vmatpush1.bf16.msra.mxu1 %v13128_v18  ;;  %v13297_v17 = vcombine.high %v959_v11, %v971_v12  ;;  %v982_v18 = vld [vmem:[#allocation5 + $0x1c80] sm:$0xff] }
  0xb5   :  { %9575 = vmatprep.subr.bf16.mxu0 %v13151_v19  ;;  %9787 = vmatprep.subr.bf16.mxu1 %v13153_v20  ;;  %v994_v19 = vld [vmem:[#allocation5 + $0x1ce0] sm:$0xff]  ;;  %v983_v20 = vld [vmem:[#allocation5 + $0x1c88] sm:$0xff] }
  0xb6   :  { %v13319_v24 = vcombine.high %v982_v18, %v994_v19  ;;  %v13318_v29 = vcombine.low %v982_v18, %v994_v19  ;;  %v13320_v30 = vcombine.low %v983_v20, %v995_v21  ;;  %v1126_v12 = vld [vmem:[#allocation5 + $0x2100] sm:$0xff] }
  0xb8   :  { %9576 = vmatpush1.bf16.msra.mxu0 %v13150_v26  ;;  %9788 = vmatpush1.bf16.msra.mxu1 %v13152_v53  ;;  %v13321_v26 = vcombine.high %v983_v20, %v995_v21  ;;  %v1006_v53 = vld [vmem:[#allocation5 + $0x1d40] sm:$0xff] }
  0xb9   :  { %9598 = vmatprep.subr.bf16.mxu0 %v13175_v54  ;;  %9810 = vmatprep.subr.bf16.mxu1 %v13177_v27  ;;  %v1018_v54 = vld [vmem:[#allocation5 + $0x1da0] sm:$0xff]  ;;  %v1007_v27 = vld [vmem:[#allocation5 + $0x1d48] sm:$0xff] }
  0xba   :  { %v13343_v32 = vcombine.high %v1006_v53, %v1018_v54  ;;  %v13345_v33 = vcombine.high %v1007_v27, %v1019_v28  ;;  %v13344_v42 = vcombine.low %v1007_v27, %v1019_v28  ;;  %v1150_v21 = vld [vmem:[#allocation5 + $0x21c0] sm:$0xff] }
  0xbb   :  { %9578 = vmatmul.mubr.bf16.vlgmr.msra.gmra.mrb[0].mxu0 %v14629_v31  ;;  %9790 = vmatmul.mubr.bf16.vlgmr.msra.gmra.mrb[0].mxu1 %v14629_v31  ;;  %v1174_v28 = vld [vmem:[#allocation5 + $0x2280] sm:$0xff] }
  0xbc   :  { %9599 = vmatpush1.bf16.msra.mxu0 %v13174_v38  ;;  %9811 = vmatpush1.bf16.msra.mxu1 %v13176_v39  ;;  %v1042_v38 = vld [vmem:[#allocation5 + $0x1e60] sm:$0xff]  ;;  %v1031_v39 = vld [vmem:[#allocation5 + $0x1e08] sm:$0xff] }
  0xbd   :  { %9600 = vmatprep.subr.bf16.mxu0 %v13199_v40  ;;  %9812 = vmatprep.subr.bf16.mxu1 %v13201_v41  ;;  %v1043_v40 = vld [vmem:[#allocation5 + $0x1e68] sm:$0xff]  ;;  %v13342_v41 = vcombine.low %v1006_v53, %v1018_v54  ;;  %v13367_v44 = vcombine.high %v1030_v37, %v1042_v38 }
  0xbe   :  { %9587 = vmatprep.mubr.bf16.mxu0 %v14631_v45  ;;  %9799 = vmatprep.mubr.bf16.mxu1 %v14631_v45  ;;  %v13369_v46 = vcombine.high %v1031_v39, %v1043_v40  ;;  %v13368_v50 = vcombine.low %v1031_v39, %v1043_v40  ;;  %v1198_v40 = vld [vmem:[#allocation5 + $0x2340] sm:$0xff] }
  0xc0   :  { %9601 = vmatpush1.bf16.msra.mxu0 %v13198_v36  ;;  %9813 = vmatpush1.bf16.msra.mxu1 %v13200_v47  ;;  %v1066_v36 = vld [vmem:[#allocation5 + $0x1f20] sm:$0xff]  ;;  %v1055_v47 = vld [vmem:[#allocation5 + $0x1ec8] sm:$0xff] }
  0xc1   :  { %9602 = vmatprep.subr.bf16.mxu0 %v13223_v48  ;;  %9814 = vmatprep.subr.bf16.mxu1 %v13225_v49  ;;  %v1067_v48 = vld [vmem:[#allocation5 + $0x1f28] sm:$0xff]  ;;  %v13366_v49 = vcombine.low %v1030_v37, %v1042_v38  ;;  %v13391_v51 = vcombine.high %v1054_v35, %v1066_v36 }
  0xc2   :  { %v13393_v52 = vcombine.high %v1055_v47, %v1067_v48  ;;  %v13392_v0 = vcombine.low %v1055_v47, %v1067_v48  ;;  %v1222_v48 = vld [vmem:[#allocation5 + $0x2400] sm:$0xff] }
  0xc3   :  { %9588 = vmatmul.mubr.bf16.gmra.mrb[4].mxu0 %v14637_v56  ;;  %9800 = vmatmul.mubr.bf16.gmra.mrb[4].mxu1 %v14637_v56 }
  0xc4   :  { %9603 = vmatpush1.bf16.msra.mxu0 %v13222_v60  ;;  %9815 = vmatpush1.bf16.msra.mxu1 %v13224_v61  ;;  %v1090_v60 = vld [vmem:[#allocation5 + $0x1fe0] sm:$0xff]  ;;  %v1079_v61 = vld [vmem:[#allocation5 + $0x1f88] sm:$0xff] }
  0xc5   :  { %9604 = vmatprep.subr.bf16.mxu0 %v13247_v62  ;;  %9816 = vmatprep.subr.bf16.mxu1 %v13249_v63  ;;  %v1091_v62 = vld [vmem:[#allocation5 + $0x1fe8] sm:$0xff]  ;;  %v13390_v63 = vcombine.low %v1054_v35, %v1066_v36  ;;  %v13415_v1 = vcombine.high %v1078_v55, %v1090_v60 }
  0xc6   :  { %9630 = vmatprep.mubr.bf16.mxu0 %v14645_v2  ;;  %9842 = vmatprep.mubr.bf16.mxu1 %v14645_v2  ;;  %v13417_v3 = vcombine.high %v1079_v61, %v1091_v62  ;;  %v13416_v9 = vcombine.low %v1079_v61, %v1091_v62  ;;  %v1246_v62 = vld [vmem:[#allocation5 + $0x24c0] sm:$0xff] }
  0xc8   :  { %9605 = vmatpush1.bf16.msra.mxu0 %v13246_v5  ;;  %9817 = vmatpush1.bf16.msra.mxu1 %v13248_v6  ;;  %v1114_v5 = vld [vmem:[#allocation5 + $0x20a0] sm:$0xff]  ;;  %v1103_v6 = vld [vmem:[#allocation5 + $0x2048] sm:$0xff] }
  0xc9   :  { %9606 = vmatprep.subr.bf16.mxu0 %v13271_v7  ;;  %9818 = vmatprep.subr.bf16.mxu1 %v13273_v8  ;;  %v1115_v7 = vld [vmem:[#allocation5 + $0x20a8] sm:$0xff]  ;;  %v13414_v8 = vcombine.low %v1078_v55, %v1090_v60  ;;  %v13439_v10 = vcombine.high %v1102_v4, %v1114_v5 }
  0xca   :  { %v13441_v11 = vcombine.high %v1103_v6, %v1115_v7  ;;  %v13440_v18 = vcombine.low %v1103_v6, %v1115_v7 }
  0xcc   :  { %9607 = vmatpush1.bf16.msra.mxu0 %v13270_v13  ;;  %9819 = vmatpush1.bf16.msra.mxu1 %v13272_v14  ;;  %v1138_v13 = vld [vmem:[#allocation5 + $0x2160] sm:$0xff]  ;;  %v1127_v14 = vld [vmem:[#allocation5 + $0x2108] sm:$0xff] }
  0xcd   :  { %9608 = vmatprep.subr.bf16.mxu0 %v13295_v16  ;;  %9820 = vmatprep.subr.bf16.mxu1 %v13297_v17  ;;  %v1139_v16 = vld [vmem:[#allocation5 + $0x2168] sm:$0xff]  ;;  %v13438_v17 = vcombine.low %v1102_v4, %v1114_v5  ;;  %v13463_v19 = vcombine.high %v1126_v12, %v1138_v13  ;;  %v64_v4 = vld [vmem:[#allocation2 + $0x50] sm:$0xff] }
  0xce   :  { %v13465_v20 = vcombine.high %v1127_v14, %v1139_v16  ;;  %v13464_v53 = vcombine.low %v1127_v14, %v1139_v16  ;;  %v68_v5 = vld [vmem:[#allocation2 + $0x70] sm:$0xff] }
  0xd0   :  { %9609 = vmatpush1.bf16.msra.mxu0 %v13294_v22  ;;  %9821 = vmatpush1.bf16.msra.mxu1 %v13296_v23  ;;  %v1162_v22 = vld [vmem:[#allocation5 + $0x2220] sm:$0xff]  ;;  %v1151_v23 = vld [vmem:[#allocation5 + $0x21c8] sm:$0xff] }
  0xd1   :  { %9610 = vmatprep.subr.bf16.mxu0 %v13319_v24  ;;  %9822 = vmatprep.subr.bf16.mxu1 %v13321_v26  ;;  %v1163_v24 = vld [vmem:[#allocation5 + $0x2228] sm:$0xff]  ;;  %v13462_v26 = vcombine.low %v1126_v12, %v1138_v13  ;;  %v13487_v54 = vcombine.high %v1150_v21, %v1162_v22  ;;  %v14655_v12 = vcombine.high %v64_v4, %v68_v5 }
  0xd2   :  { %v13489_v27 = vcombine.high %v1151_v23, %v1163_v24  ;;  %v13488_v37 = vcombine.low %v1151_v23, %v1163_v24  ;;  %v1271_v13 = vld [vmem:[#allocation5 + $0x2588] sm:$0xff]  ;;  %v14663_v23 = vld [vmem:[#allocation2 + $0x18] sm:$0xff] }
  0xd3   :  { %v14665_v24 = vld [vmem:[#allocation2 + $0x38] sm:$0xff] }
  0xd4   :  { %9611 = vmatpush1.bf16.msra.mxu0 %v13318_v29  ;;  %9823 = vmatpush1.bf16.msra.mxu1 %v13320_v30  ;;  %v1186_v29 = vld [vmem:[#allocation5 + $0x22e0] sm:$0xff]  ;;  %v1175_v30 = vld [vmem:[#allocation5 + $0x2288] sm:$0xff] }
  0xd5   :  { %9612 = vmatprep.subr.bf16.mxu0 %v13343_v32  ;;  %9824 = vmatprep.subr.bf16.mxu1 %v13345_v33  ;;  %v1187_v32 = vld [vmem:[#allocation5 + $0x22e8] sm:$0xff]  ;;  %v13486_v33 = vcombine.low %v1150_v21, %v1162_v22  ;;  %v13511_v38 = vcombine.high %v1174_v28, %v1186_v29  ;;  %v14661_v22 = vcombine.low %v64_v4, %v68_v5 }
  0xd6   :  { %v13513_v39 = vcombine.high %v1175_v30, %v1187_v32  ;;  %v13512_v35 = vcombine.low %v1175_v30, %v1187_v32  ;;  %v1307_v21 = vld [vmem:[#allocation5 + $0x26a8] sm:$0xff]  ;;  %v14669_v30 = vcombine.high %v14663_v23, %v14665_v24 }
  0xd7   :  { %v1319_v32 = vld [vmem:[#allocation5 + $0x2708] sm:$0xff] }
  0xd8   :  { %9613 = vmatpush1.bf16.msra.mxu0 %v13342_v41  ;;  %9825 = vmatpush1.bf16.msra.mxu1 %v13344_v42  ;;  %v1210_v41 = vld [vmem:[#allocation5 + $0x23a0] sm:$0xff]  ;;  %v1199_v42 = vld [vmem:[#allocation5 + $0x2348] sm:$0xff] }
  0xd9   :  { %9614 = vmatprep.subr.bf16.mxu0 %v13367_v44  ;;  %9826 = vmatprep.subr.bf16.mxu1 %v13369_v46  ;;  %v1211_v44 = vld [vmem:[#allocation5 + $0x23a8] sm:$0xff]  ;;  %v13510_v46 = vcombine.low %v1174_v28, %v1186_v29  ;;  %v13535_v36 = vcombine.high %v1198_v40, %v1210_v41  ;;  %v1318_v28 = vld [vmem:[#allocation5 + $0x2700] sm:$0xff] }
  0xda   :  { %v13537_v47 = vcombine.high %v1199_v42, %v1211_v44  ;;  %v13536_v55 = vcombine.low %v1199_v42, %v1211_v44  ;;  %v1330_v29 = vld [vmem:[#allocation5 + $0x2760] sm:$0xff]  ;;  %v1343_v44 = vld [vmem:[#allocation5 + $0x27c8] sm:$0xff] }
  0xdb   :  { %v1354_v42 = vld [vmem:[#allocation5 + $0x2820] sm:$0xff]  ;;  %v1403_v4 = vld [vmem:[#allocation5 + $0x29a8] sm:$0xff] }
  0xdc   :  { %9615 = vmatpush1.bf16.msra.mxu0 %v13366_v49  ;;  %9827 = vmatpush1.bf16.msra.mxu1 %v13368_v50  ;;  %v1234_v49 = vld [vmem:[#allocation5 + $0x2460] sm:$0xff]  ;;  %v1223_v50 = vld [vmem:[#allocation5 + $0x2408] sm:$0xff] }
  0xdd   :  { %9616 = vmatprep.subr.bf16.mxu0 %v13391_v51  ;;  %9828 = vmatprep.subr.bf16.mxu1 %v13393_v52  ;;  %v1235_v51 = vld [vmem:[#allocation5 + $0x2468] sm:$0xff]  ;;  %v13534_v52 = vcombine.low %v1198_v40, %v1210_v41  ;;  %v13559_v60 = vcombine.high %v1222_v48, %v1234_v49  ;;  %v13558_v6 = vcombine.low %v1222_v48, %v1234_v49  ;;  %v1342_v41 = vld [vmem:[#allocation5 + $0x27c0] sm:$0xff] }
  0xde   :  { %v13561_v61 = vcombine.high %v1223_v50, %v1235_v51  ;;  %v13560_v7 = vcombine.low %v1223_v50, %v1235_v51  ;;  %v1366_v49 = vld [vmem:[#allocation5 + $0x2880] sm:$0xff]  ;;  %v1367_v51 = vld [vmem:[#allocation5 + $0x2888] sm:$0xff] }
  0xdf   :  { %v1378_v50 = vld [vmem:[#allocation5 + $0x28e0] sm:$0xff] }
  0xe0   :  { %9617 = vmatpush1.bf16.msra.mxu0 %v13390_v63  ;;  %9829 = vmatpush1.bf16.msra.mxu1 %v13392_v0  ;;  %v1258_v63 = vld [vmem:[#allocation5 + $0x2520] sm:$0xff]  ;;  %v1247_v0 = vld [vmem:[#allocation5 + $0x24c8] sm:$0xff]  ;;  %v13702_v5 = vcombine.low %v1366_v49, %v1378_v50 }
  0xe1   :  { %9618 = vmatprep.subr.bf16.mxu0 %v13415_v1  ;;  %9830 = vmatprep.subr.bf16.mxu1 %v13417_v3  ;;  %v14653_v1 = vcombine.low %v14639_v57, %v14641_v59  ;;  %v1259_v3 = vld [vmem:[#allocation5 + $0x2528] sm:$0xff]  ;;  %v13582_v59 = vcombine.low %v1246_v62, %v1258_v63 }
  0xe2   :  { %v1283_v57 = vld [vmem:[#allocation5 + $0x25e8] sm:$0xff]  ;;  %v13584_v14 = vcombine.low %v1247_v0, %v1259_v3 }
  0xe4   :  { %9619 = vmatpush1.bf16.msra.mxu0 %v13414_v8  ;;  %9831 = vmatpush1.bf16.msra.mxu1 %v13416_v9  ;;  %v13583_v8 = vcombine.high %v1246_v62, %v1258_v63  ;;  %v13585_v9 = vcombine.high %v1247_v0, %v1259_v3  ;;  %v1390_v63 = vld [vmem:[#allocation5 + $0x2940] sm:$0xff]  ;;  %v1391_v3 = vld [vmem:[#allocation5 + $0x2948] sm:$0xff] }
  0xe5   :  { %9620 = vmatprep.subr.bf16.mxu0 %v13439_v10  ;;  %9832 = vmatprep.subr.bf16.mxu1 %v13441_v11  ;;  %v1270_v10 = vld [vmem:[#allocation5 + $0x2580] sm:$0xff] }
  0xe6   :  { %v1282_v11 = vld [vmem:[#allocation5 + $0x25e0] sm:$0xff] }
  0xe7   :  { %v13607_v16 = vcombine.high %v1270_v10, %v1282_v11  ;;  %v1402_v0 = vld [vmem:[#allocation5 + $0x29a0] sm:$0xff] }
  0xe8   :  { %9621 = vmatpush1.bf16.msra.mxu0 %v13438_v17  ;;  %9833 = vmatpush1.bf16.msra.mxu1 %v13440_v18  ;;  %v13609_v17 = vcombine.high %v1271_v13, %v1283_v57  ;;  %v1294_v18 = vld [vmem:[#allocation5 + $0x2640] sm:$0xff] }
  0xe9   :  { %9622 = vmatprep.subr.bf16.mxu0 %v13463_v19  ;;  %9834 = vmatprep.subr.bf16.mxu1 %v13465_v20  ;;  %v1306_v19 = vld [vmem:[#allocation5 + $0x26a0] sm:$0xff]  ;;  %v1295_v20 = vld [vmem:[#allocation5 + $0x2648] sm:$0xff] }
  0xec   :  { %9623 = vmatpush1.bf16.msra.mxu0 %v13462_v26  ;;  %9835 = vmatpush1.bf16.msra.mxu1 %v13464_v53  ;;  %v13606_v26 = vcombine.low %v1270_v10, %v1282_v11  ;;  %v13608_v53 = vcombine.low %v1271_v13, %v1283_v57  ;;  %v1426_v10 = vld [vmem:[#allocation5 + $0x2a60] sm:$0xff]  ;;  %v1415_v11 = vld [vmem:[#allocation5 + $0x2a08] sm:$0xff]  ;;  %v13726_v57 = vcombine.low %v1390_v63, %v1402_v0 }
  0xed   :  { %9624 = vmatprep.subr.bf16.mxu0 %v13487_v54  ;;  %9836 = vmatprep.subr.bf16.mxu1 %v13489_v27  ;;  %v13631_v54 = vcombine.high %v1294_v18, %v1306_v19  ;;  %v13633_v27 = vcombine.high %v1295_v20, %v1307_v21  ;;  %v1427_v13 = vld [vmem:[#allocation5 + $0x2a68] sm:$0xff] }
  0xf0   :  { %9625 = vmatpush1.bf16.msra.mxu0 %v13486_v33  ;;  %9837 = vmatpush1.bf16.msra.mxu1 %v13488_v37  ;;  %v1331_v33 = vld [vmem:[#allocation5 + $0x2768] sm:$0xff]  ;;  %v13630_v37 = vcombine.low %v1294_v18, %v1306_v19  ;;  %v1450_v18 = vld [vmem:[#allocation5 + $0x2b20] sm:$0xff] }
  0xf1   :  { %9626 = vmatprep.subr.bf16.mxu0 %v13511_v38  ;;  %9838 = vmatprep.subr.bf16.mxu1 %v13513_v39  ;;  %v13632_v38 = vcombine.low %v1295_v20, %v1307_v21  ;;  %v13655_v39 = vcombine.high %v1318_v28, %v1330_v29  ;;  %v13657_v40 = vcombine.high %v1319_v32, %v1331_v33  ;;  %v1439_v19 = vld [vmem:[#allocation5 + $0x2ac8] sm:$0xff] }
  0xf2   :  { %v1451_v20 = vld [vmem:[#allocation5 + $0x2b28] sm:$0xff] }
  0xf4   :  { %9627 = vmatpush1.bf16.msra.mxu0 %v13510_v46  ;;  %9839 = vmatpush1.bf16.msra.mxu1 %v13512_v35  ;;  %v1355_v46 = vld [vmem:[#allocation5 + $0x2828] sm:$0xff]  ;;  %v13654_v35 = vcombine.low %v1318_v28, %v1330_v29  ;;  %v1474_v28 = vld [vmem:[#allocation5 + $0x2be0] sm:$0xff] }
  0xf5   :  { %9628 = vmatprep.subr.bf16.mxu0 %v13535_v36  ;;  %9840 = vmatprep.subr.bf16.mxu1 %v13537_v47  ;;  %v13656_v36 = vcombine.low %v1319_v32, %v1331_v33  ;;  %v13679_v47 = vcombine.high %v1342_v41, %v1354_v42  ;;  %v13681_v48 = vcombine.high %v1343_v44, %v1355_v46  ;;  %v1463_v29 = vld [vmem:[#allocation5 + $0x2b88] sm:$0xff] }
  0xf6   :  { %v1475_v32 = vld [vmem:[#allocation5 + $0x2be8] sm:$0xff] }
  0xf8   :  { %9629 = vmatpush1.bf16.msra.mxu0 %v13534_v52  ;;  %9841 = vmatpush1.bf16.msra.mxu1 %v13536_v55  ;;  %v1379_v52 = vld [vmem:[#allocation5 + $0x28e8] sm:$0xff]  ;;  %v13678_v55 = vcombine.low %v1342_v41, %v1354_v42  ;;  %v1498_v41 = vld [vmem:[#allocation5 + $0x2ca0] sm:$0xff] }
  0xf9   :  { %9651 = vmatprep.subr.bf16.mxu0 %v13559_v60  ;;  %9863 = vmatprep.subr.bf16.mxu1 %v13561_v61  ;;  %v13680_v60 = vcombine.low %v1343_v44, %v1355_v46  ;;  %v13703_v61 = vcombine.high %v1366_v49, %v1378_v50  ;;  %v13705_v62 = vcombine.high %v1367_v51, %v1379_v52  ;;  %v1487_v42 = vld [vmem:[#allocation5 + $0x2c48] sm:$0xff]  ;;  %v1522_v49 = vld [vmem:[#allocation5 + $0x2d60] sm:$0xff] }
  0xfa   :  { %v1499_v44 = vld [vmem:[#allocation5 + $0x2ca8] sm:$0xff] }
  0xfb   :  { %9631 = vmatmul.mubr.bf16.vlgmr.msra.gmra.mrb[0].mxu0 %v14653_v1  ;;  %9843 = vmatmul.mubr.bf16.vlgmr.msra.gmra.mrb[0].mxu1 %v14653_v1  ;;  %v1511_v50 = vld [vmem:[#allocation5 + $0x2d08] sm:$0xff] }
  0xfc   :  { %9652 = vmatpush1.bf16.msra.mxu0 %v13558_v6  ;;  %9864 = vmatpush1.bf16.msra.mxu1 %v13560_v7  ;;  %v13704_v6 = vcombine.low %v1367_v51, %v1379_v52  ;;  %v13727_v7 = vcombine.high %v1390_v63, %v1402_v0  ;;  %v1523_v51 = vld [vmem:[#allocation5 + $0x2d68] sm:$0xff]  ;;  %v1546_v63 = vld [vmem:[#allocation5 + $0x2e20] sm:$0xff] }
  0xfd   :  { %9653 = vmatprep.subr.bf16.mxu0 %v13583_v8  ;;  %9865 = vmatprep.subr.bf16.mxu1 %v13585_v9  ;;  %v13729_v8 = vcombine.high %v1391_v3, %v1403_v4  ;;  %v1414_v9 = vld [vmem:[#allocation5 + $0x2a00] sm:$0xff]  ;;  %v1535_v0 = vld [vmem:[#allocation5 + $0x2dc8] sm:$0xff] }
  0xfe   :  { %9640 = vmatprep.mubr.bf16.mxu0 %v14655_v12  ;;  %9852 = vmatprep.mubr.bf16.mxu1 %v14655_v12  ;;  %v13750_v21 = vcombine.low %v1414_v9, %v1426_v10 }
 0x100   :  { %9654 = vmatpush1.bf16.msra.mxu0 %v13582_v59  ;;  %9866 = vmatpush1.bf16.msra.mxu1 %v13584_v14  ;;  %v13728_v59 = vcombine.low %v1391_v3, %v1403_v4  ;;  %v13751_v14 = vcombine.high %v1414_v9, %v1426_v10  ;;  %v1547_v3 = vld [vmem:[#allocation5 + $0x2e28] sm:$0xff]  ;;  %v1570_v9 = vld [vmem:[#allocation5 + $0x2ee0] sm:$0xff] }
 0x101   :  { %9655 = vmatprep.subr.bf16.mxu0 %v13607_v16  ;;  %9867 = vmatprep.subr.bf16.mxu1 %v13609_v17  ;;  %v13753_v16 = vcombine.high %v1415_v11, %v1427_v13  ;;  %v1438_v17 = vld [vmem:[#allocation5 + $0x2ac0] sm:$0xff]  ;;  %v1559_v10 = vld [vmem:[#allocation5 + $0x2e88] sm:$0xff] }
 0x102   :  { %v13774_v33 = vcombine.low %v1438_v17, %v1450_v18 }
 0x103   :  { %9641 = vmatmul.mubr.bf16.gmra.mrb[4].mxu0 %v14661_v22  ;;  %9853 = vmatmul.mubr.bf16.gmra.mrb[4].mxu1 %v14661_v22 }
 0x104   :  { %9656 = vmatpush1.bf16.msra.mxu0 %v13606_v26  ;;  %9868 = vmatpush1.bf16.msra.mxu1 %v13608_v53  ;;  %v13752_v26 = vcombine.low %v1415_v11, %v1427_v13  ;;  %v13775_v53 = vcombine.high %v1438_v17, %v1450_v18  ;;  %v1571_v11 = vld [vmem:[#allocation5 + $0x2ee8] sm:$0xff]  ;;  %v1594_v17 = vld [vmem:[#allocation5 + $0x2fa0] sm:$0xff] }
 0x105   :  { %9657 = vmatprep.subr.bf16.mxu0 %v13631_v54  ;;  %9869 = vmatprep.subr.bf16.mxu1 %v13633_v27  ;;  %v13777_v54 = vcombine.high %v1439_v19, %v1451_v20  ;;  %v1462_v27 = vld [vmem:[#allocation5 + $0x2b80] sm:$0xff]  ;;  %v1583_v18 = vld [vmem:[#allocation5 + $0x2f48] sm:$0xff] }
 0x106   :  { %9683 = vmatprep.mubr.bf16.mxu0 %v14669_v30  ;;  %9895 = vmatprep.mubr.bf16.mxu1 %v14669_v30  ;;  %v13798_v46 = vcombine.low %v1462_v27, %v1474_v28 }
 0x108   :  { %9658 = vmatpush1.bf16.msra.mxu0 %v13630_v37  ;;  %9870 = vmatpush1.bf16.msra.mxu1 %v13632_v38  ;;  %v13776_v37 = vcombine.low %v1439_v19, %v1451_v20  ;;  %v13799_v38 = vcombine.high %v1462_v27, %v1474_v28  ;;  %v1595_v19 = vld [vmem:[#allocation5 + $0x2fa8] sm:$0xff]  ;;  %v84_v27 = vld [vmem:[#allocation5 + $0x70] sm:$0xff]  ;;  %v73_v28 = vld [vmem:[#allocation5 + $0x18] sm:$0xff] }
 0x109   :  { %9659 = vmatprep.subr.bf16.mxu0 %v13655_v39  ;;  %9871 = vmatprep.subr.bf16.mxu1 %v13657_v40  ;;  %v13801_v39 = vcombine.high %v1463_v29, %v1475_v32  ;;  %v1486_v40 = vld [vmem:[#allocation5 + $0x2c40] sm:$0xff] }
 0x10a   :  { %v13822_v52 = vcombine.low %v1486_v40, %v1498_v41 }
 0x10c   :  { %9660 = vmatpush1.bf16.msra.mxu0 %v13654_v35  ;;  %9872 = vmatpush1.bf16.msra.mxu1 %v13656_v36  ;;  %v13800_v35 = vcombine.low %v1463_v29, %v1475_v32  ;;  %v13823_v36 = vcombine.high %v1486_v40, %v1498_v41  ;;  %v85_v29 = vld [vmem:[#allocation5 + $0x78] sm:$0xff]  ;;  %v108_v40 = vld [vmem:[#allocation5 + $0x130] sm:$0xff] }
 0x10d   :  { %9661 = vmatprep.subr.bf16.mxu0 %v13679_v47  ;;  %9873 = vmatprep.subr.bf16.mxu1 %v13681_v48  ;;  %v13825_v47 = vcombine.high %v1487_v42, %v1499_v44  ;;  %v1510_v48 = vld [vmem:[#allocation5 + $0x2d00] sm:$0xff]  ;;  %v97_v41 = vld [vmem:[#allocation5 + $0xd8] sm:$0xff] }
 0x10e   :  { %v13846_v4 = vcombine.low %v1510_v48, %v1522_v49 }
 0x110   :  { %9662 = vmatpush1.bf16.msra.mxu0 %v13678_v55  ;;  %9874 = vmatpush1.bf16.msra.mxu1 %v13680_v60  ;;  %v13824_v55 = vcombine.low %v1487_v42, %v1499_v44  ;;  %v13847_v60 = vcombine.high %v1510_v48, %v1522_v49  ;;  %v14677_v42 = vcombine.low %v14663_v23, %v14665_v24  ;;  %v109_v44 = vld [vmem:[#allocation5 + $0x138] sm:$0xff] }
 0x111   :  { %9663 = vmatprep.subr.bf16.mxu0 %v13703_v61  ;;  %9875 = vmatprep.subr.bf16.mxu1 %v13705_v62  ;;  %v13849_v61 = vcombine.high %v1511_v50, %v1523_v51  ;;  %v1534_v62 = vld [vmem:[#allocation5 + $0x2dc0] sm:$0xff]  ;;  %v12437_v49 = vcombine.high %v97_v41, %v109_v44  ;;  %v133_v23 = vld [vmem:[#allocation5 + $0x1f8] sm:$0xff] }
 0x112   :  { %v13870_v13 = vcombine.low %v1534_v62, %v1546_v63 }
 0x114   :  { %9664 = vmatpush1.bf16.msra.mxu0 %v13702_v5  ;;  %9876 = vmatpush1.bf16.msra.mxu1 %v13704_v6  ;;  %v13848_v5 = vcombine.low %v1511_v50, %v1523_v51  ;;  %v13871_v6 = vcombine.high %v1534_v62, %v1546_v63  ;;  %v120_v51 = vld [vmem:[#allocation5 + $0x190] sm:$0xff] }
 0x115   :  { %9665 = vmatprep.subr.bf16.mxu0 %v13727_v7  ;;  %9877 = vmatprep.subr.bf16.mxu1 %v13729_v8  ;;  %v13873_v7 = vcombine.high %v1535_v0, %v1547_v3  ;;  %v1558_v8 = vld [vmem:[#allocation5 + $0x2e80] sm:$0xff]  ;;  %v144_v63 = vld [vmem:[#allocation5 + $0x250] sm:$0xff] }
 0x116   :  { %v13894_v20 = vcombine.low %v1558_v8, %v1570_v9 }
 0x118   :  { %9666 = vmatpush1.bf16.msra.mxu0 %v13726_v57  ;;  %9878 = vmatpush1.bf16.msra.mxu1 %v13728_v59  ;;  %v13872_v57 = vcombine.low %v1535_v0, %v1547_v3  ;;  %v13895_v59 = vcombine.high %v1558_v8, %v1570_v9  ;;  %v156_v0 = vld [vmem:[#allocation5 + $0x2b0] sm:$0xff] }
 0x119   :  { %9667 = vmatprep.subr.bf16.mxu0 %v13751_v14  ;;  %9879 = vmatprep.subr.bf16.mxu1 %v13753_v16  ;;  %v13897_v14 = vcombine.high %v1559_v10, %v1571_v11  ;;  %v1582_v16 = vld [vmem:[#allocation5 + $0x2f40] sm:$0xff]  ;;  %v12483_v8 = vcombine.high %v144_v63, %v156_v0 }
 0x11a   :  { %v13918_v32 = vcombine.low %v1582_v16, %v1594_v17 }
 0x11c   :  { %9668 = vmatpush1.bf16.msra.mxu0 %v13750_v21  ;;  %9880 = vmatpush1.bf16.msra.mxu1 %v13752_v26  ;;  %v13896_v21 = vcombine.low %v1559_v10, %v1571_v11  ;;  %v13919_v26 = vcombine.high %v1582_v16, %v1594_v17  ;;  %v168_v10 = vld [vmem:[#allocation5 + $0x310] sm:$0xff] }
 0x11d   :  { %9669 = vmatprep.subr.bf16.mxu0 %v13775_v53  ;;  %9881 = vmatprep.subr.bf16.mxu1 %v13777_v54  ;;  %v13921_v53 = vcombine.high %v1583_v18, %v1595_v19  ;;  %v72_v54 = vld [vmem:[#allocation5 + $0x10] sm:$0xff] }
 0x11e   :  { %v180_v11 = vld [vmem:[#allocation5 + $0x370] sm:$0xff] }
 0x11f   :  { %v12507_v16 = vcombine.high %v168_v10, %v180_v11 }
 0x120   :  { %9670 = vmatpush1.bf16.msra.mxu0 %v13774_v33  ;;  %9882 = vmatpush1.bf16.msra.mxu1 %v13776_v37  ;;  %v13920_v33 = vcombine.low %v1583_v18, %v1595_v19  ;;  %v12411_v37 = vcombine.high %v72_v54, %v84_v27  ;;  %v192_v18 = vld [vmem:[#allocation5 + $0x3d0] sm:$0xff] }
 0x121   :  { %9671 = vmatprep.subr.bf16.mxu0 %v13799_v38  ;;  %9883 = vmatprep.subr.bf16.mxu1 %v13801_v39  ;;  %v12413_v38 = vcombine.high %v73_v28, %v85_v29  ;;  %v96_v39 = vld [vmem:[#allocation5 + $0xd0] sm:$0xff] }
 0x122   :  { %v12435_v48 = vcombine.high %v96_v39, %v108_v40  ;;  %v12434_v24 = vcombine.low %v96_v39, %v108_v40  ;;  %v204_v19 = vld [vmem:[#allocation5 + $0x430] sm:$0xff] }
 0x124   :  { %9672 = vmatpush1.bf16.msra.mxu0 %v13798_v46  ;;  %9884 = vmatpush1.bf16.msra.mxu1 %v13800_v35  ;;  %v65_v46 = vld [vmem:[#allocation2 + $0x58] sm:$0xff] }
 0x125   :  { %9673 = vmatprep.subr.bf16.mxu0 %v13823_v36  ;;  %9885 = vmatprep.subr.bf16.mxu1 %v13825_v47  ;;  %v69_v35 = vld [vmem:[#allocation2 + $0x78] sm:$0xff]  ;;  %v12410_v36 = vcombine.low %v72_v54, %v84_v27  ;;  %v12412_v47 = vcombine.low %v73_v28, %v85_v29  ;;  %v12531_v54 = vcombine.high %v192_v18, %v204_v19  ;;  %v216_v28 = vld [vmem:[#allocation5 + $0x490] sm:$0xff] }
 0x126   :  { %v14679_v50 = vcombine.high %v65_v46, %v69_v35  ;;  %v14685_v3 = vcombine.low %v65_v46, %v69_v35  ;;  %v228_v29 = vld [vmem:[#allocation5 + $0x4f0] sm:$0xff]  ;;  %v241_v46 = vld [vmem:[#allocation5 + $0x558] sm:$0xff] }
 0x127   :  { %v12555_v39 = vcombine.high %v216_v28, %v228_v29  ;;  %v253_v35 = vld [vmem:[#allocation5 + $0x5b8] sm:$0xff] }
 0x128   :  { %9674 = vmatpush1.bf16.msra.mxu0 %v13822_v52  ;;  %9886 = vmatpush1.bf16.msra.mxu1 %v13824_v55  ;;  %v132_v52 = vld [vmem:[#allocation5 + $0x1f0] sm:$0xff]  ;;  %v121_v55 = vld [vmem:[#allocation5 + $0x198] sm:$0xff] }
 0x129   :  { %9675 = vmatprep.subr.bf16.mxu0 %v13847_v60  ;;  %9887 = vmatprep.subr.bf16.mxu1 %v13849_v61  ;;  %v12436_v60 = vcombine.low %v97_v41, %v109_v44  ;;  %v12459_v61 = vcombine.high %v120_v51, %v132_v52  ;;  %v12461_v62 = vcombine.high %v121_v55, %v133_v23  ;;  %v240_v41 = vld [vmem:[#allocation5 + $0x550] sm:$0xff] }
 0x12a   :  { %v252_v44 = vld [vmem:[#allocation5 + $0x5b0] sm:$0xff] }
 0x12c   :  { %9676 = vmatpush1.bf16.msra.mxu0 %v13846_v4  ;;  %9888 = vmatpush1.bf16.msra.mxu1 %v13848_v5  ;;  %v145_v4 = vld [vmem:[#allocation5 + $0x258] sm:$0xff] }
 0x12d   :  { %9677 = vmatprep.subr.bf16.mxu0 %v13871_v6  ;;  %9889 = vmatprep.subr.bf16.mxu1 %v13873_v7  ;;  %v157_v5 = vld [vmem:[#allocation5 + $0x2b8] sm:$0xff]  ;;  %v12458_v6 = vcombine.low %v120_v51, %v132_v52  ;;  %v12460_v7 = vcombine.low %v121_v55, %v133_v23  ;;  %v264_v51 = vld [vmem:[#allocation5 + $0x610] sm:$0xff] }
 0x12e   :  { %v12485_v9 = vcombine.high %v145_v4, %v157_v5  ;;  %v276_v52 = vld [vmem:[#allocation5 + $0x670] sm:$0xff]  ;;  %v265_v55 = vld [vmem:[#allocation5 + $0x618] sm:$0xff] }
 0x12f   :  { %v277_v23 = vld [vmem:[#allocation5 + $0x678] sm:$0xff] }
 0x130   :  { %9678 = vmatpush1.bf16.msra.mxu0 %v13870_v13  ;;  %9890 = vmatpush1.bf16.msra.mxu1 %v13872_v57  ;;  %v169_v13 = vld [vmem:[#allocation5 + $0x318] sm:$0xff] }
 0x131   :  { %9679 = vmatprep.subr.bf16.mxu0 %v13895_v59  ;;  %9891 = vmatprep.subr.bf16.mxu1 %v13897_v14  ;;  %v181_v57 = vld [vmem:[#allocation5 + $0x378] sm:$0xff]  ;;  %v12482_v59 = vcombine.low %v144_v63, %v156_v0  ;;  %v12484_v14 = vcombine.low %v145_v4, %v157_v5  ;;  %v288_v63 = vld [vmem:[#allocation5 + $0x6d0] sm:$0xff] }
 0x132   :  { %v12509_v17 = vcombine.high %v169_v13, %v181_v57  ;;  %v300_v0 = vld [vmem:[#allocation5 + $0x730] sm:$0xff]  ;;  %v289_v4 = vld [vmem:[#allocation5 + $0x6d8] sm:$0xff] }
 0x133   :  { %v301_v5 = vld [vmem:[#allocation5 + $0x738] sm:$0xff] }
 0x134   :  { %9680 = vmatpush1.bf16.msra.mxu0 %v13894_v20  ;;  %9892 = vmatpush1.bf16.msra.mxu1 %v13896_v21  ;;  %v193_v20 = vld [vmem:[#allocation5 + $0x3d8] sm:$0xff] }
 0x135   :  { %9681 = vmatprep.subr.bf16.mxu0 %v13919_v26  ;;  %9893 = vmatprep.subr.bf16.mxu1 %v13921_v53  ;;  %v205_v21 = vld [vmem:[#allocation5 + $0x438] sm:$0xff]  ;;  %v12506_v26 = vcombine.low %v168_v10, %v180_v11  ;;  %v12508_v53 = vcombine.low %v169_v13, %v181_v57  ;;  %v312_v10 = vld [vmem:[#allocation5 + $0x790] sm:$0xff] }
 0x136   :  { %v12533_v27 = vcombine.high %v193_v20, %v205_v21  ;;  %v324_v11 = vld [vmem:[#allocation5 + $0x7f0] sm:$0xff]  ;;  %v313_v13 = vld [vmem:[#allocation5 + $0x798] sm:$0xff] }
 0x137   :  { %v325_v57 = vld [vmem:[#allocation5 + $0x7f8] sm:$0xff] }
 0x138   :  { %9682 = vmatpush1.bf16.msra.mxu0 %v13918_v32  ;;  %9894 = vmatpush1.bf16.msra.mxu1 %v13920_v33  ;;  %v217_v32 = vld [vmem:[#allocation5 + $0x498] sm:$0xff] }
 0x139   :  { %9916 = vmatprep.subr.bf16.mxu0 %v12411_v37  ;;  %10128 = vmatprep.subr.bf16.mxu1 %v12413_v38  ;;  %v229_v33 = vld [vmem:[#allocation5 + $0x4f8] sm:$0xff]  ;;  %v12530_v37 = vcombine.low %v192_v18, %v204_v19  ;;  %v12532_v38 = vcombine.low %v193_v20, %v205_v21  ;;  %v336_v18 = vld [vmem:[#allocation5 + $0x850] sm:$0xff] }
 0x13a   :  { %v12557_v40 = vcombine.high %v217_v32, %v229_v33  ;;  %v348_v19 = vld [vmem:[#allocation5 + $0x8b0] sm:$0xff]  ;;  %v337_v20 = vld [vmem:[#allocation5 + $0x858] sm:$0xff] }
 0x13b   :  { %9684 = vmatmul.mubr.bf16.vlgmr.msra.gmra.mrb[0].mxu0 %v14677_v42  ;;  %9896 = vmatmul.mubr.bf16.vlgmr.msra.gmra.mrb[0].mxu1 %v14677_v42  ;;  %v349_v21 = vld [vmem:[#allocation5 + $0x8b8] sm:$0xff] }
 0x13c   :  { %9917 = vmatpush1.bf16.msra.mxu0 %v12410_v36  ;;  %10129 = vmatpush1.bf16.msra.mxu1 %v12412_v47  ;;  %v12554_v36 = vcombine.low %v216_v28, %v228_v29  ;;  %v12556_v47 = vcombine.low %v217_v32, %v229_v33  ;;  %v360_v28 = vld [vmem:[#allocation5 + $0x910] sm:$0xff]  ;;  %v361_v32 = vld [vmem:[#allocation5 + $0x918] sm:$0xff] }
 0x13d   :  { %9918 = vmatprep.subr.bf16.mxu0 %v12435_v48  ;;  %10130 = vmatprep.subr.bf16.mxu1 %v12437_v49  ;;  %v12579_v48 = vcombine.high %v240_v41, %v252_v44  ;;  %v12581_v49 = vcombine.high %v241_v46, %v253_v35  ;;  %v372_v29 = vld [vmem:[#allocation5 + $0x970] sm:$0xff]  ;;  %v373_v33 = vld [vmem:[#allocation5 + $0x978] sm:$0xff] }
 0x13e   :  { %9693 = vmatprep.mubr.bf16.mxu0 %v14679_v50  ;;  %9905 = vmatprep.mubr.bf16.mxu1 %v14679_v50 }
 0x140   :  { %9919 = vmatpush1.bf16.msra.mxu0 %v12434_v24  ;;  %10131 = vmatpush1.bf16.msra.mxu1 %v12436_v60  ;;  %v12578_v24 = vcombine.low %v240_v41, %v252_v44  ;;  %v12580_v60 = vcombine.low %v241_v46, %v253_v35  ;;  %v384_v41 = vld [vmem:[#allocation5 + $0x9d0] sm:$0xff]  ;;  %v385_v46 = vld [vmem:[#allocation5 + $0x9d8] sm:$0xff] }
 0x141   :  { %9920 = vmatprep.subr.bf16.mxu0 %v12459_v61  ;;  %10132 = vmatprep.subr.bf16.mxu1 %v12461_v62  ;;  %v12603_v61 = vcombine.high %v264_v51, %v276_v52  ;;  %v12605_v62 = vcombine.high %v265_v55, %v277_v23  ;;  %v396_v44 = vld [vmem:[#allocation5 + $0xa30] sm:$0xff]  ;;  %v397_v35 = vld [vmem:[#allocation5 + $0xa38] sm:$0xff] }
 0x143   :  { %9694 = vmatmul.mubr.bf16.gmra.mrb[4].mxu0 %v14685_v3  ;;  %9906 = vmatmul.mubr.bf16.gmra.mrb[4].mxu1 %v14685_v3 }
 0x144   :  { %9921 = vmatpush1.bf16.msra.mxu0 %v12458_v6  ;;  %10133 = vmatpush1.bf16.msra.mxu1 %v12460_v7  ;;  %v12602_v6 = vcombine.low %v264_v51, %v276_v52  ;;  %v12604_v7 = vcombine.low %v265_v55, %v277_v23  ;;  %v408_v51 = vld [vmem:[#allocation5 + $0xa90] sm:$0xff]  ;;  %v409_v55 = vld [vmem:[#allocation5 + $0xa98] sm:$0xff] }
 0x145   :  { %9922 = vmatprep.subr.bf16.mxu0 %v12483_v8  ;;  %10134 = vmatprep.subr.bf16.mxu1 %v12485_v9  ;;  %v12627_v8 = vcombine.high %v288_v63, %v300_v0  ;;  %v12629_v9 = vcombine.high %v289_v4, %v301_v5  ;;  %v420_v52 = vld [vmem:[#allocation5 + $0xaf0] sm:$0xff]  ;;  %v421_v23 = vld [vmem:[#allocation5 + $0xaf8] sm:$0xff] }
 0x146   :  { %9948 = vmatprep.mubr.bf16.mxu0 %v14599_v58  ;;  %10160 = vmatprep.mubr.bf16.mxu1 %v14599_v58 }
 0x148   :  { %9923 = vmatpush1.bf16.msra.mxu0 %v12482_v59  ;;  %10135 = vmatpush1.bf16.msra.mxu1 %v12484_v14  ;;  %v12626_v59 = vcombine.low %v288_v63, %v300_v0  ;;  %v12628_v14 = vcombine.low %v289_v4, %v301_v5  ;;  %v432_v63 = vld [vmem:[#allocation5 + $0xb50] sm:$0xff]  ;;  %v433_v4 = vld [vmem:[#allocation5 + $0xb58] sm:$0xff] }
 0x149   :  { %9924 = vmatprep.subr.bf16.mxu0 %v12507_v16  ;;  %10136 = vmatprep.subr.bf16.mxu1 %v12509_v17  ;;  %v12651_v16 = vcombine.high %v312_v10, %v324_v11  ;;  %v12653_v17 = vcombine.high %v313_v13, %v325_v57  ;;  %v444_v0 = vld [vmem:[#allocation5 + $0xbb0] sm:$0xff]  ;;  %v445_v5 = vld [vmem:[#allocation5 + $0xbb8] sm:$0xff] }
 0x14c   :  { %9925 = vmatpush1.bf16.msra.mxu0 %v12506_v26  ;;  %10137 = vmatpush1.bf16.msra.mxu1 %v12508_v53  ;;  %v12650_v26 = vcombine.low %v312_v10, %v324_v11  ;;  %v12652_v53 = vcombine.low %v313_v13, %v325_v57  ;;  %v456_v10 = vld [vmem:[#allocation5 + $0xc10] sm:$0xff]  ;;  %v457_v13 = vld [vmem:[#allocation5 + $0xc18] sm:$0xff] }
 0x14d   :  { %9926 = vmatprep.subr.bf16.mxu0 %v12531_v54  ;;  %10138 = vmatprep.subr.bf16.mxu1 %v12533_v27  ;;  %v12675_v54 = vcombine.high %v336_v18, %v348_v19  ;;  %v12677_v27 = vcombine.high %v337_v20, %v349_v21  ;;  %v468_v11 = vld [vmem:[#allocation5 + $0xc70] sm:$0xff]  ;;  %v469_v57 = vld [vmem:[#allocation5 + $0xc78] sm:$0xff] }
 0x150   :  { %9927 = vmatpush1.bf16.msra.mxu0 %v12530_v37  ;;  %10139 = vmatpush1.bf16.msra.mxu1 %v12532_v38  ;;  %v12674_v37 = vcombine.low %v336_v18, %v348_v19  ;;  %v12676_v38 = vcombine.low %v337_v20, %v349_v21  ;;  %v480_v18 = vld [vmem:[#allocation5 + $0xcd0] sm:$0xff]  ;;  %v481_v20 = vld [vmem:[#allocation5 + $0xcd8] sm:$0xff] }
 0x151   :  { %9928 = vmatprep.subr.bf16.mxu0 %v12555_v39  ;;  %10140 = vmatprep.subr.bf16.mxu1 %v12557_v40  ;;  %v12699_v39 = vcombine.high %v360_v28, %v372_v29  ;;  %v12701_v40 = vcombine.high %v361_v32, %v373_v33  ;;  %v492_v19 = vld [vmem:[#allocation5 + $0xd30] sm:$0xff]  ;;  %v493_v21 = vld [vmem:[#allocation5 + $0xd38] sm:$0xff] }
 0x154   :  { %9929 = vmatpush1.bf16.msra.mxu0 %v12554_v36  ;;  %10141 = vmatpush1.bf16.msra.mxu1 %v12556_v47  ;;  %v12698_v36 = vcombine.low %v360_v28, %v372_v29  ;;  %v12700_v47 = vcombine.low %v361_v32, %v373_v33  ;;  %v504_v28 = vld [vmem:[#allocation5 + $0xd90] sm:$0xff]  ;;  %v505_v32 = vld [vmem:[#allocation5 + $0xd98] sm:$0xff] }
 0x155   :  { %9930 = vmatprep.subr.bf16.mxu0 %v12579_v48  ;;  %10142 = vmatprep.subr.bf16.mxu1 %v12581_v49  ;;  %v12723_v48 = vcombine.high %v384_v41, %v396_v44  ;;  %v12725_v49 = vcombine.high %v385_v46, %v397_v35  ;;  %v516_v29 = vld [vmem:[#allocation5 + $0xdf0] sm:$0xff]  ;;  %v517_v33 = vld [vmem:[#allocation5 + $0xdf8] sm:$0xff] }
 0x158   :  { %9931 = vmatpush1.bf16.msra.mxu0 %v12578_v24  ;;  %10143 = vmatpush1.bf16.msra.mxu1 %v12580_v60  ;;  %v12722_v24 = vcombine.low %v384_v41, %v396_v44  ;;  %v12724_v60 = vcombine.low %v385_v46, %v397_v35  ;;  %v528_v41 = vld [vmem:[#allocation5 + $0xe50] sm:$0xff]  ;;  %v529_v46 = vld [vmem:[#allocation5 + $0xe58] sm:$0xff] }
 0x159   :  { %9932 = vmatprep.subr.bf16.mxu0 %v12603_v61  ;;  %10144 = vmatprep.subr.bf16.mxu1 %v12605_v62  ;;  %v12747_v61 = vcombine.high %v408_v51, %v420_v52  ;;  %v12749_v62 = vcombine.high %v409_v55, %v421_v23  ;;  %v540_v44 = vld [vmem:[#allocation5 + $0xeb0] sm:$0xff]  ;;  %v541_v35 = vld [vmem:[#allocation5 + $0xeb8] sm:$0xff] }
 0x15c   :  { %9933 = vmatpush1.bf16.msra.mxu0 %v12602_v6  ;;  %10145 = vmatpush1.bf16.msra.mxu1 %v12604_v7  ;;  %v12746_v6 = vcombine.low %v408_v51, %v420_v52  ;;  %v12748_v7 = vcombine.low %v409_v55, %v421_v23  ;;  %v552_v51 = vld [vmem:[#allocation5 + $0xf10] sm:$0xff]  ;;  %v553_v55 = vld [vmem:[#allocation5 + $0xf18] sm:$0xff] }
 0x15d   :  { %9934 = vmatprep.subr.bf16.mxu0 %v12627_v8  ;;  %10146 = vmatprep.subr.bf16.mxu1 %v12629_v9  ;;  %v12771_v8 = vcombine.high %v432_v63, %v444_v0  ;;  %v12773_v9 = vcombine.high %v433_v4, %v445_v5  ;;  %v564_v52 = vld [vmem:[#allocation5 + $0xf70] sm:$0xff]  ;;  %v565_v23 = vld [vmem:[#allocation5 + $0xf78] sm:$0xff] }
 0x160   :  { %9935 = vmatpush1.bf16.msra.mxu0 %v12626_v59  ;;  %10147 = vmatpush1.bf16.msra.mxu1 %v12628_v14  ;;  %v12770_v59 = vcombine.low %v432_v63, %v444_v0  ;;  %v12772_v14 = vcombine.low %v433_v4, %v445_v5  ;;  %v576_v63 = vld [vmem:[#allocation5 + $0xfd0] sm:$0xff]  ;;  %v577_v4 = vld [vmem:[#allocation5 + $0xfd8] sm:$0xff] }
 0x161   :  { %9936 = vmatprep.subr.bf16.mxu0 %v12651_v16  ;;  %10148 = vmatprep.subr.bf16.mxu1 %v12653_v17  ;;  %v12795_v16 = vcombine.high %v456_v10, %v468_v11  ;;  %v12797_v17 = vcombine.high %v457_v13, %v469_v57  ;;  %v588_v0 = vld [vmem:[#allocation5 + $0x1030] sm:$0xff]  ;;  %v589_v5 = vld [vmem:[#allocation5 + $0x1038] sm:$0xff] }
 0x164   :  { %9937 = vmatpush1.bf16.msra.mxu0 %v12650_v26  ;;  %10149 = vmatpush1.bf16.msra.mxu1 %v12652_v53  ;;  %v12794_v26 = vcombine.low %v456_v10, %v468_v11  ;;  %v12796_v53 = vcombine.low %v457_v13, %v469_v57  ;;  %v600_v10 = vld [vmem:[#allocation5 + $0x1090] sm:$0xff]  ;;  %v601_v13 = vld [vmem:[#allocation5 + $0x1098] sm:$0xff] }
 0x165   :  { %9938 = vmatprep.subr.bf16.mxu0 %v12675_v54  ;;  %10150 = vmatprep.subr.bf16.mxu1 %v12677_v27  ;;  %v12819_v54 = vcombine.high %v480_v18, %v492_v19  ;;  %v12821_v27 = vcombine.high %v481_v20, %v493_v21  ;;  %v612_v11 = vld [vmem:[#allocation5 + $0x10f0] sm:$0xff]  ;;  %v613_v57 = vld [vmem:[#allocation5 + $0x10f8] sm:$0xff] }
 0x168   :  { %9939 = vmatpush1.bf16.msra.mxu0 %v12674_v37  ;;  %10151 = vmatpush1.bf16.msra.mxu1 %v12676_v38  ;;  %v12818_v37 = vcombine.low %v480_v18, %v492_v19  ;;  %v12820_v38 = vcombine.low %v481_v20, %v493_v21  ;;  %v624_v18 = vld [vmem:[#allocation5 + $0x1150] sm:$0xff]  ;;  %v625_v20 = vld [vmem:[#allocation5 + $0x1158] sm:$0xff] }
 0x169   :  { %9940 = vmatprep.subr.bf16.mxu0 %v12699_v39  ;;  %10152 = vmatprep.subr.bf16.mxu1 %v12701_v40  ;;  %v12843_v39 = vcombine.high %v504_v28, %v516_v29  ;;  %v12845_v40 = vcombine.high %v505_v32, %v517_v33  ;;  %v636_v19 = vld [vmem:[#allocation5 + $0x11b0] sm:$0xff]  ;;  %v637_v21 = vld [vmem:[#allocation5 + $0x11b8] sm:$0xff] }
 0x16c   :  { %9941 = vmatpush1.bf16.msra.mxu0 %v12698_v36  ;;  %10153 = vmatpush1.bf16.msra.mxu1 %v12700_v47  ;;  %v12842_v36 = vcombine.low %v504_v28, %v516_v29  ;;  %v12844_v47 = vcombine.low %v505_v32, %v517_v33  ;;  %v648_v28 = vld [vmem:[#allocation5 + $0x1210] sm:$0xff]  ;;  %v649_v32 = vld [vmem:[#allocation5 + $0x1218] sm:$0xff] }
 0x16d   :  { %9942 = vmatprep.subr.bf16.mxu0 %v12723_v48  ;;  %10154 = vmatprep.subr.bf16.mxu1 %v12725_v49  ;;  %v12867_v48 = vcombine.high %v528_v41, %v540_v44  ;;  %v12869_v49 = vcombine.high %v529_v46, %v541_v35  ;;  %v660_v29 = vld [vmem:[#allocation5 + $0x1270] sm:$0xff]  ;;  %v661_v33 = vld [vmem:[#allocation5 + $0x1278] sm:$0xff] }
 0x170   :  { %9943 = vmatpush1.bf16.msra.mxu0 %v12722_v24  ;;  %10155 = vmatpush1.bf16.msra.mxu1 %v12724_v60  ;;  %v12866_v24 = vcombine.low %v528_v41, %v540_v44  ;;  %v12868_v60 = vcombine.low %v529_v46, %v541_v35  ;;  %v672_v41 = vld [vmem:[#allocation5 + $0x12d0] sm:$0xff]  ;;  %v673_v46 = vld [vmem:[#allocation5 + $0x12d8] sm:$0xff] }
 0x171   :  { %9944 = vmatprep.subr.bf16.mxu0 %v12747_v61  ;;  %10156 = vmatprep.subr.bf16.mxu1 %v12749_v62  ;;  %v12891_v61 = vcombine.high %v552_v51, %v564_v52  ;;  %v12893_v62 = vcombine.high %v553_v55, %v565_v23  ;;  %v684_v44 = vld [vmem:[#allocation5 + $0x1330] sm:$0xff]  ;;  %v685_v35 = vld [vmem:[#allocation5 + $0x1338] sm:$0xff] }
 0x174   :  { %9945 = vmatpush1.bf16.msra.mxu0 %v12746_v6  ;;  %10157 = vmatpush1.bf16.msra.mxu1 %v12748_v7  ;;  %v12890_v6 = vcombine.low %v552_v51, %v564_v52  ;;  %v12892_v7 = vcombine.low %v553_v55, %v565_v23  ;;  %v696_v51 = vld [vmem:[#allocation5 + $0x1390] sm:$0xff]  ;;  %v697_v55 = vld [vmem:[#allocation5 + $0x1398] sm:$0xff] }
 0x175   :  { %9946 = vmatprep.subr.bf16.mxu0 %v12771_v8  ;;  %10158 = vmatprep.subr.bf16.mxu1 %v12773_v9  ;;  %v12915_v8 = vcombine.high %v576_v63, %v588_v0  ;;  %v12917_v9 = vcombine.high %v577_v4, %v589_v5  ;;  %v708_v52 = vld [vmem:[#allocation5 + $0x13f0] sm:$0xff]  ;;  %v709_v23 = vld [vmem:[#allocation5 + $0x13f8] sm:$0xff] }
 0x178   :  { %9947 = vmatpush1.bf16.msra.mxu0 %v12770_v59  ;;  %10159 = vmatpush1.bf16.msra.mxu1 %v12772_v14  ;;  %v12914_v59 = vcombine.low %v576_v63, %v588_v0  ;;  %v12916_v14 = vcombine.low %v577_v4, %v589_v5  ;;  %v720_v63 = vld [vmem:[#allocation5 + $0x1450] sm:$0xff]  ;;  %v721_v4 = vld [vmem:[#allocation5 + $0x1458] sm:$0xff] }
 0x179   :  { %9969 = vmatprep.subr.bf16.mxu0 %v12795_v16  ;;  %10181 = vmatprep.subr.bf16.mxu1 %v12797_v17  ;;  %v12939_v16 = vcombine.high %v600_v10, %v612_v11  ;;  %v12941_v17 = vcombine.high %v601_v13, %v613_v57  ;;  %v732_v0 = vld [vmem:[#allocation5 + $0x14b0] sm:$0xff]  ;;  %v733_v5 = vld [vmem:[#allocation5 + $0x14b8] sm:$0xff] }
 0x17b   :  { %9949 = vmatmul.mubr.bf16.vlgmr.msra.gmra.mrb[8].mxu0 %v14605_v15  ;;  %10161 = vmatmul.mubr.bf16.vlgmr.msra.gmra.mrb[8].mxu1 %v14605_v15 }
 0x17c   :  { %9970 = vmatpush1.bf16.msra.mxu0 %v12794_v26  ;;  %10182 = vmatpush1.bf16.msra.mxu1 %v12796_v53  ;;  %v12938_v26 = vcombine.low %v600_v10, %v612_v11  ;;  %v12940_v53 = vcombine.low %v601_v13, %v613_v57  ;;  %v744_v10 = vld [vmem:[#allocation5 + $0x1510] sm:$0xff]  ;;  %v745_v13 = vld [vmem:[#allocation5 + $0x1518] sm:$0xff] }
 0x17d   :  { %9971 = vmatprep.subr.bf16.mxu0 %v12819_v54  ;;  %10183 = vmatprep.subr.bf16.mxu1 %v12821_v27  ;;  %v12963_v54 = vcombine.high %v624_v18, %v636_v19  ;;  %v12965_v27 = vcombine.high %v625_v20, %v637_v21  ;;  %v756_v11 = vld [vmem:[#allocation5 + $0x1570] sm:$0xff]  ;;  %v757_v57 = vld [vmem:[#allocation5 + $0x1578] sm:$0xff] }
 0x17e   :  { %9958 = vmatprep.mubr.bf16.mxu0 %v14607_v25  ;;  %10170 = vmatprep.mubr.bf16.mxu1 %v14607_v25 }
 0x180   :  { %9972 = vmatpush1.bf16.msra.mxu0 %v12818_v37  ;;  %10184 = vmatpush1.bf16.msra.mxu1 %v12820_v38  ;;  %v12962_v37 = vcombine.low %v624_v18, %v636_v19  ;;  %v12964_v38 = vcombine.low %v625_v20, %v637_v21  ;;  %v768_v18 = vld [vmem:[#allocation5 + $0x15d0] sm:$0xff]  ;;  %v769_v20 = vld [vmem:[#allocation5 + $0x15d8] sm:$0xff] }
 0x181   :  { %9973 = vmatprep.subr.bf16.mxu0 %v12843_v39  ;;  %10185 = vmatprep.subr.bf16.mxu1 %v12845_v40  ;;  %v12987_v39 = vcombine.high %v648_v28, %v660_v29  ;;  %v12989_v40 = vcombine.high %v649_v32, %v661_v33  ;;  %v780_v19 = vld [vmem:[#allocation5 + $0x1630] sm:$0xff]  ;;  %v781_v21 = vld [vmem:[#allocation5 + $0x1638] sm:$0xff] }
 0x183   :  { %9959 = vmatmul.mubr.bf16.gmra.mrb[12].mxu0 %v14613_v34  ;;  %10171 = vmatmul.mubr.bf16.gmra.mrb[12].mxu1 %v14613_v34 }
 0x184   :  { %9974 = vmatpush1.bf16.msra.mxu0 %v12842_v36  ;;  %10186 = vmatpush1.bf16.msra.mxu1 %v12844_v47  ;;  %v12986_v36 = vcombine.low %v648_v28, %v660_v29  ;;  %v12988_v47 = vcombine.low %v649_v32, %v661_v33  ;;  %v792_v28 = vld [vmem:[#allocation5 + $0x1690] sm:$0xff]  ;;  %v793_v32 = vld [vmem:[#allocation5 + $0x1698] sm:$0xff] }
 0x185   :  { %9975 = vmatprep.subr.bf16.mxu0 %v12867_v48  ;;  %10187 = vmatprep.subr.bf16.mxu1 %v12869_v49  ;;  %v13011_v48 = vcombine.high %v672_v41, %v684_v44  ;;  %v13013_v49 = vcombine.high %v673_v46, %v685_v35  ;;  %v804_v29 = vld [vmem:[#allocation5 + $0x16f0] sm:$0xff]  ;;  %v805_v33 = vld [vmem:[#allocation5 + $0x16f8] sm:$0xff] }
 0x186   :  { %10001 = vmatprep.mubr.bf16.mxu0 %v14621_v43  ;;  %10213 = vmatprep.mubr.bf16.mxu1 %v14621_v43 }
 0x188   :  { %9976 = vmatpush1.bf16.msra.mxu0 %v12866_v24  ;;  %10188 = vmatpush1.bf16.msra.mxu1 %v12868_v60  ;;  %v13010_v24 = vcombine.low %v672_v41, %v684_v44  ;;  %v13012_v60 = vcombine.low %v673_v46, %v685_v35  ;;  %v816_v41 = vld [vmem:[#allocation5 + $0x1750] sm:$0xff]  ;;  %v817_v46 = vld [vmem:[#allocation5 + $0x1758] sm:$0xff] }
 0x189   :  { %9977 = vmatprep.subr.bf16.mxu0 %v12891_v61  ;;  %10189 = vmatprep.subr.bf16.mxu1 %v12893_v62  ;;  %v13035_v61 = vcombine.high %v696_v51, %v708_v52  ;;  %v13037_v62 = vcombine.high %v697_v55, %v709_v23  ;;  %v828_v44 = vld [vmem:[#allocation5 + $0x17b0] sm:$0xff]  ;;  %v829_v35 = vld [vmem:[#allocation5 + $0x17b8] sm:$0xff] }
 0x18c   :  { %9978 = vmatpush1.bf16.msra.mxu0 %v12890_v6  ;;  %10190 = vmatpush1.bf16.msra.mxu1 %v12892_v7  ;;  %v13034_v6 = vcombine.low %v696_v51, %v708_v52  ;;  %v13036_v7 = vcombine.low %v697_v55, %v709_v23  ;;  %v840_v51 = vld [vmem:[#allocation5 + $0x1810] sm:$0xff]  ;;  %v841_v55 = vld [vmem:[#allocation5 + $0x1818] sm:$0xff] }
 0x18d   :  { %9979 = vmatprep.subr.bf16.mxu0 %v12915_v8  ;;  %10191 = vmatprep.subr.bf16.mxu1 %v12917_v9  ;;  %v13059_v8 = vcombine.high %v720_v63, %v732_v0  ;;  %v13061_v9 = vcombine.high %v721_v4, %v733_v5  ;;  %v852_v52 = vld [vmem:[#allocation5 + $0x1870] sm:$0xff]  ;;  %v853_v23 = vld [vmem:[#allocation5 + $0x1878] sm:$0xff] }
 0x190   :  { %9980 = vmatpush1.bf16.msra.mxu0 %v12914_v59  ;;  %10192 = vmatpush1.bf16.msra.mxu1 %v12916_v14  ;;  %v13058_v59 = vcombine.low %v720_v63, %v732_v0  ;;  %v13060_v14 = vcombine.low %v721_v4, %v733_v5  ;;  %v864_v63 = vld [vmem:[#allocation5 + $0x18d0] sm:$0xff]  ;;  %v865_v4 = vld [vmem:[#allocation5 + $0x18d8] sm:$0xff] }
 0x191   :  { %9981 = vmatprep.subr.bf16.mxu0 %v12939_v16  ;;  %10193 = vmatprep.subr.bf16.mxu1 %v12941_v17  ;;  %v13083_v16 = vcombine.high %v744_v10, %v756_v11  ;;  %v13085_v17 = vcombine.high %v745_v13, %v757_v57  ;;  %v876_v0 = vld [vmem:[#allocation5 + $0x1930] sm:$0xff]  ;;  %v877_v5 = vld [vmem:[#allocation5 + $0x1938] sm:$0xff] }
 0x194   :  { %9982 = vmatpush1.bf16.msra.mxu0 %v12938_v26  ;;  %10194 = vmatpush1.bf16.msra.mxu1 %v12940_v53  ;;  %v13082_v26 = vcombine.low %v744_v10, %v756_v11  ;;  %v13084_v53 = vcombine.low %v745_v13, %v757_v57  ;;  %v888_v10 = vld [vmem:[#allocation5 + $0x1990] sm:$0xff]  ;;  %v889_v13 = vld [vmem:[#allocation5 + $0x1998] sm:$0xff] }
 0x195   :  { %9983 = vmatprep.subr.bf16.mxu0 %v12963_v54  ;;  %10195 = vmatprep.subr.bf16.mxu1 %v12965_v27  ;;  %v13107_v54 = vcombine.high %v768_v18, %v780_v19  ;;  %v13109_v27 = vcombine.high %v769_v20, %v781_v21  ;;  %v900_v11 = vld [vmem:[#allocation5 + $0x19f0] sm:$0xff]  ;;  %v901_v57 = vld [vmem:[#allocation5 + $0x19f8] sm:$0xff] }
 0x198   :  { %9984 = vmatpush1.bf16.msra.mxu0 %v12962_v37  ;;  %10196 = vmatpush1.bf16.msra.mxu1 %v12964_v38  ;;  %v13106_v37 = vcombine.low %v768_v18, %v780_v19  ;;  %v13108_v38 = vcombine.low %v769_v20, %v781_v21  ;;  %v912_v18 = vld [vmem:[#allocation5 + $0x1a50] sm:$0xff]  ;;  %v913_v20 = vld [vmem:[#allocation5 + $0x1a58] sm:$0xff] }
 0x199   :  { %9985 = vmatprep.subr.bf16.mxu0 %v12987_v39  ;;  %10197 = vmatprep.subr.bf16.mxu1 %v12989_v40  ;;  %v13131_v39 = vcombine.high %v792_v28, %v804_v29  ;;  %v13133_v40 = vcombine.high %v793_v32, %v805_v33  ;;  %v924_v19 = vld [vmem:[#allocation5 + $0x1ab0] sm:$0xff]  ;;  %v925_v21 = vld [vmem:[#allocation5 + $0x1ab8] sm:$0xff] }
 0x19c   :  { %9986 = vmatpush1.bf16.msra.mxu0 %v12986_v36  ;;  %10198 = vmatpush1.bf16.msra.mxu1 %v12988_v47  ;;  %v13130_v36 = vcombine.low %v792_v28, %v804_v29  ;;  %v13132_v47 = vcombine.low %v793_v32, %v805_v33  ;;  %v936_v28 = vld [vmem:[#allocation5 + $0x1b10] sm:$0xff]  ;;  %v937_v32 = vld [vmem:[#allocation5 + $0x1b18] sm:$0xff] }
 0x19d   :  { %9987 = vmatprep.subr.bf16.mxu0 %v13011_v48  ;;  %10199 = vmatprep.subr.bf16.mxu1 %v13013_v49  ;;  %v13155_v48 = vcombine.high %v816_v41, %v828_v44  ;;  %v13157_v49 = vcombine.high %v817_v46, %v829_v35  ;;  %v948_v29 = vld [vmem:[#allocation5 + $0x1b70] sm:$0xff]  ;;  %v949_v33 = vld [vmem:[#allocation5 + $0x1b78] sm:$0xff] }
 0x1a0   :  { %9988 = vmatpush1.bf16.msra.mxu0 %v13010_v24  ;;  %10200 = vmatpush1.bf16.msra.mxu1 %v13012_v60  ;;  %v13154_v24 = vcombine.low %v816_v41, %v828_v44  ;;  %v13156_v60 = vcombine.low %v817_v46, %v829_v35  ;;  %v960_v41 = vld [vmem:[#allocation5 + $0x1bd0] sm:$0xff]  ;;  %v961_v46 = vld [vmem:[#allocation5 + $0x1bd8] sm:$0xff] }
 0x1a1   :  { %9989 = vmatprep.subr.bf16.mxu0 %v13035_v61  ;;  %10201 = vmatprep.subr.bf16.mxu1 %v13037_v62  ;;  %v13179_v61 = vcombine.high %v840_v51, %v852_v52  ;;  %v13181_v62 = vcombine.high %v841_v55, %v853_v23  ;;  %v972_v44 = vld [vmem:[#allocation5 + $0x1c30] sm:$0xff]  ;;  %v973_v35 = vld [vmem:[#allocation5 + $0x1c38] sm:$0xff] }
 0x1a4   :  { %9990 = vmatpush1.bf16.msra.mxu0 %v13034_v6  ;;  %10202 = vmatpush1.bf16.msra.mxu1 %v13036_v7  ;;  %v13178_v6 = vcombine.low %v840_v51, %v852_v52  ;;  %v13180_v7 = vcombine.low %v841_v55, %v853_v23  ;;  %v984_v51 = vld [vmem:[#allocation5 + $0x1c90] sm:$0xff]  ;;  %v985_v55 = vld [vmem:[#allocation5 + $0x1c98] sm:$0xff] }
 0x1a5   :  { %9991 = vmatprep.subr.bf16.mxu0 %v13059_v8  ;;  %10203 = vmatprep.subr.bf16.mxu1 %v13061_v9  ;;  %v13203_v8 = vcombine.high %v864_v63, %v876_v0  ;;  %v13205_v9 = vcombine.high %v865_v4, %v877_v5  ;;  %v996_v52 = vld [vmem:[#allocation5 + $0x1cf0] sm:$0xff]  ;;  %v997_v23 = vld [vmem:[#allocation5 + $0x1cf8] sm:$0xff] }
 0x1a8   :  { %9992 = vmatpush1.bf16.msra.mxu0 %v13058_v59  ;;  %10204 = vmatpush1.bf16.msra.mxu1 %v13060_v14  ;;  %v13202_v59 = vcombine.low %v864_v63, %v876_v0  ;;  %v13204_v14 = vcombine.low %v865_v4, %v877_v5  ;;  %v1008_v63 = vld [vmem:[#allocation5 + $0x1d50] sm:$0xff]  ;;  %v1009_v4 = vld [vmem:[#allocation5 + $0x1d58] sm:$0xff] }
 0x1a9   :  { %9993 = vmatprep.subr.bf16.mxu0 %v13083_v16  ;;  %10205 = vmatprep.subr.bf16.mxu1 %v13085_v17  ;;  %v13227_v16 = vcombine.high %v888_v10, %v900_v11  ;;  %v13229_v17 = vcombine.high %v889_v13, %v901_v57  ;;  %v1020_v0 = vld [vmem:[#allocation5 + $0x1db0] sm:$0xff]  ;;  %v1021_v5 = vld [vmem:[#allocation5 + $0x1db8] sm:$0xff] }
 0x1ac   :  { %9994 = vmatpush1.bf16.msra.mxu0 %v13082_v26  ;;  %10206 = vmatpush1.bf16.msra.mxu1 %v13084_v53  ;;  %v13226_v26 = vcombine.low %v888_v10, %v900_v11  ;;  %v13228_v53 = vcombine.low %v889_v13, %v901_v57  ;;  %v1032_v10 = vld [vmem:[#allocation5 + $0x1e10] sm:$0xff]  ;;  %v1033_v13 = vld [vmem:[#allocation5 + $0x1e18] sm:$0xff] }
 0x1ad   :  { %9995 = vmatprep.subr.bf16.mxu0 %v13107_v54  ;;  %10207 = vmatprep.subr.bf16.mxu1 %v13109_v27  ;;  %v13251_v54 = vcombine.high %v912_v18, %v924_v19  ;;  %v13253_v27 = vcombine.high %v913_v20, %v925_v21  ;;  %v1044_v11 = vld [vmem:[#allocation5 + $0x1e70] sm:$0xff]  ;;  %v1045_v57 = vld [vmem:[#allocation5 + $0x1e78] sm:$0xff] }
 0x1b0   :  { %9996 = vmatpush1.bf16.msra.mxu0 %v13106_v37  ;;  %10208 = vmatpush1.bf16.msra.mxu1 %v13108_v38  ;;  %v13250_v37 = vcombine.low %v912_v18, %v924_v19  ;;  %v13252_v38 = vcombine.low %v913_v20, %v925_v21  ;;  %v1056_v18 = vld [vmem:[#allocation5 + $0x1ed0] sm:$0xff]  ;;  %v1057_v20 = vld [vmem:[#allocation5 + $0x1ed8] sm:$0xff] }
 0x1b1   :  { %9997 = vmatprep.subr.bf16.mxu0 %v13131_v39  ;;  %10209 = vmatprep.subr.bf16.mxu1 %v13133_v40  ;;  %v13275_v39 = vcombine.high %v936_v28, %v948_v29  ;;  %v13277_v40 = vcombine.high %v937_v32, %v949_v33  ;;  %v1068_v19 = vld [vmem:[#allocation5 + $0x1f30] sm:$0xff]  ;;  %v1069_v21 = vld [vmem:[#allocation5 + $0x1f38] sm:$0xff] }
 0x1b4   :  { %9998 = vmatpush1.bf16.msra.mxu0 %v13130_v36  ;;  %10210 = vmatpush1.bf16.msra.mxu1 %v13132_v47  ;;  %v13274_v36 = vcombine.low %v936_v28, %v948_v29  ;;  %v13276_v47 = vcombine.low %v937_v32, %v949_v33  ;;  %v1080_v28 = vld [vmem:[#allocation5 + $0x1f90] sm:$0xff]  ;;  %v1081_v32 = vld [vmem:[#allocation5 + $0x1f98] sm:$0xff] }
 0x1b5   :  { %9999 = vmatprep.subr.bf16.mxu0 %v13155_v48  ;;  %10211 = vmatprep.subr.bf16.mxu1 %v13157_v49  ;;  %v13299_v48 = vcombine.high %v960_v41, %v972_v44  ;;  %v13301_v49 = vcombine.high %v961_v46, %v973_v35  ;;  %v1092_v29 = vld [vmem:[#allocation5 + $0x1ff0] sm:$0xff]  ;;  %v1093_v33 = vld [vmem:[#allocation5 + $0x1ff8] sm:$0xff] }
 0x1b8   :  { %10000 = vmatpush1.bf16.msra.mxu0 %v13154_v24  ;;  %10212 = vmatpush1.bf16.msra.mxu1 %v13156_v60  ;;  %v13298_v24 = vcombine.low %v960_v41, %v972_v44  ;;  %v13300_v60 = vcombine.low %v961_v46, %v973_v35  ;;  %v1104_v41 = vld [vmem:[#allocation5 + $0x2050] sm:$0xff]  ;;  %v1105_v46 = vld [vmem:[#allocation5 + $0x2058] sm:$0xff] }
 0x1b9   :  { %10022 = vmatprep.subr.bf16.mxu0 %v13179_v61  ;;  %10234 = vmatprep.subr.bf16.mxu1 %v13181_v62  ;;  %v13323_v61 = vcombine.high %v984_v51, %v996_v52  ;;  %v13325_v62 = vcombine.high %v985_v55, %v997_v23  ;;  %v1116_v44 = vld [vmem:[#allocation5 + $0x20b0] sm:$0xff]  ;;  %v1117_v35 = vld [vmem:[#allocation5 + $0x20b8] sm:$0xff] }
 0x1bb   :  { %10002 = vmatmul.mubr.bf16.vlgmr.msra.gmra.mrb[8].mxu0 %v14629_v31  ;;  %10214 = vmatmul.mubr.bf16.vlgmr.msra.gmra.mrb[8].mxu1 %v14629_v31 }
 0x1bc   :  { %10023 = vmatpush1.bf16.msra.mxu0 %v13178_v6  ;;  %10235 = vmatpush1.bf16.msra.mxu1 %v13180_v7  ;;  %v13322_v6 = vcombine.low %v984_v51, %v996_v52  ;;  %v13324_v7 = vcombine.low %v985_v55, %v997_v23  ;;  %v1128_v51 = vld [vmem:[#allocation5 + $0x2110] sm:$0xff]  ;;  %v1129_v55 = vld [vmem:[#allocation5 + $0x2118] sm:$0xff] }
 0x1bd   :  { %10024 = vmatprep.subr.bf16.mxu0 %v13203_v8  ;;  %10236 = vmatprep.subr.bf16.mxu1 %v13205_v9  ;;  %v13347_v8 = vcombine.high %v1008_v63, %v1020_v0  ;;  %v13349_v9 = vcombine.high %v1009_v4, %v1021_v5  ;;  %v1140_v52 = vld [vmem:[#allocation5 + $0x2170] sm:$0xff]  ;;  %v1141_v23 = vld [vmem:[#allocation5 + $0x2178] sm:$0xff] }
 0x1be   :  { %10011 = vmatprep.mubr.bf16.mxu0 %v14631_v45  ;;  %10223 = vmatprep.mubr.bf16.mxu1 %v14631_v45 }
 0x1c0   :  { %10025 = vmatpush1.bf16.msra.mxu0 %v13202_v59  ;;  %10237 = vmatpush1.bf16.msra.mxu1 %v13204_v14  ;;  %v13346_v59 = vcombine.low %v1008_v63, %v1020_v0  ;;  %v13348_v14 = vcombine.low %v1009_v4, %v1021_v5  ;;  %v1152_v63 = vld [vmem:[#allocation5 + $0x21d0] sm:$0xff]  ;;  %v1153_v4 = vld [vmem:[#allocation5 + $0x21d8] sm:$0xff] }
 0x1c1   :  { %10026 = vmatprep.subr.bf16.mxu0 %v13227_v16  ;;  %10238 = vmatprep.subr.bf16.mxu1 %v13229_v17  ;;  %v13371_v16 = vcombine.high %v1032_v10, %v1044_v11  ;;  %v13373_v17 = vcombine.high %v1033_v13, %v1045_v57  ;;  %v1164_v0 = vld [vmem:[#allocation5 + $0x2230] sm:$0xff]  ;;  %v1165_v5 = vld [vmem:[#allocation5 + $0x2238] sm:$0xff] }
 0x1c3   :  { %10012 = vmatmul.mubr.bf16.gmra.mrb[12].mxu0 %v14637_v56  ;;  %10224 = vmatmul.mubr.bf16.gmra.mrb[12].mxu1 %v14637_v56 }
 0x1c4   :  { %10027 = vmatpush1.bf16.msra.mxu0 %v13226_v26  ;;  %10239 = vmatpush1.bf16.msra.mxu1 %v13228_v53  ;;  %v13370_v26 = vcombine.low %v1032_v10, %v1044_v11  ;;  %v13372_v53 = vcombine.low %v1033_v13, %v1045_v57  ;;  %v1176_v10 = vld [vmem:[#allocation5 + $0x2290] sm:$0xff]  ;;  %v1177_v13 = vld [vmem:[#allocation5 + $0x2298] sm:$0xff] }
 0x1c5   :  { %10028 = vmatprep.subr.bf16.mxu0 %v13251_v54  ;;  %10240 = vmatprep.subr.bf16.mxu1 %v13253_v27  ;;  %v13395_v54 = vcombine.high %v1056_v18, %v1068_v19  ;;  %v13397_v27 = vcombine.high %v1057_v20, %v1069_v21  ;;  %v1188_v11 = vld [vmem:[#allocation5 + $0x22f0] sm:$0xff]  ;;  %v1189_v57 = vld [vmem:[#allocation5 + $0x22f8] sm:$0xff] }
 0x1c6   :  { %10054 = vmatprep.mubr.bf16.mxu0 %v14645_v2  ;;  %10266 = vmatprep.mubr.bf16.mxu1 %v14645_v2 }
 0x1c8   :  { %10029 = vmatpush1.bf16.msra.mxu0 %v13250_v37  ;;  %10241 = vmatpush1.bf16.msra.mxu1 %v13252_v38  ;;  %v13394_v37 = vcombine.low %v1056_v18, %v1068_v19  ;;  %v13396_v38 = vcombine.low %v1057_v20, %v1069_v21  ;;  %v1200_v18 = vld [vmem:[#allocation5 + $0x2350] sm:$0xff]  ;;  %v1201_v20 = vld [vmem:[#allocation5 + $0x2358] sm:$0xff] }
 0x1c9   :  { %10030 = vmatprep.subr.bf16.mxu0 %v13275_v39  ;;  %10242 = vmatprep.subr.bf16.mxu1 %v13277_v40  ;;  %v13419_v39 = vcombine.high %v1080_v28, %v1092_v29  ;;  %v13421_v40 = vcombine.high %v1081_v32, %v1093_v33  ;;  %v1212_v19 = vld [vmem:[#allocation5 + $0x23b0] sm:$0xff]  ;;  %v1213_v21 = vld [vmem:[#allocation5 + $0x23b8] sm:$0xff] }
 0x1cc   :  { %10031 = vmatpush1.bf16.msra.mxu0 %v13274_v36  ;;  %10243 = vmatpush1.bf16.msra.mxu1 %v13276_v47  ;;  %v13418_v36 = vcombine.low %v1080_v28, %v1092_v29  ;;  %v13420_v47 = vcombine.low %v1081_v32, %v1093_v33  ;;  %v1224_v28 = vld [vmem:[#allocation5 + $0x2410] sm:$0xff]  ;;  %v1225_v32 = vld [vmem:[#allocation5 + $0x2418] sm:$0xff] }
 0x1cd   :  { %10032 = vmatprep.subr.bf16.mxu0 %v13299_v48  ;;  %10244 = vmatprep.subr.bf16.mxu1 %v13301_v49  ;;  %v13443_v48 = vcombine.high %v1104_v41, %v1116_v44  ;;  %v13445_v49 = vcombine.high %v1105_v46, %v1117_v35  ;;  %v1236_v29 = vld [vmem:[#allocation5 + $0x2470] sm:$0xff]  ;;  %v1237_v33 = vld [vmem:[#allocation5 + $0x2478] sm:$0xff] }
 0x1d0   :  { %10033 = vmatpush1.bf16.msra.mxu0 %v13298_v24  ;;  %10245 = vmatpush1.bf16.msra.mxu1 %v13300_v60  ;;  %v13442_v24 = vcombine.low %v1104_v41, %v1116_v44  ;;  %v13444_v60 = vcombine.low %v1105_v46, %v1117_v35  ;;  %v1248_v41 = vld [vmem:[#allocation5 + $0x24d0] sm:$0xff]  ;;  %v1249_v46 = vld [vmem:[#allocation5 + $0x24d8] sm:$0xff] }
 0x1d1   :  { %10034 = vmatprep.subr.bf16.mxu0 %v13323_v61  ;;  %10246 = vmatprep.subr.bf16.mxu1 %v13325_v62  ;;  %v13467_v61 = vcombine.high %v1128_v51, %v1140_v52  ;;  %v13469_v62 = vcombine.high %v1129_v55, %v1141_v23  ;;  %v1260_v44 = vld [vmem:[#allocation5 + $0x2530] sm:$0xff]  ;;  %v1261_v35 = vld [vmem:[#allocation5 + $0x2538] sm:$0xff] }
 0x1d4   :  { %10035 = vmatpush1.bf16.msra.mxu0 %v13322_v6  ;;  %10247 = vmatpush1.bf16.msra.mxu1 %v13324_v7  ;;  %v13466_v6 = vcombine.low %v1128_v51, %v1140_v52  ;;  %v13468_v7 = vcombine.low %v1129_v55, %v1141_v23  ;;  %v1272_v51 = vld [vmem:[#allocation5 + $0x2590] sm:$0xff]  ;;  %v1273_v55 = vld [vmem:[#allocation5 + $0x2598] sm:$0xff] }
 0x1d5   :  { %10036 = vmatprep.subr.bf16.mxu0 %v13347_v8  ;;  %10248 = vmatprep.subr.bf16.mxu1 %v13349_v9  ;;  %v13491_v8 = vcombine.high %v1152_v63, %v1164_v0  ;;  %v13493_v9 = vcombine.high %v1153_v4, %v1165_v5  ;;  %v1284_v52 = vld [vmem:[#allocation5 + $0x25f0] sm:$0xff]  ;;  %v1285_v23 = vld [vmem:[#allocation5 + $0x25f8] sm:$0xff] }
 0x1d8   :  { %10037 = vmatpush1.bf16.msra.mxu0 %v13346_v59  ;;  %10249 = vmatpush1.bf16.msra.mxu1 %v13348_v14  ;;  %v13490_v59 = vcombine.low %v1152_v63, %v1164_v0  ;;  %v13492_v14 = vcombine.low %v1153_v4, %v1165_v5  ;;  %v1296_v63 = vld [vmem:[#allocation5 + $0x2650] sm:$0xff]  ;;  %v1297_v4 = vld [vmem:[#allocation5 + $0x2658] sm:$0xff] }
 0x1d9   :  { %10038 = vmatprep.subr.bf16.mxu0 %v13371_v16  ;;  %10250 = vmatprep.subr.bf16.mxu1 %v13373_v17  ;;  %v13515_v16 = vcombine.high %v1176_v10, %v1188_v11  ;;  %v13517_v17 = vcombine.high %v1177_v13, %v1189_v57  ;;  %v1308_v0 = vld [vmem:[#allocation5 + $0x26b0] sm:$0xff]  ;;  %v1309_v5 = vld [vmem:[#allocation5 + $0x26b8] sm:$0xff] }
 0x1dc   :  { %10039 = vmatpush1.bf16.msra.mxu0 %v13370_v26  ;;  %10251 = vmatpush1.bf16.msra.mxu1 %v13372_v53  ;;  %v13514_v26 = vcombine.low %v1176_v10, %v1188_v11  ;;  %v13516_v53 = vcombine.low %v1177_v13, %v1189_v57  ;;  %v13637_v10 = vcombine.high %v1297_v4, %v1309_v5  ;;  %v1320_v11 = vld [vmem:[#allocation5 + $0x2710] sm:$0xff]  ;;  %v1321_v57 = vld [vmem:[#allocation5 + $0x2718] sm:$0xff] }
 0x1dd   :  { %10040 = vmatprep.subr.bf16.mxu0 %v13395_v54  ;;  %10252 = vmatprep.subr.bf16.mxu1 %v13397_v27  ;;  %v13539_v54 = vcombine.high %v1200_v18, %v1212_v19  ;;  %v13541_v27 = vcombine.high %v1201_v20, %v1213_v21  ;;  %v1332_v13 = vld [vmem:[#allocation5 + $0x2770] sm:$0xff] }
 0x1e0   :  { %10041 = vmatpush1.bf16.msra.mxu0 %v13394_v37  ;;  %10253 = vmatpush1.bf16.msra.mxu1 %v13396_v38  ;;  %v13538_v37 = vcombine.low %v1200_v18, %v1212_v19  ;;  %v13540_v38 = vcombine.low %v1201_v20, %v1213_v21  ;;  %v13659_v18 = vcombine.high %v1320_v11, %v1332_v13  ;;  %v1344_v20 = vld [vmem:[#allocation5 + $0x27d0] sm:$0xff] }
 0x1e1   :  { %10042 = vmatprep.subr.bf16.mxu0 %v13419_v39  ;;  %10254 = vmatprep.subr.bf16.mxu1 %v13421_v40  ;;  %v13563_v39 = vcombine.high %v1224_v28, %v1236_v29  ;;  %v13565_v40 = vcombine.high %v1225_v32, %v1237_v33  ;;  %v1356_v21 = vld [vmem:[#allocation5 + $0x2830] sm:$0xff] }
 0x1e4   :  { %10043 = vmatpush1.bf16.msra.mxu0 %v13418_v36  ;;  %10255 = vmatpush1.bf16.msra.mxu1 %v13420_v47  ;;  %v13562_v36 = vcombine.low %v1224_v28, %v1236_v29  ;;  %v13564_v47 = vcombine.low %v1225_v32, %v1237_v33  ;;  %v1606_v28 = vld [vmem:[#allocation7] sm:$0xff] }
 0x1e5   :  { %10044 = vmatprep.subr.bf16.mxu0 %v13443_v48  ;;  %10256 = vmatprep.subr.bf16.mxu1 %v13445_v49  ;;  %v13587_v48 = vcombine.high %v1248_v41, %v1260_v44  ;;  %v13589_v49 = vcombine.high %v1249_v46, %v1261_v35 }
 0x1e8   :  { %10045 = vmatpush1.bf16.msra.mxu0 %v13442_v24  ;;  %10257 = vmatpush1.bf16.msra.mxu1 %v13444_v60  ;;  %v13586_v24 = vcombine.low %v1248_v41, %v1260_v44  ;;  %v13588_v60 = vcombine.low %v1249_v46, %v1261_v35  ;;  %v1380_v41 = vld [vmem:[#allocation5 + $0x28f0] sm:$0xff]  ;;  %v1369_v46 = vld [vmem:[#allocation5 + $0x2898] sm:$0xff] }
 0x1e9   :  { %10046 = vmatprep.subr.bf16.mxu0 %v13467_v61  ;;  %10258 = vmatprep.subr.bf16.mxu1 %v13469_v62  ;;  %v13611_v61 = vcombine.high %v1272_v51, %v1284_v52  ;;  %v13613_v62 = vcombine.high %v1273_v55, %v1285_v23  ;;  %v1381_v35 = vld [vmem:[#allocation5 + $0x28f8] sm:$0xff] }
 0x1ec   :  { %10047 = vmatpush1.bf16.msra.mxu0 %v13466_v6  ;;  %10259 = vmatpush1.bf16.msra.mxu1 %v13468_v7  ;;  %v1612_v6 = vlaneseq  ;;  %v13610_v7 = vcombine.low %v1272_v51, %v1284_v52 }
 0x1ed   :  { %10048 = vmatprep.subr.bf16.mxu0 %v13491_v8  ;;  %10260 = vmatprep.subr.bf16.mxu1 %v13493_v9  ;;  %v13612_v8 = vcombine.low %v1273_v55, %v1285_v23  ;;  %v13635_v9 = vcombine.high %v1296_v63, %v1308_v0  ;;  %v13709_v23 = vcombine.high %v1369_v46, %v1381_v35 }
 0x1f0   :  { %10049 = vmatpush1.bf16.msra.mxu0 %v13490_v59  ;;  %10261 = vmatpush1.bf16.msra.mxu1 %v13492_v14  ;;  %v1333_v59 = vld [vmem:[#allocation5 + $0x2778] sm:$0xff]  ;;  %v14711_v14 = vshrl.u32 %v1612_v6, 7 }
 0x1f1   :  { %10050 = vmatprep.subr.bf16.mxu0 %v13515_v16  ;;  %10262 = vmatprep.subr.bf16.mxu1 %v13517_v17  ;;  %v13634_v16 = vcombine.low %v1296_v63, %v1308_v0  ;;  %v13636_v17 = vcombine.low %v1297_v4, %v1309_v5  ;;  %v13661_v19 = vcombine.high %v1321_v57, %v1333_v59  ;;  %v1393_v0 = vld [vmem:[#allocation5 + $0x2958] sm:$0xff] }
 0x1f2   :  { %v14721_v29 = vsub.s32 2, %v14711_v14  ;;  %v14724_v32 = vsub.s32 1, %v14711_v14  ;;  %v13660_v33 = vcombine.low %v1321_v57, %v1333_v59  ;;  %v1405_v4 = vld [vmem:[#allocation5 + $0x29b8] sm:$0xff] }
 0x1f4   :  { %10051 = vmatpush1.bf16.msra.mxu0 %v13514_v26  ;;  %10263 = vmatpush1.bf16.msra.mxu1 %v13516_v53  ;;  %v14717_v26 = vsub.s32 0, %v14711_v14  ;;  %v1345_v53 = vld [vmem:[#allocation5 + $0x27d8] sm:$0xff] }
 0x1f5   :  { %10052 = vmatprep.subr.bf16.mxu0 %v13539_v54  ;;  %10264 = vmatprep.subr.bf16.mxu1 %v13541_v27  ;;  %v1357_v54 = vld [vmem:[#allocation5 + $0x2838] sm:$0xff]  ;;  %v13658_v27 = vcombine.low %v1320_v11, %v1332_v13 }
 0x1f6   :  { %v14730_v44 = vrot.slane %v1606_v28, %v14717_v26  ;;  %v13684_v51 = vcombine.low %v1345_v53, %v1357_v54 }
 0x1f8   :  { %10053 = vmatpush1.bf16.msra.mxu0 %v13538_v37  ;;  %10265 = vmatpush1.bf16.msra.mxu1 %v13540_v38  ;;  %v14727_v37 = vsub.s32 3, %v14711_v14  ;;  %v13683_v38 = vcombine.high %v1344_v20, %v1356_v21 }
 0x1f9   :  { %10075 = vmatprep.subr.bf16.mxu0 %v13563_v39  ;;  %10287 = vmatprep.subr.bf16.mxu1 %v13565_v40  ;;  %v13685_v39 = vcombine.high %v1345_v53, %v1357_v54  ;;  %v1368_v40 = vld [vmem:[#allocation5 + $0x2890] sm:$0xff] }
 0x1fa   :  { %v13707_v52 = vcombine.high %v1368_v40, %v1380_v41  ;;  %v1416_v53 = vld [vmem:[#allocation5 + $0x2a10] sm:$0xff] }
 0x1fb   :  { %10055 = vmatmul.mubr.bf16.vlgmr.msra.gmra.mrb[8].mxu0 %v14653_v1  ;;  %10267 = vmatmul.mubr.bf16.vlgmr.msra.gmra.mrb[8].mxu1 %v14653_v1  ;;  %v1428_v54 = vld [vmem:[#allocation5 + $0x2a70] sm:$0xff] }
 0x1fc   :  { %10076 = vmatpush1.bf16.msra.mxu0 %v13562_v36  ;;  %10288 = vmatpush1.bf16.msra.mxu1 %v13564_v47  ;;  %v14733_v36 = vrot.slane %v1606_v28, %v14721_v29  ;;  %v14736_v47 = vrot.slane %v1606_v28, %v14724_v32 }
 0x1fd   :  { %10077 = vmatprep.subr.bf16.mxu0 %v13587_v48  ;;  %10289 = vmatprep.subr.bf16.mxu1 %v13589_v49  ;;  %v13682_v48 = vcombine.low %v1344_v20, %v1356_v21  ;;  %v14739_v49 = vrot.slane %v1606_v28, %v14727_v37  ;;  %v13733_v21 = vcombine.high %v1393_v0, %v1405_v4 }
 0x1fe   :  { %10064 = vmatprep.mubr.bf16.mxu0 %v14655_v12  ;;  %10276 = vmatprep.mubr.bf16.mxu1 %v14655_v12 }
 0x200   :  { %10078 = vmatpush1.bf16.msra.mxu0 %v13586_v24  ;;  %10290 = vmatpush1.bf16.msra.mxu1 %v13588_v60  ;;  %v1392_v24 = vld [vmem:[#allocation5 + $0x2950] sm:$0xff] }
 0x201   :  { %10079 = vmatprep.subr.bf16.mxu0 %v13611_v61  ;;  %10291 = vmatprep.subr.bf16.mxu1 %v13613_v62  ;;  %v1404_v60 = vld [vmem:[#allocation5 + $0x29b0] sm:$0xff] }
 0x203   :  { %10065 = vmatmul.mubr.bf16.gmra.mrb[12].mxu0 %v14661_v22  ;;  %10277 = vmatmul.mubr.bf16.gmra.mrb[12].mxu1 %v14661_v22 }
 0x204   :  { %10080 = vmatpush1.bf16.msra.mxu0 %v13610_v7  ;;  %10292 = vmatpush1.bf16.msra.mxu1 %v13612_v8 }
 0x205   :  { %10081 = vmatprep.subr.bf16.mxu0 %v13635_v9  ;;  %10293 = vmatprep.subr.bf16.mxu1 %v13637_v10  ;;  %v13706_v9 = vcombine.low %v1368_v40, %v1380_v41  ;;  %v13708_v10 = vcombine.low %v1369_v46, %v1381_v35  ;;  %v13730_v40 = vcombine.low %v1392_v24, %v1404_v60 }
 0x206   :  { %10107 = vmatprep.mubr.bf16.mxu0 %v14669_v30  ;;  %10319 = vmatprep.mubr.bf16.mxu1 %v14669_v30  ;;  %v13732_v46 = vcombine.low %v1393_v0, %v1405_v4  ;;  %v13755_v35 = vcombine.high %v1416_v53, %v1428_v54  ;;  %v13754_v4 = vcombine.low %v1416_v53, %v1428_v54  ;;  %v1465_v54 = vld [vmem:[#allocation5 + $0x2b98] sm:$0xff] }
 0x208   :  { %10082 = vmatpush1.bf16.msra.mxu0 %v13634_v16  ;;  %10294 = vmatpush1.bf16.msra.mxu1 %v13636_v17  ;;  %v13731_v16 = vcombine.high %v1392_v24, %v1404_v60 }
 0x209   :  { %10083 = vmatprep.subr.bf16.mxu0 %v13659_v18  ;;  %10295 = vmatprep.subr.bf16.mxu1 %v13661_v19 }
 0x20c   :  { %10084 = vmatpush1.bf16.msra.mxu0 %v13658_v27  ;;  %10296 = vmatpush1.bf16.msra.mxu1 %v13660_v33  ;;  %v1417_v33 = vld [vmem:[#allocation5 + $0x2a18] sm:$0xff] }
 0x20d   :  { %10085 = vmatprep.subr.bf16.mxu0 %v13683_v38  ;;  %10297 = vmatprep.subr.bf16.mxu1 %v13685_v39  ;;  %v1429_v38 = vld [vmem:[#allocation5 + $0x2a78] sm:$0xff] }
 0x20e   :  { %v9685_v55 = vpop.f32.mrb[0].mxu0  ;;  %v9897_v62 = vpop.f32.mrb[0].mxu1 }
 0x20f   :  { %v14038_v61 = vadd.f32 %v9685_v55, %v14730_v44  ;;  %v9687_v63 = vpop.f32.mrb[1].mxu0  ;;  %v14046_v5 = vadd.f32 %v9897_v62, %v14733_v36  ;;  %v9899_v7 = vpop.f32.mrb[1].mxu1  ;;  %v1452_v55 = vld [vmem:[#allocation5 + $0x2b30] sm:$0xff] }
 0x210   :  { %v14039_v6 = vadd.f32 %v9687_v63, %v14736_v47  ;;  %v9689_v8 = vpop.f32.mrb[2].mxu0  ;;  %10086 = vmatpush1.bf16.msra.mxu0 %v13682_v48  ;;  %v14047_v11 = vadd.f32 %v9899_v7, %v14739_v49  ;;  %v9901_v57 = vpop.f32.mrb[2].mxu1  ;;  %10298 = vmatpush1.bf16.msra.mxu1 %v13684_v51  ;;  %v13757_v51 = vcombine.high %v1417_v33, %v1429_v38  ;;  %v1441_v63 = vld [vmem:[#allocation5 + $0x2ad8] sm:$0xff] }
 0x211   :  { %v14040_v13 = vadd.f32 %v9689_v8, %v14730_v44  ;;  %v9691_v59 = vpop.f32.mrb[3].mxu0  ;;  %10087 = vmatprep.subr.bf16.mxu0 %v13707_v52  ;;  %v14048_v18 = vadd.f32 %v9901_v57, %v14733_v36  ;;  %v9903_v20 = vpop.f32.mrb[3].mxu1  ;;  %10299 = vmatprep.subr.bf16.mxu1 %v13709_v23  ;;  %v1440_v52 = vld [vmem:[#allocation5 + $0x2ad0] sm:$0xff]  ;;  %v13756_v7 = vcombine.low %v1417_v33, %v1429_v38 }
 0x212   :  { %v13990_v17 = vpack.c.bf16 %v14039_v6, %v14038_v61  ;;  %v14041_v19 = vadd.f32 %v9691_v59, %v14736_v47  ;;  %v13991_v27 = vpack.c.bf16 %v14047_v11, %v14046_v5  ;;  %v14049_v28 = vadd.f32 %v9903_v20, %v14739_v49  ;;  %v1453_v5 = vld [vmem:[#allocation5 + $0x2b38] sm:$0xff]  ;;  %v1476_v20 = vld [vmem:[#allocation5 + $0x2bf0] sm:$0xff] }
 0x214   :  { %12324 = vst [vmem:[#allocation8] sm:$0xff] %v13990_v17  ;;  %v14002_v39 = vpack.c.bf16 %v14041_v19, %v14040_v13  ;;  %10088 = vmatpush1.bf16.msra.mxu0 %v13706_v9  ;;  %12325 = vst [vmem:[#allocation8 + $0x8] sm:$0xff] %v13991_v27  ;;  %v14003_v41 = vpack.c.bf16 %v14049_v28, %v14048_v18  ;;  %10300 = vmatpush1.bf16.msra.mxu1 %v13708_v10  ;;  %v1464_v19 = vld [vmem:[#allocation5 + $0x2b90] sm:$0xff] }
 0x215   :  { %10089 = vmatprep.subr.bf16.mxu0 %v13731_v16  ;;  %10301 = vmatprep.subr.bf16.mxu1 %v13733_v21  ;;  %v13779_v13 = vcombine.high %v1440_v52, %v1452_v55  ;;  %v13781_v18 = vcombine.high %v1441_v63, %v1453_v5  ;;  %v13778_v28 = vcombine.low %v1440_v52, %v1452_v55  ;;  %v1512_v52 = vld [vmem:[#allocation5 + $0x2d10] sm:$0xff] }
 0x216   :  { %12336 = vst [vmem:[#allocation8 + $0x60] sm:$0xff] %v14002_v39  ;;  %v9695_v48 = vpop.f32.mrb[4].mxu0  ;;  %12337 = vst [vmem:[#allocation8 + $0x68] sm:$0xff] %v14003_v41  ;;  %v9907_v61 = vpop.f32.mrb[4].mxu1  ;;  %v1488_v39 = vld [vmem:[#allocation5 + $0x2c50] sm:$0xff]  ;;  %v1489_v41 = vld [vmem:[#allocation5 + $0x2c58] sm:$0xff] }
 0x217   :  { %v14042_v23 = vadd.f32 %v9695_v48, %v14730_v44  ;;  %v9697_v62 = vpop.f32.mrb[5].mxu0  ;;  %v14050_v24 = vadd.f32 %v9907_v61, %v14733_v36  ;;  %v9909_v6 = vpop.f32.mrb[5].mxu1  ;;  %v1524_v55 = vld [vmem:[#allocation5 + $0x2d70] sm:$0xff]  ;;  %v1525_v61 = vld [vmem:[#allocation5 + $0x2d78] sm:$0xff] }
 0x218   :  { %v14043_v60 = vadd.f32 %v9697_v62, %v14736_v47  ;;  %v9699_v0 = vpop.f32.mrb[6].mxu0  ;;  %10090 = vmatpush1.bf16.msra.mxu0 %v13730_v40  ;;  %v14051_v8 = vadd.f32 %v9909_v6, %v14739_v49  ;;  %v9911_v10 = vpop.f32.mrb[6].mxu1  ;;  %10302 = vmatpush1.bf16.msra.mxu1 %v13732_v46  ;;  %v1500_v40 = vld [vmem:[#allocation5 + $0x2cb0] sm:$0xff]  ;;  %v13802_v46 = vcombine.low %v1464_v19, %v1476_v20 }
 0x219   :  { %v14044_v9 = vadd.f32 %v9699_v0, %v14730_v44  ;;  %v9701_v11 = vpop.f32.mrb[7].mxu0  ;;  %10091 = vmatprep.subr.bf16.mxu0 %v13755_v35  ;;  %v14052_v59 = vadd.f32 %v9911_v10, %v14733_v36  ;;  %v9913_v17 = vpop.f32.mrb[7].mxu1  ;;  %10303 = vmatprep.subr.bf16.mxu1 %v13757_v51  ;;  %v1477_v44 = vld [vmem:[#allocation5 + $0x2bf8] sm:$0xff]  ;;  %v13780_v36 = vcombine.low %v1441_v63, %v1453_v5  ;;  %v1548_v6 = vld [vmem:[#allocation5 + $0x2e30] sm:$0xff] }
 0x21a   :  { %v14014_v57 = vpack.c.bf16 %v14043_v60, %v14042_v23  ;;  %v14045_v16 = vadd.f32 %v9701_v11, %v14736_v47  ;;  %v14015_v21 = vpack.c.bf16 %v14051_v8, %v14050_v24  ;;  %v14053_v53 = vadd.f32 %v9913_v17, %v14739_v49  ;;  %v1501_v49 = vld [vmem:[#allocation5 + $0x2cb8] sm:$0xff]  ;;  %v1536_v60 = vld [vmem:[#allocation5 + $0x2dd0] sm:$0xff] }
 0x21b   :  { %v13803_v47 = vcombine.high %v1464_v19, %v1476_v20  ;;  %v13805_v38 = vcombine.high %v1465_v54, %v1477_v44  ;;  %v13804_v35 = vcombine.low %v1465_v54, %v1477_v44  ;;  %v13827_v48 = vcombine.high %v1488_v39, %v1500_v40  ;;  %v1513_v23 = vld [vmem:[#allocation5 + $0x2d18] sm:$0xff]  ;;  %v1560_v11 = vld [vmem:[#allocation5 + $0x2e90] sm:$0xff] }
 0x21c   :  { %12348 = vst [vmem:[#allocation8 + $0xc0] sm:$0xff] %v14014_v57  ;;  %v14026_v27 = vpack.c.bf16 %v14045_v16, %v14044_v9  ;;  %10092 = vmatpush1.bf16.msra.mxu0 %v13754_v4  ;;  %12349 = vst [vmem:[#allocation8 + $0xc8] sm:$0xff] %v14015_v21  ;;  %v14027_v33 = vpack.c.bf16 %v14053_v53, %v14052_v59  ;;  %10304 = vmatpush1.bf16.msra.mxu1 %v13756_v7  ;;  %v1537_v0 = vld [vmem:[#allocation5 + $0x2dd8] sm:$0xff]  ;;  %v1584_v20 = vld [vmem:[#allocation5 + $0x2f50] sm:$0xff] }
 0x21d   :  { %10093 = vmatprep.subr.bf16.mxu0 %v13779_v13  ;;  %10305 = vmatprep.subr.bf16.mxu1 %v13781_v18  ;;  %v13829_v51 = vcombine.high %v1489_v41, %v1501_v49  ;;  %v13826_v62 = vcombine.low %v1488_v39, %v1500_v40  ;;  %v13828_v63 = vcombine.low %v1489_v41, %v1501_v49  ;;  %v1549_v4 = vld [vmem:[#allocation5 + $0x2e38] sm:$0xff]  ;;  %v1572_v13 = vld [vmem:[#allocation5 + $0x2ef0] sm:$0xff]  ;;  %v87_v39 = vld [vmem:[#allocation5 + $0x88] sm:$0xff] }
 0x21e   :  { %12360 = vst [vmem:[#allocation8 + $0x120] sm:$0xff] %v14026_v27  ;;  %12361 = vst [vmem:[#allocation8 + $0x128] sm:$0xff] %v14027_v33  ;;  %v13851_v5 = vcombine.high %v1512_v52, %v1524_v55  ;;  %v13853_v24 = vcombine.high %v1513_v23, %v1525_v61  ;;  %v13850_v7 = vcombine.low %v1512_v52, %v1524_v55  ;;  %v1561_v57 = vld [vmem:[#allocation5 + $0x2e98] sm:$0xff]  ;;  %v1596_v21 = vld [vmem:[#allocation5 + $0x2fb0] sm:$0xff] }
 0x21f   :  { %v13852_v8 = vcombine.low %v1513_v23, %v1525_v61  ;;  %v13875_v9 = vcombine.high %v1536_v60, %v1548_v6  ;;  %v13877_v10 = vcombine.high %v1537_v0, %v1549_v4  ;;  %v1573_v59 = vld [vmem:[#allocation5 + $0x2ef8] sm:$0xff]  ;;  %v13874_v16 = vcombine.low %v1536_v60, %v1548_v6  ;;  %v111_v52 = vld [vmem:[#allocation5 + $0x148] sm:$0xff] }
 0x220   :  { %10094 = vmatpush1.bf16.msra.mxu0 %v13778_v28  ;;  %10306 = vmatpush1.bf16.msra.mxu1 %v13780_v36  ;;  %v13876_v17 = vcombine.low %v1537_v0, %v1549_v4  ;;  %v13899_v18 = vcombine.high %v1560_v11, %v1572_v13  ;;  %v13901_v19 = vcombine.high %v1561_v57, %v1573_v59  ;;  %v1585_v53 = vld [vmem:[#allocation5 + $0x2f58] sm:$0xff]  ;;  %v74_v36 = vld [vmem:[#allocation5 + $0x20] sm:$0xff]  ;;  %v135_v60 = vld [vmem:[#allocation5 + $0x208] sm:$0xff] }
 0x221   :  { %10095 = vmatprep.subr.bf16.mxu0 %v13803_v47  ;;  %10307 = vmatprep.subr.bf16.mxu1 %v13805_v38  ;;  %v1597_v54 = vld [vmem:[#allocation5 + $0x2fb8] sm:$0xff]  ;;  %v13898_v44 = vcombine.low %v1560_v11, %v1572_v13  ;;  %v13900_v27 = vcombine.low %v1561_v57, %v1573_v59  ;;  %v13923_v28 = vcombine.high %v1584_v20, %v1596_v21  ;;  %v86_v47 = vld [vmem:[#allocation5 + $0x80] sm:$0xff]  ;;  %v75_v38 = vld [vmem:[#allocation5 + $0x28] sm:$0xff] }
 0x222   :  { %v13925_v33 = vcombine.high %v1585_v53, %v1597_v54  ;;  %v13922_v40 = vcombine.low %v1584_v20, %v1596_v21  ;;  %v13924_v41 = vcombine.low %v1585_v53, %v1597_v54  ;;  %v12415_v49 = vcombine.high %v74_v36, %v86_v47  ;;  %v159_v11 = vld [vmem:[#allocation5 + $0x2c8] sm:$0xff] }
 0x223   :  { %v12414_v55 = vcombine.low %v74_v36, %v86_v47  ;;  %v12416_v23 = vcombine.low %v75_v38, %v87_v39  ;;  %v183_v20 = vld [vmem:[#allocation5 + $0x388] sm:$0xff] }
 0x224   :  { %10096 = vmatpush1.bf16.msra.mxu0 %v13802_v46  ;;  %10308 = vmatpush1.bf16.msra.mxu1 %v13804_v35  ;;  %v12417_v46 = vcombine.high %v75_v38, %v87_v39  ;;  %v98_v35 = vld [vmem:[#allocation5 + $0xe0] sm:$0xff]  ;;  %v207_v36 = vld [vmem:[#allocation5 + $0x448] sm:$0xff] }
 0x225   :  { %10097 = vmatprep.subr.bf16.mxu0 %v13827_v48  ;;  %10309 = vmatprep.subr.bf16.mxu1 %v13829_v51  ;;  %v110_v48 = vld [vmem:[#allocation5 + $0x140] sm:$0xff]  ;;  %v99_v51 = vld [vmem:[#allocation5 + $0xe8] sm:$0xff] }
 0x226   :  { %v12439_v61 = vcombine.high %v98_v35, %v110_v48  ;;  %v12438_v6 = vcombine.low %v98_v35, %v110_v48  ;;  %v12440_v0 = vcombine.low %v99_v51, %v111_v52  ;;  %v231_v35 = vld [vmem:[#allocation5 + $0x508] sm:$0xff] }
 0x228   :  { %10098 = vmatpush1.bf16.msra.mxu0 %v13826_v62  ;;  %10310 = vmatpush1.bf16.msra.mxu1 %v13828_v63  ;;  %v12441_v62 = vcombine.high %v99_v51, %v111_v52  ;;  %v122_v63 = vld [vmem:[#allocation5 + $0x1a0] sm:$0xff] }
 0x229   :  { %10099 = vmatprep.subr.bf16.mxu0 %v13851_v5  ;;  %10311 = vmatprep.subr.bf16.mxu1 %v13853_v24  ;;  %v134_v5 = vld [vmem:[#allocation5 + $0x200] sm:$0xff]  ;;  %v123_v24 = vld [vmem:[#allocation5 + $0x1a8] sm:$0xff] }
 0x22a   :  { %v12463_v4 = vcombine.high %v122_v63, %v134_v5  ;;  %v12462_v13 = vcombine.low %v122_v63, %v134_v5  ;;  %v12464_v57 = vcombine.low %v123_v24, %v135_v60  ;;  %v255_v63 = vld [vmem:[#allocation5 + $0x5c8] sm:$0xff] }
 0x22c   :  { %10100 = vmatpush1.bf16.msra.mxu0 %v13850_v7  ;;  %10312 = vmatpush1.bf16.msra.mxu1 %v13852_v8  ;;  %v12465_v7 = vcombine.high %v123_v24, %v135_v60  ;;  %v146_v8 = vld [vmem:[#allocation5 + $0x260] sm:$0xff] }
 0x22d   :  { %10101 = vmatprep.subr.bf16.mxu0 %v13875_v9  ;;  %10313 = vmatprep.subr.bf16.mxu1 %v13877_v10  ;;  %v158_v9 = vld [vmem:[#allocation5 + $0x2c0] sm:$0xff]  ;;  %v147_v10 = vld [vmem:[#allocation5 + $0x268] sm:$0xff] }
 0x22e   :  { %v12487_v59 = vcombine.high %v146_v8, %v158_v9  ;;  %v12486_v21 = vcombine.low %v146_v8, %v158_v9  ;;  %v12488_v53 = vcombine.low %v147_v10, %v159_v11  ;;  %v279_v8 = vld [vmem:[#allocation5 + $0x688] sm:$0xff] }
 0x230   :  { %10102 = vmatpush1.bf16.msra.mxu0 %v13874_v16  ;;  %10314 = vmatpush1.bf16.msra.mxu1 %v13876_v17  ;;  %v12489_v16 = vcombine.high %v147_v10, %v159_v11  ;;  %v170_v17 = vld [vmem:[#allocation5 + $0x320] sm:$0xff] }
 0x231   :  { %10103 = vmatprep.subr.bf16.mxu0 %v13899_v18  ;;  %10315 = vmatprep.subr.bf16.mxu1 %v13901_v19  ;;  %v182_v18 = vld [vmem:[#allocation5 + $0x380] sm:$0xff]  ;;  %v171_v19 = vld [vmem:[#allocation5 + $0x328] sm:$0xff] }
 0x232   :  { %v12511_v54 = vcombine.high %v170_v17, %v182_v18  ;;  %v12510_v47 = vcombine.low %v170_v17, %v182_v18  ;;  %v12512_v38 = vcombine.low %v171_v19, %v183_v20  ;;  %v303_v17 = vld [vmem:[#allocation5 + $0x748] sm:$0xff] }
 0x234   :  { %10104 = vmatpush1.bf16.msra.mxu0 %v13898_v44  ;;  %10316 = vmatpush1.bf16.msra.mxu1 %v13900_v27  ;;  %v12513_v44 = vcombine.high %v171_v19, %v183_v20  ;;  %v194_v27 = vld [vmem:[#allocation5 + $0x3e0] sm:$0xff] }
 0x235   :  { %10105 = vmatprep.subr.bf16.mxu0 %v13923_v28  ;;  %10317 = vmatprep.subr.bf16.mxu1 %v13925_v33  ;;  %v206_v28 = vld [vmem:[#allocation5 + $0x440] sm:$0xff]  ;;  %v195_v33 = vld [vmem:[#allocation5 + $0x3e8] sm:$0xff] }
 0x236   :  { %v12535_v39 = vcombine.high %v194_v27, %v206_v28  ;;  %v12534_v48 = vcombine.low %v194_v27, %v206_v28  ;;  %v12536_v51 = vcombine.low %v195_v33, %v207_v36  ;;  %v327_v27 = vld [vmem:[#allocation5 + $0x808] sm:$0xff] }
 0x238   :  { %10106 = vmatpush1.bf16.msra.mxu0 %v13922_v40  ;;  %10318 = vmatpush1.bf16.msra.mxu1 %v13924_v41  ;;  %v12537_v40 = vcombine.high %v195_v33, %v207_v36  ;;  %v218_v41 = vld [vmem:[#allocation5 + $0x4a0] sm:$0xff] }
 0x239   :  { %10340 = vmatprep.subr.bf16.mxu0 %v12415_v49  ;;  %10552 = vmatprep.subr.bf16.mxu1 %v12417_v46  ;;  %v230_v49 = vld [vmem:[#allocation5 + $0x500] sm:$0xff]  ;;  %v219_v46 = vld [vmem:[#allocation5 + $0x4a8] sm:$0xff] }
 0x23a   :  { %v12559_v52 = vcombine.high %v218_v41, %v230_v49  ;;  %v12558_v5 = vcombine.low %v218_v41, %v230_v49  ;;  %v12560_v24 = vcombine.low %v219_v46, %v231_v35  ;;  %v351_v41 = vld [vmem:[#allocation5 + $0x8c8] sm:$0xff] }
 0x23b   :  { %10108 = vmatmul.mubr.bf16.vlgmr.msra.gmra.mrb[8].mxu0 %v14677_v42  ;;  %10320 = vmatmul.mubr.bf16.vlgmr.msra.gmra.mrb[8].mxu1 %v14677_v42 }
 0x23c   :  { %10341 = vmatpush1.bf16.msra.mxu0 %v12414_v55  ;;  %10553 = vmatpush1.bf16.msra.mxu1 %v12416_v23  ;;  %v12561_v55 = vcombine.high %v219_v46, %v231_v35  ;;  %v242_v23 = vld [vmem:[#allocation5 + $0x560] sm:$0xff] }
 0x23d   :  { %10342 = vmatprep.subr.bf16.mxu0 %v12439_v61  ;;  %10554 = vmatprep.subr.bf16.mxu1 %v12441_v62  ;;  %v254_v61 = vld [vmem:[#allocation5 + $0x5c0] sm:$0xff]  ;;  %v243_v62 = vld [vmem:[#allocation5 + $0x568] sm:$0xff] }
 0x23e   :  { %10117 = vmatprep.mubr.bf16.mxu0 %v14679_v50  ;;  %10329 = vmatprep.mubr.bf16.mxu1 %v14679_v50  ;;  %v12583_v60 = vcombine.high %v242_v23, %v254_v61  ;;  %v12582_v9 = vcombine.low %v242_v23, %v254_v61  ;;  %v12584_v10 = vcombine.low %v243_v62, %v255_v63  ;;  %v375_v23 = vld [vmem:[#allocation5 + $0x988] sm:$0xff] }
 0x240   :  { %10343 = vmatpush1.bf16.msra.mxu0 %v12438_v6  ;;  %10555 = vmatpush1.bf16.msra.mxu1 %v12440_v0  ;;  %v12585_v6 = vcombine.high %v243_v62, %v255_v63  ;;  %v266_v0 = vld [vmem:[#allocation5 + $0x620] sm:$0xff] }
 0x241   :  { %10344 = vmatprep.subr.bf16.mxu0 %v12463_v4  ;;  %10556 = vmatprep.subr.bf16.mxu1 %v12465_v7  ;;  %v278_v4 = vld [vmem:[#allocation5 + $0x680] sm:$0xff]  ;;  %v267_v7 = vld [vmem:[#allocation5 + $0x628] sm:$0xff] }
 0x242   :  { %v12607_v11 = vcombine.high %v266_v0, %v278_v4  ;;  %v12606_v18 = vcombine.low %v266_v0, %v278_v4  ;;  %v12608_v19 = vcombine.low %v267_v7, %v279_v8  ;;  %v399_v0 = vld [vmem:[#allocation5 + $0xa48] sm:$0xff] }
 0x243   :  { %10118 = vmatmul.mubr.bf16.gmra.mrb[12].mxu0 %v14685_v3  ;;  %10330 = vmatmul.mubr.bf16.gmra.mrb[12].mxu1 %v14685_v3 }
 0x244   :  { %10345 = vmatpush1.bf16.msra.mxu0 %v12462_v13  ;;  %10557 = vmatpush1.bf16.msra.mxu1 %v12464_v57  ;;  %v12609_v13 = vcombine.high %v267_v7, %v279_v8  ;;  %v290_v57 = vld [vmem:[#allocation5 + $0x6e0] sm:$0xff] }
 0x245   :  { %10346 = vmatprep.subr.bf16.mxu0 %v12487_v59  ;;  %10558 = vmatprep.subr.bf16.mxu1 %v12489_v16  ;;  %v302_v59 = vld [vmem:[#allocation5 + $0x740] sm:$0xff]  ;;  %v291_v16 = vld [vmem:[#allocation5 + $0x6e8] sm:$0xff] }
 0x246   :  { %10372 = vmatprep.mubr.bf16.mxu0 %v14599_v58  ;;  %10584 = vmatprep.mubr.bf16.mxu1 %v14599_v58  ;;  %v12631_v20 = vcombine.high %v290_v57, %v302_v59  ;;  %v12630_v28 = vcombine.low %v290_v57, %v302_v59  ;;  %v12632_v33 = vcombine.low %v291_v16, %v303_v17  ;;  %v423_v57 = vld [vmem:[#allocation5 + $0xb08] sm:$0xff] }
 0x248   :  { %10347 = vmatpush1.bf16.msra.mxu0 %v12486_v21  ;;  %10559 = vmatpush1.bf16.msra.mxu1 %v12488_v53  ;;  %v12633_v21 = vcombine.high %v291_v16, %v303_v17  ;;  %v314_v53 = vld [vmem:[#allocation5 + $0x7a0] sm:$0xff] }
 0x249   :  { %10348 = vmatprep.subr.bf16.mxu0 %v12511_v54  ;;  %10560 = vmatprep.subr.bf16.mxu1 %v12513_v44  ;;  %v326_v54 = vld [vmem:[#allocation5 + $0x800] sm:$0xff]  ;;  %v315_v44 = vld [vmem:[#allocation5 + $0x7a8] sm:$0xff] }
 0x24a   :  { %v12655_v36 = vcombine.high %v314_v53, %v326_v54  ;;  %v12654_v49 = vcombine.low %v314_v53, %v326_v54  ;;  %v12656_v46 = vcombine.low %v315_v44, %v327_v27  ;;  %v447_v53 = vld [vmem:[#allocation5 + $0xbc8] sm:$0xff] }
 0x24c   :  { %10349 = vmatpush1.bf16.msra.mxu0 %v12510_v47  ;;  %10561 = vmatpush1.bf16.msra.mxu1 %v12512_v38  ;;  %v12657_v47 = vcombine.high %v315_v44, %v327_v27  ;;  %v338_v38 = vld [vmem:[#allocation5 + $0x860] sm:$0xff] }
 0x24d   :  { %10350 = vmatprep.subr.bf16.mxu0 %v12535_v39  ;;  %10562 = vmatprep.subr.bf16.mxu1 %v12537_v40  ;;  %v350_v39 = vld [vmem:[#allocation5 + $0x8c0] sm:$0xff]  ;;  %v339_v40 = vld [vmem:[#allocation5 + $0x868] sm:$0xff] }
 0x24e   :  { %v12679_v35 = vcombine.high %v338_v38, %v350_v39  ;;  %v12678_v61 = vcombine.low %v338_v38, %v350_v39  ;;  %v12680_v62 = vcombine.low %v339_v40, %v351_v41  ;;  %v471_v38 = vld [vmem:[#allocation5 + $0xc88] sm:$0xff] }
 0x250   :  { %10351 = vmatpush1.bf16.msra.mxu0 %v12534_v48  ;;  %10563 = vmatpush1.bf16.msra.mxu1 %v12536_v51  ;;  %v12681_v48 = vcombine.high %v339_v40, %v351_v41  ;;  %v362_v51 = vld [vmem:[#allocation5 + $0x920] sm:$0xff] }
 0x251   :  { %10352 = vmatprep.subr.bf16.mxu0 %v12559_v52  ;;  %10564 = vmatprep.subr.bf16.mxu1 %v12561_v55  ;;  %v374_v52 = vld [vmem:[#allocation5 + $0x980] sm:$0xff]  ;;  %v363_v55 = vld [vmem:[#allocation5 + $0x928] sm:$0xff] }
 0x252   :  { %v12703_v63 = vcombine.high %v362_v51, %v374_v52  ;;  %v12702_v4 = vcombine.low %v362_v51, %v374_v52  ;;  %v12704_v7 = vcombine.low %v363_v55, %v375_v23  ;;  %v495_v51 = vld [vmem:[#allocation5 + $0xd48] sm:$0xff] }
 0x254   :  { %10353 = vmatpush1.bf16.msra.mxu0 %v12558_v5  ;;  %10565 = vmatpush1.bf16.msra.mxu1 %v12560_v24  ;;  %v12705_v5 = vcombine.high %v363_v55, %v375_v23  ;;  %v386_v24 = vld [vmem:[#allocation5 + $0x9e0] sm:$0xff] }
 0x255   :  { %10354 = vmatprep.subr.bf16.mxu0 %v12583_v60  ;;  %10566 = vmatprep.subr.bf16.mxu1 %v12585_v6  ;;  %v398_v60 = vld [vmem:[#allocation5 + $0xa40] sm:$0xff]  ;;  %v387_v6 = vld [vmem:[#allocation5 + $0x9e8] sm:$0xff] }
 0x256   :  { %v12727_v8 = vcombine.high %v386_v24, %v398_v60  ;;  %v12726_v59 = vcombine.low %v386_v24, %v398_v60  ;;  %v12728_v16 = vcombine.low %v387_v6, %v399_v0  ;;  %v519_v24 = vld [vmem:[#allocation5 + $0xe08] sm:$0xff] }
 0x258   :  { %10355 = vmatpush1.bf16.msra.mxu0 %v12582_v9  ;;  %10567 = vmatpush1.bf16.msra.mxu1 %v12584_v10  ;;  %v12729_v9 = vcombine.high %v387_v6, %v399_v0  ;;  %v410_v10 = vld [vmem:[#allocation5 + $0xaa0] sm:$0xff] }
 0x259   :  { %10356 = vmatprep.subr.bf16.mxu0 %v12607_v11  ;;  %10568 = vmatprep.subr.bf16.mxu1 %v12609_v13  ;;  %v422_v11 = vld [vmem:[#allocation5 + $0xb00] sm:$0xff]  ;;  %v411_v13 = vld [vmem:[#allocation5 + $0xaa8] sm:$0xff] }
 0x25a   :  { %v12751_v17 = vcombine.high %v410_v10, %v422_v11  ;;  %v12750_v54 = vcombine.low %v410_v10, %v422_v11  ;;  %v12752_v44 = vcombine.low %v411_v13, %v423_v57  ;;  %v543_v10 = vld [vmem:[#allocation5 + $0xec8] sm:$0xff] }
 0x25c   :  { %10357 = vmatpush1.bf16.msra.mxu0 %v12606_v18  ;;  %10569 = vmatpush1.bf16.msra.mxu1 %v12608_v19  ;;  %v12753_v18 = vcombine.high %v411_v13, %v423_v57  ;;  %v434_v19 = vld [vmem:[#allocation5 + $0xb60] sm:$0xff] }
 0x25d   :  { %10358 = vmatprep.subr.bf16.mxu0 %v12631_v20  ;;  %10570 = vmatprep.subr.bf16.mxu1 %v12633_v21  ;;  %v446_v20 = vld [vmem:[#allocation5 + $0xbc0] sm:$0xff]  ;;  %v435_v21 = vld [vmem:[#allocation5 + $0xb68] sm:$0xff] }
 0x25e   :  { %v12775_v27 = vcombine.high %v434_v19, %v446_v20  ;;  %v12774_v39 = vcombine.low %v434_v19, %v446_v20  ;;  %v12776_v40 = vcombine.low %v435_v21, %v447_v53  ;;  %v567_v19 = vld [vmem:[#allocation5 + $0xf88] sm:$0xff] }
 0x260   :  { %10359 = vmatpush1.bf16.msra.mxu0 %v12630_v28  ;;  %10571 = vmatpush1.bf16.msra.mxu1 %v12632_v33  ;;  %v12777_v28 = vcombine.high %v435_v21, %v447_v53  ;;  %v458_v33 = vld [vmem:[#allocation5 + $0xc20] sm:$0xff] }
 0x261   :  { %10360 = vmatprep.subr.bf16.mxu0 %v12655_v36  ;;  %10572 = vmatprep.subr.bf16.mxu1 %v12657_v47  ;;  %v470_v36 = vld [vmem:[#allocation5 + $0xc80] sm:$0xff]  ;;  %v459_v47 = vld [vmem:[#allocation5 + $0xc28] sm:$0xff] }
 0x262   :  { %v12799_v41 = vcombine.high %v458_v33, %v470_v36  ;;  %v12798_v52 = vcombine.low %v458_v33, %v470_v36  ;;  %v12800_v55 = vcombine.low %v459_v47, %v471_v38  ;;  %v591_v33 = vld [vmem:[#allocation5 + $0x1048] sm:$0xff] }
 0x264   :  { %10361 = vmatpush1.bf16.msra.mxu0 %v12654_v49  ;;  %10573 = vmatpush1.bf16.msra.mxu1 %v12656_v46  ;;  %v12801_v49 = vcombine.high %v459_v47, %v471_v38  ;;  %v482_v46 = vld [vmem:[#allocation5 + $0xce0] sm:$0xff] }
 0x265   :  { %10362 = vmatprep.subr.bf16.mxu0 %v12679_v35  ;;  %10574 = vmatprep.subr.bf16.mxu1 %v12681_v48  ;;  %v494_v35 = vld [vmem:[#allocation5 + $0xd40] sm:$0xff]  ;;  %v483_v48 = vld [vmem:[#allocation5 + $0xce8] sm:$0xff] }
 0x266   :  { %v12823_v23 = vcombine.high %v482_v46, %v494_v35  ;;  %v12822_v60 = vcombine.low %v482_v46, %v494_v35  ;;  %v12824_v6 = vcombine.low %v483_v48, %v495_v51  ;;  %v615_v46 = vld [vmem:[#allocation5 + $0x1108] sm:$0xff] }
 0x268   :  { %10363 = vmatpush1.bf16.msra.mxu0 %v12678_v61  ;;  %10575 = vmatpush1.bf16.msra.mxu1 %v12680_v62  ;;  %v12825_v61 = vcombine.high %v483_v48, %v495_v51  ;;  %v506_v62 = vld [vmem:[#allocation5 + $0xda0] sm:$0xff] }
 0x269   :  { %10364 = vmatprep.subr.bf16.mxu0 %v12703_v63  ;;  %10576 = vmatprep.subr.bf16.mxu1 %v12705_v5  ;;  %v518_v63 = vld [vmem:[#allocation5 + $0xe00] sm:$0xff]  ;;  %v507_v5 = vld [vmem:[#allocation5 + $0xda8] sm:$0xff] }
 0x26a   :  { %v12847_v0 = vcombine.high %v506_v62, %v518_v63  ;;  %v12846_v11 = vcombine.low %v506_v62, %v518_v63  ;;  %v12848_v13 = vcombine.low %v507_v5, %v519_v24  ;;  %v639_v62 = vld [vmem:[#allocation5 + $0x11c8] sm:$0xff] }
 0x26c   :  { %10365 = vmatpush1.bf16.msra.mxu0 %v12702_v4  ;;  %10577 = vmatpush1.bf16.msra.mxu1 %v12704_v7  ;;  %v12849_v4 = vcombine.high %v507_v5, %v519_v24  ;;  %v530_v7 = vld [vmem:[#allocation5 + $0xe60] sm:$0xff] }
 0x26d   :  { %10366 = vmatprep.subr.bf16.mxu0 %v12727_v8  ;;  %10578 = vmatprep.subr.bf16.mxu1 %v12729_v9  ;;  %v542_v8 = vld [vmem:[#allocation5 + $0xec0] sm:$0xff]  ;;  %v531_v9 = vld [vmem:[#allocation5 + $0xe68] sm:$0xff] }
 0x26e   :  { %v12871_v57 = vcombine.high %v530_v7, %v542_v8  ;;  %v12870_v20 = vcombine.low %v530_v7, %v542_v8  ;;  %v12872_v21 = vcombine.low %v531_v9, %v543_v10  ;;  %v663_v7 = vld [vmem:[#allocation5 + $0x1288] sm:$0xff] }
 0x270   :  { %10367 = vmatpush1.bf16.msra.mxu0 %v12726_v59  ;;  %10579 = vmatpush1.bf16.msra.mxu1 %v12728_v16  ;;  %v12873_v59 = vcombine.high %v531_v9, %v543_v10  ;;  %v554_v16 = vld [vmem:[#allocation5 + $0xf20] sm:$0xff] }
 0x271   :  { %10368 = vmatprep.subr.bf16.mxu0 %v12751_v17  ;;  %10580 = vmatprep.subr.bf16.mxu1 %v12753_v18  ;;  %v566_v17 = vld [vmem:[#allocation5 + $0xf80] sm:$0xff]  ;;  %v555_v18 = vld [vmem:[#allocation5 + $0xf28] sm:$0xff] }
 0x272   :  { %v12895_v53 = vcombine.high %v554_v16, %v566_v17  ;;  %v12894_v36 = vcombine.low %v554_v16, %v566_v17  ;;  %v12896_v47 = vcombine.low %v555_v18, %v567_v19  ;;  %v687_v16 = vld [vmem:[#allocation5 + $0x1348] sm:$0xff] }
 0x274   :  { %10369 = vmatpush1.bf16.msra.mxu0 %v12750_v54  ;;  %10581 = vmatpush1.bf16.msra.mxu1 %v12752_v44  ;;  %v12897_v54 = vcombine.high %v555_v18, %v567_v19  ;;  %v578_v44 = vld [vmem:[#allocation5 + $0xfe0] sm:$0xff] }
 0x275   :  { %10370 = vmatprep.subr.bf16.mxu0 %v12775_v27  ;;  %10582 = vmatprep.subr.bf16.mxu1 %v12777_v28  ;;  %v590_v27 = vld [vmem:[#allocation5 + $0x1040] sm:$0xff]  ;;  %v579_v28 = vld [vmem:[#allocation5 + $0xfe8] sm:$0xff] }
 0x276   :  { %v12919_v38 = vcombine.high %v578_v44, %v590_v27  ;;  %v12918_v35 = vcombine.low %v578_v44, %v590_v27  ;;  %v12920_v48 = vcombine.low %v579_v28, %v591_v33  ;;  %v711_v44 = vld [vmem:[#allocation5 + $0x1408] sm:$0xff] }
 0x278   :  { %10371 = vmatpush1.bf16.msra.mxu0 %v12774_v39  ;;  %10583 = vmatpush1.bf16.msra.mxu1 %v12776_v40  ;;  %v12921_v39 = vcombine.high %v579_v28, %v591_v33  ;;  %v602_v40 = vld [vmem:[#allocation5 + $0x10a0] sm:$0xff] }
 0x279   :  { %10393 = vmatprep.subr.bf16.mxu0 %v12799_v41  ;;  %10605 = vmatprep.subr.bf16.mxu1 %v12801_v49  ;;  %v614_v41 = vld [vmem:[#allocation5 + $0x1100] sm:$0xff]  ;;  %v603_v49 = vld [vmem:[#allocation5 + $0x10a8] sm:$0xff] }
 0x27a   :  { %v12943_v51 = vcombine.high %v602_v40, %v614_v41  ;;  %v12942_v63 = vcombine.low %v602_v40, %v614_v41  ;;  %v12944_v5 = vcombine.low %v603_v49, %v615_v46  ;;  %v735_v40 = vld [vmem:[#allocation5 + $0x14c8] sm:$0xff] }
 0x27b   :  { %10373 = vmatmul.mubr.bf16.vlgmr.msra.gmra.mrb[16].mxu0 %v14605_v15  ;;  %10585 = vmatmul.mubr.bf16.vlgmr.msra.gmra.mrb[16].mxu1 %v14605_v15 }
 0x27c   :  { %10394 = vmatpush1.bf16.msra.mxu0 %v12798_v52  ;;  %10606 = vmatpush1.bf16.msra.mxu1 %v12800_v55  ;;  %v12945_v52 = vcombine.high %v603_v49, %v615_v46  ;;  %v626_v55 = vld [vmem:[#allocation5 + $0x1160] sm:$0xff] }
 0x27d   :  { %10395 = vmatprep.subr.bf16.mxu0 %v12823_v23  ;;  %10607 = vmatprep.subr.bf16.mxu1 %v12825_v61  ;;  %v638_v23 = vld [vmem:[#allocation5 + $0x11c0] sm:$0xff]  ;;  %v627_v61 = vld [vmem:[#allocation5 + $0x1168] sm:$0xff] }
 0x27e   :  { %10382 = vmatprep.mubr.bf16.mxu0 %v14607_v25  ;;  %10594 = vmatprep.mubr.bf16.mxu1 %v14607_v25  ;;  %v12967_v24 = vcombine.high %v626_v55, %v638_v23  ;;  %v12966_v8 = vcombine.low %v626_v55, %v638_v23  ;;  %v12968_v9 = vcombine.low %v627_v61, %v639_v62  ;;  %v759_v55 = vld [vmem:[#allocation5 + $0x1588] sm:$0xff] }
 0x280   :  { %10396 = vmatpush1.bf16.msra.mxu0 %v12822_v60  ;;  %10608 = vmatpush1.bf16.msra.mxu1 %v12824_v6  ;;  %v12969_v60 = vcombine.high %v627_v61, %v639_v62  ;;  %v650_v6 = vld [vmem:[#allocation5 + $0x1220] sm:$0xff] }
 0x281   :  { %10397 = vmatprep.subr.bf16.mxu0 %v12847_v0  ;;  %10609 = vmatprep.subr.bf16.mxu1 %v12849_v4  ;;  %v662_v0 = vld [vmem:[#allocation5 + $0x1280] sm:$0xff]  ;;  %v651_v4 = vld [vmem:[#allocation5 + $0x1228] sm:$0xff] }
 0x282   :  { %v12991_v10 = vcombine.high %v650_v6, %v662_v0  ;;  %v12990_v17 = vcombine.low %v650_v6, %v662_v0  ;;  %v12992_v18 = vcombine.low %v651_v4, %v663_v7  ;;  %v783_v6 = vld [vmem:[#allocation5 + $0x1648] sm:$0xff] }
 0x283   :  { %10383 = vmatmul.mubr.bf16.gmra.mrb[20].mxu0 %v14613_v34  ;;  %10595 = vmatmul.mubr.bf16.gmra.mrb[20].mxu1 %v14613_v34 }
 0x284   :  { %10398 = vmatpush1.bf16.msra.mxu0 %v12846_v11  ;;  %10610 = vmatpush1.bf16.msra.mxu1 %v12848_v13  ;;  %v12993_v11 = vcombine.high %v651_v4, %v663_v7  ;;  %v674_v13 = vld [vmem:[#allocation5 + $0x12e0] sm:$0xff] }
 0x285   :  { %10399 = vmatprep.subr.bf16.mxu0 %v12871_v57  ;;  %10611 = vmatprep.subr.bf16.mxu1 %v12873_v59  ;;  %v686_v57 = vld [vmem:[#allocation5 + $0x1340] sm:$0xff]  ;;  %v675_v59 = vld [vmem:[#allocation5 + $0x12e8] sm:$0xff] }
 0x286   :  { %10425 = vmatprep.mubr.bf16.mxu0 %v14621_v43  ;;  %10637 = vmatprep.mubr.bf16.mxu1 %v14621_v43  ;;  %v13015_v19 = vcombine.high %v674_v13, %v686_v57  ;;  %v13014_v27 = vcombine.low %v674_v13, %v686_v57  ;;  %v13016_v28 = vcombine.low %v675_v59, %v687_v16  ;;  %v807_v13 = vld [vmem:[#allocation5 + $0x1708] sm:$0xff] }
 0x288   :  { %10400 = vmatpush1.bf16.msra.mxu0 %v12870_v20  ;;  %10612 = vmatpush1.bf16.msra.mxu1 %v12872_v21  ;;  %v13017_v20 = vcombine.high %v675_v59, %v687_v16  ;;  %v698_v21 = vld [vmem:[#allocation5 + $0x13a0] sm:$0xff] }
 0x289   :  { %10401 = vmatprep.subr.bf16.mxu0 %v12895_v53  ;;  %10613 = vmatprep.subr.bf16.mxu1 %v12897_v54  ;;  %v710_v53 = vld [vmem:[#allocation5 + $0x1400] sm:$0xff]  ;;  %v699_v54 = vld [vmem:[#allocation5 + $0x13a8] sm:$0xff] }
 0x28a   :  { %v13039_v33 = vcombine.high %v698_v21, %v710_v53  ;;  %v13038_v41 = vcombine.low %v698_v21, %v710_v53  ;;  %v13040_v49 = vcombine.low %v699_v54, %v711_v44  ;;  %v831_v21 = vld [vmem:[#allocation5 + $0x17c8] sm:$0xff] }
 0x28c   :  { %10402 = vmatpush1.bf16.msra.mxu0 %v12894_v36  ;;  %10614 = vmatpush1.bf16.msra.mxu1 %v12896_v47  ;;  %v13041_v36 = vcombine.high %v699_v54, %v711_v44  ;;  %v722_v47 = vld [vmem:[#allocation5 + $0x1460] sm:$0xff] }
 0x28d   :  { %10403 = vmatprep.subr.bf16.mxu0 %v12919_v38  ;;  %10615 = vmatprep.subr.bf16.mxu1 %v12921_v39  ;;  %v734_v38 = vld [vmem:[#allocation5 + $0x14c0] sm:$0xff]  ;;  %v723_v39 = vld [vmem:[#allocation5 + $0x1468] sm:$0xff] }
 0x28e   :  { %v13063_v46 = vcombine.high %v722_v47, %v734_v38  ;;  %v13062_v23 = vcombine.low %v722_v47, %v734_v38  ;;  %v13064_v61 = vcombine.low %v723_v39, %v735_v40  ;;  %v855_v47 = vld [vmem:[#allocation5 + $0x1888] sm:$0xff] }
 0x290   :  { %10404 = vmatpush1.bf16.msra.mxu0 %v12918_v35  ;;  %10616 = vmatpush1.bf16.msra.mxu1 %v12920_v48  ;;  %v13065_v35 = vcombine.high %v723_v39, %v735_v40  ;;  %v746_v48 = vld [vmem:[#allocation5 + $0x1520] sm:$0xff] }
 0x291   :  { %10405 = vmatprep.subr.bf16.mxu0 %v12943_v51  ;;  %10617 = vmatprep.subr.bf16.mxu1 %v12945_v52  ;;  %v758_v51 = vld [vmem:[#allocation5 + $0x1580] sm:$0xff]  ;;  %v747_v52 = vld [vmem:[#allocation5 + $0x1528] sm:$0xff] }
 0x292   :  { %v13087_v62 = vcombine.high %v746_v48, %v758_v51  ;;  %v13086_v0 = vcombine.low %v746_v48, %v758_v51  ;;  %v13088_v4 = vcombine.low %v747_v52, %v759_v55  ;;  %v879_v48 = vld [vmem:[#allocation5 + $0x1948] sm:$0xff] }
 0x294   :  { %10406 = vmatpush1.bf16.msra.mxu0 %v12942_v63  ;;  %10618 = vmatpush1.bf16.msra.mxu1 %v12944_v5  ;;  %v13089_v63 = vcombine.high %v747_v52, %v759_v55  ;;  %v770_v5 = vld [vmem:[#allocation5 + $0x15e0] sm:$0xff] }
 0x295   :  { %10407 = vmatprep.subr.bf16.mxu0 %v12967_v24  ;;  %10619 = vmatprep.subr.bf16.mxu1 %v12969_v60  ;;  %v782_v24 = vld [vmem:[#allocation5 + $0x1640] sm:$0xff]  ;;  %v771_v60 = vld [vmem:[#allocation5 + $0x15e8] sm:$0xff] }
 0x296   :  { %v13111_v7 = vcombine.high %v770_v5, %v782_v24  ;;  %v13110_v57 = vcombine.low %v770_v5, %v782_v24  ;;  %v13112_v59 = vcombine.low %v771_v60, %v783_v6  ;;  %v903_v5 = vld [vmem:[#allocation5 + $0x1a08] sm:$0xff] }
 0x298   :  { %10408 = vmatpush1.bf16.msra.mxu0 %v12966_v8  ;;  %10620 = vmatpush1.bf16.msra.mxu1 %v12968_v9  ;;  %v13113_v8 = vcombine.high %v771_v60, %v783_v6  ;;  %v794_v9 = vld [vmem:[#allocation5 + $0x16a0] sm:$0xff] }
 0x299   :  { %10409 = vmatprep.subr.bf16.mxu0 %v12991_v10  ;;  %10621 = vmatprep.subr.bf16.mxu1 %v12993_v11  ;;  %v806_v10 = vld [vmem:[#allocation5 + $0x1700] sm:$0xff]  ;;  %v795_v11 = vld [vmem:[#allocation5 + $0x16a8] sm:$0xff] }
 0x29a   :  { %v13135_v16 = vcombine.high %v794_v9, %v806_v10  ;;  %v13134_v53 = vcombine.low %v794_v9, %v806_v10  ;;  %v13136_v54 = vcombine.low %v795_v11, %v807_v13  ;;  %v927_v9 = vld [vmem:[#allocation5 + $0x1ac8] sm:$0xff] }
 0x29c   :  { %10410 = vmatpush1.bf16.msra.mxu0 %v12990_v17  ;;  %10622 = vmatpush1.bf16.msra.mxu1 %v12992_v18  ;;  %v13137_v17 = vcombine.high %v795_v11, %v807_v13  ;;  %v818_v18 = vld [vmem:[#allocation5 + $0x1760] sm:$0xff] }
 0x29d   :  { %10411 = vmatprep.subr.bf16.mxu0 %v13015_v19  ;;  %10623 = vmatprep.subr.bf16.mxu1 %v13017_v20  ;;  %v830_v19 = vld [vmem:[#allocation5 + $0x17c0] sm:$0xff]  ;;  %v819_v20 = vld [vmem:[#allocation5 + $0x1768] sm:$0xff] }
 0x29e   :  { %v13159_v44 = vcombine.high %v818_v18, %v830_v19  ;;  %v13158_v38 = vcombine.low %v818_v18, %v830_v19  ;;  %v13160_v39 = vcombine.low %v819_v20, %v831_v21  ;;  %v951_v18 = vld [vmem:[#allocation5 + $0x1b88] sm:$0xff] }
 0x2a0   :  { %10412 = vmatpush1.bf16.msra.mxu0 %v13014_v27  ;;  %10624 = vmatpush1.bf16.msra.mxu1 %v13016_v28  ;;  %v13161_v27 = vcombine.high %v819_v20, %v831_v21  ;;  %v842_v28 = vld [vmem:[#allocation5 + $0x1820] sm:$0xff] }
 0x2a1   :  { %10413 = vmatprep.subr.bf16.mxu0 %v13039_v33  ;;  %10625 = vmatprep.subr.bf16.mxu1 %v13041_v36  ;;  %v854_v33 = vld [vmem:[#allocation5 + $0x1880] sm:$0xff]  ;;  %v843_v36 = vld [vmem:[#allocation5 + $0x1828] sm:$0xff] }
 0x2a2   :  { %v13183_v40 = vcombine.high %v842_v28, %v854_v33  ;;  %v13182_v51 = vcombine.low %v842_v28, %v854_v33  ;;  %v13184_v52 = vcombine.low %v843_v36, %v855_v47  ;;  %v975_v28 = vld [vmem:[#allocation5 + $0x1c48] sm:$0xff] }
 0x2a4   :  { %10414 = vmatpush1.bf16.msra.mxu0 %v13038_v41  ;;  %10626 = vmatpush1.bf16.msra.mxu1 %v13040_v49  ;;  %v13185_v41 = vcombine.high %v843_v36, %v855_v47  ;;  %v866_v49 = vld [vmem:[#allocation5 + $0x18e0] sm:$0xff] }
 0x2a5   :  { %10415 = vmatprep.subr.bf16.mxu0 %v13063_v46  ;;  %10627 = vmatprep.subr.bf16.mxu1 %v13065_v35  ;;  %v878_v46 = vld [vmem:[#allocation5 + $0x1940] sm:$0xff]  ;;  %v867_v35 = vld [vmem:[#allocation5 + $0x18e8] sm:$0xff] }
 0x2a6   :  { %v13207_v55 = vcombine.high %v866_v49, %v878_v46  ;;  %v13206_v24 = vcombine.low %v866_v49, %v878_v46  ;;  %v13208_v60 = vcombine.low %v867_v35, %v879_v48  ;;  %v999_v49 = vld [vmem:[#allocation5 + $0x1d08] sm:$0xff] }
 0x2a8   :  { %10416 = vmatpush1.bf16.msra.mxu0 %v13062_v23  ;;  %10628 = vmatpush1.bf16.msra.mxu1 %v13064_v61  ;;  %v13209_v23 = vcombine.high %v867_v35, %v879_v48  ;;  %v890_v61 = vld [vmem:[#allocation5 + $0x19a0] sm:$0xff] }
 0x2a9   :  { %10417 = vmatprep.subr.bf16.mxu0 %v13087_v62  ;;  %10629 = vmatprep.subr.bf16.mxu1 %v13089_v63  ;;  %v902_v62 = vld [vmem:[#allocation5 + $0x1a00] sm:$0xff]  ;;  %v891_v63 = vld [vmem:[#allocation5 + $0x19a8] sm:$0xff] }
 0x2aa   :  { %v13231_v6 = vcombine.high %v890_v61, %v902_v62  ;;  %v13230_v10 = vcombine.low %v890_v61, %v902_v62  ;;  %v13232_v11 = vcombine.low %v891_v63, %v903_v5  ;;  %v1023_v61 = vld [vmem:[#allocation5 + $0x1dc8] sm:$0xff] }
 0x2ac   :  { %10418 = vmatpush1.bf16.msra.mxu0 %v13086_v0  ;;  %10630 = vmatpush1.bf16.msra.mxu1 %v13088_v4  ;;  %v13233_v0 = vcombine.high %v891_v63, %v903_v5  ;;  %v914_v4 = vld [vmem:[#allocation5 + $0x1a60] sm:$0xff] }
 0x2ad   :  { %10419 = vmatprep.subr.bf16.mxu0 %v13111_v7  ;;  %10631 = vmatprep.subr.bf16.mxu1 %v13113_v8  ;;  %v926_v7 = vld [vmem:[#allocation5 + $0x1ac0] sm:$0xff]  ;;  %v915_v8 = vld [vmem:[#allocation5 + $0x1a68] sm:$0xff] }
 0x2ae   :  { %v13255_v13 = vcombine.high %v914_v4, %v926_v7  ;;  %v13254_v19 = vcombine.low %v914_v4, %v926_v7  ;;  %v13256_v20 = vcombine.low %v915_v8, %v927_v9  ;;  %v1047_v4 = vld [vmem:[#allocation5 + $0x1e88] sm:$0xff] }
 0x2b0   :  { %10420 = vmatpush1.bf16.msra.mxu0 %v13110_v57  ;;  %10632 = vmatpush1.bf16.msra.mxu1 %v13112_v59  ;;  %v13257_v57 = vcombine.high %v915_v8, %v927_v9  ;;  %v938_v59 = vld [vmem:[#allocation5 + $0x1b20] sm:$0xff] }
 0x2b1   :  { %10421 = vmatprep.subr.bf16.mxu0 %v13135_v16  ;;  %10633 = vmatprep.subr.bf16.mxu1 %v13137_v17  ;;  %v950_v16 = vld [vmem:[#allocation5 + $0x1b80] sm:$0xff]  ;;  %v939_v17 = vld [vmem:[#allocation5 + $0x1b28] sm:$0xff] }
 0x2b2   :  { %v13279_v21 = vcombine.high %v938_v59, %v950_v16  ;;  %v13278_v33 = vcombine.low %v938_v59, %v950_v16  ;;  %v13280_v36 = vcombine.low %v939_v17, %v951_v18  ;;  %v1071_v59 = vld [vmem:[#allocation5 + $0x1f48] sm:$0xff] }
 0x2b4   :  { %10422 = vmatpush1.bf16.msra.mxu0 %v13134_v53  ;;  %10634 = vmatpush1.bf16.msra.mxu1 %v13136_v54  ;;  %v13281_v53 = vcombine.high %v939_v17, %v951_v18  ;;  %v962_v54 = vld [vmem:[#allocation5 + $0x1be0] sm:$0xff] }
 0x2b5   :  { %10423 = vmatprep.subr.bf16.mxu0 %v13159_v44  ;;  %10635 = vmatprep.subr.bf16.mxu1 %v13161_v27  ;;  %v974_v44 = vld [vmem:[#allocation5 + $0x1c40] sm:$0xff]  ;;  %v963_v27 = vld [vmem:[#allocation5 + $0x1be8] sm:$0xff] }
 0x2b6   :  { %v13303_v47 = vcombine.high %v962_v54, %v974_v44  ;;  %v13302_v46 = vcombine.low %v962_v54, %v974_v44  ;;  %v13304_v35 = vcombine.low %v963_v27, %v975_v28  ;;  %v1095_v54 = vld [vmem:[#allocation5 + $0x2008] sm:$0xff] }
 0x2b8   :  { %10424 = vmatpush1.bf16.msra.mxu0 %v13158_v38  ;;  %10636 = vmatpush1.bf16.msra.mxu1 %v13160_v39  ;;  %v13305_v38 = vcombine.high %v963_v27, %v975_v28  ;;  %v986_v39 = vld [vmem:[#allocation5 + $0x1ca0] sm:$0xff] }
 0x2b9   :  { %10446 = vmatprep.subr.bf16.mxu0 %v13183_v40  ;;  %10658 = vmatprep.subr.bf16.mxu1 %v13185_v41  ;;  %v998_v40 = vld [vmem:[#allocation5 + $0x1d00] sm:$0xff]  ;;  %v987_v41 = vld [vmem:[#allocation5 + $0x1ca8] sm:$0xff] }
 0x2ba   :  { %v13327_v48 = vcombine.high %v986_v39, %v998_v40  ;;  %v13326_v62 = vcombine.low %v986_v39, %v998_v40  ;;  %v13328_v63 = vcombine.low %v987_v41, %v999_v49  ;;  %v1119_v39 = vld [vmem:[#allocation5 + $0x20c8] sm:$0xff] }
 0x2bb   :  { %10426 = vmatmul.mubr.bf16.vlgmr.msra.gmra.mrb[16].mxu0 %v14629_v31  ;;  %10638 = vmatmul.mubr.bf16.vlgmr.msra.gmra.mrb[16].mxu1 %v14629_v31 }
 0x2bc   :  { %10447 = vmatpush1.bf16.msra.mxu0 %v13182_v51  ;;  %10659 = vmatpush1.bf16.msra.mxu1 %v13184_v52  ;;  %v13329_v51 = vcombine.high %v987_v41, %v999_v49  ;;  %v1010_v52 = vld [vmem:[#allocation5 + $0x1d60] sm:$0xff] }
 0x2bd   :  { %10448 = vmatprep.subr.bf16.mxu0 %v13207_v55  ;;  %10660 = vmatprep.subr.bf16.mxu1 %v13209_v23  ;;  %v1022_v55 = vld [vmem:[#allocation5 + $0x1dc0] sm:$0xff]  ;;  %v1011_v23 = vld [vmem:[#allocation5 + $0x1d68] sm:$0xff] }
 0x2be   :  { %10435 = vmatprep.mubr.bf16.mxu0 %v14631_v45  ;;  %10647 = vmatprep.mubr.bf16.mxu1 %v14631_v45  ;;  %v13351_v5 = vcombine.high %v1010_v52, %v1022_v55  ;;  %v13350_v7 = vcombine.low %v1010_v52, %v1022_v55  ;;  %v13352_v8 = vcombine.low %v1011_v23, %v1023_v61  ;;  %v1143_v52 = vld [vmem:[#allocation5 + $0x2188] sm:$0xff] }
 0x2c0   :  { %10449 = vmatpush1.bf16.msra.mxu0 %v13206_v24  ;;  %10661 = vmatpush1.bf16.msra.mxu1 %v13208_v60  ;;  %v13353_v24 = vcombine.high %v1011_v23, %v1023_v61  ;;  %v1034_v60 = vld [vmem:[#allocation5 + $0x1e20] sm:$0xff] }
 0x2c1   :  { %10450 = vmatprep.subr.bf16.mxu0 %v13231_v6  ;;  %10662 = vmatprep.subr.bf16.mxu1 %v13233_v0  ;;  %v1046_v6 = vld [vmem:[#allocation5 + $0x1e80] sm:$0xff]  ;;  %v1035_v0 = vld [vmem:[#allocation5 + $0x1e28] sm:$0xff] }
 0x2c2   :  { %v13375_v9 = vcombine.high %v1034_v60, %v1046_v6  ;;  %v13374_v16 = vcombine.low %v1034_v60, %v1046_v6  ;;  %v13376_v17 = vcombine.low %v1035_v0, %v1047_v4  ;;  %v1167_v60 = vld [vmem:[#allocation5 + $0x2248] sm:$0xff] }
 0x2c3   :  { %10436 = vmatmul.mubr.bf16.gmra.mrb[20].mxu0 %v14637_v56  ;;  %10648 = vmatmul.mubr.bf16.gmra.mrb[20].mxu1 %v14637_v56 }
 0x2c4   :  { %10451 = vmatpush1.bf16.msra.mxu0 %v13230_v10  ;;  %10663 = vmatpush1.bf16.msra.mxu1 %v13232_v11  ;;  %v13377_v10 = vcombine.high %v1035_v0, %v1047_v4  ;;  %v1058_v11 = vld [vmem:[#allocation5 + $0x1ee0] sm:$0xff] }
 0x2c5   :  { %10452 = vmatprep.subr.bf16.mxu0 %v13255_v13  ;;  %10664 = vmatprep.subr.bf16.mxu1 %v13257_v57  ;;  %v1070_v13 = vld [vmem:[#allocation5 + $0x1f40] sm:$0xff]  ;;  %v1059_v57 = vld [vmem:[#allocation5 + $0x1ee8] sm:$0xff] }
 0x2c6   :  { %10478 = vmatprep.mubr.bf16.mxu0 %v14645_v2  ;;  %10690 = vmatprep.mubr.bf16.mxu1 %v14645_v2  ;;  %v13399_v18 = vcombine.high %v1058_v11, %v1070_v13  ;;  %v13398_v44 = vcombine.low %v1058_v11, %v1070_v13  ;;  %v13400_v27 = vcombine.low %v1059_v57, %v1071_v59  ;;  %v1191_v11 = vld [vmem:[#allocation5 + $0x2308] sm:$0xff] }
 0x2c8   :  { %10453 = vmatpush1.bf16.msra.mxu0 %v13254_v19  ;;  %10665 = vmatpush1.bf16.msra.mxu1 %v13256_v20  ;;  %v13401_v19 = vcombine.high %v1059_v57, %v1071_v59  ;;  %v1082_v20 = vld [vmem:[#allocation5 + $0x1fa0] sm:$0xff] }
 0x2c9   :  { %10454 = vmatprep.subr.bf16.mxu0 %v13279_v21  ;;  %10666 = vmatprep.subr.bf16.mxu1 %v13281_v53  ;;  %v1094_v21 = vld [vmem:[#allocation5 + $0x2000] sm:$0xff]  ;;  %v1083_v53 = vld [vmem:[#allocation5 + $0x1fa8] sm:$0xff] }
 0x2ca   :  { %v13423_v28 = vcombine.high %v1082_v20, %v1094_v21  ;;  %v13422_v40 = vcombine.low %v1082_v20, %v1094_v21  ;;  %v13424_v41 = vcombine.low %v1083_v53, %v1095_v54  ;;  %v1215_v20 = vld [vmem:[#allocation5 + $0x23c8] sm:$0xff] }
 0x2cc   :  { %10455 = vmatpush1.bf16.msra.mxu0 %v13278_v33  ;;  %10667 = vmatpush1.bf16.msra.mxu1 %v13280_v36  ;;  %v13425_v33 = vcombine.high %v1083_v53, %v1095_v54  ;;  %v1106_v36 = vld [vmem:[#allocation5 + $0x2060] sm:$0xff] }
 0x2cd   :  { %10456 = vmatprep.subr.bf16.mxu0 %v13303_v47  ;;  %10668 = vmatprep.subr.bf16.mxu1 %v13305_v38  ;;  %v1118_v47 = vld [vmem:[#allocation5 + $0x20c0] sm:$0xff]  ;;  %v1107_v38 = vld [vmem:[#allocation5 + $0x2068] sm:$0xff] }
 0x2ce   :  { %v13447_v49 = vcombine.high %v1106_v36, %v1118_v47  ;;  %v13446_v55 = vcombine.low %v1106_v36, %v1118_v47  ;;  %v13448_v23 = vcombine.low %v1107_v38, %v1119_v39  ;;  %v1239_v36 = vld [vmem:[#allocation5 + $0x2488] sm:$0xff] }
 0x2d0   :  { %10457 = vmatpush1.bf16.msra.mxu0 %v13302_v46  ;;  %10669 = vmatpush1.bf16.msra.mxu1 %v13304_v35  ;;  %v13449_v46 = vcombine.high %v1107_v38, %v1119_v39  ;;  %v1130_v35 = vld [vmem:[#allocation5 + $0x2120] sm:$0xff] }
 0x2d1   :  { %10458 = vmatprep.subr.bf16.mxu0 %v13327_v48  ;;  %10670 = vmatprep.subr.bf16.mxu1 %v13329_v51  ;;  %v1142_v48 = vld [vmem:[#allocation5 + $0x2180] sm:$0xff]  ;;  %v1131_v51 = vld [vmem:[#allocation5 + $0x2128] sm:$0xff] }
 0x2d2   :  { %v13471_v61 = vcombine.high %v1130_v35, %v1142_v48  ;;  %v13470_v6 = vcombine.low %v1130_v35, %v1142_v48  ;;  %v13472_v0 = vcombine.low %v1131_v51, %v1143_v52  ;;  %v1263_v35 = vld [vmem:[#allocation5 + $0x2548] sm:$0xff] }
 0x2d4   :  { %10459 = vmatpush1.bf16.msra.mxu0 %v13326_v62  ;;  %10671 = vmatpush1.bf16.msra.mxu1 %v13328_v63  ;;  %v13473_v62 = vcombine.high %v1131_v51, %v1143_v52  ;;  %v1154_v63 = vld [vmem:[#allocation5 + $0x21e0] sm:$0xff] }
 0x2d5   :  { %10460 = vmatprep.subr.bf16.mxu0 %v13351_v5  ;;  %10672 = vmatprep.subr.bf16.mxu1 %v13353_v24  ;;  %v1166_v5 = vld [vmem:[#allocation5 + $0x2240] sm:$0xff]  ;;  %v1155_v24 = vld [vmem:[#allocation5 + $0x21e8] sm:$0xff] }
 0x2d6   :  { %v13495_v4 = vcombine.high %v1154_v63, %v1166_v5  ;;  %v13494_v13 = vcombine.low %v1154_v63, %v1166_v5  ;;  %v13496_v57 = vcombine.low %v1155_v24, %v1167_v60  ;;  %v1287_v63 = vld [vmem:[#allocation5 + $0x2608] sm:$0xff] }
 0x2d8   :  { %10461 = vmatpush1.bf16.msra.mxu0 %v13350_v7  ;;  %10673 = vmatpush1.bf16.msra.mxu1 %v13352_v8  ;;  %v13497_v7 = vcombine.high %v1155_v24, %v1167_v60  ;;  %v1178_v8 = vld [vmem:[#allocation5 + $0x22a0] sm:$0xff] }
 0x2d9   :  { %10462 = vmatprep.subr.bf16.mxu0 %v13375_v9  ;;  %10674 = vmatprep.subr.bf16.mxu1 %v13377_v10  ;;  %v1190_v9 = vld [vmem:[#allocation5 + $0x2300] sm:$0xff]  ;;  %v1179_v10 = vld [vmem:[#allocation5 + $0x22a8] sm:$0xff] }
 0x2da   :  { %v13519_v59 = vcombine.high %v1178_v8, %v1190_v9  ;;  %v13518_v21 = vcombine.low %v1178_v8, %v1190_v9  ;;  %v13520_v53 = vcombine.low %v1179_v10, %v1191_v11  ;;  %v1311_v8 = vld [vmem:[#allocation5 + $0x26c8] sm:$0xff] }
 0x2dc   :  { %10463 = vmatpush1.bf16.msra.mxu0 %v13374_v16  ;;  %10675 = vmatpush1.bf16.msra.mxu1 %v13376_v17  ;;  %v13521_v16 = vcombine.high %v1179_v10, %v1191_v11  ;;  %v1202_v17 = vld [vmem:[#allocation5 + $0x2360] sm:$0xff] }
 0x2dd   :  { %10464 = vmatprep.subr.bf16.mxu0 %v13399_v18  ;;  %10676 = vmatprep.subr.bf16.mxu1 %v13401_v19  ;;  %v1214_v18 = vld [vmem:[#allocation5 + $0x23c0] sm:$0xff]  ;;  %v1203_v19 = vld [vmem:[#allocation5 + $0x2368] sm:$0xff] }
 0x2de   :  { %v13543_v54 = vcombine.high %v1202_v17, %v1214_v18  ;;  %v13542_v47 = vcombine.low %v1202_v17, %v1214_v18  ;;  %v13544_v38 = vcombine.low %v1203_v19, %v1215_v20  ;;  %v1335_v17 = vld [vmem:[#allocation5 + $0x2788] sm:$0xff] }
 0x2e0   :  { %10465 = vmatpush1.bf16.msra.mxu0 %v13398_v44  ;;  %10677 = vmatpush1.bf16.msra.mxu1 %v13400_v27  ;;  %v13545_v44 = vcombine.high %v1203_v19, %v1215_v20  ;;  %v1226_v27 = vld [vmem:[#allocation5 + $0x2420] sm:$0xff] }
 0x2e1   :  { %10466 = vmatprep.subr.bf16.mxu0 %v13423_v28  ;;  %10678 = vmatprep.subr.bf16.mxu1 %v13425_v33  ;;  %v1238_v28 = vld [vmem:[#allocation5 + $0x2480] sm:$0xff]  ;;  %v1227_v33 = vld [vmem:[#allocation5 + $0x2428] sm:$0xff] }
 0x2e2   :  { %v13567_v39 = vcombine.high %v1226_v27, %v1238_v28  ;;  %v13566_v48 = vcombine.low %v1226_v27, %v1238_v28  ;;  %v13568_v51 = vcombine.low %v1227_v33, %v1239_v36  ;;  %v1347_v27 = vld [vmem:[#allocation5 + $0x27e8] sm:$0xff] }
 0x2e3   :  { %v1359_v28 = vld [vmem:[#allocation5 + $0x2848] sm:$0xff] }
 0x2e4   :  { %10467 = vmatpush1.bf16.msra.mxu0 %v13422_v40  ;;  %10679 = vmatpush1.bf16.msra.mxu1 %v13424_v41  ;;  %v13569_v40 = vcombine.high %v1227_v33, %v1239_v36  ;;  %v1250_v41 = vld [vmem:[#allocation5 + $0x24e0] sm:$0xff]  ;;  %v14793_v36 = vsub.s32 6, %v14711_v14 }
 0x2e5   :  { %10468 = vmatprep.subr.bf16.mxu0 %v13447_v49  ;;  %10680 = vmatprep.subr.bf16.mxu1 %v13449_v46  ;;  %v1262_v49 = vld [vmem:[#allocation5 + $0x2540] sm:$0xff]  ;;  %v1251_v46 = vld [vmem:[#allocation5 + $0x24e8] sm:$0xff] }
 0x2e6   :  { %v13591_v52 = vcombine.high %v1250_v41, %v1262_v49  ;;  %v13590_v5 = vcombine.low %v1250_v41, %v1262_v49  ;;  %v13592_v24 = vcombine.low %v1251_v46, %v1263_v35  ;;  %v13689_v41 = vcombine.high %v1347_v27, %v1359_v28  ;;  %v1370_v49 = vld [vmem:[#allocation5 + $0x28a0] sm:$0xff] }
 0x2e8   :  { %10469 = vmatpush1.bf16.msra.mxu0 %v13446_v55  ;;  %10681 = vmatpush1.bf16.msra.mxu1 %v13448_v23  ;;  %v13593_v55 = vcombine.high %v1251_v46, %v1263_v35  ;;  %v1274_v23 = vld [vmem:[#allocation5 + $0x25a0] sm:$0xff] }
 0x2e9   :  { %10470 = vmatprep.subr.bf16.mxu0 %v13471_v61  ;;  %10682 = vmatprep.subr.bf16.mxu1 %v13473_v62  ;;  %v1286_v61 = vld [vmem:[#allocation5 + $0x2600] sm:$0xff]  ;;  %v1275_v62 = vld [vmem:[#allocation5 + $0x25a8] sm:$0xff] }
 0x2ea   :  { %v13615_v60 = vcombine.high %v1274_v23, %v1286_v61  ;;  %v13614_v9 = vcombine.low %v1274_v23, %v1286_v61  ;;  %v13616_v10 = vcombine.low %v1275_v62, %v1287_v63  ;;  %v1382_v46 = vld [vmem:[#allocation5 + $0x2900] sm:$0xff] }
 0x2eb   :  { %v14430_v35 = vld [vmem:[#allocation7] sm:$0xff] }
 0x2ec   :  { %10471 = vmatpush1.bf16.msra.mxu0 %v13470_v6  ;;  %10683 = vmatpush1.bf16.msra.mxu1 %v13472_v0  ;;  %v13617_v6 = vcombine.high %v1275_v62, %v1287_v63  ;;  %v1298_v0 = vld [vmem:[#allocation5 + $0x2660] sm:$0xff]  ;;  %v13688_v62 = vcombine.low %v1347_v27, %v1359_v28  ;;  %v13711_v63 = vcombine.high %v1370_v49, %v1382_v46 }
 0x2ed   :  { %10472 = vmatprep.subr.bf16.mxu0 %v13495_v4  ;;  %10684 = vmatprep.subr.bf16.mxu1 %v13497_v7  ;;  %v1310_v4 = vld [vmem:[#allocation5 + $0x26c0] sm:$0xff]  ;;  %v1299_v7 = vld [vmem:[#allocation5 + $0x2668] sm:$0xff] }
 0x2ee   :  { %v13639_v11 = vcombine.high %v1298_v0, %v1310_v4  ;;  %v13638_v18 = vcombine.low %v1298_v0, %v1310_v4  ;;  %v13640_v19 = vcombine.low %v1299_v7, %v1311_v8 }
 0x2f0   :  { %10473 = vmatpush1.bf16.msra.mxu0 %v13494_v13  ;;  %10685 = vmatpush1.bf16.msra.mxu1 %v13496_v57  ;;  %v13641_v13 = vcombine.high %v1299_v7, %v1311_v8  ;;  %v1322_v57 = vld [vmem:[#allocation5 + $0x2720] sm:$0xff]  ;;  %v1395_v8 = vld [vmem:[#allocation5 + $0x2968] sm:$0xff] }
 0x2f1   :  { %10474 = vmatprep.subr.bf16.mxu0 %v13519_v59  ;;  %10686 = vmatprep.subr.bf16.mxu1 %v13521_v16  ;;  %v1334_v59 = vld [vmem:[#allocation5 + $0x2780] sm:$0xff]  ;;  %v1323_v16 = vld [vmem:[#allocation5 + $0x2728] sm:$0xff] }
 0x2f2   :  { %v13663_v20 = vcombine.high %v1322_v57, %v1334_v59  ;;  %v13662_v33 = vcombine.low %v1322_v57, %v1334_v59  ;;  %v13710_v59 = vcombine.low %v1370_v49, %v1382_v46  ;;  %v1419_v46 = vld [vmem:[#allocation5 + $0x2a28] sm:$0xff] }
 0x2f4   :  { %10475 = vmatpush1.bf16.msra.mxu0 %v13518_v21  ;;  %10687 = vmatpush1.bf16.msra.mxu1 %v13520_v53  ;;  %v13665_v21 = vcombine.high %v1323_v16, %v1335_v17  ;;  %v1346_v53 = vld [vmem:[#allocation5 + $0x27e0] sm:$0xff] }
 0x2f5   :  { %10476 = vmatprep.subr.bf16.mxu0 %v13543_v54  ;;  %10688 = vmatprep.subr.bf16.mxu1 %v13545_v44  ;;  %v1358_v54 = vld [vmem:[#allocation5 + $0x2840] sm:$0xff]  ;;  %v14789_v44 = vsub.s32 4, %v14711_v14 }
 0x2f8   :  { %10477 = vmatpush1.bf16.msra.mxu0 %v13542_v47  ;;  %10689 = vmatpush1.bf16.msra.mxu1 %v13544_v38  ;;  %v14796_v47 = vsub.s32 5, %v14711_v14  ;;  %v13664_v38 = vcombine.low %v1323_v16, %v1335_v17 }
 0x2f9   :  { %10499 = vmatprep.subr.bf16.mxu0 %v13567_v39  ;;  %10711 = vmatprep.subr.bf16.mxu1 %v13569_v40  ;;  %v14799_v39 = vsub.s32 7, %v14711_v14  ;;  %v13687_v40 = vcombine.high %v1346_v53, %v1358_v54  ;;  %v13686_v14 = vcombine.low %v1346_v53, %v1358_v54 }
 0x2fa   :  { %v14808_v23 = vrot.slane %v14430_v35, %v14796_v47 }
 0x2fb   :  { %10479 = vmatmul.mubr.bf16.vlgmr.msra.gmra.mrb[16].mxu0 %v14653_v1  ;;  %10691 = vmatmul.mubr.bf16.vlgmr.msra.gmra.mrb[16].mxu1 %v14653_v1  ;;  %v14811_v61 = vrot.slane %v14430_v35, %v14799_v39 }
 0x2fc   :  { %10500 = vmatpush1.bf16.msra.mxu0 %v13566_v48  ;;  %10712 = vmatpush1.bf16.msra.mxu1 %v13568_v51  ;;  %v14802_v48 = vrot.slane %v14430_v35, %v14789_v44  ;;  %v1371_v51 = vld [vmem:[#allocation5 + $0x28a8] sm:$0xff] }
 0x2fd   :  { %10501 = vmatprep.subr.bf16.mxu0 %v13591_v52  ;;  %10713 = vmatprep.subr.bf16.mxu1 %v13593_v55  ;;  %v1383_v52 = vld [vmem:[#allocation5 + $0x2908] sm:$0xff]  ;;  %v14805_v55 = vrot.slane %v14430_v35, %v14793_v36 }
 0x2fe   :  { %10488 = vmatprep.mubr.bf16.mxu0 %v14655_v12  ;;  %10700 = vmatprep.mubr.bf16.mxu1 %v14655_v12  ;;  %v13712_v16 = vcombine.low %v1371_v51, %v1383_v52  ;;  %v1431_v35 = vld [vmem:[#allocation5 + $0x2a88] sm:$0xff] }
 0x300   :  { %10502 = vmatpush1.bf16.msra.mxu0 %v13590_v5  ;;  %10714 = vmatpush1.bf16.msra.mxu1 %v13592_v24  ;;  %v13713_v24 = vcombine.high %v1371_v51, %v1383_v52 }
 0x301   :  { %10503 = vmatprep.subr.bf16.mxu0 %v13615_v60  ;;  %10715 = vmatprep.subr.bf16.mxu1 %v13617_v6  ;;  %v1394_v60 = vld [vmem:[#allocation5 + $0x2960] sm:$0xff] }
 0x302   :  { %v1406_v6 = vld [vmem:[#allocation5 + $0x29c0] sm:$0xff] }
 0x303   :  { %10489 = vmatmul.mubr.bf16.gmra.mrb[20].mxu0 %v14661_v22  ;;  %10701 = vmatmul.mubr.bf16.gmra.mrb[20].mxu1 %v14661_v22  ;;  %v13734_v52 = vcombine.low %v1394_v60, %v1406_v6 }
 0x304   :  { %10504 = vmatpush1.bf16.msra.mxu0 %v13614_v9  ;;  %10716 = vmatpush1.bf16.msra.mxu1 %v13616_v10  ;;  %v1407_v9 = vld [vmem:[#allocation5 + $0x29c8] sm:$0xff] }
 0x305   :  { %10505 = vmatprep.subr.bf16.mxu0 %v13639_v11  ;;  %10717 = vmatprep.subr.bf16.mxu1 %v13641_v13 }
 0x306   :  { %10531 = vmatprep.mubr.bf16.mxu0 %v14669_v30  ;;  %10743 = vmatprep.mubr.bf16.mxu1 %v14669_v30 }
 0x308   :  { %10506 = vmatpush1.bf16.msra.mxu0 %v13638_v18  ;;  %10718 = vmatpush1.bf16.msra.mxu1 %v13640_v19 }
 0x309   :  { %10507 = vmatprep.subr.bf16.mxu0 %v13663_v20  ;;  %10719 = vmatprep.subr.bf16.mxu1 %v13665_v21  ;;  %v13735_v21 = vcombine.high %v1394_v60, %v1406_v6 }
 0x30c   :  { %10508 = vmatpush1.bf16.msra.mxu0 %v13662_v33  ;;  %10720 = vmatpush1.bf16.msra.mxu1 %v13664_v38  ;;  %v13737_v33 = vcombine.high %v1395_v8, %v1407_v9  ;;  %v1418_v38 = vld [vmem:[#allocation5 + $0x2a20] sm:$0xff] }
 0x30d   :  { %10509 = vmatprep.subr.bf16.mxu0 %v13687_v40  ;;  %10721 = vmatprep.subr.bf16.mxu1 %v13689_v41  ;;  %v1430_v40 = vld [vmem:[#allocation5 + $0x2a80] sm:$0xff] }
 0x30e   :  { %v10109_v5 = vpop.f32.mrb[8].mxu0  ;;  %v10321_v4 = vpop.f32.mrb[8].mxu1 }
 0x30f   :  { %v14054_v0 = vadd.f32 %v10109_v5, %v14802_v48  ;;  %v10111_v7 = vpop.f32.mrb[9].mxu0  ;;  %v14062_v10 = vadd.f32 %v10321_v4, %v14805_v55  ;;  %v10323_v13 = vpop.f32.mrb[9].mxu1  ;;  %v1454_v4 = vld [vmem:[#allocation5 + $0x2b40] sm:$0xff] }
 0x310   :  { %v14055_v11 = vadd.f32 %v10111_v7, %v14808_v23  ;;  %v10113_v57 = vpop.f32.mrb[10].mxu0  ;;  %10510 = vmatpush1.bf16.msra.mxu0 %v13686_v14  ;;  %v14063_v17 = vadd.f32 %v10323_v13, %v14811_v61  ;;  %v10325_v19 = vpop.f32.mrb[10].mxu1  ;;  %10722 = vmatpush1.bf16.msra.mxu1 %v13688_v62  ;;  %v13736_v62 = vcombine.low %v1395_v8, %v1407_v9  ;;  %v1443_v13 = vld [vmem:[#allocation5 + $0x2ae8] sm:$0xff] }
 0x311   :  { %v14056_v18 = vadd.f32 %v10113_v57, %v14802_v48  ;;  %v10115_v20 = vpop.f32.mrb[11].mxu0  ;;  %10511 = vmatprep.subr.bf16.mxu0 %v13711_v63  ;;  %v14064_v54 = vadd.f32 %v10325_v19, %v14805_v55  ;;  %v10327_v28 = vpop.f32.mrb[11].mxu1  ;;  %10723 = vmatprep.subr.bf16.mxu1 %v13713_v24  ;;  %v13759_v63 = vcombine.high %v1418_v38, %v1430_v40  ;;  %v1455_v57 = vld [vmem:[#allocation5 + $0x2b48] sm:$0xff] }
 0x312   :  { %v13992_v53 = vpack.c.bf16 %v14055_v11, %v14054_v0  ;;  %v14057_v27 = vadd.f32 %v10115_v20, %v14808_v23  ;;  %v13993_v41 = vpack.c.bf16 %v14063_v17, %v14062_v10  ;;  %v14065_v49 = vadd.f32 %v10327_v28, %v14811_v61  ;;  %v1442_v0 = vld [vmem:[#allocation5 + $0x2ae0] sm:$0xff] }
 0x313   :  { %v13761_v24 = vcombine.high %v1419_v46, %v1431_v35  ;;  %v13758_v9 = vcombine.low %v1418_v38, %v1430_v40  ;;  %v1478_v38 = vld [vmem:[#allocation5 + $0x2c00] sm:$0xff] }
 0x314   :  { %12326 = vst [vmem:[#allocation8 + $0x10] sm:$0xff] %v13992_v53  ;;  %v14004_v51 = vpack.c.bf16 %v14057_v27, %v14056_v18  ;;  %10512 = vmatpush1.bf16.msra.mxu0 %v13710_v59  ;;  %12327 = vst [vmem:[#allocation8 + $0x18] sm:$0xff] %v13993_v41  ;;  %v14005_v14 = vpack.c.bf16 %v14065_v49, %v14064_v54  ;;  %10724 = vmatpush1.bf16.msra.mxu1 %v13712_v16  ;;  %v1466_v41 = vld [vmem:[#allocation5 + $0x2ba0] sm:$0xff] }
 0x315   :  { %10513 = vmatprep.subr.bf16.mxu0 %v13735_v21  ;;  %10725 = vmatprep.subr.bf16.mxu1 %v13737_v33  ;;  %v13760_v16 = vcombine.low %v1419_v46, %v1431_v35  ;;  %v13783_v21 = vcombine.high %v1442_v0, %v1454_v4  ;;  %v13785_v33 = vcombine.high %v1443_v13, %v1455_v57  ;;  %v1467_v46 = vld [vmem:[#allocation5 + $0x2ba8] sm:$0xff] }
 0x316   :  { %12338 = vst [vmem:[#allocation8 + $0x70] sm:$0xff] %v14004_v51  ;;  %v10119_v5 = vpop.f32.mrb[12].mxu0  ;;  %12339 = vst [vmem:[#allocation8 + $0x78] sm:$0xff] %v14005_v14  ;;  %v10331_v10 = vpop.f32.mrb[12].mxu1  ;;  %v13782_v51 = vcombine.low %v1442_v0, %v1454_v4 }
 0x317   :  { %v14058_v7 = vadd.f32 %v10119_v5, %v14802_v48  ;;  %v10121_v11 = vpop.f32.mrb[13].mxu0  ;;  %v14066_v60 = vadd.f32 %v10331_v10, %v14805_v55  ;;  %v10333_v59 = vpop.f32.mrb[13].mxu1  ;;  %v1491_v5 = vld [vmem:[#allocation5 + $0x2c68] sm:$0xff]  ;;  %v1514_v10 = vld [vmem:[#allocation5 + $0x2d20] sm:$0xff] }
 0x318   :  { %v14059_v6 = vadd.f32 %v10121_v11, %v14808_v23  ;;  %v10123_v8 = vpop.f32.mrb[14].mxu0  ;;  %10514 = vmatpush1.bf16.msra.mxu0 %v13734_v52  ;;  %v14067_v17 = vadd.f32 %v10333_v59, %v14811_v61  ;;  %v10335_v19 = vpop.f32.mrb[14].mxu1  ;;  %10726 = vmatpush1.bf16.msra.mxu1 %v13736_v62  ;;  %v1490_v62 = vld [vmem:[#allocation5 + $0x2c60] sm:$0xff] }
 0x319   :  { %v14060_v18 = vadd.f32 %v10123_v8, %v14802_v48  ;;  %v10125_v20 = vpop.f32.mrb[15].mxu0  ;;  %10515 = vmatprep.subr.bf16.mxu0 %v13759_v63  ;;  %v14068_v54 = vadd.f32 %v10335_v19, %v14805_v55  ;;  %v10337_v28 = vpop.f32.mrb[15].mxu1  ;;  %10727 = vmatprep.subr.bf16.mxu1 %v13761_v24  ;;  %v1479_v48 = vld [vmem:[#allocation5 + $0x2c08] sm:$0xff]  ;;  %v13784_v55 = vcombine.low %v1443_v13, %v1455_v57  ;;  %v1502_v63 = vld [vmem:[#allocation5 + $0x2cc0] sm:$0xff] }
 0x31a   :  { %v14016_v53 = vpack.c.bf16 %v14059_v6, %v14058_v7  ;;  %v14061_v27 = vadd.f32 %v10125_v20, %v14808_v23  ;;  %v14017_v40 = vpack.c.bf16 %v14067_v17, %v14066_v60  ;;  %v14069_v49 = vadd.f32 %v10337_v28, %v14811_v61  ;;  %v1503_v61 = vld [vmem:[#allocation5 + $0x2cc8] sm:$0xff]  ;;  %v1526_v11 = vld [vmem:[#allocation5 + $0x2d80] sm:$0xff] }
 0x31b   :  { %v13807_v23 = vcombine.high %v1466_v41, %v1478_v38  ;;  %v13809_v14 = vcombine.high %v1467_v46, %v1479_v48  ;;  %v13806_v24 = vcombine.low %v1466_v41, %v1478_v38  ;;  %v13808_v7 = vcombine.low %v1467_v46, %v1479_v48  ;;  %v1515_v13 = vld [vmem:[#allocation5 + $0x2d28] sm:$0xff]  ;;  %v1586_v46 = vld [vmem:[#allocation5 + $0x2f60] sm:$0xff] }
 0x31c   :  { %12350 = vst [vmem:[#allocation8 + $0xd0] sm:$0xff] %v14016_v53  ;;  %v14028_v35 = vpack.c.bf16 %v14061_v27, %v14060_v18  ;;  %10516 = vmatpush1.bf16.msra.mxu0 %v13758_v9  ;;  %12351 = vst [vmem:[#allocation8 + $0xd8] sm:$0xff] %v14017_v40  ;;  %v14029_v52 = vpack.c.bf16 %v14069_v49, %v14068_v54  ;;  %10728 = vmatpush1.bf16.msra.mxu1 %v13760_v16  ;;  %v1527_v57 = vld [vmem:[#allocation5 + $0x2d88] sm:$0xff]  ;;  %v1538_v9 = vld [vmem:[#allocation5 + $0x2de0] sm:$0xff] }
 0x31d   :  { %10517 = vmatprep.subr.bf16.mxu0 %v13783_v21  ;;  %10729 = vmatprep.subr.bf16.mxu1 %v13785_v33  ;;  %v13831_v0 = vcombine.high %v1490_v62, %v1502_v63  ;;  %v13833_v4 = vcombine.high %v1491_v5, %v1503_v61  ;;  %v13830_v60 = vcombine.low %v1490_v62, %v1502_v63  ;;  %v1550_v16 = vld [vmem:[#allocation5 + $0x2e40] sm:$0xff]  ;;  %v1539_v17 = vld [vmem:[#allocation5 + $0x2de8] sm:$0xff]  ;;  %v76_v62 = vld [vmem:[#allocation5 + $0x30] sm:$0xff] }
 0x31e   :  { %12362 = vst [vmem:[#allocation8 + $0x130] sm:$0xff] %v14028_v35  ;;  %12363 = vst [vmem:[#allocation8 + $0x138] sm:$0xff] %v14029_v52  ;;  %v13832_v6 = vcombine.low %v1491_v5, %v1503_v61  ;;  %v13855_v59 = vcombine.high %v1514_v10, %v1526_v11  ;;  %v13857_v8 = vcombine.high %v1515_v13, %v1527_v57  ;;  %v1551_v18 = vld [vmem:[#allocation5 + $0x2e48] sm:$0xff]  ;;  %v1562_v54 = vld [vmem:[#allocation5 + $0x2ea0] sm:$0xff] }
 0x31f   :  { %v13854_v19 = vcombine.low %v1514_v10, %v1526_v11  ;;  %v13856_v20 = vcombine.low %v1515_v13, %v1527_v57  ;;  %v13879_v21 = vcombine.high %v1538_v9, %v1550_v16  ;;  %v13881_v53 = vcombine.high %v1539_v17, %v1551_v18  ;;  %v1574_v27 = vld [vmem:[#allocation5 + $0x2f00] sm:$0xff]  ;;  %v1563_v28 = vld [vmem:[#allocation5 + $0x2ea8] sm:$0xff]  ;;  %v88_v63 = vld [vmem:[#allocation5 + $0x90] sm:$0xff] }
 0x320   :  { %10518 = vmatpush1.bf16.msra.mxu0 %v13782_v51  ;;  %10730 = vmatpush1.bf16.msra.mxu1 %v13784_v55  ;;  %v1575_v33 = vld [vmem:[#allocation5 + $0x2f08] sm:$0xff]  ;;  %v13878_v41 = vcombine.low %v1538_v9, %v1550_v16  ;;  %v13880_v38 = vcombine.low %v1539_v17, %v1551_v18  ;;  %v13903_v40 = vcombine.high %v1562_v54, %v1574_v27  ;;  %v1598_v48 = vld [vmem:[#allocation5 + $0x2fc0] sm:$0xff]  ;;  %v77_v5 = vld [vmem:[#allocation5 + $0x38] sm:$0xff] }
 0x321   :  { %10519 = vmatprep.subr.bf16.mxu0 %v13807_v23  ;;  %10731 = vmatprep.subr.bf16.mxu1 %v13809_v14  ;;  %v13905_v49 = vcombine.high %v1563_v28, %v1575_v33  ;;  %v1587_v35 = vld [vmem:[#allocation5 + $0x2f68] sm:$0xff]  ;;  %v13902_v52 = vcombine.low %v1562_v54, %v1574_v27  ;;  %v13904_v55 = vcombine.low %v1563_v28, %v1575_v33  ;;  %v89_v61 = vld [vmem:[#allocation5 + $0x98] sm:$0xff]  ;;  %v100_v10 = vld [vmem:[#allocation5 + $0xf0] sm:$0xff] }
 0x322   :  { %v1599_v51 = vld [vmem:[#allocation5 + $0x2fc8] sm:$0xff]  ;;  %v13927_v23 = vcombine.high %v1586_v46, %v1598_v48  ;;  %v112_v11 = vld [vmem:[#allocation5 + $0x150] sm:$0xff]  ;;  %v101_v13 = vld [vmem:[#allocation5 + $0xf8] sm:$0xff] }
 0x323   :  { %v13929_v14 = vcombine.high %v1587_v35, %v1599_v51  ;;  %v113_v57 = vld [vmem:[#allocation5 + $0x158] sm:$0xff]  ;;  %v124_v9 = vld [vmem:[#allocation5 + $0x1b0] sm:$0xff] }
 0x324   :  { %10520 = vmatpush1.bf16.msra.mxu0 %v13806_v24  ;;  %10732 = vmatpush1.bf16.msra.mxu1 %v13808_v7  ;;  %v13926_v24 = vcombine.low %v1586_v46, %v1598_v48  ;;  %v13928_v7 = vcombine.low %v1587_v35, %v1599_v51  ;;  %v136_v16 = vld [vmem:[#allocation5 + $0x210] sm:$0xff]  ;;  %v125_v17 = vld [vmem:[#allocation5 + $0x1b8] sm:$0xff] }
 0x325   :  { %10521 = vmatprep.subr.bf16.mxu0 %v13831_v0  ;;  %10733 = vmatprep.subr.bf16.mxu1 %v13833_v4  ;;  %v12419_v0 = vcombine.high %v76_v62, %v88_v63  ;;  %v12421_v4 = vcombine.high %v77_v5, %v89_v61  ;;  %v137_v18 = vld [vmem:[#allocation5 + $0x218] sm:$0xff]  ;;  %v148_v54 = vld [vmem:[#allocation5 + $0x270] sm:$0xff] }
 0x326   :  { %v160_v27 = vld [vmem:[#allocation5 + $0x2d0] sm:$0xff]  ;;  %v149_v28 = vld [vmem:[#allocation5 + $0x278] sm:$0xff] }
 0x327   :  { %v161_v33 = vld [vmem:[#allocation5 + $0x2d8] sm:$0xff]  ;;  %v172_v46 = vld [vmem:[#allocation5 + $0x330] sm:$0xff] }
 0x328   :  { %10522 = vmatpush1.bf16.msra.mxu0 %v13830_v60  ;;  %10734 = vmatpush1.bf16.msra.mxu1 %v13832_v6  ;;  %v12418_v60 = vcombine.low %v76_v62, %v88_v63  ;;  %v12420_v6 = vcombine.low %v77_v5, %v89_v61  ;;  %v184_v48 = vld [vmem:[#allocation5 + $0x390] sm:$0xff]  ;;  %v173_v35 = vld [vmem:[#allocation5 + $0x338] sm:$0xff] }
 0x329   :  { %10523 = vmatprep.subr.bf16.mxu0 %v13855_v59  ;;  %10735 = vmatprep.subr.bf16.mxu1 %v13857_v8  ;;  %v12443_v59 = vcombine.high %v100_v10, %v112_v11  ;;  %v12445_v8 = vcombine.high %v101_v13, %v113_v57  ;;  %v185_v51 = vld [vmem:[#allocation5 + $0x398] sm:$0xff]  ;;  %v196_v62 = vld [vmem:[#allocation5 + $0x3f0] sm:$0xff] }
 0x32a   :  { %v208_v63 = vld [vmem:[#allocation5 + $0x450] sm:$0xff]  ;;  %v197_v5 = vld [vmem:[#allocation5 + $0x3f8] sm:$0xff] }
 0x32b   :  { %v209_v61 = vld [vmem:[#allocation5 + $0x458] sm:$0xff] }
 0x32c   :  { %10524 = vmatpush1.bf16.msra.mxu0 %v13854_v19  ;;  %10736 = vmatpush1.bf16.msra.mxu1 %v13856_v20  ;;  %v12442_v19 = vcombine.low %v100_v10, %v112_v11  ;;  %v12444_v20 = vcombine.low %v101_v13, %v113_v57  ;;  %v220_v10 = vld [vmem:[#allocation5 + $0x4b0] sm:$0xff]  ;;  %v221_v13 = vld [vmem:[#allocation5 + $0x4b8] sm:$0xff] }
 0x32d   :  { %10525 = vmatprep.subr.bf16.mxu0 %v13879_v21  ;;  %10737 = vmatprep.subr.bf16.mxu1 %v13881_v53  ;;  %v12467_v21 = vcombine.high %v124_v9, %v136_v16  ;;  %v12469_v53 = vcombine.high %v125_v17, %v137_v18  ;;  %v232_v11 = vld [vmem:[#allocation5 + $0x510] sm:$0xff]  ;;  %v233_v57 = vld [vmem:[#allocation5 + $0x518] sm:$0xff] }
 0x330   :  { %10526 = vmatpush1.bf16.msra.mxu0 %v13878_v41  ;;  %10738 = vmatpush1.bf16.msra.mxu1 %v13880_v38  ;;  %v12466_v41 = vcombine.low %v124_v9, %v136_v16  ;;  %v12468_v38 = vcombine.low %v125_v17, %v137_v18  ;;  %v244_v9 = vld [vmem:[#allocation5 + $0x570] sm:$0xff]  ;;  %v245_v17 = vld [vmem:[#allocation5 + $0x578] sm:$0xff] }
 0x331   :  { %10527 = vmatprep.subr.bf16.mxu0 %v13903_v40  ;;  %10739 = vmatprep.subr.bf16.mxu1 %v13905_v49  ;;  %v12491_v40 = vcombine.high %v148_v54, %v160_v27  ;;  %v12493_v49 = vcombine.high %v149_v28, %v161_v33  ;;  %v256_v16 = vld [vmem:[#allocation5 + $0x5d0] sm:$0xff]  ;;  %v257_v18 = vld [vmem:[#allocation5 + $0x5d8] sm:$0xff] }
 0x334   :  { %10528 = vmatpush1.bf16.msra.mxu0 %v13902_v52  ;;  %10740 = vmatpush1.bf16.msra.mxu1 %v13904_v55  ;;  %v12490_v52 = vcombine.low %v148_v54, %v160_v27  ;;  %v12492_v55 = vcombine.low %v149_v28, %v161_v33  ;;  %v268_v54 = vld [vmem:[#allocation5 + $0x630] sm:$0xff]  ;;  %v269_v28 = vld [vmem:[#allocation5 + $0x638] sm:$0xff] }
 0x335   :  { %10529 = vmatprep.subr.bf16.mxu0 %v13927_v23  ;;  %10741 = vmatprep.subr.bf16.mxu1 %v13929_v14  ;;  %v12515_v23 = vcombine.high %v172_v46, %v184_v48  ;;  %v12517_v14 = vcombine.high %v173_v35, %v185_v51  ;;  %v280_v27 = vld [vmem:[#allocation5 + $0x690] sm:$0xff]  ;;  %v281_v33 = vld [vmem:[#allocation5 + $0x698] sm:$0xff] }
 0x338   :  { %10530 = vmatpush1.bf16.msra.mxu0 %v13926_v24  ;;  %10742 = vmatpush1.bf16.msra.mxu1 %v13928_v7  ;;  %v12514_v24 = vcombine.low %v172_v46, %v184_v48  ;;  %v12516_v7 = vcombine.low %v173_v35, %v185_v51  ;;  %v292_v46 = vld [vmem:[#allocation5 + $0x6f0] sm:$0xff]  ;;  %v293_v35 = vld [vmem:[#allocation5 + $0x6f8] sm:$0xff] }
 0x339   :  { %10764 = vmatprep.subr.bf16.mxu0 %v12419_v0  ;;  %10976 = vmatprep.subr.bf16.mxu1 %v12421_v4  ;;  %v12539_v0 = vcombine.high %v196_v62, %v208_v63  ;;  %v12541_v4 = vcombine.high %v197_v5, %v209_v61  ;;  %v304_v48 = vld [vmem:[#allocation5 + $0x750] sm:$0xff]  ;;  %v305_v51 = vld [vmem:[#allocation5 + $0x758] sm:$0xff] }
 0x33b   :  { %10532 = vmatmul.mubr.bf16.vlgmr.msra.gmra.mrb[16].mxu0 %v14677_v42  ;;  %10744 = vmatmul.mubr.bf16.vlgmr.msra.gmra.mrb[16].mxu1 %v14677_v42 }
 0x33c   :  { %10765 = vmatpush1.bf16.msra.mxu0 %v12418_v60  ;;  %10977 = vmatpush1.bf16.msra.mxu1 %v12420_v6  ;;  %v12538_v60 = vcombine.low %v196_v62, %v208_v63  ;;  %v12540_v6 = vcombine.low %v197_v5, %v209_v61  ;;  %v316_v62 = vld [vmem:[#allocation5 + $0x7b0] sm:$0xff]  ;;  %v317_v5 = vld [vmem:[#allocation5 + $0x7b8] sm:$0xff] }
 0x33d   :  { %10766 = vmatprep.subr.bf16.mxu0 %v12443_v59  ;;  %10978 = vmatprep.subr.bf16.mxu1 %v12445_v8  ;;  %v12563_v59 = vcombine.high %v220_v10, %v232_v11  ;;  %v12565_v8 = vcombine.high %v221_v13, %v233_v57  ;;  %v328_v63 = vld [vmem:[#allocation5 + $0x810] sm:$0xff]  ;;  %v329_v61 = vld [vmem:[#allocation5 + $0x818] sm:$0xff] }
 0x33e   :  { %10541 = vmatprep.mubr.bf16.mxu0 %v14679_v50  ;;  %10753 = vmatprep.mubr.bf16.mxu1 %v14679_v50 }
 0x340   :  { %10767 = vmatpush1.bf16.msra.mxu0 %v12442_v19  ;;  %10979 = vmatpush1.bf16.msra.mxu1 %v12444_v20  ;;  %v12562_v19 = vcombine.low %v220_v10, %v232_v11  ;;  %v12564_v20 = vcombine.low %v221_v13, %v233_v57  ;;  %v340_v10 = vld [vmem:[#allocation5 + $0x870] sm:$0xff]  ;;  %v341_v13 = vld [vmem:[#allocation5 + $0x878] sm:$0xff] }
 0x341   :  { %10768 = vmatprep.subr.bf16.mxu0 %v12467_v21  ;;  %10980 = vmatprep.subr.bf16.mxu1 %v12469_v53  ;;  %v12587_v21 = vcombine.high %v244_v9, %v256_v16  ;;  %v12589_v53 = vcombine.high %v245_v17, %v257_v18  ;;  %v352_v11 = vld [vmem:[#allocation5 + $0x8d0] sm:$0xff]  ;;  %v353_v57 = vld [vmem:[#allocation5 + $0x8d8] sm:$0xff] }
 0x343   :  { %10542 = vmatmul.mubr.bf16.gmra.mrb[20].mxu0 %v14685_v3  ;;  %10754 = vmatmul.mubr.bf16.gmra.mrb[20].mxu1 %v14685_v3 }
 0x344   :  { %10769 = vmatpush1.bf16.msra.mxu0 %v12466_v41  ;;  %10981 = vmatpush1.bf16.msra.mxu1 %v12468_v38  ;;  %v12586_v41 = vcombine.low %v244_v9, %v256_v16  ;;  %v12588_v38 = vcombine.low %v245_v17, %v257_v18  ;;  %v364_v9 = vld [vmem:[#allocation5 + $0x930] sm:$0xff]  ;;  %v365_v17 = vld [vmem:[#allocation5 + $0x938] sm:$0xff] }
 0x345   :  { %10770 = vmatprep.subr.bf16.mxu0 %v12491_v40  ;;  %10982 = vmatprep.subr.bf16.mxu1 %v12493_v49  ;;  %v12611_v40 = vcombine.high %v268_v54, %v280_v27  ;;  %v12613_v49 = vcombine.high %v269_v28, %v281_v33  ;;  %v376_v16 = vld [vmem:[#allocation5 + $0x990] sm:$0xff]  ;;  %v377_v18 = vld [vmem:[#allocation5 + $0x998] sm:$0xff] }
 0x346   :  { %10796 = vmatprep.mubr.bf16.mxu0 %v14599_v58  ;;  %11008 = vmatprep.mubr.bf16.mxu1 %v14599_v58 }
 0x348   :  { %10771 = vmatpush1.bf16.msra.mxu0 %v12490_v52  ;;  %10983 = vmatpush1.bf16.msra.mxu1 %v12492_v55  ;;  %v12610_v52 = vcombine.low %v268_v54, %v280_v27  ;;  %v12612_v55 = vcombine.low %v269_v28, %v281_v33  ;;  %v388_v54 = vld [vmem:[#allocation5 + $0x9f0] sm:$0xff]  ;;  %v389_v28 = vld [vmem:[#allocation5 + $0x9f8] sm:$0xff] }
 0x349   :  { %10772 = vmatprep.subr.bf16.mxu0 %v12515_v23  ;;  %10984 = vmatprep.subr.bf16.mxu1 %v12517_v14  ;;  %v12635_v23 = vcombine.high %v292_v46, %v304_v48  ;;  %v12637_v14 = vcombine.high %v293_v35, %v305_v51  ;;  %v400_v27 = vld [vmem:[#allocation5 + $0xa50] sm:$0xff]  ;;  %v401_v33 = vld [vmem:[#allocation5 + $0xa58] sm:$0xff] }
 0x34c   :  { %10773 = vmatpush1.bf16.msra.mxu0 %v12514_v24  ;;  %10985 = vmatpush1.bf16.msra.mxu1 %v12516_v7  ;;  %v12634_v24 = vcombine.low %v292_v46, %v304_v48  ;;  %v12636_v7 = vcombine.low %v293_v35, %v305_v51  ;;  %v412_v46 = vld [vmem:[#allocation5 + $0xab0] sm:$0xff]  ;;  %v413_v35 = vld [vmem:[#allocation5 + $0xab8] sm:$0xff] }
 0x34d   :  { %10774 = vmatprep.subr.bf16.mxu0 %v12539_v0  ;;  %10986 = vmatprep.subr.bf16.mxu1 %v12541_v4  ;;  %v12659_v0 = vcombine.high %v316_v62, %v328_v63  ;;  %v12661_v4 = vcombine.high %v317_v5, %v329_v61  ;;  %v424_v48 = vld [vmem:[#allocation5 + $0xb10] sm:$0xff]  ;;  %v425_v51 = vld [vmem:[#allocation5 + $0xb18] sm:$0xff] }
 0x350   :  { %10775 = vmatpush1.bf16.msra.mxu0 %v12538_v60  ;;  %10987 = vmatpush1.bf16.msra.mxu1 %v12540_v6  ;;  %v12658_v60 = vcombine.low %v316_v62, %v328_v63  ;;  %v12660_v6 = vcombine.low %v317_v5, %v329_v61  ;;  %v436_v62 = vld [vmem:[#allocation5 + $0xb70] sm:$0xff]  ;;  %v437_v5 = vld [vmem:[#allocation5 + $0xb78] sm:$0xff] }
 0x351   :  { %10776 = vmatprep.subr.bf16.mxu0 %v12563_v59  ;;  %10988 = vmatprep.subr.bf16.mxu1 %v12565_v8  ;;  %v12683_v59 = vcombine.high %v340_v10, %v352_v11  ;;  %v12685_v8 = vcombine.high %v341_v13, %v353_v57  ;;  %v448_v63 = vld [vmem:[#allocation5 + $0xbd0] sm:$0xff]  ;;  %v449_v61 = vld [vmem:[#allocation5 + $0xbd8] sm:$0xff] }
 0x354   :  { %10777 = vmatpush1.bf16.msra.mxu0 %v12562_v19  ;;  %10989 = vmatpush1.bf16.msra.mxu1 %v12564_v20  ;;  %v12682_v19 = vcombine.low %v340_v10, %v352_v11  ;;  %v12684_v20 = vcombine.low %v341_v13, %v353_v57  ;;  %v460_v10 = vld [vmem:[#allocation5 + $0xc30] sm:$0xff]  ;;  %v461_v13 = vld [vmem:[#allocation5 + $0xc38] sm:$0xff] }
 0x355   :  { %10778 = vmatprep.subr.bf16.mxu0 %v12587_v21  ;;  %10990 = vmatprep.subr.bf16.mxu1 %v12589_v53  ;;  %v12707_v21 = vcombine.high %v364_v9, %v376_v16  ;;  %v12709_v53 = vcombine.high %v365_v17, %v377_v18  ;;  %v472_v11 = vld [vmem:[#allocation5 + $0xc90] sm:$0xff]  ;;  %v473_v57 = vld [vmem:[#allocation5 + $0xc98] sm:$0xff] }
 0x358   :  { %10779 = vmatpush1.bf16.msra.mxu0 %v12586_v41  ;;  %10991 = vmatpush1.bf16.msra.mxu1 %v12588_v38  ;;  %v12706_v41 = vcombine.low %v364_v9, %v376_v16  ;;  %v12708_v38 = vcombine.low %v365_v17, %v377_v18  ;;  %v484_v9 = vld [vmem:[#allocation5 + $0xcf0] sm:$0xff]  ;;  %v485_v17 = vld [vmem:[#allocation5 + $0xcf8] sm:$0xff] }
 0x359   :  { %10780 = vmatprep.subr.bf16.mxu0 %v12611_v40  ;;  %10992 = vmatprep.subr.bf16.mxu1 %v12613_v49  ;;  %v12731_v40 = vcombine.high %v388_v54, %v400_v27  ;;  %v12733_v49 = vcombine.high %v389_v28, %v401_v33  ;;  %v496_v16 = vld [vmem:[#allocation5 + $0xd50] sm:$0xff]  ;;  %v497_v18 = vld [vmem:[#allocation5 + $0xd58] sm:$0xff] }
 0x35c   :  { %10781 = vmatpush1.bf16.msra.mxu0 %v12610_v52  ;;  %10993 = vmatpush1.bf16.msra.mxu1 %v12612_v55  ;;  %v12730_v52 = vcombine.low %v388_v54, %v400_v27  ;;  %v12732_v55 = vcombine.low %v389_v28, %v401_v33  ;;  %v508_v54 = vld [vmem:[#allocation5 + $0xdb0] sm:$0xff]  ;;  %v509_v28 = vld [vmem:[#allocation5 + $0xdb8] sm:$0xff] }
 0x35d   :  { %10782 = vmatprep.subr.bf16.mxu0 %v12635_v23  ;;  %10994 = vmatprep.subr.bf16.mxu1 %v12637_v14  ;;  %v12755_v23 = vcombine.high %v412_v46, %v424_v48  ;;  %v12757_v14 = vcombine.high %v413_v35, %v425_v51  ;;  %v520_v27 = vld [vmem:[#allocation5 + $0xe10] sm:$0xff]  ;;  %v521_v33 = vld [vmem:[#allocation5 + $0xe18] sm:$0xff] }
 0x360   :  { %10783 = vmatpush1.bf16.msra.mxu0 %v12634_v24  ;;  %10995 = vmatpush1.bf16.msra.mxu1 %v12636_v7  ;;  %v12754_v24 = vcombine.low %v412_v46, %v424_v48  ;;  %v12756_v7 = vcombine.low %v413_v35, %v425_v51  ;;  %v532_v46 = vld [vmem:[#allocation5 + $0xe70] sm:$0xff]  ;;  %v533_v35 = vld [vmem:[#allocation5 + $0xe78] sm:$0xff] }
 0x361   :  { %10784 = vmatprep.subr.bf16.mxu0 %v12659_v0  ;;  %10996 = vmatprep.subr.bf16.mxu1 %v12661_v4  ;;  %v12779_v0 = vcombine.high %v436_v62, %v448_v63  ;;  %v12781_v4 = vcombine.high %v437_v5, %v449_v61  ;;  %v544_v48 = vld [vmem:[#allocation5 + $0xed0] sm:$0xff]  ;;  %v545_v51 = vld [vmem:[#allocation5 + $0xed8] sm:$0xff] }
 0x364   :  { %10785 = vmatpush1.bf16.msra.mxu0 %v12658_v60  ;;  %10997 = vmatpush1.bf16.msra.mxu1 %v12660_v6  ;;  %v12778_v60 = vcombine.low %v436_v62, %v448_v63  ;;  %v12780_v6 = vcombine.low %v437_v5, %v449_v61  ;;  %v556_v62 = vld [vmem:[#allocation5 + $0xf30] sm:$0xff]  ;;  %v557_v5 = vld [vmem:[#allocation5 + $0xf38] sm:$0xff] }
 0x365   :  { %10786 = vmatprep.subr.bf16.mxu0 %v12683_v59  ;;  %10998 = vmatprep.subr.bf16.mxu1 %v12685_v8  ;;  %v12803_v59 = vcombine.high %v460_v10, %v472_v11  ;;  %v12805_v8 = vcombine.high %v461_v13, %v473_v57  ;;  %v568_v63 = vld [vmem:[#allocation5 + $0xf90] sm:$0xff]  ;;  %v569_v61 = vld [vmem:[#allocation5 + $0xf98] sm:$0xff] }
 0x368   :  { %10787 = vmatpush1.bf16.msra.mxu0 %v12682_v19  ;;  %10999 = vmatpush1.bf16.msra.mxu1 %v12684_v20  ;;  %v12802_v19 = vcombine.low %v460_v10, %v472_v11  ;;  %v12804_v20 = vcombine.low %v461_v13, %v473_v57  ;;  %v580_v10 = vld [vmem:[#allocation5 + $0xff0] sm:$0xff]  ;;  %v581_v13 = vld [vmem:[#allocation5 + $0xff8] sm:$0xff] }
 0x369   :  { %10788 = vmatprep.subr.bf16.mxu0 %v12707_v21  ;;  %11000 = vmatprep.subr.bf16.mxu1 %v12709_v53  ;;  %v12827_v21 = vcombine.high %v484_v9, %v496_v16  ;;  %v12829_v53 = vcombine.high %v485_v17, %v497_v18  ;;  %v592_v11 = vld [vmem:[#allocation5 + $0x1050] sm:$0xff]  ;;  %v593_v57 = vld [vmem:[#allocation5 + $0x1058] sm:$0xff] }
 0x36c   :  { %10789 = vmatpush1.bf16.msra.mxu0 %v12706_v41  ;;  %11001 = vmatpush1.bf16.msra.mxu1 %v12708_v38  ;;  %v12826_v41 = vcombine.low %v484_v9, %v496_v16  ;;  %v12828_v38 = vcombine.low %v485_v17, %v497_v18  ;;  %v604_v9 = vld [vmem:[#allocation5 + $0x10b0] sm:$0xff]  ;;  %v605_v17 = vld [vmem:[#allocation5 + $0x10b8] sm:$0xff] }
 0x36d   :  { %10790 = vmatprep.subr.bf16.mxu0 %v12731_v40  ;;  %11002 = vmatprep.subr.bf16.mxu1 %v12733_v49  ;;  %v12851_v40 = vcombine.high %v508_v54, %v520_v27  ;;  %v12853_v49 = vcombine.high %v509_v28, %v521_v33  ;;  %v616_v16 = vld [vmem:[#allocation5 + $0x1110] sm:$0xff]  ;;  %v617_v18 = vld [vmem:[#allocation5 + $0x1118] sm:$0xff] }
 0x370   :  { %10791 = vmatpush1.bf16.msra.mxu0 %v12730_v52  ;;  %11003 = vmatpush1.bf16.msra.mxu1 %v12732_v55  ;;  %v12850_v52 = vcombine.low %v508_v54, %v520_v27  ;;  %v12852_v55 = vcombine.low %v509_v28, %v521_v33  ;;  %v628_v54 = vld [vmem:[#allocation5 + $0x1170] sm:$0xff]  ;;  %v629_v28 = vld [vmem:[#allocation5 + $0x1178] sm:$0xff] }
 0x371   :  { %10792 = vmatprep.subr.bf16.mxu0 %v12755_v23  ;;  %11004 = vmatprep.subr.bf16.mxu1 %v12757_v14  ;;  %v12875_v23 = vcombine.high %v532_v46, %v544_v48  ;;  %v12877_v14 = vcombine.high %v533_v35, %v545_v51  ;;  %v640_v27 = vld [vmem:[#allocation5 + $0x11d0] sm:$0xff]  ;;  %v641_v33 = vld [vmem:[#allocation5 + $0x11d8] sm:$0xff] }
 0x374   :  { %10793 = vmatpush1.bf16.msra.mxu0 %v12754_v24  ;;  %11005 = vmatpush1.bf16.msra.mxu1 %v12756_v7  ;;  %v12874_v24 = vcombine.low %v532_v46, %v544_v48  ;;  %v12876_v7 = vcombine.low %v533_v35, %v545_v51  ;;  %v652_v46 = vld [vmem:[#allocation5 + $0x1230] sm:$0xff]  ;;  %v653_v35 = vld [vmem:[#allocation5 + $0x1238] sm:$0xff] }
 0x375   :  { %10794 = vmatprep.subr.bf16.mxu0 %v12779_v0  ;;  %11006 = vmatprep.subr.bf16.mxu1 %v12781_v4  ;;  %v12899_v0 = vcombine.high %v556_v62, %v568_v63  ;;  %v12901_v4 = vcombine.high %v557_v5, %v569_v61  ;;  %v664_v48 = vld [vmem:[#allocation5 + $0x1290] sm:$0xff]  ;;  %v665_v51 = vld [vmem:[#allocation5 + $0x1298] sm:$0xff] }
 0x378   :  { %10795 = vmatpush1.bf16.msra.mxu0 %v12778_v60  ;;  %11007 = vmatpush1.bf16.msra.mxu1 %v12780_v6  ;;  %v12898_v60 = vcombine.low %v556_v62, %v568_v63  ;;  %v12900_v6 = vcombine.low %v557_v5, %v569_v61  ;;  %v676_v62 = vld [vmem:[#allocation5 + $0x12f0] sm:$0xff]  ;;  %v677_v5 = vld [vmem:[#allocation5 + $0x12f8] sm:$0xff] }
 0x379   :  { %10817 = vmatprep.subr.bf16.mxu0 %v12803_v59  ;;  %11029 = vmatprep.subr.bf16.mxu1 %v12805_v8  ;;  %v12923_v59 = vcombine.high %v580_v10, %v592_v11  ;;  %v12925_v8 = vcombine.high %v581_v13, %v593_v57  ;;  %v688_v63 = vld [vmem:[#allocation5 + $0x1350] sm:$0xff]  ;;  %v689_v61 = vld [vmem:[#allocation5 + $0x1358] sm:$0xff] }
 0x37b   :  { %10797 = vmatmul.mubr.bf16.vlgmr.msra.gmra.mrb[24].mxu0 %v14605_v15  ;;  %11009 = vmatmul.mubr.bf16.vlgmr.msra.gmra.mrb[24].mxu1 %v14605_v15 }
 0x37c   :  { %10818 = vmatpush1.bf16.msra.mxu0 %v12802_v19  ;;  %11030 = vmatpush1.bf16.msra.mxu1 %v12804_v20  ;;  %v12922_v19 = vcombine.low %v580_v10, %v592_v11  ;;  %v12924_v20 = vcombine.low %v581_v13, %v593_v57  ;;  %v700_v10 = vld [vmem:[#allocation5 + $0x13b0] sm:$0xff]  ;;  %v701_v13 = vld [vmem:[#allocation5 + $0x13b8] sm:$0xff] }
 0x37d   :  { %10819 = vmatprep.subr.bf16.mxu0 %v12827_v21  ;;  %11031 = vmatprep.subr.bf16.mxu1 %v12829_v53  ;;  %v12947_v21 = vcombine.high %v604_v9, %v616_v16  ;;  %v12949_v53 = vcombine.high %v605_v17, %v617_v18  ;;  %v712_v11 = vld [vmem:[#allocation5 + $0x1410] sm:$0xff]  ;;  %v713_v57 = vld [vmem:[#allocation5 + $0x1418] sm:$0xff] }
 0x37e   :  { %10806 = vmatprep.mubr.bf16.mxu0 %v14607_v25  ;;  %11018 = vmatprep.mubr.bf16.mxu1 %v14607_v25 }
 0x380   :  { %10820 = vmatpush1.bf16.msra.mxu0 %v12826_v41  ;;  %11032 = vmatpush1.bf16.msra.mxu1 %v12828_v38  ;;  %v12946_v41 = vcombine.low %v604_v9, %v616_v16  ;;  %v12948_v38 = vcombine.low %v605_v17, %v617_v18  ;;  %v724_v9 = vld [vmem:[#allocation5 + $0x1470] sm:$0xff]  ;;  %v725_v17 = vld [vmem:[#allocation5 + $0x1478] sm:$0xff] }
 0x381   :  { %10821 = vmatprep.subr.bf16.mxu0 %v12851_v40  ;;  %11033 = vmatprep.subr.bf16.mxu1 %v12853_v49  ;;  %v12971_v40 = vcombine.high %v628_v54, %v640_v27  ;;  %v12973_v49 = vcombine.high %v629_v28, %v641_v33  ;;  %v736_v16 = vld [vmem:[#allocation5 + $0x14d0] sm:$0xff]  ;;  %v737_v18 = vld [vmem:[#allocation5 + $0x14d8] sm:$0xff] }
 0x383   :  { %10807 = vmatmul.mubr.bf16.gmra.mrb[28].mxu0 %v14613_v34  ;;  %11019 = vmatmul.mubr.bf16.gmra.mrb[28].mxu1 %v14613_v34 }
 0x384   :  { %10822 = vmatpush1.bf16.msra.mxu0 %v12850_v52  ;;  %11034 = vmatpush1.bf16.msra.mxu1 %v12852_v55  ;;  %v12970_v52 = vcombine.low %v628_v54, %v640_v27  ;;  %v12972_v55 = vcombine.low %v629_v28, %v641_v33  ;;  %v748_v54 = vld [vmem:[#allocation5 + $0x1530] sm:$0xff]  ;;  %v749_v28 = vld [vmem:[#allocation5 + $0x1538] sm:$0xff] }
 0x385   :  { %10823 = vmatprep.subr.bf16.mxu0 %v12875_v23  ;;  %11035 = vmatprep.subr.bf16.mxu1 %v12877_v14  ;;  %v12995_v23 = vcombine.high %v652_v46, %v664_v48  ;;  %v12997_v14 = vcombine.high %v653_v35, %v665_v51  ;;  %v760_v27 = vld [vmem:[#allocation5 + $0x1590] sm:$0xff]  ;;  %v761_v33 = vld [vmem:[#allocation5 + $0x1598] sm:$0xff] }
 0x386   :  { %10849 = vmatprep.mubr.bf16.mxu0 %v14621_v43  ;;  %11061 = vmatprep.mubr.bf16.mxu1 %v14621_v43 }
 0x388   :  { %10824 = vmatpush1.bf16.msra.mxu0 %v12874_v24  ;;  %11036 = vmatpush1.bf16.msra.mxu1 %v12876_v7  ;;  %v12994_v24 = vcombine.low %v652_v46, %v664_v48  ;;  %v12996_v7 = vcombine.low %v653_v35, %v665_v51  ;;  %v772_v46 = vld [vmem:[#allocation5 + $0x15f0] sm:$0xff]  ;;  %v773_v35 = vld [vmem:[#allocation5 + $0x15f8] sm:$0xff] }
 0x389   :  { %10825 = vmatprep.subr.bf16.mxu0 %v12899_v0  ;;  %11037 = vmatprep.subr.bf16.mxu1 %v12901_v4  ;;  %v13019_v0 = vcombine.high %v676_v62, %v688_v63  ;;  %v13021_v4 = vcombine.high %v677_v5, %v689_v61  ;;  %v784_v48 = vld [vmem:[#allocation5 + $0x1650] sm:$0xff]  ;;  %v785_v51 = vld [vmem:[#allocation5 + $0x1658] sm:$0xff] }
 0x38c   :  { %10826 = vmatpush1.bf16.msra.mxu0 %v12898_v60  ;;  %11038 = vmatpush1.bf16.msra.mxu1 %v12900_v6  ;;  %v13018_v60 = vcombine.low %v676_v62, %v688_v63  ;;  %v13020_v6 = vcombine.low %v677_v5, %v689_v61  ;;  %v796_v62 = vld [vmem:[#allocation5 + $0x16b0] sm:$0xff]  ;;  %v797_v5 = vld [vmem:[#allocation5 + $0x16b8] sm:$0xff] }
 0x38d   :  { %10827 = vmatprep.subr.bf16.mxu0 %v12923_v59  ;;  %11039 = vmatprep.subr.bf16.mxu1 %v12925_v8  ;;  %v13043_v59 = vcombine.high %v700_v10, %v712_v11  ;;  %v13045_v8 = vcombine.high %v701_v13, %v713_v57  ;;  %v808_v63 = vld [vmem:[#allocation5 + $0x1710] sm:$0xff]  ;;  %v809_v61 = vld [vmem:[#allocation5 + $0x1718] sm:$0xff] }
 0x390   :  { %10828 = vmatpush1.bf16.msra.mxu0 %v12922_v19  ;;  %11040 = vmatpush1.bf16.msra.mxu1 %v12924_v20  ;;  %v13042_v19 = vcombine.low %v700_v10, %v712_v11  ;;  %v13044_v20 = vcombine.low %v701_v13, %v713_v57  ;;  %v820_v10 = vld [vmem:[#allocation5 + $0x1770] sm:$0xff]  ;;  %v821_v13 = vld [vmem:[#allocation5 + $0x1778] sm:$0xff] }
 0x391   :  { %10829 = vmatprep.subr.bf16.mxu0 %v12947_v21  ;;  %11041 = vmatprep.subr.bf16.mxu1 %v12949_v53  ;;  %v13067_v21 = vcombine.high %v724_v9, %v736_v16  ;;  %v13069_v53 = vcombine.high %v725_v17, %v737_v18  ;;  %v832_v11 = vld [vmem:[#allocation5 + $0x17d0] sm:$0xff]  ;;  %v833_v57 = vld [vmem:[#allocation5 + $0x17d8] sm:$0xff] }
 0x394   :  { %10830 = vmatpush1.bf16.msra.mxu0 %v12946_v41  ;;  %11042 = vmatpush1.bf16.msra.mxu1 %v12948_v38  ;;  %v13066_v41 = vcombine.low %v724_v9, %v736_v16  ;;  %v13068_v38 = vcombine.low %v725_v17, %v737_v18  ;;  %v844_v9 = vld [vmem:[#allocation5 + $0x1830] sm:$0xff]  ;;  %v845_v17 = vld [vmem:[#allocation5 + $0x1838] sm:$0xff] }
 0x395   :  { %10831 = vmatprep.subr.bf16.mxu0 %v12971_v40  ;;  %11043 = vmatprep.subr.bf16.mxu1 %v12973_v49  ;;  %v13091_v40 = vcombine.high %v748_v54, %v760_v27  ;;  %v13093_v49 = vcombine.high %v749_v28, %v761_v33  ;;  %v856_v16 = vld [vmem:[#allocation5 + $0x1890] sm:$0xff]  ;;  %v857_v18 = vld [vmem:[#allocation5 + $0x1898] sm:$0xff] }
 0x398   :  { %10832 = vmatpush1.bf16.msra.mxu0 %v12970_v52  ;;  %11044 = vmatpush1.bf16.msra.mxu1 %v12972_v55  ;;  %v13090_v52 = vcombine.low %v748_v54, %v760_v27  ;;  %v13092_v55 = vcombine.low %v749_v28, %v761_v33  ;;  %v868_v54 = vld [vmem:[#allocation5 + $0x18f0] sm:$0xff]  ;;  %v869_v28 = vld [vmem:[#allocation5 + $0x18f8] sm:$0xff] }
 0x399   :  { %10833 = vmatprep.subr.bf16.mxu0 %v12995_v23  ;;  %11045 = vmatprep.subr.bf16.mxu1 %v12997_v14  ;;  %v13115_v23 = vcombine.high %v772_v46, %v784_v48  ;;  %v13117_v14 = vcombine.high %v773_v35, %v785_v51  ;;  %v880_v27 = vld [vmem:[#allocation5 + $0x1950] sm:$0xff]  ;;  %v881_v33 = vld [vmem:[#allocation5 + $0x1958] sm:$0xff] }
 0x39c   :  { %10834 = vmatpush1.bf16.msra.mxu0 %v12994_v24  ;;  %11046 = vmatpush1.bf16.msra.mxu1 %v12996_v7  ;;  %v13114_v24 = vcombine.low %v772_v46, %v784_v48  ;;  %v13116_v7 = vcombine.low %v773_v35, %v785_v51  ;;  %v892_v46 = vld [vmem:[#allocation5 + $0x19b0] sm:$0xff]  ;;  %v893_v35 = vld [vmem:[#allocation5 + $0x19b8] sm:$0xff] }
 0x39d   :  { %10835 = vmatprep.subr.bf16.mxu0 %v13019_v0  ;;  %11047 = vmatprep.subr.bf16.mxu1 %v13021_v4  ;;  %v13139_v0 = vcombine.high %v796_v62, %v808_v63  ;;  %v13141_v4 = vcombine.high %v797_v5, %v809_v61  ;;  %v904_v48 = vld [vmem:[#allocation5 + $0x1a10] sm:$0xff]  ;;  %v905_v51 = vld [vmem:[#allocation5 + $0x1a18] sm:$0xff] }
 0x3a0   :  { %10836 = vmatpush1.bf16.msra.mxu0 %v13018_v60  ;;  %11048 = vmatpush1.bf16.msra.mxu1 %v13020_v6  ;;  %v13138_v60 = vcombine.low %v796_v62, %v808_v63  ;;  %v13140_v6 = vcombine.low %v797_v5, %v809_v61  ;;  %v916_v62 = vld [vmem:[#allocation5 + $0x1a70] sm:$0xff]  ;;  %v917_v5 = vld [vmem:[#allocation5 + $0x1a78] sm:$0xff] }
 0x3a1   :  { %10837 = vmatprep.subr.bf16.mxu0 %v13043_v59  ;;  %11049 = vmatprep.subr.bf16.mxu1 %v13045_v8  ;;  %v13163_v59 = vcombine.high %v820_v10, %v832_v11  ;;  %v13165_v8 = vcombine.high %v821_v13, %v833_v57  ;;  %v928_v63 = vld [vmem:[#allocation5 + $0x1ad0] sm:$0xff]  ;;  %v929_v61 = vld [vmem:[#allocation5 + $0x1ad8] sm:$0xff] }
 0x3a4   :  { %10838 = vmatpush1.bf16.msra.mxu0 %v13042_v19  ;;  %11050 = vmatpush1.bf16.msra.mxu1 %v13044_v20  ;;  %v13162_v19 = vcombine.low %v820_v10, %v832_v11  ;;  %v13164_v20 = vcombine.low %v821_v13, %v833_v57  ;;  %v940_v10 = vld [vmem:[#allocation5 + $0x1b30] sm:$0xff]  ;;  %v941_v13 = vld [vmem:[#allocation5 + $0x1b38] sm:$0xff] }
 0x3a5   :  { %10839 = vmatprep.subr.bf16.mxu0 %v13067_v21  ;;  %11051 = vmatprep.subr.bf16.mxu1 %v13069_v53  ;;  %v13187_v21 = vcombine.high %v844_v9, %v856_v16  ;;  %v13189_v53 = vcombine.high %v845_v17, %v857_v18  ;;  %v952_v11 = vld [vmem:[#allocation5 + $0x1b90] sm:$0xff]  ;;  %v953_v57 = vld [vmem:[#allocation5 + $0x1b98] sm:$0xff] }
 0x3a8   :  { %10840 = vmatpush1.bf16.msra.mxu0 %v13066_v41  ;;  %11052 = vmatpush1.bf16.msra.mxu1 %v13068_v38  ;;  %v13186_v41 = vcombine.low %v844_v9, %v856_v16  ;;  %v13188_v38 = vcombine.low %v845_v17, %v857_v18  ;;  %v964_v9 = vld [vmem:[#allocation5 + $0x1bf0] sm:$0xff]  ;;  %v965_v17 = vld [vmem:[#allocation5 + $0x1bf8] sm:$0xff] }
 0x3a9   :  { %10841 = vmatprep.subr.bf16.mxu0 %v13091_v40  ;;  %11053 = vmatprep.subr.bf16.mxu1 %v13093_v49  ;;  %v13211_v40 = vcombine.high %v868_v54, %v880_v27  ;;  %v13213_v49 = vcombine.high %v869_v28, %v881_v33  ;;  %v976_v16 = vld [vmem:[#allocation5 + $0x1c50] sm:$0xff]  ;;  %v977_v18 = vld [vmem:[#allocation5 + $0x1c58] sm:$0xff] }
 0x3ac   :  { %10842 = vmatpush1.bf16.msra.mxu0 %v13090_v52  ;;  %11054 = vmatpush1.bf16.msra.mxu1 %v13092_v55  ;;  %v13210_v52 = vcombine.low %v868_v54, %v880_v27  ;;  %v13212_v55 = vcombine.low %v869_v28, %v881_v33  ;;  %v988_v54 = vld [vmem:[#allocation5 + $0x1cb0] sm:$0xff]  ;;  %v989_v28 = vld [vmem:[#allocation5 + $0x1cb8] sm:$0xff] }
 0x3ad   :  { %10843 = vmatprep.subr.bf16.mxu0 %v13115_v23  ;;  %11055 = vmatprep.subr.bf16.mxu1 %v13117_v14  ;;  %v13235_v23 = vcombine.high %v892_v46, %v904_v48  ;;  %v13237_v14 = vcombine.high %v893_v35, %v905_v51  ;;  %v1000_v27 = vld [vmem:[#allocation5 + $0x1d10] sm:$0xff]  ;;  %v1001_v33 = vld [vmem:[#allocation5 + $0x1d18] sm:$0xff] }
 0x3b0   :  { %10844 = vmatpush1.bf16.msra.mxu0 %v13114_v24  ;;  %11056 = vmatpush1.bf16.msra.mxu1 %v13116_v7  ;;  %v13234_v24 = vcombine.low %v892_v46, %v904_v48  ;;  %v13236_v7 = vcombine.low %v893_v35, %v905_v51  ;;  %v1012_v46 = vld [vmem:[#allocation5 + $0x1d70] sm:$0xff]  ;;  %v1013_v35 = vld [vmem:[#allocation5 + $0x1d78] sm:$0xff] }
 0x3b1   :  { %10845 = vmatprep.subr.bf16.mxu0 %v13139_v0  ;;  %11057 = vmatprep.subr.bf16.mxu1 %v13141_v4  ;;  %v13259_v0 = vcombine.high %v916_v62, %v928_v63  ;;  %v13261_v4 = vcombine.high %v917_v5, %v929_v61  ;;  %v1024_v48 = vld [vmem:[#allocation5 + $0x1dd0] sm:$0xff]  ;;  %v1025_v51 = vld [vmem:[#allocation5 + $0x1dd8] sm:$0xff] }
 0x3b4   :  { %10846 = vmatpush1.bf16.msra.mxu0 %v13138_v60  ;;  %11058 = vmatpush1.bf16.msra.mxu1 %v13140_v6  ;;  %v13258_v60 = vcombine.low %v916_v62, %v928_v63  ;;  %v13260_v6 = vcombine.low %v917_v5, %v929_v61  ;;  %v1036_v62 = vld [vmem:[#allocation5 + $0x1e30] sm:$0xff]  ;;  %v1037_v5 = vld [vmem:[#allocation5 + $0x1e38] sm:$0xff] }
 0x3b5   :  { %10847 = vmatprep.subr.bf16.mxu0 %v13163_v59  ;;  %11059 = vmatprep.subr.bf16.mxu1 %v13165_v8  ;;  %v13283_v59 = vcombine.high %v940_v10, %v952_v11  ;;  %v13285_v8 = vcombine.high %v941_v13, %v953_v57  ;;  %v1048_v63 = vld [vmem:[#allocation5 + $0x1e90] sm:$0xff]  ;;  %v1049_v61 = vld [vmem:[#allocation5 + $0x1e98] sm:$0xff] }
 0x3b8   :  { %10848 = vmatpush1.bf16.msra.mxu0 %v13162_v19  ;;  %11060 = vmatpush1.bf16.msra.mxu1 %v13164_v20  ;;  %v13282_v19 = vcombine.low %v940_v10, %v952_v11  ;;  %v13284_v20 = vcombine.low %v941_v13, %v953_v57  ;;  %v1060_v10 = vld [vmem:[#allocation5 + $0x1ef0] sm:$0xff]  ;;  %v1061_v13 = vld [vmem:[#allocation5 + $0x1ef8] sm:$0xff] }
 0x3b9   :  { %10870 = vmatprep.subr.bf16.mxu0 %v13187_v21  ;;  %11082 = vmatprep.subr.bf16.mxu1 %v13189_v53  ;;  %v13307_v21 = vcombine.high %v964_v9, %v976_v16  ;;  %v13309_v53 = vcombine.high %v965_v17, %v977_v18  ;;  %v1072_v11 = vld [vmem:[#allocation5 + $0x1f50] sm:$0xff]  ;;  %v1073_v57 = vld [vmem:[#allocation5 + $0x1f58] sm:$0xff] }
 0x3bb   :  { %10850 = vmatmul.mubr.bf16.vlgmr.msra.gmra.mrb[24].mxu0 %v14629_v31  ;;  %11062 = vmatmul.mubr.bf16.vlgmr.msra.gmra.mrb[24].mxu1 %v14629_v31 }
 0x3bc   :  { %10871 = vmatpush1.bf16.msra.mxu0 %v13186_v41  ;;  %11083 = vmatpush1.bf16.msra.mxu1 %v13188_v38  ;;  %v13306_v41 = vcombine.low %v964_v9, %v976_v16  ;;  %v13308_v38 = vcombine.low %v965_v17, %v977_v18  ;;  %v1084_v9 = vld [vmem:[#allocation5 + $0x1fb0] sm:$0xff]  ;;  %v1085_v17 = vld [vmem:[#allocation5 + $0x1fb8] sm:$0xff] }
 0x3bd   :  { %10872 = vmatprep.subr.bf16.mxu0 %v13211_v40  ;;  %11084 = vmatprep.subr.bf16.mxu1 %v13213_v49  ;;  %v13331_v40 = vcombine.high %v988_v54, %v1000_v27  ;;  %v13333_v49 = vcombine.high %v989_v28, %v1001_v33  ;;  %v1096_v16 = vld [vmem:[#allocation5 + $0x2010] sm:$0xff]  ;;  %v1097_v18 = vld [vmem:[#allocation5 + $0x2018] sm:$0xff] }
 0x3be   :  { %10859 = vmatprep.mubr.bf16.mxu0 %v14631_v45  ;;  %11071 = vmatprep.mubr.bf16.mxu1 %v14631_v45 }
 0x3c0   :  { %10873 = vmatpush1.bf16.msra.mxu0 %v13210_v52  ;;  %11085 = vmatpush1.bf16.msra.mxu1 %v13212_v55  ;;  %v13330_v52 = vcombine.low %v988_v54, %v1000_v27  ;;  %v13332_v55 = vcombine.low %v989_v28, %v1001_v33  ;;  %v1108_v54 = vld [vmem:[#allocation5 + $0x2070] sm:$0xff]  ;;  %v1109_v28 = vld [vmem:[#allocation5 + $0x2078] sm:$0xff] }
 0x3c1   :  { %10874 = vmatprep.subr.bf16.mxu0 %v13235_v23  ;;  %11086 = vmatprep.subr.bf16.mxu1 %v13237_v14  ;;  %v13355_v23 = vcombine.high %v1012_v46, %v1024_v48  ;;  %v13357_v14 = vcombine.high %v1013_v35, %v1025_v51  ;;  %v1120_v27 = vld [vmem:[#allocation5 + $0x20d0] sm:$0xff]  ;;  %v1121_v33 = vld [vmem:[#allocation5 + $0x20d8] sm:$0xff] }
 0x3c3   :  { %10860 = vmatmul.mubr.bf16.gmra.mrb[28].mxu0 %v14637_v56  ;;  %11072 = vmatmul.mubr.bf16.gmra.mrb[28].mxu1 %v14637_v56 }
 0x3c4   :  { %10875 = vmatpush1.bf16.msra.mxu0 %v13234_v24  ;;  %11087 = vmatpush1.bf16.msra.mxu1 %v13236_v7  ;;  %v13354_v24 = vcombine.low %v1012_v46, %v1024_v48  ;;  %v13356_v7 = vcombine.low %v1013_v35, %v1025_v51  ;;  %v1132_v46 = vld [vmem:[#allocation5 + $0x2130] sm:$0xff]  ;;  %v1133_v35 = vld [vmem:[#allocation5 + $0x2138] sm:$0xff] }
 0x3c5   :  { %10876 = vmatprep.subr.bf16.mxu0 %v13259_v0  ;;  %11088 = vmatprep.subr.bf16.mxu1 %v13261_v4  ;;  %v13379_v0 = vcombine.high %v1036_v62, %v1048_v63  ;;  %v13381_v4 = vcombine.high %v1037_v5, %v1049_v61  ;;  %v1144_v48 = vld [vmem:[#allocation5 + $0x2190] sm:$0xff]  ;;  %v1145_v51 = vld [vmem:[#allocation5 + $0x2198] sm:$0xff] }
 0x3c6   :  { %10902 = vmatprep.mubr.bf16.mxu0 %v14645_v2  ;;  %11114 = vmatprep.mubr.bf16.mxu1 %v14645_v2 }
 0x3c8   :  { %10877 = vmatpush1.bf16.msra.mxu0 %v13258_v60  ;;  %11089 = vmatpush1.bf16.msra.mxu1 %v13260_v6  ;;  %v13378_v60 = vcombine.low %v1036_v62, %v1048_v63  ;;  %v13380_v6 = vcombine.low %v1037_v5, %v1049_v61  ;;  %v1156_v62 = vld [vmem:[#allocation5 + $0x21f0] sm:$0xff]  ;;  %v1157_v5 = vld [vmem:[#allocation5 + $0x21f8] sm:$0xff] }
 0x3c9   :  { %10878 = vmatprep.subr.bf16.mxu0 %v13283_v59  ;;  %11090 = vmatprep.subr.bf16.mxu1 %v13285_v8  ;;  %v13403_v59 = vcombine.high %v1060_v10, %v1072_v11  ;;  %v13405_v8 = vcombine.high %v1061_v13, %v1073_v57  ;;  %v1168_v63 = vld [vmem:[#allocation5 + $0x2250] sm:$0xff]  ;;  %v1169_v61 = vld [vmem:[#allocation5 + $0x2258] sm:$0xff] }
 0x3cc   :  { %10879 = vmatpush1.bf16.msra.mxu0 %v13282_v19  ;;  %11091 = vmatpush1.bf16.msra.mxu1 %v13284_v20  ;;  %v13402_v19 = vcombine.low %v1060_v10, %v1072_v11  ;;  %v13404_v20 = vcombine.low %v1061_v13, %v1073_v57  ;;  %v1180_v10 = vld [vmem:[#allocation5 + $0x22b0] sm:$0xff]  ;;  %v1181_v13 = vld [vmem:[#allocation5 + $0x22b8] sm:$0xff] }
 0x3cd   :  { %10880 = vmatprep.subr.bf16.mxu0 %v13307_v21  ;;  %11092 = vmatprep.subr.bf16.mxu1 %v13309_v53  ;;  %v13427_v21 = vcombine.high %v1084_v9, %v1096_v16  ;;  %v13429_v53 = vcombine.high %v1085_v17, %v1097_v18  ;;  %v1192_v11 = vld [vmem:[#allocation5 + $0x2310] sm:$0xff]  ;;  %v1193_v57 = vld [vmem:[#allocation5 + $0x2318] sm:$0xff] }
 0x3d0   :  { %10881 = vmatpush1.bf16.msra.mxu0 %v13306_v41  ;;  %11093 = vmatpush1.bf16.msra.mxu1 %v13308_v38  ;;  %v13426_v41 = vcombine.low %v1084_v9, %v1096_v16  ;;  %v13428_v38 = vcombine.low %v1085_v17, %v1097_v18  ;;  %v1204_v9 = vld [vmem:[#allocation5 + $0x2370] sm:$0xff]  ;;  %v1205_v17 = vld [vmem:[#allocation5 + $0x2378] sm:$0xff] }
 0x3d1   :  { %10882 = vmatprep.subr.bf16.mxu0 %v13331_v40  ;;  %11094 = vmatprep.subr.bf16.mxu1 %v13333_v49  ;;  %v13451_v40 = vcombine.high %v1108_v54, %v1120_v27  ;;  %v13453_v49 = vcombine.high %v1109_v28, %v1121_v33  ;;  %v1216_v16 = vld [vmem:[#allocation5 + $0x23d0] sm:$0xff]  ;;  %v1217_v18 = vld [vmem:[#allocation5 + $0x23d8] sm:$0xff] }
 0x3d4   :  { %10883 = vmatpush1.bf16.msra.mxu0 %v13330_v52  ;;  %11095 = vmatpush1.bf16.msra.mxu1 %v13332_v55  ;;  %v13450_v52 = vcombine.low %v1108_v54, %v1120_v27  ;;  %v13452_v55 = vcombine.low %v1109_v28, %v1121_v33  ;;  %v1228_v54 = vld [vmem:[#allocation5 + $0x2430] sm:$0xff]  ;;  %v1229_v28 = vld [vmem:[#allocation5 + $0x2438] sm:$0xff] }
 0x3d5   :  { %10884 = vmatprep.subr.bf16.mxu0 %v13355_v23  ;;  %11096 = vmatprep.subr.bf16.mxu1 %v13357_v14  ;;  %v13475_v23 = vcombine.high %v1132_v46, %v1144_v48  ;;  %v13477_v14 = vcombine.high %v1133_v35, %v1145_v51  ;;  %v1240_v27 = vld [vmem:[#allocation5 + $0x2490] sm:$0xff]  ;;  %v1241_v33 = vld [vmem:[#allocation5 + $0x2498] sm:$0xff] }
 0x3d8   :  { %10885 = vmatpush1.bf16.msra.mxu0 %v13354_v24  ;;  %11097 = vmatpush1.bf16.msra.mxu1 %v13356_v7  ;;  %v13474_v24 = vcombine.low %v1132_v46, %v1144_v48  ;;  %v13476_v7 = vcombine.low %v1133_v35, %v1145_v51  ;;  %v1252_v46 = vld [vmem:[#allocation5 + $0x24f0] sm:$0xff]  ;;  %v1253_v35 = vld [vmem:[#allocation5 + $0x24f8] sm:$0xff] }
 0x3d9   :  { %10886 = vmatprep.subr.bf16.mxu0 %v13379_v0  ;;  %11098 = vmatprep.subr.bf16.mxu1 %v13381_v4  ;;  %v13499_v0 = vcombine.high %v1156_v62, %v1168_v63  ;;  %v13501_v4 = vcombine.high %v1157_v5, %v1169_v61  ;;  %v1264_v48 = vld [vmem:[#allocation5 + $0x2550] sm:$0xff]  ;;  %v1265_v51 = vld [vmem:[#allocation5 + $0x2558] sm:$0xff] }
 0x3dc   :  { %10887 = vmatpush1.bf16.msra.mxu0 %v13378_v60  ;;  %11099 = vmatpush1.bf16.msra.mxu1 %v13380_v6  ;;  %v13498_v60 = vcombine.low %v1156_v62, %v1168_v63  ;;  %v13500_v6 = vcombine.low %v1157_v5, %v1169_v61  ;;  %v1276_v62 = vld [vmem:[#allocation5 + $0x25b0] sm:$0xff]  ;;  %v1277_v5 = vld [vmem:[#allocation5 + $0x25b8] sm:$0xff] }
 0x3dd   :  { %10888 = vmatprep.subr.bf16.mxu0 %v13403_v59  ;;  %11100 = vmatprep.subr.bf16.mxu1 %v13405_v8  ;;  %v13523_v59 = vcombine.high %v1180_v10, %v1192_v11  ;;  %v13525_v8 = vcombine.high %v1181_v13, %v1193_v57  ;;  %v1288_v63 = vld [vmem:[#allocation5 + $0x2610] sm:$0xff]  ;;  %v1289_v61 = vld [vmem:[#allocation5 + $0x2618] sm:$0xff] }
 0x3e0   :  { %10889 = vmatpush1.bf16.msra.mxu0 %v13402_v19  ;;  %11101 = vmatpush1.bf16.msra.mxu1 %v13404_v20  ;;  %v13522_v19 = vcombine.low %v1180_v10, %v1192_v11  ;;  %v13524_v20 = vcombine.low %v1181_v13, %v1193_v57  ;;  %v1300_v10 = vld [vmem:[#allocation5 + $0x2670] sm:$0xff]  ;;  %v1301_v13 = vld [vmem:[#allocation5 + $0x2678] sm:$0xff] }
 0x3e1   :  { %10890 = vmatprep.subr.bf16.mxu0 %v13427_v21  ;;  %11102 = vmatprep.subr.bf16.mxu1 %v13429_v53  ;;  %v13547_v21 = vcombine.high %v1204_v9, %v1216_v16  ;;  %v13549_v53 = vcombine.high %v1205_v17, %v1217_v18  ;;  %v1312_v11 = vld [vmem:[#allocation5 + $0x26d0] sm:$0xff]  ;;  %v1313_v57 = vld [vmem:[#allocation5 + $0x26d8] sm:$0xff] }
 0x3e4   :  { %10891 = vmatpush1.bf16.msra.mxu0 %v13426_v41  ;;  %11103 = vmatpush1.bf16.msra.mxu1 %v13428_v38  ;;  %v13546_v41 = vcombine.low %v1204_v9, %v1216_v16  ;;  %v13548_v38 = vcombine.low %v1205_v17, %v1217_v18  ;;  %v1324_v9 = vld [vmem:[#allocation5 + $0x2730] sm:$0xff]  ;;  %v1325_v17 = vld [vmem:[#allocation5 + $0x2738] sm:$0xff] }
 0x3e5   :  { %10892 = vmatprep.subr.bf16.mxu0 %v13451_v40  ;;  %11104 = vmatprep.subr.bf16.mxu1 %v13453_v49  ;;  %v13571_v40 = vcombine.high %v1228_v54, %v1240_v27  ;;  %v13573_v49 = vcombine.high %v1229_v28, %v1241_v33  ;;  %v1336_v16 = vld [vmem:[#allocation5 + $0x2790] sm:$0xff]  ;;  %v1337_v18 = vld [vmem:[#allocation5 + $0x2798] sm:$0xff] }
 0x3e8   :  { %10893 = vmatpush1.bf16.msra.mxu0 %v13450_v52  ;;  %11105 = vmatpush1.bf16.msra.mxu1 %v13452_v55  ;;  %v13570_v52 = vcombine.low %v1228_v54, %v1240_v27  ;;  %v13572_v55 = vcombine.low %v1229_v28, %v1241_v33  ;;  %v1348_v54 = vld [vmem:[#allocation5 + $0x27f0] sm:$0xff]  ;;  %v1349_v28 = vld [vmem:[#allocation5 + $0x27f8] sm:$0xff] }
 0x3e9   :  { %10894 = vmatprep.subr.bf16.mxu0 %v13475_v23  ;;  %11106 = vmatprep.subr.bf16.mxu1 %v13477_v14  ;;  %v13595_v23 = vcombine.high %v1252_v46, %v1264_v48  ;;  %v13597_v14 = vcombine.high %v1253_v35, %v1265_v51  ;;  %v1360_v27 = vld [vmem:[#allocation5 + $0x2850] sm:$0xff]  ;;  %v1361_v33 = vld [vmem:[#allocation5 + $0x2858] sm:$0xff] }
 0x3ec   :  { %10895 = vmatpush1.bf16.msra.mxu0 %v13474_v24  ;;  %11107 = vmatpush1.bf16.msra.mxu1 %v13476_v7  ;;  %v13594_v24 = vcombine.low %v1252_v46, %v1264_v48  ;;  %v13596_v7 = vcombine.low %v1253_v35, %v1265_v51  ;;  %v13693_v46 = vcombine.high %v1349_v28, %v1361_v33  ;;  %v1372_v48 = vld [vmem:[#allocation5 + $0x28b0] sm:$0xff] }
 0x3ed   :  { %10896 = vmatprep.subr.bf16.mxu0 %v13499_v0  ;;  %11108 = vmatprep.subr.bf16.mxu1 %v13501_v4  ;;  %v13619_v0 = vcombine.high %v1276_v62, %v1288_v63  ;;  %v13621_v4 = vcombine.high %v1277_v5, %v1289_v61  ;;  %v1384_v35 = vld [vmem:[#allocation5 + $0x2910] sm:$0xff] }
 0x3f0   :  { %10897 = vmatpush1.bf16.msra.mxu0 %v13498_v60  ;;  %11109 = vmatpush1.bf16.msra.mxu1 %v13500_v6  ;;  %v13618_v60 = vcombine.low %v1276_v62, %v1288_v63  ;;  %v13620_v6 = vcombine.low %v1277_v5, %v1289_v61  ;;  %v13690_v62 = vcombine.low %v1348_v54, %v1360_v27 }
 0x3f1   :  { %10898 = vmatprep.subr.bf16.mxu0 %v13523_v59  ;;  %11110 = vmatprep.subr.bf16.mxu1 %v13525_v8  ;;  %v13643_v59 = vcombine.high %v1300_v10, %v1312_v11  ;;  %v13645_v8 = vcombine.high %v1301_v13, %v1313_v57  ;;  %v13692_v5 = vcombine.low %v1349_v28, %v1361_v33 }
 0x3f2   :  { %v13715_v61 = vcombine.high %v1372_v48, %v1384_v35 }
 0x3f4   :  { %10899 = vmatpush1.bf16.msra.mxu0 %v13522_v19  ;;  %11111 = vmatpush1.bf16.msra.mxu1 %v13524_v20  ;;  %v13642_v19 = vcombine.low %v1300_v10, %v1312_v11  ;;  %v13644_v20 = vcombine.low %v1301_v13, %v1313_v57  ;;  %v1397_v57 = vld [vmem:[#allocation5 + $0x2978] sm:$0xff] }
 0x3f5   :  { %10900 = vmatprep.subr.bf16.mxu0 %v13547_v21  ;;  %11112 = vmatprep.subr.bf16.mxu1 %v13549_v53  ;;  %v13667_v21 = vcombine.high %v1324_v9, %v1336_v16  ;;  %v13669_v53 = vcombine.high %v1325_v17, %v1337_v18 }
 0x3f8   :  { %10901 = vmatpush1.bf16.msra.mxu0 %v13546_v41  ;;  %11113 = vmatpush1.bf16.msra.mxu1 %v13548_v38  ;;  %v13666_v41 = vcombine.low %v1324_v9, %v1336_v16  ;;  %v1607_v38 = vld [vmem:[#allocation7 + $0x8] sm:$0xff]  ;;  %v13714_v16 = vcombine.low %v1372_v48, %v1384_v35  ;;  %v1421_v48 = vld [vmem:[#allocation5 + $0x2a38] sm:$0xff] }
 0x3f9   :  { %10923 = vmatprep.subr.bf16.mxu0 %v13571_v40  ;;  %11135 = vmatprep.subr.bf16.mxu1 %v13573_v49  ;;  %v13668_v40 = vcombine.low %v1325_v17, %v1337_v18  ;;  %v13691_v49 = vcombine.high %v1348_v54, %v1360_v27  ;;  %v14862_v51 = vrot.slane %v1607_v38, %v14717_v26  ;;  %v1433_v35 = vld [vmem:[#allocation5 + $0x2a98] sm:$0xff] }
 0x3fa   :  { %v14871_v63 = vrot.slane %v1607_v38, %v14727_v37 }
 0x3fb   :  { %10903 = vmatmul.mubr.bf16.vlgmr.msra.gmra.mrb[24].mxu0 %v14653_v1  ;;  %11115 = vmatmul.mubr.bf16.vlgmr.msra.gmra.mrb[24].mxu1 %v14653_v1 }
 0x3fc   :  { %10924 = vmatpush1.bf16.msra.mxu0 %v13570_v52  ;;  %11136 = vmatpush1.bf16.msra.mxu1 %v13572_v55  ;;  %v1373_v52 = vld [vmem:[#allocation5 + $0x28b8] sm:$0xff] }
 0x3fd   :  { %10925 = vmatprep.subr.bf16.mxu0 %v13595_v23  ;;  %11137 = vmatprep.subr.bf16.mxu1 %v13597_v14  ;;  %v1385_v55 = vld [vmem:[#allocation5 + $0x2918] sm:$0xff]  ;;  %v14865_v23 = vrot.slane %v1607_v38, %v14721_v29  ;;  %v14868_v14 = vrot.slane %v1607_v38, %v14724_v32  ;;  %v1420_v38 = vld [vmem:[#allocation5 + $0x2a30] sm:$0xff] }
 0x3fe   :  { %10912 = vmatprep.mubr.bf16.mxu0 %v14655_v12  ;;  %11124 = vmatprep.mubr.bf16.mxu1 %v14655_v12  ;;  %v13716_v17 = vcombine.low %v1373_v52, %v1385_v55 }
 0x400   :  { %10926 = vmatpush1.bf16.msra.mxu0 %v13594_v24  ;;  %11138 = vmatpush1.bf16.msra.mxu1 %v13596_v7  ;;  %v13717_v7 = vcombine.high %v1373_v52, %v1385_v55 }
 0x401   :  { %10927 = vmatprep.subr.bf16.mxu0 %v13619_v0  ;;  %11139 = vmatprep.subr.bf16.mxu1 %v13621_v4  ;;  %v1396_v0 = vld [vmem:[#allocation5 + $0x2970] sm:$0xff] }
 0x402   :  { %v1408_v4 = vld [vmem:[#allocation5 + $0x29d0] sm:$0xff] }
 0x403   :  { %10913 = vmatmul.mubr.bf16.gmra.mrb[28].mxu0 %v14661_v22  ;;  %11125 = vmatmul.mubr.bf16.gmra.mrb[28].mxu1 %v14661_v22  ;;  %v13738_v55 = vcombine.low %v1396_v0, %v1408_v4 }
 0x404   :  { %10928 = vmatpush1.bf16.msra.mxu0 %v13618_v60  ;;  %11140 = vmatpush1.bf16.msra.mxu1 %v13620_v6  ;;  %v1409_v60 = vld [vmem:[#allocation5 + $0x29d8] sm:$0xff] }
 0x405   :  { %10929 = vmatprep.subr.bf16.mxu0 %v13643_v59  ;;  %11141 = vmatprep.subr.bf16.mxu1 %v13645_v8 }
 0x406   :  { %10955 = vmatprep.mubr.bf16.mxu0 %v14669_v30  ;;  %11167 = vmatprep.mubr.bf16.mxu1 %v14669_v30 }
 0x408   :  { %10930 = vmatpush1.bf16.msra.mxu0 %v13642_v19  ;;  %11142 = vmatpush1.bf16.msra.mxu1 %v13644_v20 }
 0x409   :  { %10931 = vmatprep.subr.bf16.mxu0 %v13667_v21  ;;  %11143 = vmatprep.subr.bf16.mxu1 %v13669_v53  ;;  %v13739_v53 = vcombine.high %v1396_v0, %v1408_v4 }
 0x40c   :  { %10932 = vmatpush1.bf16.msra.mxu0 %v13666_v41  ;;  %11144 = vmatpush1.bf16.msra.mxu1 %v13668_v40  ;;  %v13741_v41 = vcombine.high %v1397_v57, %v1409_v60  ;;  %v1432_v40 = vld [vmem:[#allocation5 + $0x2a90] sm:$0xff] }
 0x40d   :  { %10933 = vmatprep.subr.bf16.mxu0 %v13691_v49  ;;  %11145 = vmatprep.subr.bf16.mxu1 %v13693_v46 }
 0x40e   :  { %v10533_v24 = vpop.f32.mrb[16].mxu0  ;;  %v10745_v11 = vpop.f32.mrb[16].mxu1 }
 0x40f   :  { %v14070_v10 = vadd.f32 %v10533_v24, %v14862_v51  ;;  %v10535_v13 = vpop.f32.mrb[17].mxu0  ;;  %v14078_v6 = vadd.f32 %v10745_v11, %v14865_v23  ;;  %v10747_v8 = vpop.f32.mrb[17].mxu1  ;;  %v1456_v11 = vld [vmem:[#allocation5 + $0x2b50] sm:$0xff] }
 0x410   :  { %v14071_v59 = vadd.f32 %v10535_v13, %v14868_v14  ;;  %v10537_v9 = vpop.f32.mrb[18].mxu0  ;;  %10934 = vmatpush1.bf16.msra.mxu0 %v13690_v62  ;;  %v14079_v18 = vadd.f32 %v10747_v8, %v14871_v63  ;;  %v10749_v20 = vpop.f32.mrb[18].mxu1  ;;  %11146 = vmatpush1.bf16.msra.mxu1 %v13692_v5  ;;  %v13740_v5 = vcombine.low %v1397_v57, %v1409_v60  ;;  %v1445_v8 = vld [vmem:[#allocation5 + $0x2af8] sm:$0xff] }
 0x411   :  { %v14072_v19 = vadd.f32 %v10537_v9, %v14862_v51  ;;  %v10539_v21 = vpop.f32.mrb[19].mxu0  ;;  %10935 = vmatprep.subr.bf16.mxu0 %v13715_v61  ;;  %v14080_v27 = vadd.f32 %v10749_v20, %v14865_v23  ;;  %v10751_v33 = vpop.f32.mrb[19].mxu1  ;;  %11147 = vmatprep.subr.bf16.mxu1 %v13717_v7  ;;  %v13763_v61 = vcombine.high %v1420_v38, %v1432_v40  ;;  %v1457_v9 = vld [vmem:[#allocation5 + $0x2b58] sm:$0xff] }
 0x412   :  { %v13994_v54 = vpack.c.bf16 %v14071_v59, %v14070_v10  ;;  %v14073_v28 = vadd.f32 %v10539_v21, %v14868_v14  ;;  %v13995_v49 = vpack.c.bf16 %v14079_v18, %v14078_v6  ;;  %v14081_v46 = vadd.f32 %v10751_v33, %v14871_v63  ;;  %v1444_v10 = vld [vmem:[#allocation5 + $0x2af0] sm:$0xff] }
 0x413   :  { %v13765_v7 = vcombine.high %v1421_v48, %v1433_v35  ;;  %v13762_v60 = vcombine.low %v1420_v38, %v1432_v40  ;;  %v1480_v38 = vld [vmem:[#allocation5 + $0x2c10] sm:$0xff] }
 0x414   :  { %12328 = vst [vmem:[#allocation8 + $0x20] sm:$0xff] %v13994_v54  ;;  %v14006_v52 = vpack.c.bf16 %v14073_v28, %v14072_v19  ;;  %10936 = vmatpush1.bf16.msra.mxu0 %v13714_v16  ;;  %12329 = vst [vmem:[#allocation8 + $0x28] sm:$0xff] %v13995_v49  ;;  %v14007_v62 = vpack.c.bf16 %v14081_v46, %v14080_v27  ;;  %11148 = vmatpush1.bf16.msra.mxu1 %v13716_v17  ;;  %v1468_v49 = vld [vmem:[#allocation5 + $0x2bb0] sm:$0xff] }
 0x415   :  { %10937 = vmatprep.subr.bf16.mxu0 %v13739_v53  ;;  %11149 = vmatprep.subr.bf16.mxu1 %v13741_v41  ;;  %v13764_v17 = vcombine.low %v1421_v48, %v1433_v35  ;;  %v13787_v53 = vcombine.high %v1444_v10, %v1456_v11  ;;  %v13789_v41 = vcombine.high %v1445_v8, %v1457_v9  ;;  %v1469_v48 = vld [vmem:[#allocation5 + $0x2bb8] sm:$0xff] }
 0x416   :  { %12340 = vst [vmem:[#allocation8 + $0x80] sm:$0xff] %v14006_v52  ;;  %v10543_v24 = vpop.f32.mrb[20].mxu0  ;;  %12341 = vst [vmem:[#allocation8 + $0x88] sm:$0xff] %v14007_v62  ;;  %v10755_v6 = vpop.f32.mrb[20].mxu1  ;;  %v13786_v52 = vcombine.low %v1444_v10, %v1456_v11 }
 0x417   :  { %v14074_v13 = vadd.f32 %v10543_v24, %v14862_v51  ;;  %v10545_v59 = vpop.f32.mrb[21].mxu0  ;;  %v14082_v0 = vadd.f32 %v10755_v6, %v14865_v23  ;;  %v10757_v16 = vpop.f32.mrb[21].mxu1  ;;  %v1493_v24 = vld [vmem:[#allocation5 + $0x2c78] sm:$0xff]  ;;  %v1516_v6 = vld [vmem:[#allocation5 + $0x2d30] sm:$0xff] }
 0x418   :  { %v14075_v4 = vadd.f32 %v10545_v59, %v14868_v14  ;;  %v10547_v57 = vpop.f32.mrb[22].mxu0  ;;  %10938 = vmatpush1.bf16.msra.mxu0 %v13738_v55  ;;  %v14083_v18 = vadd.f32 %v10757_v16, %v14871_v63  ;;  %v10759_v20 = vpop.f32.mrb[22].mxu1  ;;  %11150 = vmatpush1.bf16.msra.mxu1 %v13740_v5  ;;  %v1492_v5 = vld [vmem:[#allocation5 + $0x2c70] sm:$0xff] }
 0x419   :  { %v14076_v19 = vadd.f32 %v10547_v57, %v14862_v51  ;;  %v10549_v21 = vpop.f32.mrb[23].mxu0  ;;  %10939 = vmatprep.subr.bf16.mxu0 %v13763_v61  ;;  %v14084_v27 = vadd.f32 %v10759_v20, %v14865_v23  ;;  %v10761_v33 = vpop.f32.mrb[23].mxu1  ;;  %11151 = vmatprep.subr.bf16.mxu1 %v13765_v7  ;;  %v1481_v51 = vld [vmem:[#allocation5 + $0x2c18] sm:$0xff]  ;;  %v13788_v23 = vcombine.low %v1445_v8, %v1457_v9  ;;  %v1504_v61 = vld [vmem:[#allocation5 + $0x2cd0] sm:$0xff] }
 0x41a   :  { %v14018_v54 = vpack.c.bf16 %v14075_v4, %v14074_v13  ;;  %v14077_v28 = vadd.f32 %v10549_v21, %v14868_v14  ;;  %v14019_v40 = vpack.c.bf16 %v14083_v18, %v14082_v0  ;;  %v14085_v46 = vadd.f32 %v10761_v33, %v14871_v63  ;;  %v1505_v63 = vld [vmem:[#allocation5 + $0x2cd8] sm:$0xff]  ;;  %v1528_v59 = vld [vmem:[#allocation5 + $0x2d90] sm:$0xff] }
 0x41b   :  { %v13811_v14 = vcombine.high %v1468_v49, %v1480_v38  ;;  %v13813_v62 = vcombine.high %v1469_v48, %v1481_v51  ;;  %v13810_v7 = vcombine.low %v1468_v49, %v1480_v38  ;;  %v13812_v13 = vcombine.low %v1469_v48, %v1481_v51  ;;  %v1517_v8 = vld [vmem:[#allocation5 + $0x2d38] sm:$0xff]  ;;  %v1588_v48 = vld [vmem:[#allocation5 + $0x2f70] sm:$0xff] }
 0x41c   :  { %12352 = vst [vmem:[#allocation8 + $0xe0] sm:$0xff] %v14018_v54  ;;  %v14030_v35 = vpack.c.bf16 %v14077_v28, %v14076_v19  ;;  %10940 = vmatpush1.bf16.msra.mxu0 %v13762_v60  ;;  %12353 = vst [vmem:[#allocation8 + $0xe8] sm:$0xff] %v14019_v40  ;;  %v14031_v55 = vpack.c.bf16 %v14085_v46, %v14084_v27  ;;  %11152 = vmatpush1.bf16.msra.mxu1 %v13764_v17  ;;  %v1529_v9 = vld [vmem:[#allocation5 + $0x2d98] sm:$0xff]  ;;  %v1540_v60 = vld [vmem:[#allocation5 + $0x2df0] sm:$0xff] }
 0x41d   :  { %10941 = vmatprep.subr.bf16.mxu0 %v13787_v53  ;;  %11153 = vmatprep.subr.bf16.mxu1 %v13789_v41  ;;  %v13835_v10 = vcombine.high %v1492_v5, %v1504_v61  ;;  %v13837_v11 = vcombine.high %v1493_v24, %v1505_v63  ;;  %v13834_v0 = vcombine.low %v1492_v5, %v1504_v61  ;;  %v1552_v17 = vld [vmem:[#allocation5 + $0x2e50] sm:$0xff]  ;;  %v1541_v18 = vld [vmem:[#allocation5 + $0x2df8] sm:$0xff]  ;;  %v78_v5 = vld [vmem:[#allocation5 + $0x40] sm:$0xff] }
 0x41e   :  { %12364 = vst [vmem:[#allocation8 + $0x140] sm:$0xff] %v14030_v35  ;;  %12365 = vst [vmem:[#allocation8 + $0x148] sm:$0xff] %v14031_v55  ;;  %v13836_v4 = vcombine.low %v1493_v24, %v1505_v63  ;;  %v13859_v16 = vcombine.high %v1516_v6, %v1528_v59  ;;  %v13861_v57 = vcombine.high %v1517_v8, %v1529_v9  ;;  %v1553_v19 = vld [vmem:[#allocation5 + $0x2e58] sm:$0xff]  ;;  %v1564_v27 = vld [vmem:[#allocation5 + $0x2eb0] sm:$0xff] }
 0x41f   :  { %v13858_v20 = vcombine.low %v1516_v6, %v1528_v59  ;;  %v13860_v21 = vcombine.low %v1517_v8, %v1529_v9  ;;  %v13883_v53 = vcombine.high %v1540_v60, %v1552_v17  ;;  %v13885_v54 = vcombine.high %v1541_v18, %v1553_v19  ;;  %v1576_v28 = vld [vmem:[#allocation5 + $0x2f10] sm:$0xff]  ;;  %v1565_v33 = vld [vmem:[#allocation5 + $0x2eb8] sm:$0xff]  ;;  %v90_v61 = vld [vmem:[#allocation5 + $0xa0] sm:$0xff] }
 0x420   :  { %10942 = vmatpush1.bf16.msra.mxu0 %v13786_v52  ;;  %11154 = vmatpush1.bf16.msra.mxu1 %v13788_v23  ;;  %v1577_v41 = vld [vmem:[#allocation5 + $0x2f18] sm:$0xff]  ;;  %v13882_v49 = vcombine.low %v1540_v60, %v1552_v17  ;;  %v13884_v38 = vcombine.low %v1541_v18, %v1553_v19  ;;  %v13907_v40 = vcombine.high %v1564_v27, %v1576_v28  ;;  %v1600_v51 = vld [vmem:[#allocation5 + $0x2fd0] sm:$0xff]  ;;  %v79_v24 = vld [vmem:[#allocation5 + $0x48] sm:$0xff] }
 0x421   :  { %10943 = vmatprep.subr.bf16.mxu0 %v13811_v14  ;;  %11155 = vmatprep.subr.bf16.mxu1 %v13813_v62  ;;  %v13909_v46 = vcombine.high %v1565_v33, %v1577_v41  ;;  %v1589_v35 = vld [vmem:[#allocation5 + $0x2f78] sm:$0xff]  ;;  %v13906_v55 = vcombine.low %v1564_v27, %v1576_v28  ;;  %v13908_v23 = vcombine.low %v1565_v33, %v1577_v41  ;;  %v91_v63 = vld [vmem:[#allocation5 + $0xa8] sm:$0xff]  ;;  %v102_v6 = vld [vmem:[#allocation5 + $0x100] sm:$0xff] }
 0x422   :  { %v1601_v52 = vld [vmem:[#allocation5 + $0x2fd8] sm:$0xff]  ;;  %v13931_v14 = vcombine.high %v1588_v48, %v1600_v51  ;;  %v114_v59 = vld [vmem:[#allocation5 + $0x160] sm:$0xff]  ;;  %v103_v8 = vld [vmem:[#allocation5 + $0x108] sm:$0xff] }
 0x423   :  { %v13933_v62 = vcombine.high %v1589_v35, %v1601_v52  ;;  %v115_v9 = vld [vmem:[#allocation5 + $0x168] sm:$0xff]  ;;  %v126_v60 = vld [vmem:[#allocation5 + $0x1c0] sm:$0xff] }
 0x424   :  { %10944 = vmatpush1.bf16.msra.mxu0 %v13810_v7  ;;  %11156 = vmatpush1.bf16.msra.mxu1 %v13812_v13  ;;  %v13930_v7 = vcombine.low %v1588_v48, %v1600_v51  ;;  %v13932_v13 = vcombine.low %v1589_v35, %v1601_v52  ;;  %v138_v17 = vld [vmem:[#allocation5 + $0x220] sm:$0xff]  ;;  %v127_v18 = vld [vmem:[#allocation5 + $0x1c8] sm:$0xff] }
 0x425   :  { %10945 = vmatprep.subr.bf16.mxu0 %v13835_v10  ;;  %11157 = vmatprep.subr.bf16.mxu1 %v13837_v11  ;;  %v12423_v10 = vcombine.high %v78_v5, %v90_v61  ;;  %v12425_v11 = vcombine.high %v79_v24, %v91_v63  ;;  %v139_v19 = vld [vmem:[#allocation5 + $0x228] sm:$0xff]  ;;  %v150_v27 = vld [vmem:[#allocation5 + $0x280] sm:$0xff] }
 0x426   :  { %v162_v28 = vld [vmem:[#allocation5 + $0x2e0] sm:$0xff]  ;;  %v151_v33 = vld [vmem:[#allocation5 + $0x288] sm:$0xff] }
 0x427   :  { %v163_v41 = vld [vmem:[#allocation5 + $0x2e8] sm:$0xff]  ;;  %v174_v48 = vld [vmem:[#allocation5 + $0x340] sm:$0xff] }
 0x428   :  { %10946 = vmatpush1.bf16.msra.mxu0 %v13834_v0  ;;  %11158 = vmatpush1.bf16.msra.mxu1 %v13836_v4  ;;  %v12422_v0 = vcombine.low %v78_v5, %v90_v61  ;;  %v12424_v4 = vcombine.low %v79_v24, %v91_v63  ;;  %v186_v51 = vld [vmem:[#allocation5 + $0x3a0] sm:$0xff]  ;;  %v175_v35 = vld [vmem:[#allocation5 + $0x348] sm:$0xff] }
 0x429   :  { %10947 = vmatprep.subr.bf16.mxu0 %v13859_v16  ;;  %11159 = vmatprep.subr.bf16.mxu1 %v13861_v57  ;;  %v12447_v16 = vcombine.high %v102_v6, %v114_v59  ;;  %v12449_v57 = vcombine.high %v103_v8, %v115_v9  ;;  %v187_v52 = vld [vmem:[#allocation5 + $0x3a8] sm:$0xff]  ;;  %v198_v5 = vld [vmem:[#allocation5 + $0x400] sm:$0xff] }
 0x42a   :  { %v210_v61 = vld [vmem:[#allocation5 + $0x460] sm:$0xff]  ;;  %v199_v24 = vld [vmem:[#allocation5 + $0x408] sm:$0xff] }
 0x42b   :  { %v211_v63 = vld [vmem:[#allocation5 + $0x468] sm:$0xff] }
 0x42c   :  { %10948 = vmatpush1.bf16.msra.mxu0 %v13858_v20  ;;  %11160 = vmatpush1.bf16.msra.mxu1 %v13860_v21  ;;  %v12446_v20 = vcombine.low %v102_v6, %v114_v59  ;;  %v12448_v21 = vcombine.low %v103_v8, %v115_v9  ;;  %v222_v6 = vld [vmem:[#allocation5 + $0x4c0] sm:$0xff]  ;;  %v223_v8 = vld [vmem:[#allocation5 + $0x4c8] sm:$0xff] }
 0x42d   :  { %10949 = vmatprep.subr.bf16.mxu0 %v13883_v53  ;;  %11161 = vmatprep.subr.bf16.mxu1 %v13885_v54  ;;  %v12471_v53 = vcombine.high %v126_v60, %v138_v17  ;;  %v12473_v54 = vcombine.high %v127_v18, %v139_v19  ;;  %v234_v59 = vld [vmem:[#allocation5 + $0x520] sm:$0xff]  ;;  %v235_v9 = vld [vmem:[#allocation5 + $0x528] sm:$0xff] }
 0x430   :  { %10950 = vmatpush1.bf16.msra.mxu0 %v13882_v49  ;;  %11162 = vmatpush1.bf16.msra.mxu1 %v13884_v38  ;;  %v12470_v49 = vcombine.low %v126_v60, %v138_v17  ;;  %v12472_v38 = vcombine.low %v127_v18, %v139_v19  ;;  %v246_v60 = vld [vmem:[#allocation5 + $0x580] sm:$0xff]  ;;  %v247_v18 = vld [vmem:[#allocation5 + $0x588] sm:$0xff] }
 0x431   :  { %10951 = vmatprep.subr.bf16.mxu0 %v13907_v40  ;;  %11163 = vmatprep.subr.bf16.mxu1 %v13909_v46  ;;  %v12495_v40 = vcombine.high %v150_v27, %v162_v28  ;;  %v12497_v46 = vcombine.high %v151_v33, %v163_v41  ;;  %v258_v17 = vld [vmem:[#allocation5 + $0x5e0] sm:$0xff]  ;;  %v259_v19 = vld [vmem:[#allocation5 + $0x5e8] sm:$0xff] }
 0x434   :  { %10952 = vmatpush1.bf16.msra.mxu0 %v13906_v55  ;;  %11164 = vmatpush1.bf16.msra.mxu1 %v13908_v23  ;;  %v12494_v55 = vcombine.low %v150_v27, %v162_v28  ;;  %v12496_v23 = vcombine.low %v151_v33, %v163_v41  ;;  %v270_v27 = vld [vmem:[#allocation5 + $0x640] sm:$0xff]  ;;  %v271_v33 = vld [vmem:[#allocation5 + $0x648] sm:$0xff] }
 0x435   :  { %10953 = vmatprep.subr.bf16.mxu0 %v13931_v14  ;;  %11165 = vmatprep.subr.bf16.mxu1 %v13933_v62  ;;  %v12519_v14 = vcombine.high %v174_v48, %v186_v51  ;;  %v12521_v62 = vcombine.high %v175_v35, %v187_v52  ;;  %v282_v28 = vld [vmem:[#allocation5 + $0x6a0] sm:$0xff]  ;;  %v283_v41 = vld [vmem:[#allocation5 + $0x6a8] sm:$0xff] }
 0x438   :  { %10954 = vmatpush1.bf16.msra.mxu0 %v13930_v7  ;;  %11166 = vmatpush1.bf16.msra.mxu1 %v13932_v13  ;;  %v12518_v7 = vcombine.low %v174_v48, %v186_v51  ;;  %v12520_v13 = vcombine.low %v175_v35, %v187_v52  ;;  %v294_v48 = vld [vmem:[#allocation5 + $0x700] sm:$0xff]  ;;  %v295_v35 = vld [vmem:[#allocation5 + $0x708] sm:$0xff] }
 0x439   :  { %11188 = vmatprep.subr.bf16.mxu0 %v12423_v10  ;;  %11400 = vmatprep.subr.bf16.mxu1 %v12425_v11  ;;  %v12543_v10 = vcombine.high %v198_v5, %v210_v61  ;;  %v12545_v11 = vcombine.high %v199_v24, %v211_v63  ;;  %v306_v51 = vld [vmem:[#allocation5 + $0x760] sm:$0xff]  ;;  %v307_v52 = vld [vmem:[#allocation5 + $0x768] sm:$0xff] }
 0x43b   :  { %10956 = vmatmul.mubr.bf16.vlgmr.msra.gmra.mrb[24].mxu0 %v14677_v42  ;;  %11168 = vmatmul.mubr.bf16.vlgmr.msra.gmra.mrb[24].mxu1 %v14677_v42 }
 0x43c   :  { %11189 = vmatpush1.bf16.msra.mxu0 %v12422_v0  ;;  %11401 = vmatpush1.bf16.msra.mxu1 %v12424_v4  ;;  %v12542_v0 = vcombine.low %v198_v5, %v210_v61  ;;  %v12544_v4 = vcombine.low %v199_v24, %v211_v63  ;;  %v318_v5 = vld [vmem:[#allocation5 + $0x7c0] sm:$0xff]  ;;  %v319_v24 = vld [vmem:[#allocation5 + $0x7c8] sm:$0xff] }
 0x43d   :  { %11190 = vmatprep.subr.bf16.mxu0 %v12447_v16  ;;  %11402 = vmatprep.subr.bf16.mxu1 %v12449_v57  ;;  %v12567_v16 = vcombine.high %v222_v6, %v234_v59  ;;  %v12569_v57 = vcombine.high %v223_v8, %v235_v9  ;;  %v330_v61 = vld [vmem:[#allocation5 + $0x820] sm:$0xff]  ;;  %v331_v63 = vld [vmem:[#allocation5 + $0x828] sm:$0xff] }
 0x43e   :  { %10965 = vmatprep.mubr.bf16.mxu0 %v14679_v50  ;;  %11177 = vmatprep.mubr.bf16.mxu1 %v14679_v50 }
 0x440   :  { %11191 = vmatpush1.bf16.msra.mxu0 %v12446_v20  ;;  %11403 = vmatpush1.bf16.msra.mxu1 %v12448_v21  ;;  %v12566_v20 = vcombine.low %v222_v6, %v234_v59  ;;  %v12568_v21 = vcombine.low %v223_v8, %v235_v9  ;;  %v342_v6 = vld [vmem:[#allocation5 + $0x880] sm:$0xff]  ;;  %v343_v8 = vld [vmem:[#allocation5 + $0x888] sm:$0xff] }
 0x441   :  { %11192 = vmatprep.subr.bf16.mxu0 %v12471_v53  ;;  %11404 = vmatprep.subr.bf16.mxu1 %v12473_v54  ;;  %v12591_v53 = vcombine.high %v246_v60, %v258_v17  ;;  %v12593_v54 = vcombine.high %v247_v18, %v259_v19  ;;  %v354_v59 = vld [vmem:[#allocation5 + $0x8e0] sm:$0xff]  ;;  %v355_v9 = vld [vmem:[#allocation5 + $0x8e8] sm:$0xff] }
 0x443   :  { %10966 = vmatmul.mubr.bf16.gmra.mrb[28].mxu0 %v14685_v3  ;;  %11178 = vmatmul.mubr.bf16.gmra.mrb[28].mxu1 %v14685_v3 }
 0x444   :  { %11193 = vmatpush1.bf16.msra.mxu0 %v12470_v49  ;;  %11405 = vmatpush1.bf16.msra.mxu1 %v12472_v38  ;;  %v12590_v49 = vcombine.low %v246_v60, %v258_v17  ;;  %v12592_v38 = vcombine.low %v247_v18, %v259_v19  ;;  %v366_v60 = vld [vmem:[#allocation5 + $0x940] sm:$0xff]  ;;  %v367_v18 = vld [vmem:[#allocation5 + $0x948] sm:$0xff] }
 0x445   :  { %11194 = vmatprep.subr.bf16.mxu0 %v12495_v40  ;;  %11406 = vmatprep.subr.bf16.mxu1 %v12497_v46  ;;  %v12615_v40 = vcombine.high %v270_v27, %v282_v28  ;;  %v12617_v46 = vcombine.high %v271_v33, %v283_v41  ;;  %v378_v17 = vld [vmem:[#allocation5 + $0x9a0] sm:$0xff]  ;;  %v379_v19 = vld [vmem:[#allocation5 + $0x9a8] sm:$0xff] }
 0x446   :  { %11220 = vmatprep.mubr.bf16.mxu0 %v14599_v58  ;;  %11432 = vmatprep.mubr.bf16.mxu1 %v14599_v58 }
 0x448   :  { %11195 = vmatpush1.bf16.msra.mxu0 %v12494_v55  ;;  %11407 = vmatpush1.bf16.msra.mxu1 %v12496_v23  ;;  %v12614_v55 = vcombine.low %v270_v27, %v282_v28  ;;  %v12616_v23 = vcombine.low %v271_v33, %v283_v41  ;;  %v390_v27 = vld [vmem:[#allocation5 + $0xa00] sm:$0xff]  ;;  %v391_v33 = vld [vmem:[#allocation5 + $0xa08] sm:$0xff] }
 0x449   :  { %11196 = vmatprep.subr.bf16.mxu0 %v12519_v14  ;;  %11408 = vmatprep.subr.bf16.mxu1 %v12521_v62  ;;  %v12639_v14 = vcombine.high %v294_v48, %v306_v51  ;;  %v12641_v62 = vcombine.high %v295_v35, %v307_v52  ;;  %v402_v28 = vld [vmem:[#allocation5 + $0xa60] sm:$0xff]  ;;  %v403_v41 = vld [vmem:[#allocation5 + $0xa68] sm:$0xff] }
 0x44c   :  { %11197 = vmatpush1.bf16.msra.mxu0 %v12518_v7  ;;  %11409 = vmatpush1.bf16.msra.mxu1 %v12520_v13  ;;  %v12638_v7 = vcombine.low %v294_v48, %v306_v51  ;;  %v12640_v13 = vcombine.low %v295_v35, %v307_v52  ;;  %v414_v48 = vld [vmem:[#allocation5 + $0xac0] sm:$0xff]  ;;  %v415_v35 = vld [vmem:[#allocation5 + $0xac8] sm:$0xff] }
 0x44d   :  { %11198 = vmatprep.subr.bf16.mxu0 %v12543_v10  ;;  %11410 = vmatprep.subr.bf16.mxu1 %v12545_v11  ;;  %v12663_v10 = vcombine.high %v318_v5, %v330_v61  ;;  %v12665_v11 = vcombine.high %v319_v24, %v331_v63  ;;  %v426_v51 = vld [vmem:[#allocation5 + $0xb20] sm:$0xff]  ;;  %v427_v52 = vld [vmem:[#allocation5 + $0xb28] sm:$0xff] }
 0x450   :  { %11199 = vmatpush1.bf16.msra.mxu0 %v12542_v0  ;;  %11411 = vmatpush1.bf16.msra.mxu1 %v12544_v4  ;;  %v12662_v0 = vcombine.low %v318_v5, %v330_v61  ;;  %v12664_v4 = vcombine.low %v319_v24, %v331_v63  ;;  %v438_v5 = vld [vmem:[#allocation5 + $0xb80] sm:$0xff]  ;;  %v439_v24 = vld [vmem:[#allocation5 + $0xb88] sm:$0xff] }
 0x451   :  { %11200 = vmatprep.subr.bf16.mxu0 %v12567_v16  ;;  %11412 = vmatprep.subr.bf16.mxu1 %v12569_v57  ;;  %v12687_v16 = vcombine.high %v342_v6, %v354_v59  ;;  %v12689_v57 = vcombine.high %v343_v8, %v355_v9  ;;  %v450_v61 = vld [vmem:[#allocation5 + $0xbe0] sm:$0xff]  ;;  %v451_v63 = vld [vmem:[#allocation5 + $0xbe8] sm:$0xff] }
 0x454   :  { %11201 = vmatpush1.bf16.msra.mxu0 %v12566_v20  ;;  %11413 = vmatpush1.bf16.msra.mxu1 %v12568_v21  ;;  %v12686_v20 = vcombine.low %v342_v6, %v354_v59  ;;  %v12688_v21 = vcombine.low %v343_v8, %v355_v9  ;;  %v462_v6 = vld [vmem:[#allocation5 + $0xc40] sm:$0xff]  ;;  %v463_v8 = vld [vmem:[#allocation5 + $0xc48] sm:$0xff] }
 0x455   :  { %11202 = vmatprep.subr.bf16.mxu0 %v12591_v53  ;;  %11414 = vmatprep.subr.bf16.mxu1 %v12593_v54  ;;  %v12711_v53 = vcombine.high %v366_v60, %v378_v17  ;;  %v12713_v54 = vcombine.high %v367_v18, %v379_v19  ;;  %v474_v59 = vld [vmem:[#allocation5 + $0xca0] sm:$0xff]  ;;  %v475_v9 = vld [vmem:[#allocation5 + $0xca8] sm:$0xff] }
 0x458   :  { %11203 = vmatpush1.bf16.msra.mxu0 %v12590_v49  ;;  %11415 = vmatpush1.bf16.msra.mxu1 %v12592_v38  ;;  %v12710_v49 = vcombine.low %v366_v60, %v378_v17  ;;  %v12712_v38 = vcombine.low %v367_v18, %v379_v19  ;;  %v486_v60 = vld [vmem:[#allocation5 + $0xd00] sm:$0xff]  ;;  %v487_v18 = vld [vmem:[#allocation5 + $0xd08] sm:$0xff] }
 0x459   :  { %11204 = vmatprep.subr.bf16.mxu0 %v12615_v40  ;;  %11416 = vmatprep.subr.bf16.mxu1 %v12617_v46  ;;  %v12735_v40 = vcombine.high %v390_v27, %v402_v28  ;;  %v12737_v46 = vcombine.high %v391_v33, %v403_v41  ;;  %v498_v17 = vld [vmem:[#allocation5 + $0xd60] sm:$0xff]  ;;  %v499_v19 = vld [vmem:[#allocation5 + $0xd68] sm:$0xff] }
 0x45c   :  { %11205 = vmatpush1.bf16.msra.mxu0 %v12614_v55  ;;  %11417 = vmatpush1.bf16.msra.mxu1 %v12616_v23  ;;  %v12734_v55 = vcombine.low %v390_v27, %v402_v28  ;;  %v12736_v23 = vcombine.low %v391_v33, %v403_v41  ;;  %v510_v27 = vld [vmem:[#allocation5 + $0xdc0] sm:$0xff]  ;;  %v511_v33 = vld [vmem:[#allocation5 + $0xdc8] sm:$0xff] }
 0x45d   :  { %11206 = vmatprep.subr.bf16.mxu0 %v12639_v14  ;;  %11418 = vmatprep.subr.bf16.mxu1 %v12641_v62  ;;  %v12759_v14 = vcombine.high %v414_v48, %v426_v51  ;;  %v12761_v62 = vcombine.high %v415_v35, %v427_v52  ;;  %v522_v28 = vld [vmem:[#allocation5 + $0xe20] sm:$0xff]  ;;  %v523_v41 = vld [vmem:[#allocation5 + $0xe28] sm:$0xff] }
 0x460   :  { %11207 = vmatpush1.bf16.msra.mxu0 %v12638_v7  ;;  %11419 = vmatpush1.bf16.msra.mxu1 %v12640_v13  ;;  %v12758_v7 = vcombine.low %v414_v48, %v426_v51  ;;  %v12760_v13 = vcombine.low %v415_v35, %v427_v52  ;;  %v534_v48 = vld [vmem:[#allocation5 + $0xe80] sm:$0xff]  ;;  %v535_v35 = vld [vmem:[#allocation5 + $0xe88] sm:$0xff] }
 0x461   :  { %11208 = vmatprep.subr.bf16.mxu0 %v12663_v10  ;;  %11420 = vmatprep.subr.bf16.mxu1 %v12665_v11  ;;  %v12783_v10 = vcombine.high %v438_v5, %v450_v61  ;;  %v12785_v11 = vcombine.high %v439_v24, %v451_v63  ;;  %v546_v51 = vld [vmem:[#allocation5 + $0xee0] sm:$0xff]  ;;  %v547_v52 = vld [vmem:[#allocation5 + $0xee8] sm:$0xff] }
 0x464   :  { %11209 = vmatpush1.bf16.msra.mxu0 %v12662_v0  ;;  %11421 = vmatpush1.bf16.msra.mxu1 %v12664_v4  ;;  %v12782_v0 = vcombine.low %v438_v5, %v450_v61  ;;  %v12784_v4 = vcombine.low %v439_v24, %v451_v63  ;;  %v558_v5 = vld [vmem:[#allocation5 + $0xf40] sm:$0xff]  ;;  %v559_v24 = vld [vmem:[#allocation5 + $0xf48] sm:$0xff] }
 0x465   :  { %11210 = vmatprep.subr.bf16.mxu0 %v12687_v16  ;;  %11422 = vmatprep.subr.bf16.mxu1 %v12689_v57  ;;  %v12807_v16 = vcombine.high %v462_v6, %v474_v59  ;;  %v12809_v57 = vcombine.high %v463_v8, %v475_v9  ;;  %v570_v61 = vld [vmem:[#allocation5 + $0xfa0] sm:$0xff]  ;;  %v571_v63 = vld [vmem:[#allocation5 + $0xfa8] sm:$0xff] }
 0x468   :  { %11211 = vmatpush1.bf16.msra.mxu0 %v12686_v20  ;;  %11423 = vmatpush1.bf16.msra.mxu1 %v12688_v21  ;;  %v12806_v20 = vcombine.low %v462_v6, %v474_v59  ;;  %v12808_v21 = vcombine.low %v463_v8, %v475_v9  ;;  %v582_v6 = vld [vmem:[#allocation5 + $0x1000] sm:$0xff]  ;;  %v583_v8 = vld [vmem:[#allocation5 + $0x1008] sm:$0xff] }
 0x469   :  { %11212 = vmatprep.subr.bf16.mxu0 %v12711_v53  ;;  %11424 = vmatprep.subr.bf16.mxu1 %v12713_v54  ;;  %v12831_v53 = vcombine.high %v486_v60, %v498_v17  ;;  %v12833_v54 = vcombine.high %v487_v18, %v499_v19  ;;  %v594_v59 = vld [vmem:[#allocation5 + $0x1060] sm:$0xff]  ;;  %v595_v9 = vld [vmem:[#allocation5 + $0x1068] sm:$0xff] }
 0x46c   :  { %11213 = vmatpush1.bf16.msra.mxu0 %v12710_v49  ;;  %11425 = vmatpush1.bf16.msra.mxu1 %v12712_v38  ;;  %v12830_v49 = vcombine.low %v486_v60, %v498_v17  ;;  %v12832_v38 = vcombine.low %v487_v18, %v499_v19  ;;  %v606_v60 = vld [vmem:[#allocation5 + $0x10c0] sm:$0xff]  ;;  %v607_v18 = vld [vmem:[#allocation5 + $0x10c8] sm:$0xff] }
 0x46d   :  { %11214 = vmatprep.subr.bf16.mxu0 %v12735_v40  ;;  %11426 = vmatprep.subr.bf16.mxu1 %v12737_v46  ;;  %v12855_v40 = vcombine.high %v510_v27, %v522_v28  ;;  %v12857_v46 = vcombine.high %v511_v33, %v523_v41  ;;  %v618_v17 = vld [vmem:[#allocation5 + $0x1120] sm:$0xff]  ;;  %v619_v19 = vld [vmem:[#allocation5 + $0x1128] sm:$0xff] }
 0x470   :  { %11215 = vmatpush1.bf16.msra.mxu0 %v12734_v55  ;;  %11427 = vmatpush1.bf16.msra.mxu1 %v12736_v23  ;;  %v12854_v55 = vcombine.low %v510_v27, %v522_v28  ;;  %v12856_v23 = vcombine.low %v511_v33, %v523_v41  ;;  %v630_v27 = vld [vmem:[#allocation5 + $0x1180] sm:$0xff]  ;;  %v631_v33 = vld [vmem:[#allocation5 + $0x1188] sm:$0xff] }
 0x471   :  { %11216 = vmatprep.subr.bf16.mxu0 %v12759_v14  ;;  %11428 = vmatprep.subr.bf16.mxu1 %v12761_v62  ;;  %v12879_v14 = vcombine.high %v534_v48, %v546_v51  ;;  %v12881_v62 = vcombine.high %v535_v35, %v547_v52  ;;  %v642_v28 = vld [vmem:[#allocation5 + $0x11e0] sm:$0xff]  ;;  %v643_v41 = vld [vmem:[#allocation5 + $0x11e8] sm:$0xff] }
 0x474   :  { %11217 = vmatpush1.bf16.msra.mxu0 %v12758_v7  ;;  %11429 = vmatpush1.bf16.msra.mxu1 %v12760_v13  ;;  %v12878_v7 = vcombine.low %v534_v48, %v546_v51  ;;  %v12880_v13 = vcombine.low %v535_v35, %v547_v52  ;;  %v654_v48 = vld [vmem:[#allocation5 + $0x1240] sm:$0xff]  ;;  %v655_v35 = vld [vmem:[#allocation5 + $0x1248] sm:$0xff] }
 0x475   :  { %11218 = vmatprep.subr.bf16.mxu0 %v12783_v10  ;;  %11430 = vmatprep.subr.bf16.mxu1 %v12785_v11  ;;  %v12903_v10 = vcombine.high %v558_v5, %v570_v61  ;;  %v12905_v11 = vcombine.high %v559_v24, %v571_v63  ;;  %v666_v51 = vld [vmem:[#allocation5 + $0x12a0] sm:$0xff]  ;;  %v667_v52 = vld [vmem:[#allocation5 + $0x12a8] sm:$0xff] }
 0x478   :  { %11219 = vmatpush1.bf16.msra.mxu0 %v12782_v0  ;;  %11431 = vmatpush1.bf16.msra.mxu1 %v12784_v4  ;;  %v12902_v0 = vcombine.low %v558_v5, %v570_v61  ;;  %v12904_v4 = vcombine.low %v559_v24, %v571_v63  ;;  %v678_v5 = vld [vmem:[#allocation5 + $0x1300] sm:$0xff]  ;;  %v679_v24 = vld [vmem:[#allocation5 + $0x1308] sm:$0xff] }
 0x479   :  { %11241 = vmatprep.subr.bf16.mxu0 %v12807_v16  ;;  %11453 = vmatprep.subr.bf16.mxu1 %v12809_v57  ;;  %v12927_v16 = vcombine.high %v582_v6, %v594_v59  ;;  %v12929_v57 = vcombine.high %v583_v8, %v595_v9  ;;  %v690_v61 = vld [vmem:[#allocation5 + $0x1360] sm:$0xff]  ;;  %v691_v63 = vld [vmem:[#allocation5 + $0x1368] sm:$0xff] }
 0x47b   :  { %11221 = vmatmul.mubr.bf16.vlgmr.msra.gmra.mrb[32].mxu0 %v14605_v15  ;;  %11433 = vmatmul.mubr.bf16.vlgmr.msra.gmra.mrb[32].mxu1 %v14605_v15 }
 0x47c   :  { %11242 = vmatpush1.bf16.msra.mxu0 %v12806_v20  ;;  %11454 = vmatpush1.bf16.msra.mxu1 %v12808_v21  ;;  %v12926_v20 = vcombine.low %v582_v6, %v594_v59  ;;  %v12928_v21 = vcombine.low %v583_v8, %v595_v9  ;;  %v702_v6 = vld [vmem:[#allocation5 + $0x13c0] sm:$0xff]  ;;  %v703_v8 = vld [vmem:[#allocation5 + $0x13c8] sm:$0xff] }
 0x47d   :  { %11243 = vmatprep.subr.bf16.mxu0 %v12831_v53  ;;  %11455 = vmatprep.subr.bf16.mxu1 %v12833_v54  ;;  %v12951_v53 = vcombine.high %v606_v60, %v618_v17  ;;  %v12953_v54 = vcombine.high %v607_v18, %v619_v19  ;;  %v714_v59 = vld [vmem:[#allocation5 + $0x1420] sm:$0xff]  ;;  %v715_v9 = vld [vmem:[#allocation5 + $0x1428] sm:$0xff] }
 0x47e   :  { %11230 = vmatprep.mubr.bf16.mxu0 %v14607_v25  ;;  %11442 = vmatprep.mubr.bf16.mxu1 %v14607_v25 }
 0x480   :  { %11244 = vmatpush1.bf16.msra.mxu0 %v12830_v49  ;;  %11456 = vmatpush1.bf16.msra.mxu1 %v12832_v38  ;;  %v12950_v49 = vcombine.low %v606_v60, %v618_v17  ;;  %v12952_v38 = vcombine.low %v607_v18, %v619_v19  ;;  %v726_v60 = vld [vmem:[#allocation5 + $0x1480] sm:$0xff]  ;;  %v727_v18 = vld [vmem:[#allocation5 + $0x1488] sm:$0xff] }
 0x481   :  { %11245 = vmatprep.subr.bf16.mxu0 %v12855_v40  ;;  %11457 = vmatprep.subr.bf16.mxu1 %v12857_v46  ;;  %v12975_v40 = vcombine.high %v630_v27, %v642_v28  ;;  %v12977_v46 = vcombine.high %v631_v33, %v643_v41  ;;  %v738_v17 = vld [vmem:[#allocation5 + $0x14e0] sm:$0xff]  ;;  %v739_v19 = vld [vmem:[#allocation5 + $0x14e8] sm:$0xff] }
 0x483   :  { %11231 = vmatmul.mubr.bf16.gmra.mrb[36].mxu0 %v14613_v34  ;;  %11443 = vmatmul.mubr.bf16.gmra.mrb[36].mxu1 %v14613_v34 }
 0x484   :  { %11246 = vmatpush1.bf16.msra.mxu0 %v12854_v55  ;;  %11458 = vmatpush1.bf16.msra.mxu1 %v12856_v23  ;;  %v12974_v55 = vcombine.low %v630_v27, %v642_v28  ;;  %v12976_v23 = vcombine.low %v631_v33, %v643_v41  ;;  %v750_v27 = vld [vmem:[#allocation5 + $0x1540] sm:$0xff]  ;;  %v751_v33 = vld [vmem:[#allocation5 + $0x1548] sm:$0xff] }
 0x485   :  { %11247 = vmatprep.subr.bf16.mxu0 %v12879_v14  ;;  %11459 = vmatprep.subr.bf16.mxu1 %v12881_v62  ;;  %v12999_v14 = vcombine.high %v654_v48, %v666_v51  ;;  %v13001_v62 = vcombine.high %v655_v35, %v667_v52  ;;  %v762_v28 = vld [vmem:[#allocation5 + $0x15a0] sm:$0xff]  ;;  %v763_v41 = vld [vmem:[#allocation5 + $0x15a8] sm:$0xff] }
 0x486   :  { %11273 = vmatprep.mubr.bf16.mxu0 %v14621_v43  ;;  %11485 = vmatprep.mubr.bf16.mxu1 %v14621_v43 }
 0x488   :  { %11248 = vmatpush1.bf16.msra.mxu0 %v12878_v7  ;;  %11460 = vmatpush1.bf16.msra.mxu1 %v12880_v13  ;;  %v12998_v7 = vcombine.low %v654_v48, %v666_v51  ;;  %v13000_v13 = vcombine.low %v655_v35, %v667_v52  ;;  %v774_v48 = vld [vmem:[#allocation5 + $0x1600] sm:$0xff]  ;;  %v775_v35 = vld [vmem:[#allocation5 + $0x1608] sm:$0xff] }
 0x489   :  { %11249 = vmatprep.subr.bf16.mxu0 %v12903_v10  ;;  %11461 = vmatprep.subr.bf16.mxu1 %v12905_v11  ;;  %v13023_v10 = vcombine.high %v678_v5, %v690_v61  ;;  %v13025_v11 = vcombine.high %v679_v24, %v691_v63  ;;  %v786_v51 = vld [vmem:[#allocation5 + $0x1660] sm:$0xff]  ;;  %v787_v52 = vld [vmem:[#allocation5 + $0x1668] sm:$0xff] }
 0x48c   :  { %11250 = vmatpush1.bf16.msra.mxu0 %v12902_v0  ;;  %11462 = vmatpush1.bf16.msra.mxu1 %v12904_v4  ;;  %v13022_v0 = vcombine.low %v678_v5, %v690_v61  ;;  %v13024_v4 = vcombine.low %v679_v24, %v691_v63  ;;  %v798_v5 = vld [vmem:[#allocation5 + $0x16c0] sm:$0xff]  ;;  %v799_v24 = vld [vmem:[#allocation5 + $0x16c8] sm:$0xff] }
 0x48d   :  { %11251 = vmatprep.subr.bf16.mxu0 %v12927_v16  ;;  %11463 = vmatprep.subr.bf16.mxu1 %v12929_v57  ;;  %v13047_v16 = vcombine.high %v702_v6, %v714_v59  ;;  %v13049_v57 = vcombine.high %v703_v8, %v715_v9  ;;  %v810_v61 = vld [vmem:[#allocation5 + $0x1720] sm:$0xff]  ;;  %v811_v63 = vld [vmem:[#allocation5 + $0x1728] sm:$0xff] }
 0x490   :  { %11252 = vmatpush1.bf16.msra.mxu0 %v12926_v20  ;;  %11464 = vmatpush1.bf16.msra.mxu1 %v12928_v21  ;;  %v13046_v20 = vcombine.low %v702_v6, %v714_v59  ;;  %v13048_v21 = vcombine.low %v703_v8, %v715_v9  ;;  %v822_v6 = vld [vmem:[#allocation5 + $0x1780] sm:$0xff]  ;;  %v823_v8 = vld [vmem:[#allocation5 + $0x1788] sm:$0xff] }
 0x491   :  { %11253 = vmatprep.subr.bf16.mxu0 %v12951_v53  ;;  %11465 = vmatprep.subr.bf16.mxu1 %v12953_v54  ;;  %v13071_v53 = vcombine.high %v726_v60, %v738_v17  ;;  %v13073_v54 = vcombine.high %v727_v18, %v739_v19  ;;  %v834_v59 = vld [vmem:[#allocation5 + $0x17e0] sm:$0xff]  ;;  %v835_v9 = vld [vmem:[#allocation5 + $0x17e8] sm:$0xff] }
 0x494   :  { %11254 = vmatpush1.bf16.msra.mxu0 %v12950_v49  ;;  %11466 = vmatpush1.bf16.msra.mxu1 %v12952_v38  ;;  %v13070_v49 = vcombine.low %v726_v60, %v738_v17  ;;  %v13072_v38 = vcombine.low %v727_v18, %v739_v19  ;;  %v846_v60 = vld [vmem:[#allocation5 + $0x1840] sm:$0xff]  ;;  %v847_v18 = vld [vmem:[#allocation5 + $0x1848] sm:$0xff] }
 0x495   :  { %11255 = vmatprep.subr.bf16.mxu0 %v12975_v40  ;;  %11467 = vmatprep.subr.bf16.mxu1 %v12977_v46  ;;  %v13095_v40 = vcombine.high %v750_v27, %v762_v28  ;;  %v13097_v46 = vcombine.high %v751_v33, %v763_v41  ;;  %v858_v17 = vld [vmem:[#allocation5 + $0x18a0] sm:$0xff]  ;;  %v859_v19 = vld [vmem:[#allocation5 + $0x18a8] sm:$0xff] }
 0x498   :  { %11256 = vmatpush1.bf16.msra.mxu0 %v12974_v55  ;;  %11468 = vmatpush1.bf16.msra.mxu1 %v12976_v23  ;;  %v13094_v55 = vcombine.low %v750_v27, %v762_v28  ;;  %v13096_v23 = vcombine.low %v751_v33, %v763_v41  ;;  %v870_v27 = vld [vmem:[#allocation5 + $0x1900] sm:$0xff]  ;;  %v871_v33 = vld [vmem:[#allocation5 + $0x1908] sm:$0xff] }
 0x499   :  { %11257 = vmatprep.subr.bf16.mxu0 %v12999_v14  ;;  %11469 = vmatprep.subr.bf16.mxu1 %v13001_v62  ;;  %v13119_v14 = vcombine.high %v774_v48, %v786_v51  ;;  %v13121_v62 = vcombine.high %v775_v35, %v787_v52  ;;  %v882_v28 = vld [vmem:[#allocation5 + $0x1960] sm:$0xff]  ;;  %v883_v41 = vld [vmem:[#allocation5 + $0x1968] sm:$0xff] }
 0x49c   :  { %11258 = vmatpush1.bf16.msra.mxu0 %v12998_v7  ;;  %11470 = vmatpush1.bf16.msra.mxu1 %v13000_v13  ;;  %v13118_v7 = vcombine.low %v774_v48, %v786_v51  ;;  %v13120_v13 = vcombine.low %v775_v35, %v787_v52  ;;  %v894_v48 = vld [vmem:[#allocation5 + $0x19c0] sm:$0xff]  ;;  %v895_v35 = vld [vmem:[#allocation5 + $0x19c8] sm:$0xff] }
 0x49d   :  { %11259 = vmatprep.subr.bf16.mxu0 %v13023_v10  ;;  %11471 = vmatprep.subr.bf16.mxu1 %v13025_v11  ;;  %v13143_v10 = vcombine.high %v798_v5, %v810_v61  ;;  %v13145_v11 = vcombine.high %v799_v24, %v811_v63  ;;  %v906_v51 = vld [vmem:[#allocation5 + $0x1a20] sm:$0xff]  ;;  %v907_v52 = vld [vmem:[#allocation5 + $0x1a28] sm:$0xff] }
 0x4a0   :  { %11260 = vmatpush1.bf16.msra.mxu0 %v13022_v0  ;;  %11472 = vmatpush1.bf16.msra.mxu1 %v13024_v4  ;;  %v13142_v0 = vcombine.low %v798_v5, %v810_v61  ;;  %v13144_v4 = vcombine.low %v799_v24, %v811_v63  ;;  %v918_v5 = vld [vmem:[#allocation5 + $0x1a80] sm:$0xff]  ;;  %v919_v24 = vld [vmem:[#allocation5 + $0x1a88] sm:$0xff] }
 0x4a1   :  { %11261 = vmatprep.subr.bf16.mxu0 %v13047_v16  ;;  %11473 = vmatprep.subr.bf16.mxu1 %v13049_v57  ;;  %v13167_v16 = vcombine.high %v822_v6, %v834_v59  ;;  %v13169_v57 = vcombine.high %v823_v8, %v835_v9  ;;  %v930_v61 = vld [vmem:[#allocation5 + $0x1ae0] sm:$0xff]  ;;  %v931_v63 = vld [vmem:[#allocation5 + $0x1ae8] sm:$0xff] }
 0x4a4   :  { %11262 = vmatpush1.bf16.msra.mxu0 %v13046_v20  ;;  %11474 = vmatpush1.bf16.msra.mxu1 %v13048_v21  ;;  %v13166_v20 = vcombine.low %v822_v6, %v834_v59  ;;  %v13168_v21 = vcombine.low %v823_v8, %v835_v9  ;;  %v942_v6 = vld [vmem:[#allocation5 + $0x1b40] sm:$0xff]  ;;  %v943_v8 = vld [vmem:[#allocation5 + $0x1b48] sm:$0xff] }
 0x4a5   :  { %11263 = vmatprep.subr.bf16.mxu0 %v13071_v53  ;;  %11475 = vmatprep.subr.bf16.mxu1 %v13073_v54  ;;  %v13191_v53 = vcombine.high %v846_v60, %v858_v17  ;;  %v13193_v54 = vcombine.high %v847_v18, %v859_v19  ;;  %v954_v59 = vld [vmem:[#allocation5 + $0x1ba0] sm:$0xff]  ;;  %v955_v9 = vld [vmem:[#allocation5 + $0x1ba8] sm:$0xff] }
 0x4a8   :  { %11264 = vmatpush1.bf16.msra.mxu0 %v13070_v49  ;;  %11476 = vmatpush1.bf16.msra.mxu1 %v13072_v38  ;;  %v13190_v49 = vcombine.low %v846_v60, %v858_v17  ;;  %v13192_v38 = vcombine.low %v847_v18, %v859_v19  ;;  %v966_v60 = vld [vmem:[#allocation5 + $0x1c00] sm:$0xff]  ;;  %v967_v18 = vld [vmem:[#allocation5 + $0x1c08] sm:$0xff] }
 0x4a9   :  { %11265 = vmatprep.subr.bf16.mxu0 %v13095_v40  ;;  %11477 = vmatprep.subr.bf16.mxu1 %v13097_v46  ;;  %v13215_v40 = vcombine.high %v870_v27, %v882_v28  ;;  %v13217_v46 = vcombine.high %v871_v33, %v883_v41  ;;  %v978_v17 = vld [vmem:[#allocation5 + $0x1c60] sm:$0xff]  ;;  %v979_v19 = vld [vmem:[#allocation5 + $0x1c68] sm:$0xff] }
 0x4ac   :  { %11266 = vmatpush1.bf16.msra.mxu0 %v13094_v55  ;;  %11478 = vmatpush1.bf16.msra.mxu1 %v13096_v23  ;;  %v13214_v55 = vcombine.low %v870_v27, %v882_v28  ;;  %v13216_v23 = vcombine.low %v871_v33, %v883_v41  ;;  %v990_v27 = vld [vmem:[#allocation5 + $0x1cc0] sm:$0xff]  ;;  %v991_v33 = vld [vmem:[#allocation5 + $0x1cc8] sm:$0xff] }
 0x4ad   :  { %11267 = vmatprep.subr.bf16.mxu0 %v13119_v14  ;;  %11479 = vmatprep.subr.bf16.mxu1 %v13121_v62  ;;  %v13239_v14 = vcombine.high %v894_v48, %v906_v51  ;;  %v13241_v62 = vcombine.high %v895_v35, %v907_v52  ;;  %v1002_v28 = vld [vmem:[#allocation5 + $0x1d20] sm:$0xff]  ;;  %v1003_v41 = vld [vmem:[#allocation5 + $0x1d28] sm:$0xff] }
 0x4b0   :  { %11268 = vmatpush1.bf16.msra.mxu0 %v13118_v7  ;;  %11480 = vmatpush1.bf16.msra.mxu1 %v13120_v13  ;;  %v13238_v7 = vcombine.low %v894_v48, %v906_v51  ;;  %v13240_v13 = vcombine.low %v895_v35, %v907_v52  ;;  %v1014_v48 = vld [vmem:[#allocation5 + $0x1d80] sm:$0xff]  ;;  %v1015_v35 = vld [vmem:[#allocation5 + $0x1d88] sm:$0xff] }
 0x4b1   :  { %11269 = vmatprep.subr.bf16.mxu0 %v13143_v10  ;;  %11481 = vmatprep.subr.bf16.mxu1 %v13145_v11  ;;  %v13263_v10 = vcombine.high %v918_v5, %v930_v61  ;;  %v13265_v11 = vcombine.high %v919_v24, %v931_v63  ;;  %v1026_v51 = vld [vmem:[#allocation5 + $0x1de0] sm:$0xff]  ;;  %v1027_v52 = vld [vmem:[#allocation5 + $0x1de8] sm:$0xff] }
 0x4b4   :  { %11270 = vmatpush1.bf16.msra.mxu0 %v13142_v0  ;;  %11482 = vmatpush1.bf16.msra.mxu1 %v13144_v4  ;;  %v13262_v0 = vcombine.low %v918_v5, %v930_v61  ;;  %v13264_v4 = vcombine.low %v919_v24, %v931_v63  ;;  %v1038_v5 = vld [vmem:[#allocation5 + $0x1e40] sm:$0xff]  ;;  %v1039_v24 = vld [vmem:[#allocation5 + $0x1e48] sm:$0xff] }
 0x4b5   :  { %11271 = vmatprep.subr.bf16.mxu0 %v13167_v16  ;;  %11483 = vmatprep.subr.bf16.mxu1 %v13169_v57  ;;  %v13287_v16 = vcombine.high %v942_v6, %v954_v59  ;;  %v13289_v57 = vcombine.high %v943_v8, %v955_v9  ;;  %v1050_v61 = vld [vmem:[#allocation5 + $0x1ea0] sm:$0xff]  ;;  %v1051_v63 = vld [vmem:[#allocation5 + $0x1ea8] sm:$0xff] }
 0x4b8   :  { %11272 = vmatpush1.bf16.msra.mxu0 %v13166_v20  ;;  %11484 = vmatpush1.bf16.msra.mxu1 %v13168_v21  ;;  %v13286_v20 = vcombine.low %v942_v6, %v954_v59  ;;  %v13288_v21 = vcombine.low %v943_v8, %v955_v9  ;;  %v1062_v6 = vld [vmem:[#allocation5 + $0x1f00] sm:$0xff]  ;;  %v1063_v8 = vld [vmem:[#allocation5 + $0x1f08] sm:$0xff] }
 0x4b9   :  { %11294 = vmatprep.subr.bf16.mxu0 %v13191_v53  ;;  %11506 = vmatprep.subr.bf16.mxu1 %v13193_v54  ;;  %v13311_v53 = vcombine.high %v966_v60, %v978_v17  ;;  %v13313_v54 = vcombine.high %v967_v18, %v979_v19  ;;  %v1074_v59 = vld [vmem:[#allocation5 + $0x1f60] sm:$0xff]  ;;  %v1075_v9 = vld [vmem:[#allocation5 + $0x1f68] sm:$0xff] }
 0x4bb   :  { %11274 = vmatmul.mubr.bf16.vlgmr.msra.gmra.mrb[32].mxu0 %v14629_v31  ;;  %11486 = vmatmul.mubr.bf16.vlgmr.msra.gmra.mrb[32].mxu1 %v14629_v31 }
 0x4bc   :  { %11295 = vmatpush1.bf16.msra.mxu0 %v13190_v49  ;;  %11507 = vmatpush1.bf16.msra.mxu1 %v13192_v38  ;;  %v13310_v49 = vcombine.low %v966_v60, %v978_v17  ;;  %v13312_v38 = vcombine.low %v967_v18, %v979_v19  ;;  %v1086_v60 = vld [vmem:[#allocation5 + $0x1fc0] sm:$0xff]  ;;  %v1087_v18 = vld [vmem:[#allocation5 + $0x1fc8] sm:$0xff] }
 0x4bd   :  { %11296 = vmatprep.subr.bf16.mxu0 %v13215_v40  ;;  %11508 = vmatprep.subr.bf16.mxu1 %v13217_v46  ;;  %v13335_v40 = vcombine.high %v990_v27, %v1002_v28  ;;  %v13337_v46 = vcombine.high %v991_v33, %v1003_v41  ;;  %v1098_v17 = vld [vmem:[#allocation5 + $0x2020] sm:$0xff]  ;;  %v1099_v19 = vld [vmem:[#allocation5 + $0x2028] sm:$0xff] }
 0x4be   :  { %11283 = vmatprep.mubr.bf16.mxu0 %v14631_v45  ;;  %11495 = vmatprep.mubr.bf16.mxu1 %v14631_v45 }
 0x4c0   :  { %11297 = vmatpush1.bf16.msra.mxu0 %v13214_v55  ;;  %11509 = vmatpush1.bf16.msra.mxu1 %v13216_v23  ;;  %v13334_v55 = vcombine.low %v990_v27, %v1002_v28  ;;  %v13336_v23 = vcombine.low %v991_v33, %v1003_v41  ;;  %v1110_v27 = vld [vmem:[#allocation5 + $0x2080] sm:$0xff]  ;;  %v1111_v33 = vld [vmem:[#allocation5 + $0x2088] sm:$0xff] }
 0x4c1   :  { %11298 = vmatprep.subr.bf16.mxu0 %v13239_v14  ;;  %11510 = vmatprep.subr.bf16.mxu1 %v13241_v62  ;;  %v13359_v14 = vcombine.high %v1014_v48, %v1026_v51  ;;  %v13361_v62 = vcombine.high %v1015_v35, %v1027_v52  ;;  %v1122_v28 = vld [vmem:[#allocation5 + $0x20e0] sm:$0xff]  ;;  %v1123_v41 = vld [vmem:[#allocation5 + $0x20e8] sm:$0xff] }
 0x4c3   :  { %11284 = vmatmul.mubr.bf16.gmra.mrb[36].mxu0 %v14637_v56  ;;  %11496 = vmatmul.mubr.bf16.gmra.mrb[36].mxu1 %v14637_v56 }
 0x4c4   :  { %11299 = vmatpush1.bf16.msra.mxu0 %v13238_v7  ;;  %11511 = vmatpush1.bf16.msra.mxu1 %v13240_v13  ;;  %v13358_v7 = vcombine.low %v1014_v48, %v1026_v51  ;;  %v13360_v13 = vcombine.low %v1015_v35, %v1027_v52  ;;  %v1134_v48 = vld [vmem:[#allocation5 + $0x2140] sm:$0xff]  ;;  %v1135_v35 = vld [vmem:[#allocation5 + $0x2148] sm:$0xff] }
 0x4c5   :  { %11300 = vmatprep.subr.bf16.mxu0 %v13263_v10  ;;  %11512 = vmatprep.subr.bf16.mxu1 %v13265_v11  ;;  %v13383_v10 = vcombine.high %v1038_v5, %v1050_v61  ;;  %v13385_v11 = vcombine.high %v1039_v24, %v1051_v63  ;;  %v1146_v51 = vld [vmem:[#allocation5 + $0x21a0] sm:$0xff]  ;;  %v1147_v52 = vld [vmem:[#allocation5 + $0x21a8] sm:$0xff] }
 0x4c6   :  { %11326 = vmatprep.mubr.bf16.mxu0 %v14645_v2  ;;  %11538 = vmatprep.mubr.bf16.mxu1 %v14645_v2 }
 0x4c8   :  { %11301 = vmatpush1.bf16.msra.mxu0 %v13262_v0  ;;  %11513 = vmatpush1.bf16.msra.mxu1 %v13264_v4  ;;  %v13382_v0 = vcombine.low %v1038_v5, %v1050_v61  ;;  %v13384_v4 = vcombine.low %v1039_v24, %v1051_v63  ;;  %v1158_v5 = vld [vmem:[#allocation5 + $0x2200] sm:$0xff]  ;;  %v1159_v24 = vld [vmem:[#allocation5 + $0x2208] sm:$0xff] }
 0x4c9   :  { %11302 = vmatprep.subr.bf16.mxu0 %v13287_v16  ;;  %11514 = vmatprep.subr.bf16.mxu1 %v13289_v57  ;;  %v13407_v16 = vcombine.high %v1062_v6, %v1074_v59  ;;  %v13409_v57 = vcombine.high %v1063_v8, %v1075_v9  ;;  %v1170_v61 = vld [vmem:[#allocation5 + $0x2260] sm:$0xff]  ;;  %v1171_v63 = vld [vmem:[#allocation5 + $0x2268] sm:$0xff] }
 0x4cc   :  { %11303 = vmatpush1.bf16.msra.mxu0 %v13286_v20  ;;  %11515 = vmatpush1.bf16.msra.mxu1 %v13288_v21  ;;  %v13406_v20 = vcombine.low %v1062_v6, %v1074_v59  ;;  %v13408_v21 = vcombine.low %v1063_v8, %v1075_v9  ;;  %v1182_v6 = vld [vmem:[#allocation5 + $0x22c0] sm:$0xff]  ;;  %v1183_v8 = vld [vmem:[#allocation5 + $0x22c8] sm:$0xff] }
 0x4cd   :  { %11304 = vmatprep.subr.bf16.mxu0 %v13311_v53  ;;  %11516 = vmatprep.subr.bf16.mxu1 %v13313_v54  ;;  %v13431_v53 = vcombine.high %v1086_v60, %v1098_v17  ;;  %v13433_v54 = vcombine.high %v1087_v18, %v1099_v19  ;;  %v1194_v59 = vld [vmem:[#allocation5 + $0x2320] sm:$0xff]  ;;  %v1195_v9 = vld [vmem:[#allocation5 + $0x2328] sm:$0xff] }
 0x4d0   :  { %11305 = vmatpush1.bf16.msra.mxu0 %v13310_v49  ;;  %11517 = vmatpush1.bf16.msra.mxu1 %v13312_v38  ;;  %v13430_v49 = vcombine.low %v1086_v60, %v1098_v17  ;;  %v13432_v38 = vcombine.low %v1087_v18, %v1099_v19  ;;  %v1206_v60 = vld [vmem:[#allocation5 + $0x2380] sm:$0xff]  ;;  %v1207_v18 = vld [vmem:[#allocation5 + $0x2388] sm:$0xff] }
 0x4d1   :  { %11306 = vmatprep.subr.bf16.mxu0 %v13335_v40  ;;  %11518 = vmatprep.subr.bf16.mxu1 %v13337_v46  ;;  %v13455_v40 = vcombine.high %v1110_v27, %v1122_v28  ;;  %v13457_v46 = vcombine.high %v1111_v33, %v1123_v41  ;;  %v1218_v17 = vld [vmem:[#allocation5 + $0x23e0] sm:$0xff]  ;;  %v1219_v19 = vld [vmem:[#allocation5 + $0x23e8] sm:$0xff] }
 0x4d4   :  { %11307 = vmatpush1.bf16.msra.mxu0 %v13334_v55  ;;  %11519 = vmatpush1.bf16.msra.mxu1 %v13336_v23  ;;  %v13454_v55 = vcombine.low %v1110_v27, %v1122_v28  ;;  %v13456_v23 = vcombine.low %v1111_v33, %v1123_v41  ;;  %v1230_v27 = vld [vmem:[#allocation5 + $0x2440] sm:$0xff]  ;;  %v1231_v33 = vld [vmem:[#allocation5 + $0x2448] sm:$0xff] }
 0x4d5   :  { %11308 = vmatprep.subr.bf16.mxu0 %v13359_v14  ;;  %11520 = vmatprep.subr.bf16.mxu1 %v13361_v62  ;;  %v13479_v14 = vcombine.high %v1134_v48, %v1146_v51  ;;  %v13481_v62 = vcombine.high %v1135_v35, %v1147_v52  ;;  %v1242_v28 = vld [vmem:[#allocation5 + $0x24a0] sm:$0xff]  ;;  %v1243_v41 = vld [vmem:[#allocation5 + $0x24a8] sm:$0xff] }
 0x4d8   :  { %11309 = vmatpush1.bf16.msra.mxu0 %v13358_v7  ;;  %11521 = vmatpush1.bf16.msra.mxu1 %v13360_v13  ;;  %v13478_v7 = vcombine.low %v1134_v48, %v1146_v51  ;;  %v13480_v13 = vcombine.low %v1135_v35, %v1147_v52  ;;  %v1254_v48 = vld [vmem:[#allocation5 + $0x2500] sm:$0xff]  ;;  %v1255_v35 = vld [vmem:[#allocation5 + $0x2508] sm:$0xff] }
 0x4d9   :  { %11310 = vmatprep.subr.bf16.mxu0 %v13383_v10  ;;  %11522 = vmatprep.subr.bf16.mxu1 %v13385_v11  ;;  %v13503_v10 = vcombine.high %v1158_v5, %v1170_v61  ;;  %v13505_v11 = vcombine.high %v1159_v24, %v1171_v63  ;;  %v1266_v51 = vld [vmem:[#allocation5 + $0x2560] sm:$0xff]  ;;  %v1267_v52 = vld [vmem:[#allocation5 + $0x2568] sm:$0xff] }
 0x4dc   :  { %11311 = vmatpush1.bf16.msra.mxu0 %v13382_v0  ;;  %11523 = vmatpush1.bf16.msra.mxu1 %v13384_v4  ;;  %v13502_v0 = vcombine.low %v1158_v5, %v1170_v61  ;;  %v13504_v4 = vcombine.low %v1159_v24, %v1171_v63  ;;  %v1278_v5 = vld [vmem:[#allocation5 + $0x25c0] sm:$0xff]  ;;  %v1279_v24 = vld [vmem:[#allocation5 + $0x25c8] sm:$0xff] }
 0x4dd   :  { %11312 = vmatprep.subr.bf16.mxu0 %v13407_v16  ;;  %11524 = vmatprep.subr.bf16.mxu1 %v13409_v57  ;;  %v13527_v16 = vcombine.high %v1182_v6, %v1194_v59  ;;  %v13529_v57 = vcombine.high %v1183_v8, %v1195_v9  ;;  %v1290_v61 = vld [vmem:[#allocation5 + $0x2620] sm:$0xff]  ;;  %v1291_v63 = vld [vmem:[#allocation5 + $0x2628] sm:$0xff] }
 0x4e0   :  { %11313 = vmatpush1.bf16.msra.mxu0 %v13406_v20  ;;  %11525 = vmatpush1.bf16.msra.mxu1 %v13408_v21  ;;  %v13526_v20 = vcombine.low %v1182_v6, %v1194_v59  ;;  %v13528_v21 = vcombine.low %v1183_v8, %v1195_v9  ;;  %v1302_v6 = vld [vmem:[#allocation5 + $0x2680] sm:$0xff]  ;;  %v1303_v8 = vld [vmem:[#allocation5 + $0x2688] sm:$0xff] }
 0x4e1   :  { %11314 = vmatprep.subr.bf16.mxu0 %v13431_v53  ;;  %11526 = vmatprep.subr.bf16.mxu1 %v13433_v54  ;;  %v13551_v53 = vcombine.high %v1206_v60, %v1218_v17  ;;  %v13553_v54 = vcombine.high %v1207_v18, %v1219_v19  ;;  %v1314_v59 = vld [vmem:[#allocation5 + $0x26e0] sm:$0xff]  ;;  %v1315_v9 = vld [vmem:[#allocation5 + $0x26e8] sm:$0xff] }
 0x4e4   :  { %11315 = vmatpush1.bf16.msra.mxu0 %v13430_v49  ;;  %11527 = vmatpush1.bf16.msra.mxu1 %v13432_v38  ;;  %v13550_v49 = vcombine.low %v1206_v60, %v1218_v17  ;;  %v13552_v38 = vcombine.low %v1207_v18, %v1219_v19  ;;  %v1326_v60 = vld [vmem:[#allocation5 + $0x2740] sm:$0xff]  ;;  %v1327_v18 = vld [vmem:[#allocation5 + $0x2748] sm:$0xff] }
 0x4e5   :  { %11316 = vmatprep.subr.bf16.mxu0 %v13455_v40  ;;  %11528 = vmatprep.subr.bf16.mxu1 %v13457_v46  ;;  %v13575_v40 = vcombine.high %v1230_v27, %v1242_v28  ;;  %v13577_v46 = vcombine.high %v1231_v33, %v1243_v41  ;;  %v1338_v17 = vld [vmem:[#allocation5 + $0x27a0] sm:$0xff]  ;;  %v1339_v19 = vld [vmem:[#allocation5 + $0x27a8] sm:$0xff] }
 0x4e8   :  { %11317 = vmatpush1.bf16.msra.mxu0 %v13454_v55  ;;  %11529 = vmatpush1.bf16.msra.mxu1 %v13456_v23  ;;  %v13574_v55 = vcombine.low %v1230_v27, %v1242_v28  ;;  %v13576_v23 = vcombine.low %v1231_v33, %v1243_v41  ;;  %v1350_v27 = vld [vmem:[#allocation5 + $0x2800] sm:$0xff]  ;;  %v1351_v33 = vld [vmem:[#allocation5 + $0x2808] sm:$0xff] }
 0x4e9   :  { %11318 = vmatprep.subr.bf16.mxu0 %v13479_v14  ;;  %11530 = vmatprep.subr.bf16.mxu1 %v13481_v62  ;;  %v13599_v14 = vcombine.high %v1254_v48, %v1266_v51  ;;  %v13601_v62 = vcombine.high %v1255_v35, %v1267_v52  ;;  %v1362_v28 = vld [vmem:[#allocation5 + $0x2860] sm:$0xff]  ;;  %v1363_v41 = vld [vmem:[#allocation5 + $0x2868] sm:$0xff] }
 0x4ec   :  { %11319 = vmatpush1.bf16.msra.mxu0 %v13478_v7  ;;  %11531 = vmatpush1.bf16.msra.mxu1 %v13480_v13  ;;  %v13598_v7 = vcombine.low %v1254_v48, %v1266_v51  ;;  %v13600_v13 = vcombine.low %v1255_v35, %v1267_v52  ;;  %v1374_v48 = vld [vmem:[#allocation5 + $0x28c0] sm:$0xff]  ;;  %v14431_v35 = vld [vmem:[#allocation7 + $0x8] sm:$0xff] }
 0x4ed   :  { %11320 = vmatprep.subr.bf16.mxu0 %v13503_v10  ;;  %11532 = vmatprep.subr.bf16.mxu1 %v13505_v11  ;;  %v13623_v10 = vcombine.high %v1278_v5, %v1290_v61  ;;  %v13625_v11 = vcombine.high %v1279_v24, %v1291_v63  ;;  %v1386_v51 = vld [vmem:[#allocation5 + $0x2920] sm:$0xff]  ;;  %v14922_v52 = vrot.slane %v14431_v35, %v14789_v44 }
 0x4f0   :  { %11321 = vmatpush1.bf16.msra.mxu0 %v13502_v0  ;;  %11533 = vmatpush1.bf16.msra.mxu1 %v13504_v4  ;;  %v13622_v0 = vcombine.low %v1278_v5, %v1290_v61  ;;  %v13624_v4 = vcombine.low %v1279_v24, %v1291_v63  ;;  %v13694_v5 = vcombine.low %v1350_v27, %v1362_v28 }
 0x4f1   :  { %11322 = vmatprep.subr.bf16.mxu0 %v13527_v16  ;;  %11534 = vmatprep.subr.bf16.mxu1 %v13529_v57  ;;  %v13647_v16 = vcombine.high %v1302_v6, %v1314_v59  ;;  %v13649_v57 = vcombine.high %v1303_v8, %v1315_v9  ;;  %v14931_v61 = vrot.slane %v14431_v35, %v14799_v39 }
 0x4f2   :  { %v13696_v24 = vcombine.low %v1351_v33, %v1363_v41  ;;  %v13719_v63 = vcombine.high %v1374_v48, %v1386_v51 }
 0x4f4   :  { %11323 = vmatpush1.bf16.msra.mxu0 %v13526_v20  ;;  %11535 = vmatpush1.bf16.msra.mxu1 %v13528_v21  ;;  %v13646_v20 = vcombine.low %v1302_v6, %v1314_v59  ;;  %v13648_v21 = vcombine.low %v1303_v8, %v1315_v9  ;;  %v1399_v9 = vld [vmem:[#allocation5 + $0x2988] sm:$0xff] }
 0x4f5   :  { %11324 = vmatprep.subr.bf16.mxu0 %v13551_v53  ;;  %11536 = vmatprep.subr.bf16.mxu1 %v13553_v54  ;;  %v13671_v53 = vcombine.high %v1326_v60, %v1338_v17  ;;  %v13673_v54 = vcombine.high %v1327_v18, %v1339_v19 }
 0x4f8   :  { %11325 = vmatpush1.bf16.msra.mxu0 %v13550_v49  ;;  %11537 = vmatpush1.bf16.msra.mxu1 %v13552_v38  ;;  %v13670_v49 = vcombine.low %v1326_v60, %v1338_v17  ;;  %v13672_v38 = vcombine.low %v1327_v18, %v1339_v19  ;;  %v13718_v17 = vcombine.low %v1374_v48, %v1386_v51  ;;  %v1423_v51 = vld [vmem:[#allocation5 + $0x2a48] sm:$0xff] }
 0x4f9   :  { %11347 = vmatprep.subr.bf16.mxu0 %v13575_v40  ;;  %11559 = vmatprep.subr.bf16.mxu1 %v13577_v46  ;;  %v13695_v40 = vcombine.high %v1350_v27, %v1362_v28  ;;  %v13697_v46 = vcombine.high %v1351_v33, %v1363_v41 }
 0x4fb   :  { %11327 = vmatmul.mubr.bf16.vlgmr.msra.gmra.mrb[32].mxu0 %v14653_v1  ;;  %11539 = vmatmul.mubr.bf16.vlgmr.msra.gmra.mrb[32].mxu1 %v14653_v1 }
 0x4fc   :  { %11348 = vmatpush1.bf16.msra.mxu0 %v13574_v55  ;;  %11560 = vmatpush1.bf16.msra.mxu1 %v13576_v23  ;;  %v1375_v55 = vld [vmem:[#allocation5 + $0x28c8] sm:$0xff] }
 0x4fd   :  { %11349 = vmatprep.subr.bf16.mxu0 %v13599_v14  ;;  %11561 = vmatprep.subr.bf16.mxu1 %v13601_v62  ;;  %v1387_v23 = vld [vmem:[#allocation5 + $0x2928] sm:$0xff]  ;;  %v14925_v14 = vrot.slane %v14431_v35, %v14793_v36  ;;  %v14928_v62 = vrot.slane %v14431_v35, %v14796_v47 }
 0x4fe   :  { %11336 = vmatprep.mubr.bf16.mxu0 %v14655_v12  ;;  %11548 = vmatprep.mubr.bf16.mxu1 %v14655_v12  ;;  %v13720_v18 = vcombine.low %v1375_v55, %v1387_v23  ;;  %v1435_v35 = vld [vmem:[#allocation5 + $0x2aa8] sm:$0xff] }
 0x500   :  { %11350 = vmatpush1.bf16.msra.mxu0 %v13598_v7  ;;  %11562 = vmatpush1.bf16.msra.mxu1 %v13600_v13  ;;  %v13721_v13 = vcombine.high %v1375_v55, %v1387_v23 }
 0x501   :  { %11351 = vmatprep.subr.bf16.mxu0 %v13623_v10  ;;  %11563 = vmatprep.subr.bf16.mxu1 %v13625_v11  ;;  %v1398_v10 = vld [vmem:[#allocation5 + $0x2980] sm:$0xff] }
 0x502   :  { %v1410_v11 = vld [vmem:[#allocation5 + $0x29e0] sm:$0xff] }
 0x503   :  { %11337 = vmatmul.mubr.bf16.gmra.mrb[36].mxu0 %v14661_v22  ;;  %11549 = vmatmul.mubr.bf16.gmra.mrb[36].mxu1 %v14661_v22  ;;  %v13742_v23 = vcombine.low %v1398_v10, %v1410_v11 }
 0x504   :  { %11352 = vmatpush1.bf16.msra.mxu0 %v13622_v0  ;;  %11564 = vmatpush1.bf16.msra.mxu1 %v13624_v4  ;;  %v1411_v0 = vld [vmem:[#allocation5 + $0x29e8] sm:$0xff] }
 0x505   :  { %11353 = vmatprep.subr.bf16.mxu0 %v13647_v16  ;;  %11565 = vmatprep.subr.bf16.mxu1 %v13649_v57 }
 0x506   :  { %11379 = vmatprep.mubr.bf16.mxu0 %v14669_v30  ;;  %11591 = vmatprep.mubr.bf16.mxu1 %v14669_v30 }
 0x508   :  { %11354 = vmatpush1.bf16.msra.mxu0 %v13646_v20  ;;  %11566 = vmatpush1.bf16.msra.mxu1 %v13648_v21 }
 0x509   :  { %11355 = vmatprep.subr.bf16.mxu0 %v13671_v53  ;;  %11567 = vmatprep.subr.bf16.mxu1 %v13673_v54  ;;  %v13743_v54 = vcombine.high %v1398_v10, %v1410_v11 }
 0x50c   :  { %11356 = vmatpush1.bf16.msra.mxu0 %v13670_v49  ;;  %11568 = vmatpush1.bf16.msra.mxu1 %v13672_v38  ;;  %v13745_v49 = vcombine.high %v1399_v9, %v1411_v0  ;;  %v1422_v38 = vld [vmem:[#allocation5 + $0x2a40] sm:$0xff] }
 0x50d   :  { %11357 = vmatprep.subr.bf16.mxu0 %v13695_v40  ;;  %11569 = vmatprep.subr.bf16.mxu1 %v13697_v46  ;;  %v1434_v40 = vld [vmem:[#allocation5 + $0x2aa0] sm:$0xff] }
 0x50e   :  { %v10957_v7 = vpop.f32.mrb[24].mxu0  ;;  %v11169_v59 = vpop.f32.mrb[24].mxu1 }
 0x50f   :  { %v14086_v6 = vadd.f32 %v10957_v7, %v14922_v52  ;;  %v10959_v8 = vpop.f32.mrb[25].mxu0  ;;  %v14094_v4 = vadd.f32 %v11169_v59, %v14925_v14  ;;  %v11171_v57 = vpop.f32.mrb[25].mxu1  ;;  %v1458_v59 = vld [vmem:[#allocation5 + $0x2b60] sm:$0xff] }
 0x510   :  { %v14087_v16 = vadd.f32 %v10959_v8, %v14928_v62  ;;  %v10961_v60 = vpop.f32.mrb[26].mxu0  ;;  %11358 = vmatpush1.bf16.msra.mxu0 %v13694_v5  ;;  %v14095_v19 = vadd.f32 %v11171_v57, %v14931_v61  ;;  %v11173_v21 = vpop.f32.mrb[26].mxu1  ;;  %11570 = vmatpush1.bf16.msra.mxu1 %v13696_v24  ;;  %v13744_v24 = vcombine.low %v1399_v9, %v1411_v0  ;;  %v1447_v57 = vld [vmem:[#allocation5 + $0x2b08] sm:$0xff] }
 0x511   :  { %v14088_v20 = vadd.f32 %v10961_v60, %v14922_v52  ;;  %v10963_v53 = vpop.f32.mrb[27].mxu0  ;;  %11359 = vmatprep.subr.bf16.mxu0 %v13719_v63  ;;  %v14096_v28 = vadd.f32 %v11173_v21, %v14925_v14  ;;  %v11175_v41 = vpop.f32.mrb[27].mxu1  ;;  %11571 = vmatprep.subr.bf16.mxu1 %v13721_v13  ;;  %v13767_v63 = vcombine.high %v1422_v38, %v1434_v40  ;;  %v1459_v60 = vld [vmem:[#allocation5 + $0x2b68] sm:$0xff] }
 0x512   :  { %v13996_v27 = vpack.c.bf16 %v14087_v16, %v14086_v6  ;;  %v14089_v33 = vadd.f32 %v10963_v53, %v14928_v62  ;;  %v13997_v46 = vpack.c.bf16 %v14095_v19, %v14094_v4  ;;  %v14097_v48 = vadd.f32 %v11175_v41, %v14931_v61  ;;  %v1446_v6 = vld [vmem:[#allocation5 + $0x2b00] sm:$0xff] }
 0x513   :  { %v13769_v13 = vcombine.high %v1423_v51, %v1435_v35  ;;  %v13766_v0 = vcombine.low %v1422_v38, %v1434_v40  ;;  %v1482_v38 = vld [vmem:[#allocation5 + $0x2c20] sm:$0xff] }
 0x514   :  { %12330 = vst [vmem:[#allocation8 + $0x30] sm:$0xff] %v13996_v27  ;;  %v14008_v55 = vpack.c.bf16 %v14089_v33, %v14088_v20  ;;  %11360 = vmatpush1.bf16.msra.mxu0 %v13718_v17  ;;  %12331 = vst [vmem:[#allocation8 + $0x38] sm:$0xff] %v13997_v46  ;;  %v14009_v5 = vpack.c.bf16 %v14097_v48, %v14096_v28  ;;  %11572 = vmatpush1.bf16.msra.mxu1 %v13720_v18  ;;  %v1470_v46 = vld [vmem:[#allocation5 + $0x2bc0] sm:$0xff] }
 0x515   :  { %11361 = vmatprep.subr.bf16.mxu0 %v13743_v54  ;;  %11573 = vmatprep.subr.bf16.mxu1 %v13745_v49  ;;  %v13768_v18 = vcombine.low %v1423_v51, %v1435_v35  ;;  %v13791_v54 = vcombine.high %v1446_v6, %v1458_v59  ;;  %v13793_v49 = vcombine.high %v1447_v57, %v1459_v60  ;;  %v1471_v51 = vld [vmem:[#allocation5 + $0x2bc8] sm:$0xff] }
 0x516   :  { %12342 = vst [vmem:[#allocation8 + $0x90] sm:$0xff] %v14008_v55  ;;  %v10967_v7 = vpop.f32.mrb[28].mxu0  ;;  %12343 = vst [vmem:[#allocation8 + $0x98] sm:$0xff] %v14009_v5  ;;  %v11179_v4 = vpop.f32.mrb[28].mxu1  ;;  %v13790_v55 = vcombine.low %v1446_v6, %v1458_v59 }
 0x517   :  { %v14090_v8 = vadd.f32 %v10967_v7, %v14922_v52  ;;  %v10969_v16 = vpop.f32.mrb[29].mxu0  ;;  %v14098_v10 = vadd.f32 %v11179_v4, %v14925_v14  ;;  %v11181_v17 = vpop.f32.mrb[29].mxu1  ;;  %v1495_v7 = vld [vmem:[#allocation5 + $0x2c88] sm:$0xff]  ;;  %v1518_v4 = vld [vmem:[#allocation5 + $0x2d40] sm:$0xff] }
 0x518   :  { %v14091_v11 = vadd.f32 %v10969_v16, %v14928_v62  ;;  %v10971_v9 = vpop.f32.mrb[30].mxu0  ;;  %11362 = vmatpush1.bf16.msra.mxu0 %v13742_v23  ;;  %v14099_v19 = vadd.f32 %v11181_v17, %v14931_v61  ;;  %v11183_v21 = vpop.f32.mrb[30].mxu1  ;;  %11574 = vmatpush1.bf16.msra.mxu1 %v13744_v24  ;;  %v1494_v24 = vld [vmem:[#allocation5 + $0x2c80] sm:$0xff] }
 0x519   :  { %v14092_v20 = vadd.f32 %v10971_v9, %v14922_v52  ;;  %v10973_v53 = vpop.f32.mrb[31].mxu0  ;;  %11363 = vmatprep.subr.bf16.mxu0 %v13767_v63  ;;  %v14100_v28 = vadd.f32 %v11183_v21, %v14925_v14  ;;  %v11185_v41 = vpop.f32.mrb[31].mxu1  ;;  %11575 = vmatprep.subr.bf16.mxu1 %v13769_v13  ;;  %v1483_v52 = vld [vmem:[#allocation5 + $0x2c28] sm:$0xff]  ;;  %v13792_v14 = vcombine.low %v1447_v57, %v1459_v60  ;;  %v1506_v63 = vld [vmem:[#allocation5 + $0x2ce0] sm:$0xff] }
 0x51a   :  { %v14020_v27 = vpack.c.bf16 %v14091_v11, %v14090_v8  ;;  %v14093_v33 = vadd.f32 %v10973_v53, %v14928_v62  ;;  %v14021_v40 = vpack.c.bf16 %v14099_v19, %v14098_v10  ;;  %v14101_v48 = vadd.f32 %v11185_v41, %v14931_v61  ;;  %v1507_v61 = vld [vmem:[#allocation5 + $0x2ce8] sm:$0xff]  ;;  %v1530_v16 = vld [vmem:[#allocation5 + $0x2da0] sm:$0xff] }
 0x51b   :  { %v13815_v62 = vcombine.high %v1470_v46, %v1482_v38  ;;  %v13817_v5 = vcombine.high %v1471_v51, %v1483_v52  ;;  %v13814_v13 = vcombine.low %v1470_v46, %v1482_v38  ;;  %v13816_v8 = vcombine.low %v1471_v51, %v1483_v52  ;;  %v1519_v57 = vld [vmem:[#allocation5 + $0x2d48] sm:$0xff]  ;;  %v1590_v51 = vld [vmem:[#allocation5 + $0x2f80] sm:$0xff] }
 0x51c   :  { %12354 = vst [vmem:[#allocation8 + $0xf0] sm:$0xff] %v14020_v27  ;;  %v14032_v35 = vpack.c.bf16 %v14093_v33, %v14092_v20  ;;  %11364 = vmatpush1.bf16.msra.mxu0 %v13766_v0  ;;  %12355 = vst [vmem:[#allocation8 + $0xf8] sm:$0xff] %v14021_v40  ;;  %v14033_v23 = vpack.c.bf16 %v14101_v48, %v14100_v28  ;;  %11576 = vmatpush1.bf16.msra.mxu1 %v13768_v18  ;;  %v1531_v60 = vld [vmem:[#allocation5 + $0x2da8] sm:$0xff]  ;;  %v1542_v0 = vld [vmem:[#allocation5 + $0x2e00] sm:$0xff] }
 0x51d   :  { %11365 = vmatprep.subr.bf16.mxu0 %v13791_v54  ;;  %11577 = vmatprep.subr.bf16.mxu1 %v13793_v49  ;;  %v13839_v6 = vcombine.high %v1494_v24, %v1506_v63  ;;  %v13841_v59 = vcombine.high %v1495_v7, %v1507_v61  ;;  %v13838_v10 = vcombine.low %v1494_v24, %v1506_v63  ;;  %v1554_v18 = vld [vmem:[#allocation5 + $0x2e60] sm:$0xff]  ;;  %v1543_v19 = vld [vmem:[#allocation5 + $0x2e08] sm:$0xff]  ;;  %v80_v24 = vld [vmem:[#allocation5 + $0x50] sm:$0xff] }
 0x51e   :  { %12366 = vst [vmem:[#allocation8 + $0x150] sm:$0xff] %v14032_v35  ;;  %12367 = vst [vmem:[#allocation8 + $0x158] sm:$0xff] %v14033_v23  ;;  %v13840_v11 = vcombine.low %v1495_v7, %v1507_v61  ;;  %v13863_v17 = vcombine.high %v1518_v4, %v1530_v16  ;;  %v13865_v9 = vcombine.high %v1519_v57, %v1531_v60  ;;  %v1555_v20 = vld [vmem:[#allocation5 + $0x2e68] sm:$0xff]  ;;  %v1566_v28 = vld [vmem:[#allocation5 + $0x2ec0] sm:$0xff] }
 0x51f   :  { %v13862_v21 = vcombine.low %v1518_v4, %v1530_v16  ;;  %v13864_v53 = vcombine.low %v1519_v57, %v1531_v60  ;;  %v13887_v54 = vcombine.high %v1542_v0, %v1554_v18  ;;  %v13889_v27 = vcombine.high %v1543_v19, %v1555_v20  ;;  %v1578_v33 = vld [vmem:[#allocation5 + $0x2f20] sm:$0xff]  ;;  %v1567_v41 = vld [vmem:[#allocation5 + $0x2ec8] sm:$0xff]  ;;  %v92_v63 = vld [vmem:[#allocation5 + $0xb0] sm:$0xff] }
 0x520   :  { %11366 = vmatpush1.bf16.msra.mxu0 %v13790_v55  ;;  %11578 = vmatpush1.bf16.msra.mxu1 %v13792_v14  ;;  %v1579_v49 = vld [vmem:[#allocation5 + $0x2f28] sm:$0xff]  ;;  %v13886_v46 = vcombine.low %v1542_v0, %v1554_v18  ;;  %v13888_v38 = vcombine.low %v1543_v19, %v1555_v20  ;;  %v13911_v40 = vcombine.high %v1566_v28, %v1578_v33  ;;  %v1602_v52 = vld [vmem:[#allocation5 + $0x2fe0] sm:$0xff]  ;;  %v81_v7 = vld [vmem:[#allocation5 + $0x58] sm:$0xff] }
 0x521   :  { %11367 = vmatprep.subr.bf16.mxu0 %v13815_v62  ;;  %11579 = vmatprep.subr.bf16.mxu1 %v13817_v5  ;;  %v13913_v48 = vcombine.high %v1567_v41, %v1579_v49  ;;  %v1591_v35 = vld [vmem:[#allocation5 + $0x2f88] sm:$0xff]  ;;  %v13910_v23 = vcombine.low %v1566_v28, %v1578_v33  ;;  %v13912_v14 = vcombine.low %v1567_v41, %v1579_v49  ;;  %v93_v61 = vld [vmem:[#allocation5 + $0xb8] sm:$0xff]  ;;  %v104_v4 = vld [vmem:[#allocation5 + $0x110] sm:$0xff] }
 0x522   :  { %v1603_v55 = vld [vmem:[#allocation5 + $0x2fe8] sm:$0xff]  ;;  %v13935_v62 = vcombine.high %v1590_v51, %v1602_v52  ;;  %v116_v16 = vld [vmem:[#allocation5 + $0x170] sm:$0xff]  ;;  %v105_v57 = vld [vmem:[#allocation5 + $0x118] sm:$0xff] }
 0x523   :  { %v13937_v5 = vcombine.high %v1591_v35, %v1603_v55  ;;  %v117_v60 = vld [vmem:[#allocation5 + $0x178] sm:$0xff]  ;;  %v128_v0 = vld [vmem:[#allocation5 + $0x1d0] sm:$0xff] }
 0x524   :  { %11368 = vmatpush1.bf16.msra.mxu0 %v13814_v13  ;;  %11580 = vmatpush1.bf16.msra.mxu1 %v13816_v8  ;;  %v13934_v13 = vcombine.low %v1590_v51, %v1602_v52  ;;  %v13936_v8 = vcombine.low %v1591_v35, %v1603_v55  ;;  %v140_v18 = vld [vmem:[#allocation5 + $0x230] sm:$0xff]  ;;  %v129_v19 = vld [vmem:[#allocation5 + $0x1d8] sm:$0xff] }
 0x525   :  { %11369 = vmatprep.subr.bf16.mxu0 %v13839_v6  ;;  %11581 = vmatprep.subr.bf16.mxu1 %v13841_v59  ;;  %v12427_v6 = vcombine.high %v80_v24, %v92_v63  ;;  %v12429_v59 = vcombine.high %v81_v7, %v93_v61  ;;  %v141_v20 = vld [vmem:[#allocation5 + $0x238] sm:$0xff]  ;;  %v152_v28 = vld [vmem:[#allocation5 + $0x290] sm:$0xff] }
 0x526   :  { %v164_v33 = vld [vmem:[#allocation5 + $0x2f0] sm:$0xff]  ;;  %v153_v41 = vld [vmem:[#allocation5 + $0x298] sm:$0xff] }
 0x527   :  { %v165_v49 = vld [vmem:[#allocation5 + $0x2f8] sm:$0xff]  ;;  %v176_v51 = vld [vmem:[#allocation5 + $0x350] sm:$0xff] }
 0x528   :  { %11370 = vmatpush1.bf16.msra.mxu0 %v13838_v10  ;;  %11582 = vmatpush1.bf16.msra.mxu1 %v13840_v11  ;;  %v12426_v10 = vcombine.low %v80_v24, %v92_v63  ;;  %v12428_v11 = vcombine.low %v81_v7, %v93_v61  ;;  %v188_v52 = vld [vmem:[#allocation5 + $0x3b0] sm:$0xff]  ;;  %v177_v35 = vld [vmem:[#allocation5 + $0x358] sm:$0xff] }
 0x529   :  { %11371 = vmatprep.subr.bf16.mxu0 %v13863_v17  ;;  %11583 = vmatprep.subr.bf16.mxu1 %v13865_v9  ;;  %v12451_v17 = vcombine.high %v104_v4, %v116_v16  ;;  %v12453_v9 = vcombine.high %v105_v57, %v117_v60  ;;  %v189_v55 = vld [vmem:[#allocation5 + $0x3b8] sm:$0xff]  ;;  %v200_v24 = vld [vmem:[#allocation5 + $0x410] sm:$0xff] }
 0x52a   :  { %v212_v63 = vld [vmem:[#allocation5 + $0x470] sm:$0xff]  ;;  %v201_v7 = vld [vmem:[#allocation5 + $0x418] sm:$0xff] }
 0x52b   :  { %v213_v61 = vld [vmem:[#allocation5 + $0x478] sm:$0xff] }
 0x52c   :  { %11372 = vmatpush1.bf16.msra.mxu0 %v13862_v21  ;;  %11584 = vmatpush1.bf16.msra.mxu1 %v13864_v53  ;;  %v12450_v21 = vcombine.low %v104_v4, %v116_v16  ;;  %v12452_v53 = vcombine.low %v105_v57, %v117_v60  ;;  %v224_v4 = vld [vmem:[#allocation5 + $0x4d0] sm:$0xff]  ;;  %v225_v57 = vld [vmem:[#allocation5 + $0x4d8] sm:$0xff] }
 0x52d   :  { %11373 = vmatprep.subr.bf16.mxu0 %v13887_v54  ;;  %11585 = vmatprep.subr.bf16.mxu1 %v13889_v27  ;;  %v12475_v54 = vcombine.high %v128_v0, %v140_v18  ;;  %v12477_v27 = vcombine.high %v129_v19, %v141_v20  ;;  %v236_v16 = vld [vmem:[#allocation5 + $0x530] sm:$0xff]  ;;  %v237_v60 = vld [vmem:[#allocation5 + $0x538] sm:$0xff] }
 0x530   :  { %11374 = vmatpush1.bf16.msra.mxu0 %v13886_v46  ;;  %11586 = vmatpush1.bf16.msra.mxu1 %v13888_v38  ;;  %v12474_v46 = vcombine.low %v128_v0, %v140_v18  ;;  %v12476_v38 = vcombine.low %v129_v19, %v141_v20  ;;  %v260_v0 = vld [vmem:[#allocation5 + $0x5f0] sm:$0xff]  ;;  %v249_v18 = vld [vmem:[#allocation5 + $0x598] sm:$0xff]  ;;  %v12570_v20 = vcombine.low %v224_v4, %v236_v16 }
 0x531   :  { %11375 = vmatprep.subr.bf16.mxu0 %v13911_v40  ;;  %11587 = vmatprep.subr.bf16.mxu1 %v13913_v48  ;;  %v12499_v40 = vcombine.high %v152_v28, %v164_v33  ;;  %v12501_v48 = vcombine.high %v153_v41, %v165_v49  ;;  %v261_v19 = vld [vmem:[#allocation5 + $0x5f8] sm:$0xff] }
 0x534   :  { %11376 = vmatpush1.bf16.msra.mxu0 %v13910_v23  ;;  %11588 = vmatpush1.bf16.msra.mxu1 %v13912_v14  ;;  %v12498_v23 = vcombine.low %v152_v28, %v164_v33  ;;  %v12500_v14 = vcombine.low %v153_v41, %v165_v49  ;;  %v284_v28 = vld [vmem:[#allocation5 + $0x6b0] sm:$0xff]  ;;  %v273_v33 = vld [vmem:[#allocation5 + $0x658] sm:$0xff] }
 0x535   :  { %11377 = vmatprep.subr.bf16.mxu0 %v13935_v62  ;;  %11589 = vmatprep.subr.bf16.mxu1 %v13937_v5  ;;  %v12523_v62 = vcombine.high %v176_v51, %v188_v52  ;;  %v12525_v5 = vcombine.high %v177_v35, %v189_v55  ;;  %v285_v41 = vld [vmem:[#allocation5 + $0x6b8] sm:$0xff] }
 0x538   :  { %11378 = vmatpush1.bf16.msra.mxu0 %v13934_v13  ;;  %11590 = vmatpush1.bf16.msra.mxu1 %v13936_v8  ;;  %v12522_v13 = vcombine.low %v176_v51, %v188_v52  ;;  %v12524_v8 = vcombine.low %v177_v35, %v189_v55  ;;  %v308_v51 = vld [vmem:[#allocation5 + $0x770] sm:$0xff]  ;;  %v297_v52 = vld [vmem:[#allocation5 + $0x718] sm:$0xff] }
 0x539   :  { %11612 = vmatprep.subr.bf16.mxu0 %v12427_v6  ;;  %11824 = vmatprep.subr.bf16.mxu1 %v12429_v59  ;;  %v12547_v6 = vcombine.high %v200_v24, %v212_v63  ;;  %v12549_v59 = vcombine.high %v201_v7, %v213_v61  ;;  %v309_v35 = vld [vmem:[#allocation5 + $0x778] sm:$0xff] }
 0x53b   :  { %11380 = vmatmul.mubr.bf16.vlgmr.msra.gmra.mrb[32].mxu0 %v14677_v42  ;;  %11592 = vmatmul.mubr.bf16.vlgmr.msra.gmra.mrb[32].mxu1 %v14677_v42 }
 0x53c   :  { %11613 = vmatpush1.bf16.msra.mxu0 %v12426_v10  ;;  %11825 = vmatpush1.bf16.msra.mxu1 %v12428_v11  ;;  %v12546_v10 = vcombine.low %v200_v24, %v212_v63  ;;  %v12548_v11 = vcombine.low %v201_v7, %v213_v61  ;;  %v332_v24 = vld [vmem:[#allocation5 + $0x830] sm:$0xff]  ;;  %v321_v63 = vld [vmem:[#allocation5 + $0x7d8] sm:$0xff] }
 0x53d   :  { %11614 = vmatprep.subr.bf16.mxu0 %v12451_v17  ;;  %11826 = vmatprep.subr.bf16.mxu1 %v12453_v9  ;;  %v12571_v17 = vcombine.high %v224_v4, %v236_v16  ;;  %v248_v9 = vld [vmem:[#allocation5 + $0x590] sm:$0xff]  ;;  %v333_v7 = vld [vmem:[#allocation5 + $0x838] sm:$0xff] }
 0x53e   :  { %11389 = vmatprep.mubr.bf16.mxu0 %v14679_v50  ;;  %11601 = vmatprep.mubr.bf16.mxu1 %v14679_v50  ;;  %v12594_v49 = vcombine.low %v248_v9, %v260_v0  ;;  %v356_v4 = vld [vmem:[#allocation5 + $0x8f0] sm:$0xff]  ;;  %v345_v16 = vld [vmem:[#allocation5 + $0x898] sm:$0xff] }
 0x540   :  { %11615 = vmatpush1.bf16.msra.mxu0 %v12450_v21  ;;  %11827 = vmatpush1.bf16.msra.mxu1 %v12452_v53  ;;  %v12572_v21 = vcombine.low %v225_v57, %v237_v60  ;;  %v12595_v53 = vcombine.high %v248_v9, %v260_v0  ;;  %v380_v9 = vld [vmem:[#allocation5 + $0x9b0] sm:$0xff]  ;;  %v369_v0 = vld [vmem:[#allocation5 + $0x958] sm:$0xff] }
 0x541   :  { %11616 = vmatprep.subr.bf16.mxu0 %v12475_v54  ;;  %11828 = vmatprep.subr.bf16.mxu1 %v12477_v27  ;;  %v12597_v54 = vcombine.high %v249_v18, %v261_v19  ;;  %v272_v27 = vld [vmem:[#allocation5 + $0x650] sm:$0xff] }
 0x542   :  { %v12618_v55 = vcombine.low %v272_v27, %v284_v28 }
 0x543   :  { %11390 = vmatmul.mubr.bf16.gmra.mrb[36].mxu0 %v14685_v3  ;;  %11602 = vmatmul.mubr.bf16.gmra.mrb[36].mxu1 %v14685_v3 }
 0x544   :  { %11617 = vmatpush1.bf16.msra.mxu0 %v12474_v46  ;;  %11829 = vmatpush1.bf16.msra.mxu1 %v12476_v38  ;;  %v12596_v46 = vcombine.low %v249_v18, %v261_v19  ;;  %v12619_v38 = vcombine.high %v272_v27, %v284_v28  ;;  %v381_v18 = vld [vmem:[#allocation5 + $0x9b8] sm:$0xff]  ;;  %v404_v27 = vld [vmem:[#allocation5 + $0xa70] sm:$0xff] }
 0x545   :  { %11618 = vmatprep.subr.bf16.mxu0 %v12499_v40  ;;  %11830 = vmatprep.subr.bf16.mxu1 %v12501_v48  ;;  %v12621_v40 = vcombine.high %v273_v33, %v285_v41  ;;  %v296_v48 = vld [vmem:[#allocation5 + $0x710] sm:$0xff]  ;;  %v393_v28 = vld [vmem:[#allocation5 + $0xa18] sm:$0xff] }
 0x546   :  { %11644 = vmatprep.mubr.bf16.mxu0 %v14599_v58  ;;  %11856 = vmatprep.mubr.bf16.mxu1 %v14599_v58  ;;  %v12573_v58 = vcombine.high %v225_v57, %v237_v60  ;;  %v12642_v61 = vcombine.low %v296_v48, %v308_v51  ;;  %v357_v57 = vld [vmem:[#allocation5 + $0x8f8] sm:$0xff] }
 0x548   :  { %11619 = vmatpush1.bf16.msra.mxu0 %v12498_v23  ;;  %11831 = vmatpush1.bf16.msra.mxu1 %v12500_v14  ;;  %v12620_v23 = vcombine.low %v273_v33, %v285_v41  ;;  %v12643_v14 = vcombine.high %v296_v48, %v308_v51  ;;  %v405_v33 = vld [vmem:[#allocation5 + $0xa78] sm:$0xff]  ;;  %v428_v48 = vld [vmem:[#allocation5 + $0xb30] sm:$0xff] }
 0x549   :  { %11620 = vmatprep.subr.bf16.mxu0 %v12523_v62  ;;  %11832 = vmatprep.subr.bf16.mxu1 %v12525_v5  ;;  %v12645_v62 = vcombine.high %v297_v52, %v309_v35  ;;  %v320_v5 = vld [vmem:[#allocation5 + $0x7d0] sm:$0xff]  ;;  %v417_v51 = vld [vmem:[#allocation5 + $0xad8] sm:$0xff] }
 0x54a   :  { %v12666_v60 = vcombine.low %v320_v5, %v332_v24 }
 0x54c   :  { %11621 = vmatpush1.bf16.msra.mxu0 %v12522_v13  ;;  %11833 = vmatpush1.bf16.msra.mxu1 %v12524_v8  ;;  %v12644_v13 = vcombine.low %v297_v52, %v309_v35  ;;  %v12667_v8 = vcombine.high %v320_v5, %v332_v24  ;;  %v429_v52 = vld [vmem:[#allocation5 + $0xb38] sm:$0xff]  ;;  %v452_v5 = vld [vmem:[#allocation5 + $0xbf0] sm:$0xff] }
 0x54d   :  { %11622 = vmatprep.subr.bf16.mxu0 %v12547_v6  ;;  %11834 = vmatprep.subr.bf16.mxu1 %v12549_v59  ;;  %v12669_v6 = vcombine.high %v321_v63, %v333_v7  ;;  %v344_v59 = vld [vmem:[#allocation5 + $0x890] sm:$0xff]  ;;  %v441_v24 = vld [vmem:[#allocation5 + $0xb98] sm:$0xff] }
 0x54e   :  { %v12690_v19 = vcombine.low %v344_v59, %v356_v4 }
 0x550   :  { %11623 = vmatpush1.bf16.msra.mxu0 %v12546_v10  ;;  %11835 = vmatpush1.bf16.msra.mxu1 %v12548_v11  ;;  %v12668_v10 = vcombine.low %v321_v63, %v333_v7  ;;  %v12691_v11 = vcombine.high %v344_v59, %v356_v4  ;;  %v453_v63 = vld [vmem:[#allocation5 + $0xbf8] sm:$0xff]  ;;  %v476_v59 = vld [vmem:[#allocation5 + $0xcb0] sm:$0xff] }
 0x551   :  { %11624 = vmatprep.subr.bf16.mxu0 %v12571_v17  ;;  %11836 = vmatprep.subr.bf16.mxu1 %v12573_v58  ;;  %v12693_v17 = vcombine.high %v345_v16, %v357_v57  ;;  %v368_v58 = vld [vmem:[#allocation5 + $0x950] sm:$0xff]  ;;  %v465_v4 = vld [vmem:[#allocation5 + $0xc58] sm:$0xff] }
 0x552   :  { %v12714_v41 = vcombine.low %v368_v58, %v380_v9 }
 0x554   :  { %11625 = vmatpush1.bf16.msra.mxu0 %v12570_v20  ;;  %11837 = vmatpush1.bf16.msra.mxu1 %v12572_v21  ;;  %v12692_v20 = vcombine.low %v345_v16, %v357_v57  ;;  %v12715_v21 = vcombine.high %v368_v58, %v380_v9  ;;  %v477_v16 = vld [vmem:[#allocation5 + $0xcb8] sm:$0xff]  ;;  %v500_v58 = vld [vmem:[#allocation5 + $0xd70] sm:$0xff] }
 0x555   :  { %11626 = vmatprep.subr.bf16.mxu0 %v12595_v53  ;;  %11838 = vmatprep.subr.bf16.mxu1 %v12597_v54  ;;  %v12717_v53 = vcombine.high %v369_v0, %v381_v18  ;;  %v392_v54 = vld [vmem:[#allocation5 + $0xa10] sm:$0xff]  ;;  %v489_v9 = vld [vmem:[#allocation5 + $0xd18] sm:$0xff] }
 0x556   :  { %v12738_v35 = vcombine.low %v392_v54, %v404_v27 }
 0x558   :  { %11627 = vmatpush1.bf16.msra.mxu0 %v12594_v49  ;;  %11839 = vmatpush1.bf16.msra.mxu1 %v12596_v46  ;;  %v12716_v49 = vcombine.low %v369_v0, %v381_v18  ;;  %v12739_v46 = vcombine.high %v392_v54, %v404_v27  ;;  %v501_v0 = vld [vmem:[#allocation5 + $0xd78] sm:$0xff]  ;;  %v524_v54 = vld [vmem:[#allocation5 + $0xe30] sm:$0xff] }
 0x559   :  { %11628 = vmatprep.subr.bf16.mxu0 %v12619_v38  ;;  %11840 = vmatprep.subr.bf16.mxu1 %v12621_v40  ;;  %v12741_v38 = vcombine.high %v393_v28, %v405_v33  ;;  %v416_v40 = vld [vmem:[#allocation5 + $0xad0] sm:$0xff]  ;;  %v513_v27 = vld [vmem:[#allocation5 + $0xdd8] sm:$0xff] }
 0x55a   :  { %v12762_v7 = vcombine.low %v416_v40, %v428_v48 }
 0x55c   :  { %11629 = vmatpush1.bf16.msra.mxu0 %v12618_v55  ;;  %11841 = vmatpush1.bf16.msra.mxu1 %v12620_v23  ;;  %v12740_v55 = vcombine.low %v393_v28, %v405_v33  ;;  %v12763_v23 = vcombine.high %v416_v40, %v428_v48  ;;  %v525_v28 = vld [vmem:[#allocation5 + $0xe38] sm:$0xff]  ;;  %v548_v40 = vld [vmem:[#allocation5 + $0xef0] sm:$0xff] }
 0x55d   :  { %11630 = vmatprep.subr.bf16.mxu0 %v12643_v14  ;;  %11842 = vmatprep.subr.bf16.mxu1 %v12645_v62  ;;  %v12765_v14 = vcombine.high %v417_v51, %v429_v52  ;;  %v440_v62 = vld [vmem:[#allocation5 + $0xb90] sm:$0xff]  ;;  %v537_v48 = vld [vmem:[#allocation5 + $0xe98] sm:$0xff] }
 0x55e   :  { %v12786_v57 = vcombine.low %v440_v62, %v452_v5 }
 0x560   :  { %11631 = vmatpush1.bf16.msra.mxu0 %v12642_v61  ;;  %11843 = vmatpush1.bf16.msra.mxu1 %v12644_v13  ;;  %v12764_v61 = vcombine.low %v417_v51, %v429_v52  ;;  %v12787_v13 = vcombine.high %v440_v62, %v452_v5  ;;  %v549_v51 = vld [vmem:[#allocation5 + $0xef8] sm:$0xff] }
 0x561   :  { %11632 = vmatprep.subr.bf16.mxu0 %v12667_v8  ;;  %11844 = vmatprep.subr.bf16.mxu1 %v12669_v6  ;;  %v12789_v8 = vcombine.high %v441_v24, %v453_v63  ;;  %v464_v6 = vld [vmem:[#allocation5 + $0xc50] sm:$0xff]  ;;  %v561_v62 = vld [vmem:[#allocation5 + $0xf58] sm:$0xff] }
 0x562   :  { %v12810_v18 = vcombine.low %v464_v6, %v476_v59  ;;  %v573_v5 = vld [vmem:[#allocation5 + $0xfb8] sm:$0xff] }
 0x564   :  { %11633 = vmatpush1.bf16.msra.mxu0 %v12666_v60  ;;  %11845 = vmatpush1.bf16.msra.mxu1 %v12668_v10  ;;  %v12788_v60 = vcombine.low %v441_v24, %v453_v63  ;;  %v12811_v10 = vcombine.high %v464_v6, %v476_v59  ;;  %v597_v6 = vld [vmem:[#allocation5 + $0x1078] sm:$0xff] }
 0x565   :  { %11634 = vmatprep.subr.bf16.mxu0 %v12691_v11  ;;  %11846 = vmatprep.subr.bf16.mxu1 %v12693_v17  ;;  %v12813_v11 = vcombine.high %v465_v4, %v477_v16  ;;  %v488_v17 = vld [vmem:[#allocation5 + $0xd10] sm:$0xff] }
 0x566   :  { %v12834_v33 = vcombine.low %v488_v17, %v500_v58 }
 0x568   :  { %11635 = vmatpush1.bf16.msra.mxu0 %v12690_v19  ;;  %11847 = vmatpush1.bf16.msra.mxu1 %v12692_v20  ;;  %v12812_v19 = vcombine.low %v465_v4, %v477_v16  ;;  %v12835_v20 = vcombine.high %v488_v17, %v500_v58  ;;  %v12908_v4 = vcombine.low %v561_v62, %v573_v5 }
 0x569   :  { %11636 = vmatprep.subr.bf16.mxu0 %v12715_v21  ;;  %11848 = vmatprep.subr.bf16.mxu1 %v12717_v53  ;;  %v12837_v21 = vcombine.high %v489_v9, %v501_v0  ;;  %v512_v53 = vld [vmem:[#allocation5 + $0xdd0] sm:$0xff] }
 0x56a   :  { %v12858_v52 = vcombine.low %v512_v53, %v524_v54 }
 0x56c   :  { %11637 = vmatpush1.bf16.msra.mxu0 %v12714_v41  ;;  %11849 = vmatpush1.bf16.msra.mxu1 %v12716_v49  ;;  %v12836_v41 = vcombine.low %v489_v9, %v501_v0  ;;  %v12859_v49 = vcombine.high %v512_v53, %v524_v54  ;;  %v632_v0 = vld [vmem:[#allocation5 + $0x1190] sm:$0xff] }
 0x56d   :  { %11638 = vmatprep.subr.bf16.mxu0 %v12739_v46  ;;  %11850 = vmatprep.subr.bf16.mxu1 %v12741_v38  ;;  %v12861_v46 = vcombine.high %v513_v27, %v525_v28  ;;  %v536_v38 = vld [vmem:[#allocation5 + $0xe90] sm:$0xff] }
 0x56e   :  { %v12882_v24 = vcombine.low %v536_v38, %v548_v40 }
 0x570   :  { %11639 = vmatpush1.bf16.msra.mxu0 %v12738_v35  ;;  %11851 = vmatpush1.bf16.msra.mxu1 %v12740_v55  ;;  %v12883_v35 = vcombine.high %v536_v38, %v548_v40  ;;  %v12885_v55 = vcombine.high %v537_v48, %v549_v51 }
 0x571   :  { %11640 = vmatprep.subr.bf16.mxu0 %v12763_v23  ;;  %11852 = vmatprep.subr.bf16.mxu1 %v12765_v14  ;;  %v560_v23 = vld [vmem:[#allocation5 + $0xf50] sm:$0xff] }
 0x572   :  { %v572_v14 = vld [vmem:[#allocation5 + $0xfb0] sm:$0xff] }
 0x573   :  { %v12907_v63 = vcombine.high %v560_v23, %v572_v14  ;;  %v12906_v59 = vcombine.low %v560_v23, %v572_v14 }
 0x574   :  { %11641 = vmatpush1.bf16.msra.mxu0 %v12762_v7  ;;  %11853 = vmatpush1.bf16.msra.mxu1 %v12764_v61  ;;  %v12909_v7 = vcombine.high %v561_v62, %v573_v5  ;;  %v584_v61 = vld [vmem:[#allocation5 + $0x1010] sm:$0xff] }
 0x575   :  { %11642 = vmatprep.subr.bf16.mxu0 %v12787_v13  ;;  %11854 = vmatprep.subr.bf16.mxu1 %v12789_v8  ;;  %v596_v13 = vld [vmem:[#allocation5 + $0x1070] sm:$0xff]  ;;  %v585_v8 = vld [vmem:[#allocation5 + $0x1018] sm:$0xff] }
 0x576   :  { %v12933_v16 = vcombine.high %v585_v8, %v597_v6  ;;  %v12930_v17 = vcombine.low %v584_v61, %v596_v13  ;;  %v12932_v58 = vcombine.low %v585_v8, %v597_v6  ;;  %v704_v5 = vld [vmem:[#allocation5 + $0x13d0] sm:$0xff] }
 0x577   :  { %v728_v6 = vld [vmem:[#allocation5 + $0x1490] sm:$0xff] }
 0x578   :  { %11643 = vmatpush1.bf16.msra.mxu0 %v12786_v57  ;;  %11855 = vmatpush1.bf16.msra.mxu1 %v12788_v60  ;;  %v608_v57 = vld [vmem:[#allocation5 + $0x10d0] sm:$0xff] }
 0x579   :  { %11665 = vmatprep.subr.bf16.mxu0 %v12811_v10  ;;  %11877 = vmatprep.subr.bf16.mxu1 %v12813_v11  ;;  %v620_v60 = vld [vmem:[#allocation5 + $0x1130] sm:$0xff]  ;;  %v609_v10 = vld [vmem:[#allocation5 + $0x10d8] sm:$0xff] }
 0x57a   :  { %v621_v11 = vld [vmem:[#allocation5 + $0x1138] sm:$0xff]  ;;  %v12955_v9 = vcombine.high %v608_v57, %v620_v60 }
 0x57b   :  { %11645 = vmatmul.mubr.bf16.vlgmr.msra.gmra.mrb[40].mxu0 %v14605_v15  ;;  %11857 = vmatmul.mubr.bf16.vlgmr.msra.gmra.mrb[40].mxu1 %v14605_v15  ;;  %v12860_v15 = vcombine.low %v513_v27, %v525_v28  ;;  %v12956_v53 = vcombine.low %v609_v10, %v621_v11  ;;  %v656_v28 = vld [vmem:[#allocation5 + $0x1250] sm:$0xff] }
 0x57c   :  { %11666 = vmatpush1.bf16.msra.mxu0 %v12810_v18  ;;  %11878 = vmatpush1.bf16.msra.mxu1 %v12812_v19  ;;  %v644_v18 = vld [vmem:[#allocation5 + $0x11f0] sm:$0xff]  ;;  %v633_v19 = vld [vmem:[#allocation5 + $0x1198] sm:$0xff] }
 0x57d   :  { %11667 = vmatprep.subr.bf16.mxu0 %v12835_v20  ;;  %11879 = vmatprep.subr.bf16.mxu1 %v12837_v21  ;;  %v645_v20 = vld [vmem:[#allocation5 + $0x11f8] sm:$0xff]  ;;  %v12954_v21 = vcombine.low %v608_v57, %v620_v60  ;;  %v12979_v54 = vcombine.high %v632_v0, %v644_v18 }
 0x57e   :  { %11654 = vmatprep.mubr.bf16.mxu0 %v14607_v25  ;;  %11866 = vmatprep.mubr.bf16.mxu1 %v14607_v25  ;;  %v12884_v25 = vcombine.low %v537_v48, %v549_v51  ;;  %v12981_v27 = vcombine.high %v633_v19, %v645_v20  ;;  %v12980_v38 = vcombine.low %v633_v19, %v645_v20  ;;  %v680_v51 = vld [vmem:[#allocation5 + $0x1310] sm:$0xff] }
 0x57f   :  { %v776_v20 = vld [vmem:[#allocation5 + $0x1610] sm:$0xff] }
 0x580   :  { %11668 = vmatpush1.bf16.msra.mxu0 %v12834_v33  ;;  %11880 = vmatpush1.bf16.msra.mxu1 %v12836_v41  ;;  %v668_v33 = vld [vmem:[#allocation5 + $0x12b0] sm:$0xff]  ;;  %v657_v41 = vld [vmem:[#allocation5 + $0x1258] sm:$0xff] }
 0x581   :  { %11669 = vmatprep.subr.bf16.mxu0 %v12859_v49  ;;  %11881 = vmatprep.subr.bf16.mxu1 %v12861_v46  ;;  %v669_v49 = vld [vmem:[#allocation5 + $0x12b8] sm:$0xff]  ;;  %v12978_v46 = vcombine.low %v632_v0, %v644_v18  ;;  %v13003_v40 = vcombine.high %v656_v28, %v668_v33 }
 0x582   :  { %v13005_v48 = vcombine.high %v657_v41, %v669_v49  ;;  %v13004_v23 = vcombine.low %v657_v41, %v669_v49  ;;  %v800_v49 = vld [vmem:[#allocation5 + $0x16d0] sm:$0xff] }
 0x583   :  { %11655 = vmatmul.mubr.bf16.gmra.mrb[44].mxu0 %v14613_v34  ;;  %11867 = vmatmul.mubr.bf16.gmra.mrb[44].mxu1 %v14613_v34  ;;  %v12931_v34 = vcombine.high %v584_v61, %v596_v13 }
 0x584   :  { %11670 = vmatpush1.bf16.msra.mxu0 %v12858_v52  ;;  %11882 = vmatpush1.bf16.msra.mxu1 %v12860_v15  ;;  %v692_v52 = vld [vmem:[#allocation5 + $0x1370] sm:$0xff]  ;;  %v681_v15 = vld [vmem:[#allocation5 + $0x1318] sm:$0xff] }
 0x585   :  { %11671 = vmatprep.subr.bf16.mxu0 %v12883_v35  ;;  %11883 = vmatprep.subr.bf16.mxu1 %v12885_v55  ;;  %v693_v35 = vld [vmem:[#allocation5 + $0x1378] sm:$0xff]  ;;  %v13002_v55 = vcombine.low %v656_v28, %v668_v33  ;;  %v13027_v14 = vcombine.high %v680_v51, %v692_v52 }
 0x586   :  { %11697 = vmatprep.mubr.bf16.mxu0 %v14621_v43  ;;  %11909 = vmatprep.mubr.bf16.mxu1 %v14621_v43  ;;  %v12957_v43 = vcombine.high %v609_v10, %v621_v11  ;;  %v13029_v62 = vcombine.high %v681_v15, %v693_v35  ;;  %v13028_v61 = vcombine.low %v681_v15, %v693_v35  ;;  %v752_v11 = vld [vmem:[#allocation5 + $0x1550] sm:$0xff] }
 0x587   :  { %v824_v35 = vld [vmem:[#allocation5 + $0x1790] sm:$0xff] }
 0x588   :  { %11672 = vmatpush1.bf16.msra.mxu0 %v12882_v24  ;;  %11884 = vmatpush1.bf16.msra.mxu1 %v12884_v25  ;;  %v716_v24 = vld [vmem:[#allocation5 + $0x1430] sm:$0xff]  ;;  %v705_v25 = vld [vmem:[#allocation5 + $0x13d8] sm:$0xff] }
 0x589   :  { %11673 = vmatprep.subr.bf16.mxu0 %v12907_v63  ;;  %11885 = vmatprep.subr.bf16.mxu1 %v12909_v7  ;;  %v717_v63 = vld [vmem:[#allocation5 + $0x1438] sm:$0xff]  ;;  %v13026_v7 = vcombine.low %v680_v51, %v692_v52  ;;  %v13051_v13 = vcombine.high %v704_v5, %v716_v24 }
 0x58a   :  { %v13053_v8 = vcombine.high %v705_v25, %v717_v63  ;;  %v13052_v57 = vcombine.low %v705_v25, %v717_v63  ;;  %v848_v63 = vld [vmem:[#allocation5 + $0x1850] sm:$0xff] }
 0x58c   :  { %11674 = vmatpush1.bf16.msra.mxu0 %v12906_v59  ;;  %11886 = vmatpush1.bf16.msra.mxu1 %v12908_v4  ;;  %v740_v59 = vld [vmem:[#allocation5 + $0x14f0] sm:$0xff]  ;;  %v729_v4 = vld [vmem:[#allocation5 + $0x1498] sm:$0xff] }
 0x58d   :  { %11675 = vmatprep.subr.bf16.mxu0 %v12931_v34  ;;  %11887 = vmatprep.subr.bf16.mxu1 %v12933_v16  ;;  %v741_v34 = vld [vmem:[#allocation5 + $0x14f8] sm:$0xff]  ;;  %v13050_v16 = vcombine.low %v704_v5, %v716_v24  ;;  %v13075_v60 = vcombine.high %v728_v6, %v740_v59 }
 0x58e   :  { %v13077_v10 = vcombine.high %v729_v4, %v741_v34  ;;  %v13076_v0 = vcombine.low %v729_v4, %v741_v34  ;;  %v872_v34 = vld [vmem:[#allocation5 + $0x1910] sm:$0xff] }
 0x590   :  { %11676 = vmatpush1.bf16.msra.mxu0 %v12930_v17  ;;  %11888 = vmatpush1.bf16.msra.mxu1 %v12932_v58  ;;  %v764_v17 = vld [vmem:[#allocation5 + $0x15b0] sm:$0xff]  ;;  %v753_v58 = vld [vmem:[#allocation5 + $0x1558] sm:$0xff] }
 0x591   :  { %11677 = vmatprep.subr.bf16.mxu0 %v12955_v9  ;;  %11889 = vmatprep.subr.bf16.mxu1 %v12957_v43  ;;  %v765_v9 = vld [vmem:[#allocation5 + $0x15b8] sm:$0xff]  ;;  %v13074_v43 = vcombine.low %v728_v6, %v740_v59  ;;  %v13099_v18 = vcombine.high %v752_v11, %v764_v17 }
 0x592   :  { %v13101_v19 = vcombine.high %v753_v58, %v765_v9  ;;  %v13100_v28 = vcombine.low %v753_v58, %v765_v9  ;;  %v896_v9 = vld [vmem:[#allocation5 + $0x19d0] sm:$0xff] }
 0x594   :  { %11678 = vmatpush1.bf16.msra.mxu0 %v12954_v21  ;;  %11890 = vmatpush1.bf16.msra.mxu1 %v12956_v53  ;;  %v788_v21 = vld [vmem:[#allocation5 + $0x1670] sm:$0xff]  ;;  %v777_v53 = vld [vmem:[#allocation5 + $0x1618] sm:$0xff] }
 0x595   :  { %11679 = vmatprep.subr.bf16.mxu0 %v12979_v54  ;;  %11891 = vmatprep.subr.bf16.mxu1 %v12981_v27  ;;  %v789_v54 = vld [vmem:[#allocation5 + $0x1678] sm:$0xff]  ;;  %v13098_v27 = vcombine.low %v752_v11, %v764_v17  ;;  %v13123_v33 = vcombine.high %v776_v20, %v788_v21 }
 0x596   :  { %v13125_v41 = vcombine.high %v777_v53, %v789_v54  ;;  %v13124_v51 = vcombine.low %v777_v53, %v789_v54  ;;  %v920_v54 = vld [vmem:[#allocation5 + $0x1a90] sm:$0xff] }
 0x598   :  { %11680 = vmatpush1.bf16.msra.mxu0 %v12978_v46  ;;  %11892 = vmatpush1.bf16.msra.mxu1 %v12980_v38  ;;  %v812_v46 = vld [vmem:[#allocation5 + $0x1730] sm:$0xff]  ;;  %v801_v38 = vld [vmem:[#allocation5 + $0x16d8] sm:$0xff] }
 0x599   :  { %11681 = vmatprep.subr.bf16.mxu0 %v13003_v40  ;;  %11893 = vmatprep.subr.bf16.mxu1 %v13005_v48  ;;  %v813_v40 = vld [vmem:[#allocation5 + $0x1738] sm:$0xff]  ;;  %v13122_v48 = vcombine.low %v776_v20, %v788_v21  ;;  %v13147_v52 = vcombine.high %v800_v49, %v812_v46 }
 0x59a   :  { %v13149_v15 = vcombine.high %v801_v38, %v813_v40  ;;  %v13148_v5 = vcombine.low %v801_v38, %v813_v40  ;;  %v944_v38 = vld [vmem:[#allocation5 + $0x1b50] sm:$0xff] }
 0x59b   :  { %v956_v40 = vld [vmem:[#allocation5 + $0x1bb0] sm:$0xff] }
 0x59c   :  { %11682 = vmatpush1.bf16.msra.mxu0 %v13002_v55  ;;  %11894 = vmatpush1.bf16.msra.mxu1 %v13004_v23  ;;  %v836_v55 = vld [vmem:[#allocation5 + $0x17f0] sm:$0xff]  ;;  %v825_v23 = vld [vmem:[#allocation5 + $0x1798] sm:$0xff] }
 0x59d   :  { %11683 = vmatprep.subr.bf16.mxu0 %v13027_v14  ;;  %11895 = vmatprep.subr.bf16.mxu1 %v13029_v62  ;;  %v837_v14 = vld [vmem:[#allocation5 + $0x17f8] sm:$0xff]  ;;  %v13146_v62 = vcombine.low %v800_v49, %v812_v46  ;;  %v13171_v24 = vcombine.high %v824_v35, %v836_v55 }
 0x59e   :  { %v13173_v25 = vcombine.high %v825_v23, %v837_v14  ;;  %v13172_v6 = vcombine.low %v825_v23, %v837_v14  ;;  %v980_v23 = vld [vmem:[#allocation5 + $0x1c70] sm:$0xff]  ;;  %v969_v14 = vld [vmem:[#allocation5 + $0x1c18] sm:$0xff] }
 0x5a0   :  { %11684 = vmatpush1.bf16.msra.mxu0 %v13026_v7  ;;  %11896 = vmatpush1.bf16.msra.mxu1 %v13028_v61  ;;  %v860_v7 = vld [vmem:[#allocation5 + $0x18b0] sm:$0xff]  ;;  %v849_v61 = vld [vmem:[#allocation5 + $0x1858] sm:$0xff] }
 0x5a1   :  { %11685 = vmatprep.subr.bf16.mxu0 %v13051_v13  ;;  %11897 = vmatprep.subr.bf16.mxu1 %v13053_v8  ;;  %v861_v13 = vld [vmem:[#allocation5 + $0x18b8] sm:$0xff]  ;;  %v13170_v8 = vcombine.low %v824_v35, %v836_v55  ;;  %v13195_v59 = vcombine.high %v848_v63, %v860_v7  ;;  %v968_v55 = vld [vmem:[#allocation5 + $0x1c10] sm:$0xff] }
 0x5a2   :  { %v13197_v4 = vcombine.high %v849_v61, %v861_v13  ;;  %v13196_v11 = vcombine.low %v849_v61, %v861_v13  ;;  %v993_v61 = vld [vmem:[#allocation5 + $0x1cd8] sm:$0xff] }
 0x5a3   :  { %v1005_v13 = vld [vmem:[#allocation5 + $0x1d38] sm:$0xff] }
 0x5a4   :  { %11686 = vmatpush1.bf16.msra.mxu0 %v13050_v16  ;;  %11898 = vmatpush1.bf16.msra.mxu1 %v13052_v57  ;;  %v884_v16 = vld [vmem:[#allocation5 + $0x1970] sm:$0xff]  ;;  %v873_v57 = vld [vmem:[#allocation5 + $0x1918] sm:$0xff] }
 0x5a5   :  { %11687 = vmatprep.subr.bf16.mxu0 %v13075_v60  ;;  %11899 = vmatprep.subr.bf16.mxu1 %v13077_v10  ;;  %v885_v60 = vld [vmem:[#allocation5 + $0x1978] sm:$0xff]  ;;  %v13194_v10 = vcombine.low %v848_v63, %v860_v7  ;;  %v13219_v17 = vcombine.high %v872_v34, %v884_v16  ;;  %v992_v63 = vld [vmem:[#allocation5 + $0x1cd0] sm:$0xff] }
 0x5a6   :  { %v13221_v58 = vcombine.high %v873_v57, %v885_v60  ;;  %v13220_v20 = vcombine.low %v873_v57, %v885_v60  ;;  %v1004_v7 = vld [vmem:[#allocation5 + $0x1d30] sm:$0xff]  ;;  %v1029_v57 = vld [vmem:[#allocation5 + $0x1df8] sm:$0xff] }
 0x5a7   :  { %v13338_v60 = vcombine.low %v992_v63, %v1004_v7 }
 0x5a8   :  { %11688 = vmatpush1.bf16.msra.mxu0 %v13074_v43  ;;  %11900 = vmatpush1.bf16.msra.mxu1 %v13076_v0  ;;  %v908_v43 = vld [vmem:[#allocation5 + $0x1a30] sm:$0xff]  ;;  %v897_v0 = vld [vmem:[#allocation5 + $0x19d8] sm:$0xff] }
 0x5a9   :  { %11689 = vmatprep.subr.bf16.mxu0 %v13099_v18  ;;  %11901 = vmatprep.subr.bf16.mxu1 %v13101_v19  ;;  %v909_v18 = vld [vmem:[#allocation5 + $0x1a38] sm:$0xff]  ;;  %v13218_v19 = vcombine.low %v872_v34, %v884_v16  ;;  %v13243_v21 = vcombine.high %v896_v9, %v908_v43  ;;  %v1028_v34 = vld [vmem:[#allocation5 + $0x1df0] sm:$0xff] }
 0x5aa   :  { %v13245_v53 = vcombine.high %v897_v0, %v909_v18  ;;  %v1017_v16 = vld [vmem:[#allocation5 + $0x1d98] sm:$0xff] }
 0x5ac   :  { %11690 = vmatpush1.bf16.msra.mxu0 %v13098_v27  ;;  %11902 = vmatpush1.bf16.msra.mxu1 %v13100_v28  ;;  %v932_v27 = vld [vmem:[#allocation5 + $0x1af0] sm:$0xff]  ;;  %v921_v28 = vld [vmem:[#allocation5 + $0x1a98] sm:$0xff] }
 0x5ad   :  { %11691 = vmatprep.subr.bf16.mxu0 %v13123_v33  ;;  %11903 = vmatprep.subr.bf16.mxu1 %v13125_v41  ;;  %v933_v33 = vld [vmem:[#allocation5 + $0x1af8] sm:$0xff]  ;;  %v13242_v41 = vcombine.low %v896_v9, %v908_v43  ;;  %v13267_v49 = vcombine.high %v920_v54, %v932_v27  ;;  %v1052_v9 = vld [vmem:[#allocation5 + $0x1eb0] sm:$0xff] }
 0x5ae   :  { %v13269_v46 = vcombine.high %v921_v28, %v933_v33  ;;  %v1041_v43 = vld [vmem:[#allocation5 + $0x1e58] sm:$0xff] }
 0x5b0   :  { %11692 = vmatpush1.bf16.msra.mxu0 %v13122_v48  ;;  %11904 = vmatpush1.bf16.msra.mxu1 %v13124_v51  ;;  %v945_v48 = vld [vmem:[#allocation5 + $0x1b58] sm:$0xff] }
 0x5b1   :  { %11693 = vmatprep.subr.bf16.mxu0 %v13147_v52  ;;  %11905 = vmatprep.subr.bf16.mxu1 %v13149_v15  ;;  %v957_v51 = vld [vmem:[#allocation5 + $0x1bb8] sm:$0xff]  ;;  %v13266_v52 = vcombine.low %v920_v54, %v932_v27  ;;  %v13291_v15 = vcombine.high %v944_v38, %v956_v40  ;;  %v1076_v54 = vld [vmem:[#allocation5 + $0x1f70] sm:$0xff] }
 0x5b2   :  { %v13293_v35 = vcombine.high %v945_v48, %v957_v51  ;;  %v1065_v27 = vld [vmem:[#allocation5 + $0x1f18] sm:$0xff] }
 0x5b4   :  { %11694 = vmatpush1.bf16.msra.mxu0 %v13146_v62  ;;  %11906 = vmatpush1.bf16.msra.mxu1 %v13148_v5  ;;  %v981_v62 = vld [vmem:[#allocation5 + $0x1c78] sm:$0xff]  ;;  %v13290_v5 = vcombine.low %v944_v38, %v956_v40  ;;  %v1100_v38 = vld [vmem:[#allocation5 + $0x2030] sm:$0xff] }
 0x5b5   :  { %11695 = vmatprep.subr.bf16.mxu0 %v13171_v24  ;;  %11907 = vmatprep.subr.bf16.mxu1 %v13173_v25  ;;  %v13292_v24 = vcombine.low %v945_v48, %v957_v51  ;;  %v13317_v25 = vcombine.high %v969_v14, %v981_v62  ;;  %v1089_v40 = vld [vmem:[#allocation5 + $0x1fd8] sm:$0xff] }
 0x5b6   :  { %v1101_v48 = vld [vmem:[#allocation5 + $0x2038] sm:$0xff] }
 0x5b8   :  { %11696 = vmatpush1.bf16.msra.mxu0 %v13170_v8  ;;  %11908 = vmatpush1.bf16.msra.mxu1 %v13172_v6  ;;  %v13314_v8 = vcombine.low %v968_v55, %v980_v23  ;;  %v13316_v6 = vcombine.low %v969_v14, %v981_v62  ;;  %v1125_v14 = vld [vmem:[#allocation5 + $0x20f8] sm:$0xff] }
 0x5b9   :  { %11718 = vmatprep.subr.bf16.mxu0 %v13195_v59  ;;  %11930 = vmatprep.subr.bf16.mxu1 %v13197_v4  ;;  %v13339_v59 = vcombine.high %v992_v63, %v1004_v7  ;;  %v1016_v4 = vld [vmem:[#allocation5 + $0x1d90] sm:$0xff]  ;;  %v1137_v7 = vld [vmem:[#allocation5 + $0x2158] sm:$0xff] }
 0x5ba   :  { %v1148_v63 = vld [vmem:[#allocation5 + $0x21b0] sm:$0xff] }
 0x5bb   :  { %11698 = vmatmul.mubr.bf16.vlgmr.msra.gmra.mrb[40].mxu0 %v14629_v31  ;;  %11910 = vmatmul.mubr.bf16.vlgmr.msra.gmra.mrb[40].mxu1 %v14629_v31  ;;  %v13244_v31 = vcombine.low %v897_v0, %v909_v18  ;;  %v1053_v0 = vld [vmem:[#allocation5 + $0x1eb8] sm:$0xff]  ;;  %v13362_v18 = vcombine.low %v1016_v4, %v1028_v34 }
 0x5bc   :  { %11719 = vmatpush1.bf16.msra.mxu0 %v13194_v10  ;;  %11931 = vmatpush1.bf16.msra.mxu1 %v13196_v11  ;;  %v13340_v10 = vcombine.low %v993_v61, %v1005_v13  ;;  %v13363_v11 = vcombine.high %v1016_v4, %v1028_v34  ;;  %v1172_v4 = vld [vmem:[#allocation5 + $0x2270] sm:$0xff]  ;;  %v1161_v34 = vld [vmem:[#allocation5 + $0x2218] sm:$0xff] }
 0x5bd   :  { %11720 = vmatprep.subr.bf16.mxu0 %v13219_v17  ;;  %11932 = vmatprep.subr.bf16.mxu1 %v13221_v58  ;;  %v13365_v17 = vcombine.high %v1017_v16, %v1029_v57  ;;  %v1040_v58 = vld [vmem:[#allocation5 + $0x1e50] sm:$0xff] }
 0x5be   :  { %11707 = vmatprep.mubr.bf16.mxu0 %v14631_v45  ;;  %11919 = vmatprep.mubr.bf16.mxu1 %v14631_v45  ;;  %v13268_v45 = vcombine.low %v921_v28, %v933_v33  ;;  %v1077_v28 = vld [vmem:[#allocation5 + $0x1f78] sm:$0xff]  ;;  %v13386_v33 = vcombine.low %v1040_v58, %v1052_v9 }
 0x5c0   :  { %11721 = vmatpush1.bf16.msra.mxu0 %v13218_v19  ;;  %11933 = vmatpush1.bf16.msra.mxu1 %v13220_v20  ;;  %v13364_v19 = vcombine.low %v1017_v16, %v1029_v57  ;;  %v13387_v20 = vcombine.high %v1040_v58, %v1052_v9  ;;  %v1173_v16 = vld [vmem:[#allocation5 + $0x2278] sm:$0xff]  ;;  %v1196_v58 = vld [vmem:[#allocation5 + $0x2330] sm:$0xff] }
 0x5c1   :  { %11722 = vmatprep.subr.bf16.mxu0 %v13243_v21  ;;  %11934 = vmatprep.subr.bf16.mxu1 %v13245_v53  ;;  %v13389_v21 = vcombine.high %v1041_v43, %v1053_v0  ;;  %v1064_v53 = vld [vmem:[#allocation5 + $0x1f10] sm:$0xff]  ;;  %v1185_v9 = vld [vmem:[#allocation5 + $0x22d8] sm:$0xff] }
 0x5c2   :  { %v13410_v51 = vcombine.low %v1064_v53, %v1076_v54 }
 0x5c3   :  { %11708 = vmatmul.mubr.bf16.gmra.mrb[44].mxu0 %v14637_v56  ;;  %11920 = vmatmul.mubr.bf16.gmra.mrb[44].mxu1 %v14637_v56  ;;  %v13315_v56 = vcombine.high %v968_v55, %v980_v23  ;;  %v1124_v55 = vld [vmem:[#allocation5 + $0x20f0] sm:$0xff]  ;;  %v1113_v23 = vld [vmem:[#allocation5 + $0x2098] sm:$0xff] }
 0x5c4   :  { %11723 = vmatpush1.bf16.msra.mxu0 %v13242_v41  ;;  %11935 = vmatpush1.bf16.msra.mxu1 %v13244_v31  ;;  %v13388_v41 = vcombine.low %v1041_v43, %v1053_v0  ;;  %v13411_v31 = vcombine.high %v1064_v53, %v1076_v54  ;;  %v1197_v43 = vld [vmem:[#allocation5 + $0x2338] sm:$0xff]  ;;  %v1220_v53 = vld [vmem:[#allocation5 + $0x23f0] sm:$0xff] }
 0x5c5   :  { %11724 = vmatprep.subr.bf16.mxu0 %v13267_v49  ;;  %11936 = vmatprep.subr.bf16.mxu1 %v13269_v46  ;;  %v13413_v49 = vcombine.high %v1065_v27, %v1077_v28  ;;  %v1088_v46 = vld [vmem:[#allocation5 + $0x1fd0] sm:$0xff]  ;;  %v1209_v54 = vld [vmem:[#allocation5 + $0x2398] sm:$0xff] }
 0x5c6   :  { %11750 = vmatprep.mubr.bf16.mxu0 %v14645_v2  ;;  %11962 = vmatprep.mubr.bf16.mxu1 %v14645_v2  ;;  %v13341_v2 = vcombine.high %v993_v61, %v1005_v13  ;;  %v13434_v62 = vcombine.low %v1088_v46, %v1100_v38  ;;  %v1149_v61 = vld [vmem:[#allocation5 + $0x21b8] sm:$0xff] }
 0x5c8   :  { %11725 = vmatpush1.bf16.msra.mxu0 %v13266_v52  ;;  %11937 = vmatpush1.bf16.msra.mxu1 %v13268_v45  ;;  %v13412_v52 = vcombine.low %v1065_v27, %v1077_v28  ;;  %v13435_v45 = vcombine.high %v1088_v46, %v1100_v38  ;;  %v1221_v27 = vld [vmem:[#allocation5 + $0x23f8] sm:$0xff]  ;;  %v1244_v46 = vld [vmem:[#allocation5 + $0x24b0] sm:$0xff] }
 0x5c9   :  { %11726 = vmatprep.subr.bf16.mxu0 %v13291_v15  ;;  %11938 = vmatprep.subr.bf16.mxu1 %v13293_v35  ;;  %v13437_v15 = vcombine.high %v1089_v40, %v1101_v48  ;;  %v1112_v35 = vld [vmem:[#allocation5 + $0x2090] sm:$0xff]  ;;  %v1233_v38 = vld [vmem:[#allocation5 + $0x2458] sm:$0xff] }
 0x5ca   :  { %v13458_v13 = vcombine.low %v1112_v35, %v1124_v55 }
 0x5cc   :  { %11727 = vmatpush1.bf16.msra.mxu0 %v13290_v5  ;;  %11939 = vmatpush1.bf16.msra.mxu1 %v13292_v24  ;;  %v13436_v5 = vcombine.low %v1089_v40, %v1101_v48  ;;  %v13459_v24 = vcombine.high %v1112_v35, %v1124_v55  ;;  %v1245_v40 = vld [vmem:[#allocation5 + $0x24b8] sm:$0xff]  ;;  %v1268_v35 = vld [vmem:[#allocation5 + $0x2570] sm:$0xff] }
 0x5cd   :  { %11728 = vmatprep.subr.bf16.mxu0 %v13315_v56  ;;  %11940 = vmatprep.subr.bf16.mxu1 %v13317_v25  ;;  %v13461_v56 = vcombine.high %v1113_v23, %v1125_v14  ;;  %v1136_v25 = vld [vmem:[#allocation5 + $0x2150] sm:$0xff]  ;;  %v1257_v55 = vld [vmem:[#allocation5 + $0x2518] sm:$0xff] }
 0x5ce   :  { %v13482_v57 = vcombine.low %v1136_v25, %v1148_v63 }
 0x5d0   :  { %11729 = vmatpush1.bf16.msra.mxu0 %v13314_v8  ;;  %11941 = vmatpush1.bf16.msra.mxu1 %v13316_v6  ;;  %v13460_v8 = vcombine.low %v1113_v23, %v1125_v14  ;;  %v13483_v6 = vcombine.high %v1136_v25, %v1148_v63  ;;  %v1269_v23 = vld [vmem:[#allocation5 + $0x2578] sm:$0xff]  ;;  %v1292_v25 = vld [vmem:[#allocation5 + $0x2630] sm:$0xff] }
 0x5d1   :  { %11730 = vmatprep.subr.bf16.mxu0 %v13339_v59  ;;  %11942 = vmatprep.subr.bf16.mxu1 %v13341_v2  ;;  %v13485_v59 = vcombine.high %v1137_v7, %v1149_v61  ;;  %v1160_v2 = vld [vmem:[#allocation5 + $0x2210] sm:$0xff]  ;;  %v1281_v63 = vld [vmem:[#allocation5 + $0x25d8] sm:$0xff] }
 0x5d2   :  { %v13506_v0 = vcombine.low %v1160_v2, %v1172_v4 }
 0x5d4   :  { %11731 = vmatpush1.bf16.msra.mxu0 %v13338_v60  ;;  %11943 = vmatpush1.bf16.msra.mxu1 %v13340_v10  ;;  %v13484_v60 = vcombine.low %v1137_v7, %v1149_v61  ;;  %v13507_v10 = vcombine.high %v1160_v2, %v1172_v4  ;;  %v1293_v7 = vld [vmem:[#allocation5 + $0x2638] sm:$0xff]  ;;  %v1316_v2 = vld [vmem:[#allocation5 + $0x26f0] sm:$0xff] }
 0x5d5   :  { %11732 = vmatprep.subr.bf16.mxu0 %v13363_v11  ;;  %11944 = vmatprep.subr.bf16.mxu1 %v13365_v17  ;;  %v13509_v11 = vcombine.high %v1161_v34, %v1173_v16  ;;  %v1184_v17 = vld [vmem:[#allocation5 + $0x22d0] sm:$0xff]  ;;  %v1305_v4 = vld [vmem:[#allocation5 + $0x2698] sm:$0xff] }
 0x5d6   :  { %v13530_v28 = vcombine.low %v1184_v17, %v1196_v58 }
 0x5d8   :  { %11733 = vmatpush1.bf16.msra.mxu0 %v13362_v18  ;;  %11945 = vmatpush1.bf16.msra.mxu1 %v13364_v19  ;;  %v13508_v18 = vcombine.low %v1161_v34, %v1173_v16  ;;  %v13531_v19 = vcombine.high %v1184_v17, %v1196_v58  ;;  %v1317_v34 = vld [vmem:[#allocation5 + $0x26f8] sm:$0xff] }
 0x5d9   :  { %11734 = vmatprep.subr.bf16.mxu0 %v13387_v20  ;;  %11946 = vmatprep.subr.bf16.mxu1 %v13389_v21  ;;  %v13533_v20 = vcombine.high %v1185_v9, %v1197_v43  ;;  %v1208_v21 = vld [vmem:[#allocation5 + $0x2390] sm:$0xff]  ;;  %v1329_v17 = vld [vmem:[#allocation5 + $0x2758] sm:$0xff] }
 0x5da   :  { %v13554_v48 = vcombine.low %v1208_v21, %v1220_v53  ;;  %v1341_v58 = vld [vmem:[#allocation5 + $0x27b8] sm:$0xff] }
 0x5dc   :  { %11735 = vmatpush1.bf16.msra.mxu0 %v13386_v33  ;;  %11947 = vmatpush1.bf16.msra.mxu1 %v13388_v41  ;;  %v13532_v33 = vcombine.low %v1185_v9, %v1197_v43  ;;  %v13555_v41 = vcombine.high %v1208_v21, %v1220_v53  ;;  %v1365_v21 = vld [vmem:[#allocation5 + $0x2878] sm:$0xff] }
 0x5dd   :  { %11736 = vmatprep.subr.bf16.mxu0 %v13411_v31  ;;  %11948 = vmatprep.subr.bf16.mxu1 %v13413_v49  ;;  %v13557_v31 = vcombine.high %v1209_v54, %v1221_v27  ;;  %v1232_v49 = vld [vmem:[#allocation5 + $0x2450] sm:$0xff] }
 0x5de   :  { %v13578_v14 = vcombine.low %v1232_v49, %v1244_v46 }
 0x5e0   :  { %11737 = vmatpush1.bf16.msra.mxu0 %v13410_v51  ;;  %11949 = vmatpush1.bf16.msra.mxu1 %v13412_v52  ;;  %v13556_v51 = vcombine.low %v1209_v54, %v1221_v27  ;;  %v13579_v52 = vcombine.high %v1232_v49, %v1244_v46  ;;  %v14981_v54 = vld [vmem:[#allocation7 + $0x10] sm:$0xff]  ;;  %v1377_v49 = vld [vmem:[#allocation5 + $0x28d8] sm:$0xff] }
 0x5e1   :  { %11738 = vmatprep.subr.bf16.mxu0 %v13435_v45  ;;  %11950 = vmatprep.subr.bf16.mxu1 %v13437_v15  ;;  %v13581_v45 = vcombine.high %v1233_v38, %v1245_v40  ;;  %v1256_v15 = vld [vmem:[#allocation5 + $0x2510] sm:$0xff]  ;;  %v1389_v46 = vld [vmem:[#allocation5 + $0x2938] sm:$0xff] }
 0x5e2   :  { %v13602_v61 = vcombine.low %v1256_v15, %v1268_v35 }
 0x5e4   :  { %11739 = vmatpush1.bf16.msra.mxu0 %v13434_v62  ;;  %11951 = vmatpush1.bf16.msra.mxu1 %v13436_v5  ;;  %v13580_v62 = vcombine.low %v1233_v38, %v1245_v40  ;;  %v13603_v5 = vcombine.high %v1256_v15, %v1268_v35  ;;  %v14993_v38 = vrot.slane %v14981_v54, %v14724_v32  ;;  %v1400_v15 = vld [vmem:[#allocation5 + $0x2990] sm:$0xff]  ;;  %v1401_v32 = vld [vmem:[#allocation5 + $0x2998] sm:$0xff] }
 0x5e5   :  { %11740 = vmatprep.subr.bf16.mxu0 %v13459_v24  ;;  %11952 = vmatprep.subr.bf16.mxu1 %v13461_v56  ;;  %v13605_v24 = vcombine.high %v1257_v55, %v1269_v23  ;;  %v1280_v56 = vld [vmem:[#allocation5 + $0x25d0] sm:$0xff] }
 0x5e6   :  { %v13626_v16 = vcombine.low %v1280_v56, %v1292_v25  ;;  %v1412_v35 = vld [vmem:[#allocation5 + $0x29f0] sm:$0xff] }
 0x5e8   :  { %11741 = vmatpush1.bf16.msra.mxu0 %v13458_v13  ;;  %11953 = vmatpush1.bf16.msra.mxu1 %v13460_v8  ;;  %v13604_v13 = vcombine.low %v1257_v55, %v1269_v23  ;;  %v13627_v8 = vcombine.high %v1280_v56, %v1292_v25  ;;  %v13724_v25 = vcombine.low %v1377_v49, %v1389_v46 }
 0x5e9   :  { %11742 = vmatprep.subr.bf16.mxu0 %v13483_v6  ;;  %11954 = vmatprep.subr.bf16.mxu1 %v13485_v59  ;;  %v13629_v6 = vcombine.high %v1281_v63, %v1293_v7  ;;  %v1304_v59 = vld [vmem:[#allocation5 + $0x2690] sm:$0xff] }
 0x5ea   :  { %v13650_v9 = vcombine.low %v1304_v59, %v1316_v2 }
 0x5ec   :  { %11743 = vmatpush1.bf16.msra.mxu0 %v13482_v57  ;;  %11955 = vmatpush1.bf16.msra.mxu1 %v13484_v60  ;;  %v13651_v57 = vcombine.high %v1304_v59, %v1316_v2  ;;  %v13653_v60 = vcombine.high %v1305_v4, %v1317_v34 }
 0x5ed   :  { %11744 = vmatprep.subr.bf16.mxu0 %v13507_v10  ;;  %11956 = vmatprep.subr.bf16.mxu1 %v13509_v11  ;;  %v1328_v10 = vld [vmem:[#allocation5 + $0x2750] sm:$0xff] }
 0x5ee   :  { %v1340_v11 = vld [vmem:[#allocation5 + $0x27b0] sm:$0xff] }
 0x5ef   :  { %v13675_v43 = vcombine.high %v1328_v10, %v1340_v11  ;;  %v13674_v53 = vcombine.low %v1328_v10, %v1340_v11  ;;  %v1425_v10 = vld [vmem:[#allocation5 + $0x2a58] sm:$0xff] }
 0x5f0   :  { %11745 = vmatpush1.bf16.msra.mxu0 %v13506_v0  ;;  %11957 = vmatpush1.bf16.msra.mxu1 %v13508_v18  ;;  %v13677_v0 = vcombine.high %v1329_v17, %v1341_v58  ;;  %v1352_v18 = vld [vmem:[#allocation5 + $0x2810] sm:$0xff]  ;;  %v1437_v11 = vld [vmem:[#allocation5 + $0x2ab8] sm:$0xff] }
 0x5f1   :  { %11746 = vmatprep.subr.bf16.mxu0 %v13531_v19  ;;  %11958 = vmatprep.subr.bf16.mxu1 %v13533_v20  ;;  %v1364_v19 = vld [vmem:[#allocation5 + $0x2870] sm:$0xff]  ;;  %v1353_v20 = vld [vmem:[#allocation5 + $0x2818] sm:$0xff] }
 0x5f2   :  { %v13699_v27 = vcombine.high %v1352_v18, %v1364_v19  ;;  %v13698_v40 = vcombine.low %v1352_v18, %v1364_v19  ;;  %v13773_v18 = vcombine.high %v1425_v10, %v1437_v11  ;;  %v1448_v19 = vld [vmem:[#allocation5 + $0x2b10] sm:$0xff] }
 0x5f4   :  { %11747 = vmatpush1.bf16.msra.mxu0 %v13530_v28  ;;  %11959 = vmatpush1.bf16.msra.mxu1 %v13532_v33  ;;  %v13701_v28 = vcombine.high %v1353_v20, %v1365_v21  ;;  %v1376_v33 = vld [vmem:[#allocation5 + $0x28d0] sm:$0xff] }
 0x5f5   :  { %11748 = vmatprep.subr.bf16.mxu0 %v13555_v41  ;;  %11960 = vmatprep.subr.bf16.mxu1 %v13557_v31  ;;  %v1388_v41 = vld [vmem:[#allocation5 + $0x2930] sm:$0xff]  ;;  %v14985_v31 = vrot.slane %v14981_v54, %v14717_v26  ;;  %v13700_v26 = vcombine.low %v1353_v20, %v1365_v21 }
 0x5f6   :  { %v13722_v56 = vcombine.low %v1376_v33, %v1388_v41  ;;  %v1460_v20 = vld [vmem:[#allocation5 + $0x2b70] sm:$0xff] }
 0x5f8   :  { %11749 = vmatpush1.bf16.msra.mxu0 %v13554_v48  ;;  %11961 = vmatpush1.bf16.msra.mxu1 %v13556_v51  ;;  %v14997_v48 = vrot.slane %v14981_v54, %v14727_v37  ;;  %v13723_v51 = vcombine.high %v1376_v33, %v1388_v41 }
 0x5f9   :  { %11771 = vmatprep.subr.bf16.mxu0 %v13579_v52  ;;  %11983 = vmatprep.subr.bf16.mxu1 %v13581_v45  ;;  %v13725_v45 = vcombine.high %v1377_v49, %v1389_v46 }
 0x5fb   :  { %11751 = vmatmul.mubr.bf16.vlgmr.msra.gmra.mrb[40].mxu0 %v14653_v1  ;;  %11963 = vmatmul.mubr.bf16.vlgmr.msra.gmra.mrb[40].mxu1 %v14653_v1  ;;  %v13628_v1 = vcombine.low %v1281_v63, %v1293_v7 }
 0x5fc   :  { %11772 = vmatpush1.bf16.msra.mxu0 %v13578_v14  ;;  %11984 = vmatpush1.bf16.msra.mxu1 %v13580_v62  ;;  %v1413_v14 = vld [vmem:[#allocation5 + $0x29f8] sm:$0xff] }
 0x5fd   :  { %11773 = vmatprep.subr.bf16.mxu0 %v13603_v5  ;;  %11985 = vmatprep.subr.bf16.mxu1 %v13605_v24 }
 0x5fe   :  { %11760 = vmatprep.mubr.bf16.mxu0 %v14655_v12  ;;  %11972 = vmatprep.mubr.bf16.mxu1 %v14655_v12  ;;  %v13652_v12 = vcombine.low %v1305_v4, %v1317_v34  ;;  %v13749_v34 = vcombine.high %v1401_v32, %v1413_v14 }
 0x600   :  { %11774 = vmatpush1.bf16.msra.mxu0 %v13602_v61  ;;  %11986 = vmatpush1.bf16.msra.mxu1 %v13604_v13 }
 0x601   :  { %11775 = vmatprep.subr.bf16.mxu0 %v13627_v8  ;;  %11987 = vmatprep.subr.bf16.mxu1 %v13629_v6  ;;  %v13747_v8 = vcombine.high %v1400_v15, %v1412_v35 }
 0x603   :  { %11761 = vmatmul.mubr.bf16.gmra.mrb[44].mxu0 %v14661_v22  ;;  %11973 = vmatmul.mubr.bf16.gmra.mrb[44].mxu1 %v14661_v22  ;;  %v13676_v22 = vcombine.low %v1329_v17, %v1341_v58  ;;  %v13746_v58 = vcombine.low %v1400_v15, %v1412_v35  ;;  %v13795_v35 = vcombine.high %v1448_v19, %v1460_v20 }
 0x604   :  { %11776 = vmatpush1.bf16.msra.mxu0 %v13626_v16  ;;  %11988 = vmatpush1.bf16.msra.mxu1 %v13628_v1  ;;  %v1424_v16 = vld [vmem:[#allocation5 + $0x2a50] sm:$0xff] }
 0x605   :  { %11777 = vmatprep.subr.bf16.mxu0 %v13651_v57  ;;  %11989 = vmatprep.subr.bf16.mxu1 %v13653_v60  ;;  %v1436_v1 = vld [vmem:[#allocation5 + $0x2ab0] sm:$0xff] }
 0x606   :  { %11803 = vmatprep.mubr.bf16.mxu0 %v14669_v30  ;;  %12015 = vmatprep.mubr.bf16.mxu1 %v14669_v30  ;;  %v14989_v30 = vrot.slane %v14981_v54, %v14721_v29 }
 0x608   :  { %11778 = vmatpush1.bf16.msra.mxu0 %v13650_v9  ;;  %11990 = vmatpush1.bf16.msra.mxu1 %v13652_v12  ;;  %v13748_v12 = vcombine.low %v1401_v32, %v1413_v14 }
 0x609   :  { %11779 = vmatprep.subr.bf16.mxu0 %v13675_v43  ;;  %11991 = vmatprep.subr.bf16.mxu1 %v13677_v0  ;;  %v13771_v43 = vcombine.high %v1424_v16, %v1436_v1 }
 0x60c   :  { %11780 = vmatpush1.bf16.msra.mxu0 %v13674_v53  ;;  %11992 = vmatpush1.bf16.msra.mxu1 %v13676_v22 }
 0x60d   :  { %11781 = vmatprep.subr.bf16.mxu0 %v13699_v27  ;;  %11993 = vmatprep.subr.bf16.mxu1 %v13701_v28  ;;  %v1449_v27 = vld [vmem:[#allocation5 + $0x2b18] sm:$0xff] }
 0x60e   :  { %v11381_v52 = vpop.f32.mrb[32].mxu0  ;;  %v11593_v55 = vpop.f32.mrb[32].mxu1  ;;  %v1461_v28 = vld [vmem:[#allocation5 + $0x2b78] sm:$0xff] }
 0x60f   :  { %v14102_v29 = vadd.f32 %v11381_v52, %v14985_v31  ;;  %v11383_v23 = vpop.f32.mrb[33].mxu0  ;;  %v14110_v62 = vadd.f32 %v11593_v55, %v14989_v30  ;;  %v11595_v37 = vpop.f32.mrb[33].mxu1  ;;  %v13797_v14 = vcombine.high %v1449_v27, %v1461_v28 }
 0x610   :  { %v14103_v5 = vadd.f32 %v11383_v23, %v14993_v38  ;;  %v11385_v24 = vpop.f32.mrb[34].mxu0  ;;  %11782 = vmatpush1.bf16.msra.mxu0 %v13698_v40  ;;  %v14111_v63 = vadd.f32 %v11595_v37, %v14997_v48  ;;  %v11597_v61 = vpop.f32.mrb[34].mxu1  ;;  %11994 = vmatpush1.bf16.msra.mxu1 %v13700_v26  ;;  %v13770_v40 = vcombine.low %v1424_v16, %v1436_v1  ;;  %v1520_v16 = vld [vmem:[#allocation5 + $0x2d50] sm:$0xff] }
 0x611   :  { %v14104_v7 = vadd.f32 %v11385_v24, %v14985_v31  ;;  %v11387_v13 = vpop.f32.mrb[35].mxu0  ;;  %11783 = vmatprep.subr.bf16.mxu0 %v13723_v51  ;;  %v14112_v59 = vadd.f32 %v11597_v61, %v14989_v30  ;;  %v11599_v4 = vpop.f32.mrb[35].mxu1  ;;  %11995 = vmatprep.subr.bf16.mxu1 %v13725_v45  ;;  %v13772_v26 = vcombine.low %v1425_v10, %v1437_v11  ;;  %v1532_v1 = vld [vmem:[#allocation5 + $0x2db0] sm:$0xff] }
 0x612   :  { %v13998_v6 = vpack.c.bf16 %v14103_v5, %v14102_v29  ;;  %v14105_v2 = vadd.f32 %v11387_v13, %v14993_v38  ;;  %v13999_v57 = vpack.c.bf16 %v14111_v63, %v14110_v62  ;;  %v14113_v60 = vadd.f32 %v11599_v4, %v14997_v48  ;;  %v1472_v62 = vld [vmem:[#allocation5 + $0x2bd0] sm:$0xff] }
 0x613   :  { %v1484_v5 = vld [vmem:[#allocation5 + $0x2c30] sm:$0xff]  ;;  %v13794_v63 = vcombine.low %v1448_v19, %v1460_v20 }
 0x614   :  { %12332 = vst [vmem:[#allocation8 + $0x40] sm:$0xff] %v13998_v6  ;;  %v14010_v17 = vpack.c.bf16 %v14105_v2, %v14104_v7  ;;  %11784 = vmatpush1.bf16.msra.mxu0 %v13722_v56  ;;  %12333 = vst [vmem:[#allocation8 + $0x48] sm:$0xff] %v13999_v57  ;;  %v14011_v9 = vpack.c.bf16 %v14113_v60, %v14112_v59  ;;  %11996 = vmatpush1.bf16.msra.mxu1 %v13724_v25  ;;  %v1473_v56 = vld [vmem:[#allocation5 + $0x2bd8] sm:$0xff]  ;;  %v1496_v13 = vld [vmem:[#allocation5 + $0x2c90] sm:$0xff] }
 0x615   :  { %11785 = vmatprep.subr.bf16.mxu0 %v13747_v8  ;;  %11997 = vmatprep.subr.bf16.mxu1 %v13749_v34  ;;  %v1508_v8 = vld [vmem:[#allocation5 + $0x2cf0] sm:$0xff]  ;;  %v1497_v6 = vld [vmem:[#allocation5 + $0x2c98] sm:$0xff]  ;;  %v13818_v59 = vcombine.low %v1472_v62, %v1484_v5 }
 0x616   :  { %12344 = vst [vmem:[#allocation8 + $0xa0] sm:$0xff] %v14010_v17  ;;  %v11391_v0 = vpop.f32.mrb[36].mxu0  ;;  %12345 = vst [vmem:[#allocation8 + $0xa8] sm:$0xff] %v14011_v9  ;;  %v11603_v53 = vpop.f32.mrb[36].mxu1  ;;  %v13843_v4 = vcombine.high %v1496_v13, %v1508_v8  ;;  %v1521_v57 = vld [vmem:[#allocation5 + $0x2d58] sm:$0xff]  ;;  %v13842_v10 = vcombine.low %v1496_v13, %v1508_v8  ;;  %v13867_v17 = vcombine.high %v1520_v16, %v1532_v1  ;;  %v1544_v9 = vld [vmem:[#allocation5 + $0x2e10] sm:$0xff] }
 0x617   :  { %v14106_v21 = vadd.f32 %v11391_v0, %v14985_v31  ;;  %v11393_v22 = vpop.f32.mrb[37].mxu0  ;;  %v14114_v33 = vadd.f32 %v11603_v53, %v14989_v30  ;;  %v11605_v49 = vpop.f32.mrb[37].mxu1  ;;  %v1533_v60 = vld [vmem:[#allocation5 + $0x2db8] sm:$0xff]  ;;  %v1568_v53 = vld [vmem:[#allocation5 + $0x2ed0] sm:$0xff] }
 0x618   :  { %v14107_v41 = vadd.f32 %v11393_v22, %v14993_v38  ;;  %v11395_v46 = vpop.f32.mrb[38].mxu0  ;;  %11786 = vmatpush1.bf16.msra.mxu0 %v13746_v58  ;;  %v14115_v51 = vadd.f32 %v11605_v49, %v14997_v48  ;;  %v11607_v45 = vpop.f32.mrb[38].mxu1  ;;  %11998 = vmatpush1.bf16.msra.mxu1 %v13748_v12  ;;  %v13869_v58 = vcombine.high %v1521_v57, %v1533_v60  ;;  %v1556_v12 = vld [vmem:[#allocation5 + $0x2e70] sm:$0xff]  ;;  %v1557_v0 = vld [vmem:[#allocation5 + $0x2e78] sm:$0xff] }
 0x619   :  { %v14108_v52 = vadd.f32 %v11395_v46, %v14985_v31  ;;  %v11397_v15 = vpop.f32.mrb[39].mxu0  ;;  %11787 = vmatprep.subr.bf16.mxu0 %v13771_v43  ;;  %v14116_v55 = vadd.f32 %v11607_v45, %v14989_v30  ;;  %v11609_v32 = vpop.f32.mrb[39].mxu1  ;;  %11999 = vmatprep.subr.bf16.mxu1 %v13773_v18  ;;  %v1485_v31 = vld [vmem:[#allocation5 + $0x2c38] sm:$0xff]  ;;  %v13796_v30 = vcombine.low %v1449_v27, %v1461_v28  ;;  %v1580_v22 = vld [vmem:[#allocation5 + $0x2f30] sm:$0xff] }
 0x61a   :  { %v14022_v29 = vpack.c.bf16 %v14107_v41, %v14106_v21  ;;  %v14109_v23 = vadd.f32 %v11397_v15, %v14993_v38  ;;  %v14023_v37 = vpack.c.bf16 %v14115_v51, %v14114_v33  ;;  %v14117_v24 = vadd.f32 %v11609_v32, %v14997_v48  ;;  %v1509_v48 = vld [vmem:[#allocation5 + $0x2cf8] sm:$0xff] }
 0x61b   :  { %v13819_v38 = vcombine.high %v1472_v62, %v1484_v5  ;;  %v13821_v61 = vcombine.high %v1473_v56, %v1485_v31  ;;  %v13820_v2 = vcombine.low %v1473_v56, %v1485_v31  ;;  %v13845_v34 = vcombine.high %v1497_v6, %v1509_v48  ;;  %v1545_v43 = vld [vmem:[#allocation5 + $0x2e18] sm:$0xff] }
 0x61c   :  { %12356 = vst [vmem:[#allocation8 + $0x100] sm:$0xff] %v14022_v29  ;;  %v14034_v25 = vpack.c.bf16 %v14109_v23, %v14108_v52  ;;  %11788 = vmatpush1.bf16.msra.mxu0 %v13770_v40  ;;  %12357 = vst [vmem:[#allocation8 + $0x108] sm:$0xff] %v14023_v37  ;;  %v14035_v7 = vpack.c.bf16 %v14117_v24, %v14116_v55  ;;  %12000 = vmatpush1.bf16.msra.mxu1 %v13772_v26  ;;  %v1569_v27 = vld [vmem:[#allocation5 + $0x2ed8] sm:$0xff]  ;;  %v1592_v40 = vld [vmem:[#allocation5 + $0x2f90] sm:$0xff] }
 0x61d   :  { %11789 = vmatprep.subr.bf16.mxu0 %v13795_v35  ;;  %12001 = vmatprep.subr.bf16.mxu1 %v13797_v14  ;;  %v13844_v11 = vcombine.low %v1497_v6, %v1509_v48  ;;  %v13866_v18 = vcombine.low %v1520_v16, %v1532_v1  ;;  %v13868_v19 = vcombine.low %v1521_v57, %v1533_v60  ;;  %v1581_v28 = vld [vmem:[#allocation5 + $0x2f38] sm:$0xff]  ;;  %v1604_v26 = vld [vmem:[#allocation5 + $0x2ff0] sm:$0xff] }
 0x61e   :  { %12368 = vst [vmem:[#allocation8 + $0x160] sm:$0xff] %v14034_v25  ;;  %12369 = vst [vmem:[#allocation8 + $0x168] sm:$0xff] %v14035_v7  ;;  %v13891_v20 = vcombine.high %v1544_v9, %v1556_v12  ;;  %v13893_v21 = vcombine.high %v1545_v43, %v1557_v0  ;;  %v13890_v33 = vcombine.low %v1544_v9, %v1556_v12  ;;  %v1593_v51 = vld [vmem:[#allocation5 + $0x2f98] sm:$0xff] }
 0x61f   :  { %v13892_v41 = vcombine.low %v1545_v43, %v1557_v0  ;;  %v13915_v49 = vcombine.high %v1568_v53, %v1580_v22  ;;  %v13917_v46 = vcombine.high %v1569_v27, %v1581_v28  ;;  %v1605_v52 = vld [vmem:[#allocation5 + $0x2ff8] sm:$0xff]  ;;  %v13914_v45 = vcombine.low %v1568_v53, %v1580_v22 }
 0x620   :  { %11790 = vmatpush1.bf16.msra.mxu0 %v13794_v63  ;;  %12002 = vmatpush1.bf16.msra.mxu1 %v13796_v30  ;;  %v13916_v15 = vcombine.low %v1569_v27, %v1581_v28  ;;  %v13939_v35 = vcombine.high %v1592_v40, %v1604_v26  ;;  %v13941_v29 = vcombine.high %v1593_v51, %v1605_v52 }
 0x621   :  { %11791 = vmatprep.subr.bf16.mxu0 %v13819_v38  ;;  %12003 = vmatprep.subr.bf16.mxu1 %v13821_v61  ;;  %v13938_v55 = vcombine.low %v1592_v40, %v1604_v26  ;;  %v13940_v23 = vcombine.low %v1593_v51, %v1605_v52  ;;  %v1695_v32 = vrot.slane %v14981_v54, %v14789_v44 }
 0x622   :  { %v1703_v14 = vrot.slane %v14981_v54, %v14793_v36  ;;  %v1699_v62 = vrot.slane %v14981_v54, %v14796_v47 }
 0x624   :  { %11792 = vmatpush1.bf16.msra.mxu0 %v13818_v59  ;;  %12004 = vmatpush1.bf16.msra.mxu1 %v13820_v2 }
 0x625   :  { %11793 = vmatprep.subr.bf16.mxu0 %v13843_v4  ;;  %12005 = vmatprep.subr.bf16.mxu1 %v13845_v34 }
 0x628   :  { %11794 = vmatpush1.bf16.msra.mxu0 %v13842_v10  ;;  %12006 = vmatpush1.bf16.msra.mxu1 %v13844_v11 }
 0x629   :  { %11795 = vmatprep.subr.bf16.mxu0 %v13867_v17  ;;  %12007 = vmatprep.subr.bf16.mxu1 %v13869_v58 }
 0x62c   :  { %11796 = vmatpush1.bf16.msra.mxu0 %v13866_v18  ;;  %12008 = vmatpush1.bf16.msra.mxu1 %v13868_v19 }
 0x62d   :  { %11797 = vmatprep.subr.bf16.mxu0 %v13891_v20  ;;  %12009 = vmatprep.subr.bf16.mxu1 %v13893_v21 }
 0x630   :  { %11798 = vmatpush1.bf16.msra.mxu0 %v13890_v33  ;;  %12010 = vmatpush1.bf16.msra.mxu1 %v13892_v41 }
 0x631   :  { %11799 = vmatprep.subr.bf16.mxu0 %v13915_v49  ;;  %12011 = vmatprep.subr.bf16.mxu1 %v13917_v46 }
 0x634   :  { %11800 = vmatpush1.bf16.msra.mxu0 %v13914_v45  ;;  %12012 = vmatpush1.bf16.msra.mxu1 %v13916_v15 }
 0x635   :  { %11801 = vmatprep.subr.bf16.mxu0 %v13939_v35  ;;  %12013 = vmatprep.subr.bf16.mxu1 %v13941_v29 }
 0x638   :  { %11802 = vmatpush1.bf16.msra.mxu0 %v13938_v55  ;;  %12014 = vmatpush1.bf16.msra.mxu1 %v13940_v23 }
 0x63b   :  { %11804 = vmatmul.mubr.bf16.vlgmr.msra.gmra.mrb[40].mxu0 %v14677_v42  ;;  %12016 = vmatmul.mubr.bf16.vlgmr.msra.gmra.mrb[40].mxu1 %v14677_v42  ;;  %v1707_v42 = vrot.slane %v14981_v54, %v14799_v39 }
 0x63c   :  { %11813 = vmatprep.mubr.bf16.mxu0 %v14679_v50  ;;  %12025 = vmatprep.mubr.bf16.mxu1 %v14679_v50 }
 0x643   :  { %11814 = vmatmul.mubr.bf16.gmra.mrb[44].mxu0 %v14685_v3  ;;  %12026 = vmatmul.mubr.bf16.gmra.mrb[44].mxu1 %v14685_v3 }
 0x70e   :  { %v11805_v5 = vpop.f32.mrb[40].mxu0  ;;  %v12017_v24 = vpop.f32.mrb[40].mxu1 }
 0x70f   :  { %v14118_v37 = vadd.f32 %v11805_v5, %v1695_v32  ;;  %v11807_v50 = vpop.f32.mrb[41].mxu0  ;;  %v14126_v56 = vadd.f32 %v12017_v24, %v1703_v14  ;;  %v12019_v25 = vpop.f32.mrb[41].mxu1 }
 0x710   :  { %v14119_v31 = vadd.f32 %v11807_v50, %v1699_v62  ;;  %v11809_v3 = vpop.f32.mrb[42].mxu0  ;;  %v14127_v63 = vadd.f32 %v12019_v25, %v1707_v42  ;;  %v12021_v44 = vpop.f32.mrb[42].mxu1 }
 0x711   :  { %v14120_v7 = vadd.f32 %v11809_v3, %v1695_v32  ;;  %v11811_v30 = vpop.f32.mrb[43].mxu0  ;;  %v14128_v36 = vadd.f32 %v12021_v44, %v1703_v14  ;;  %v12023_v13 = vpop.f32.mrb[43].mxu1 }
 0x712   :  { %v14000_v38 = vpack.c.bf16 %v14119_v31, %v14118_v37  ;;  %v14121_v61 = vadd.f32 %v11811_v30, %v1699_v62  ;;  %v14001_v47 = vpack.c.bf16 %v14127_v63, %v14126_v56  ;;  %v14129_v8 = vadd.f32 %v12023_v13, %v1707_v42 }
 0x714   :  { %12334 = vst [vmem:[#allocation8 + $0x50] sm:$0xff] %v14000_v38  ;;  %v14012_v39 = vpack.c.bf16 %v14121_v61, %v14120_v7  ;;  %12335 = vst [vmem:[#allocation8 + $0x58] sm:$0xff] %v14001_v47  ;;  %v14013_v54 = vpack.c.bf16 %v14129_v8, %v14128_v36 }
 0x716   :  { %12346 = vst [vmem:[#allocation8 + $0xb0] sm:$0xff] %v14012_v39  ;;  %v11815_v6 = vpop.f32.mrb[44].mxu0  ;;  %12347 = vst [vmem:[#allocation8 + $0xb8] sm:$0xff] %v14013_v54  ;;  %v12027_v59 = vpop.f32.mrb[44].mxu1 }
 0x717   :  { %v14122_v48 = vadd.f32 %v11815_v6, %v1695_v32  ;;  %v11817_v2 = vpop.f32.mrb[45].mxu0  ;;  %v14130_v4 = vadd.f32 %v12027_v59, %v1703_v14  ;;  %v12029_v16 = vpop.f32.mrb[45].mxu1 }
 0x718   :  { %v14123_v34 = vadd.f32 %v11817_v2, %v1699_v62  ;;  %v11819_v1 = vpop.f32.mrb[46].mxu0  ;;  %v14131_v57 = vadd.f32 %v12029_v16, %v1707_v42  ;;  %v12031_v10 = vpop.f32.mrb[46].mxu1 }
 0x719   :  { %v14124_v60 = vadd.f32 %v11819_v1, %v1695_v32  ;;  %v11821_v11 = vpop.f32.mrb[47].mxu0  ;;  %v14132_v58 = vadd.f32 %v12031_v10, %v1703_v14  ;;  %v12033_v12 = vpop.f32.mrb[47].mxu1 }
 0x71a   :  { %v14024_v17 = vpack.c.bf16 %v14123_v34, %v14122_v48  ;;  %v14125_v9 = vadd.f32 %v11821_v11, %v1699_v62  ;;  %v14025_v43 = vpack.c.bf16 %v14131_v57, %v14130_v4  ;;  %v14133_v0 = vadd.f32 %v12033_v12, %v1707_v42 }
 0x71c   :  { %12358 = vst [vmem:[#allocation8 + $0x110] sm:$0xff] %v14024_v17  ;;  %v14036_v18 = vpack.c.bf16 %v14125_v9, %v14124_v60  ;;  %12359 = vst [vmem:[#allocation8 + $0x118] sm:$0xff] %v14025_v43  ;;  %v14037_v19 = vpack.c.bf16 %v14133_v0, %v14132_v58 }
 0x71e   :  { %12370 = vst [vmem:[#allocation8 + $0x170] sm:$0xff] %v14036_v18  ;;  %12371 = vst [vmem:[#allocation8 + $0x178] sm:$0xff] %v14037_v19 }
 0x71f   :  { %14509 = shalt.err (!%p14506_p0)
}
 0x720   :  { %s14510_s29 = scalar_lea.hbm %s15047_s3, 6144 }
 0x721   :  { %p14511_p1 = scmp.ne.s32.totalorder %s15047_s3, %s14510_s29  ;;  %p14514_p2 = scmp.lt.u32.totalorder %s14510_s29, %s15047_s3 }
 0x723   :  { %p14516_p3 = pnand %p14514_p2, %p14511_p1 }
 0x725   :  { %14519 = shalt.err (!%p14516_p3)
}
 0x726   :  { %12383 = dma.vmem_to_hbm [thread:$0]  %s12378_s25, 6144, %s15047_s3, [#allocation4], %s14527_s22, %s14527_s22, %s14528_s23  }
 0x727   :  { %14524 = dma.done.wait [#allocation4], 6144  }
 0x728   :  { %14525 = vsyncadd [#allocation4], 4294961152 }
 0x729   :  { %12387 = vsyncpa [#allocation3], 1 }
 0x72a   :  { %12388 = vsyncpa [#allocation6], 1 }
 0x72b   :  { %12389 = vsyncpa [#allocation4], 1 }

</bundles_post_ra>
